<compile_context>
chip_gen: v6e
topology: v6e:2x2x1
jax: 0.10.0
libtpu: 0.0.40
codegen_flags: <defaults>
</compile_context>

<pallas_src>
import functools

import jax
import jax.numpy as jnp
from jax import lax
from jax.experimental import pallas as pl
from jax.experimental.pallas import tpu as pltpu


def _mish_f32(x):
    # mish(x) = x * tanh(softplus(x)) = x * ((1+e^x)^2 - 1) / ((1+e^x)^2 + 1)
    # -> 1 EUP exp + 1 approx EUP reciprocal (+ 1 Newton step on the VPU).
    ex = jnp.exp(jnp.minimum(x, 20.0))          # tanh(softplus(20)) == 1.0
    z = (1.0 + ex) * (1.0 + ex)
    d = z + 1.0
    r = pl.reciprocal(d, approx=True)
    r = r * (2.0 - d * r)                       # one Newton step -> ~f32 accuracy
    return x * (z - 1.0) * r


def _resnet_fused_kernel(x_ref, w1_ref, b1_ref, g1_ref, be1_ref,
                         w2_ref, b2_ref, g2_ref, be2_ref,
                         o_ref, y1s_ref, slab1_ref, slab2_ref,
                         *, ho, wo, cin, cmid, eps):
    """One image per grid step.

    x_ref   : (4*(ho+1), wo+1, cin) bf16   4 parity planes of the 1-padded input
    w1_ref  : (9*cin,  cmid) bf16          conv1 taps flattened (kh, kw, cin)
    w2_ref  : (9*cmid, cmid) bf16          conv2 taps flattened (kh, kw, cmid)
    b*/g*/be* : (1, cmid) f32              conv bias / IN gamma / IN beta
    o_ref   : (cmid + cin, ho*wo) f32      channel-major output [conv | pooled]
    y1s_ref : (4*(ho+1), wo+1, cmid) bf16  zero-padded parity planes of stage-1
    slab1_ref: (4, ho, wo, 9*cin)  bf16    conv1 im2col slab (all 4 out planes)
    slab2_ref: (ho, wo, 9*cmid)    bf16    conv2 im2col slab
    """
    s2 = ho * wo                 # spatial size after stride-2 / pooling
    s1 = 4 * s2                  # spatial size of the conv1 output (H*W)
    hp = ho + 1                  # rows per (padded) parity plane
    f32 = jnp.float32

    # bf16 parity planes of the padded input (kept bf16 for the MXU).
    xp = [x_ref[p * hp:(p + 1) * hp] for p in range(4)]

    # Re-zero only the 1-wide padding border of the stage-1 scratch; the
    # interior is fully overwritten below every iteration.
    for p in range(4):
        y1s_ref[p * hp:p * hp + 1, :, :] = jnp.zeros((1, wo + 1, cmid), y1s_ref.dtype)
        y1s_ref[p * hp:(p + 1) * hp, 0:1, :] = jnp.zeros((hp, 1, cmid), y1s_ref.dtype)

    # ------------------- stage 1: conv1 + InstanceNorm + Mish -------------- #
    # Pack the 9 contiguous windows of each output parity plane into one bf16
    # im2col slab, then do a single (4*S2, 9*Cin) x (9*Cin, Cmid) MXU dot.
    for ao in range(2):
        for bo in range(2):
            p = 2 * ao + bo
            for kh in range(3):
                a_s, i0 = (ao + kh) % 2, (ao + kh) // 2
                for kw in range(3):
                    b_s, j0 = (bo + kw) % 2, (bo + kw) // 2
                    t = 3 * kh + kw
                    slab1_ref[p, :, :, t * cin:(t + 1) * cin] = (
                        xp[2 * a_s + b_s][i0:i0 + ho, j0:j0 + wo, :])

    acc1 = jnp.dot(slab1_ref[...].reshape(s1, 9 * cin), w1_ref[...],
                   preferred_element_type=f32) + b1_ref[...]      # (4*S2, cmid) f32

    # Two-pass (shifted) InstanceNorm statistics over the full H*W extent.
    mu1 = jnp.sum(acc1, axis=0, keepdims=True) * (1.0 / s1)
    d1 = acc1 - mu1
    var1 = jnp.sum(d1 * d1, axis=0, keepdims=True) * (1.0 / s1)
    scale1 = lax.rsqrt(var1 + eps) * g1_ref[...]
    y1 = _mish_f32(d1 * scale1 + be1_ref[...])                    # (4*S2, cmid) f32

    # Scatter the 4 parity planes into the zero-padded bf16 scratch so the
    # stride-2 conv below only needs contiguous windows of it.
    for p in range(4):
        y1s_ref[p * hp + 1:p * hp + 1 + ho, 1:1 + wo, :] = (
            y1[p * s2:(p + 1) * s2].reshape(ho, wo, cmid).astype(y1s_ref.dtype))

    # ------------------- stage 2: conv2 (stride 2) + InstanceNorm ---------- #
    for kh in range(3):
        a_s, i0 = (kh + 1) % 2, (kh + 1) // 2
        for kw in range(3):
            b_s, j0 = (kw + 1) % 2, (kw + 1) // 2
            t = 3 * kh + kw
            q0 = (2 * a_s + b_s) * hp
            slab2_ref[:, :, t * cmid:(t + 1) * cmid] = (
                y1s_ref[q0 + i0:q0 + i0 + ho, j0:j0 + wo, :])

    acc2 = jnp.dot(slab2_ref[...].reshape(s2, 9 * cmid), w2_ref[...],
                   preferred_element_type=f32) + b2_ref[...]      # (S2, cmid) f32

    mu2 = jnp.sum(acc2, axis=0, keepdims=True) * (1.0 / s2)
    d2 = acc2 - mu2
    var2 = jnp.sum(d2 * d2, axis=0, keepdims=True) * (1.0 / s2)
    scale2 = lax.rsqrt(var2 + eps) * g2_ref[...]
    y2 = _mish_f32(d2 * scale2 + be2_ref[...])                    # (S2, cmid) f32

    # ------------------- identity branch: 2x2 max-pool + Mish -------------- #
    # Max over the four parity planes of the (un-padded) identity; compare in
    # f32 (v5e has no bf16 VPU) -- bf16->f32 is exact so the max is unchanged.
    mp = jnp.maximum(
        jnp.maximum(xp[3][0:ho, 0:wo, :].astype(f32),
                    xp[2][0:ho, 1:1 + wo, :].astype(f32)),
        jnp.maximum(xp[1][1:1 + ho, 0:wo, :].astype(f32),
                    xp[0][1:1 + ho, 1:1 + wo, :].astype(f32)))
    mp = _mish_f32(mp.reshape(s2, cin))                           # (S2, cin)

    # Two channel-major stores (conv branch | pooled branch).
    # TODO(synk): if Cmid is not a multiple of the sublane tile at real sizes,
    # pad Cmid so the second store starts on a tile boundary.
    o_ref[0:cmid, :] = jnp.transpose(y2, (1, 0)).astype(o_ref.dtype)
    o_ref[cmid:, :] = jnp.transpose(mp, (1, 0)).astype(o_ref.dtype)


# ---------------------------------- wrapper --------------------------------- #

def resnet_forward(x_nchw, params):
    """Pallas implementation of ResNet.forward (input/output are NCHW)."""
    wt1, b1, g1, be1, wt2, b2, g2, be2 = params
    N, Cin, H, W = x_nchw.shape
    assert H % 2 == 0 and W % 2 == 0
    Cmid = wt1.shape[-1]
    Cout = Cmid + Cin
    Ho, Wo = H // 2, W // 2
    S2 = Ho * Wo
    eps = 1e-5

    # Cheap input glue: NHWC, pad by 1, 2x2 parity (space-to-depth) split, bf16.
    x = jnp.transpose(x_nchw, (0, 2, 3, 1)).astype(jnp.float32)     # NHWC
    xpad = jnp.pad(x, ((0, 0), (1, 1), (1, 1), (0, 0)))             # (N,H+2,W+2,C)
    xpp = xpad.reshape(N, Ho + 1, 2, Wo + 1, 2, Cin)
    xpp = xpp.transpose(0, 2, 4, 1, 3, 5)                           # (N,2,2,Ho+1,Wo+1,C)
    xpp = xpp.reshape(N, 4 * (Ho + 1), Wo + 1, Cin).astype(jnp.bfloat16)

    # HWIO weights flattened to (9*Cin_tap, Cout_tap) in (kh, kw, cin) order,
    # matching the in-kernel slab packing.
    w1 = wt1.reshape(9 * Cin, Cmid).astype(jnp.bfloat16)
    w2 = wt2.reshape(9 * Cmid, Cmid).astype(jnp.bfloat16)
    f32v = lambda a, c: a.reshape(1, c).astype(jnp.float32)

    kern = functools.partial(_resnet_fused_kernel, ho=Ho, wo=Wo,
                             cin=Cin, cmid=Cmid, eps=eps)
    out = pl.pallas_call(
        kern,
        out_shape=jax.ShapeDtypeStruct((N, Cout, S2), jnp.float32),
        grid_spec=pltpu.PrefetchScalarGridSpec(
            num_scalar_prefetch=0,
            grid=(N,),
            in_specs=[
                pl.BlockSpec((None, 4 * (Ho + 1), Wo + 1, Cin),
                             lambda n: (n, 0, 0, 0)),
                pl.BlockSpec((9 * Cin, Cmid), lambda n: (0, 0)),
                pl.BlockSpec((1, Cmid), lambda n: (0, 0)),
                pl.BlockSpec((1, Cmid), lambda n: (0, 0)),
                pl.BlockSpec((1, Cmid), lambda n: (0, 0)),
                pl.BlockSpec((9 * Cmid, Cmid), lambda n: (0, 0)),
                pl.BlockSpec((1, Cmid), lambda n: (0, 0)),
                pl.BlockSpec((1, Cmid), lambda n: (0, 0)),
                pl.BlockSpec((1, Cmid), lambda n: (0, 0)),
            ],
            out_specs=pl.BlockSpec((None, Cout, S2), lambda n: (n, 0, 0)),
            scratch_shapes=[
                pltpu.VMEM((4 * (Ho + 1), Wo + 1, Cmid), jnp.bfloat16),  # y1 parity planes
                pltpu.VMEM((4, Ho, Wo, 9 * Cin), jnp.bfloat16),          # conv1 im2col slab
                pltpu.VMEM((Ho, Wo, 9 * Cmid), jnp.bfloat16),            # conv2 im2col slab
            ],
        ),
        compiler_params=pltpu.CompilerParams(dimension_semantics=("parallel",)),
    )(xpp, w1, f32v(b1, Cmid), f32v(g1, Cmid), f32v(be1, Cmid),
      w2, f32v(b2, Cmid), f32v(g2, Cmid), f32v(be2, Cmid))

    # Channel-major kernel output -> NCHW is a free reshape (no transpose).
    return out.reshape(N, Cout, Ho, Wo)


# ------------------------- pure-JAX reference check ------------------------- #

def resnet_reference(x_nchw, params):
    """Reference path (same bf16 rounding points as the kernel, f32 math)."""
    wt1, b1, g1, be1, wt2, b2, g2, be2 = params
    eps = 1e-5
    q = lambda a: a.astype(jnp.bfloat16).astype(jnp.float32)

    x = jnp.transpose(x_nchw, (0, 2, 3, 1)).astype(jnp.float32)
    xb = q(x)

    def conv(v, w, b, stride):
        y = lax.conv_general_dilated(v, w, (stride, stride), [(1, 1), (1, 1)],
                                     dimension_numbers=("NHWC", "HWIO", "NHWC"))
        return y + b

    def inorm(y, g, be):
        mu = jnp.mean(y, axis=(1, 2), keepdims=True)
        var = jnp.mean(jnp.square(y - mu), axis=(1, 2), keepdims=True)
        return (y - mu) * lax.rsqrt(var + eps) * g + be

    def mish(v):
        sp = jnp.maximum(v, 0.0) + jnp.log1p(jnp.exp(-jnp.abs(v)))
        return v * jnp.tanh(sp)

    y = mish(inorm(conv(xb, q(wt1), b1, 1), g1, be1))
    y = q(y)                         # kernel keeps stage-1 activations bf16 in VMEM
    y = inorm(conv(y, q(wt2), b2, 2), g2, be2)
    mpool = lax.reduce_window(xb, -jnp.inf, lax.max,
                              (1, 2, 2, 1), (1, 2, 2, 1), "VALID")
    out = mish(jnp.concatenate([y, mpool], axis=-1))
    return jnp.transpose(out, (0, 3, 1, 2))


# ------------------------------------ main ----------------------------------- #

if __name__ == "__main__":
    key = jax.random.PRNGKey(0)
    N, Cin, H, W = 2, 4, 16, 16
    Cout_total = 8                       # module's `out_channels`
    Cmid = Cout_total - Cin              # channels of the conv branch

    ks = jax.random.split(key, 9)
    x = jax.random.normal(ks[0], (N, Cin, H, W), jnp.float32)

    # deterministic synthetic parameters (HWIO conv weights == PyTorch OIHW^T)
    wt1 = jax.random.normal(ks[1], (3, 3, Cin, Cmid), jnp.float32) / jnp.sqrt(9.0 * Cin)
    b1 = 0.1 * jax.random.normal(ks[2], (Cmid,), jnp.float32)
    g1 = 1.0 + 0.1 * jax.random.normal(ks[3], (Cmid,), jnp.float32)
    be1 = 0.1 * jax.random.normal(ks[4], (Cmid,), jnp.float32)
    wt2 = jax.random.normal(ks[5], (3, 3, Cmid, Cmid), jnp.float32) / jnp.sqrt(9.0 * Cmid)
    b2 = 0.1 * jax.random.normal(ks[6], (Cmid,), jnp.float32)
    g2 = 1.0 + 0.1 * jax.random.normal(ks[7], (Cmid,), jnp.float32)
    be2 = 0.1 * jax.random.normal(ks[8], (Cmid,), jnp.float32)
    params = (wt1, b1, g1, be1, wt2, b2, g2, be2)

    out = jax.jit(resnet_forward)(x, params)
    out = jax.block_until_ready(out)
    assert out.shape == (N, Cout_total, H // 2, W // 2), out.shape

    ref = resnet_reference(x, params)
    err = float(jnp.max(jnp.abs(out - ref)))
    # Tolerance covers the bf16 MXU operands / bf16 stage-1 scratch that both
    # paths share, plus the approx-reciprocal Mish; it is NOT an end-to-end
    # f32-PyTorch accuracy claim.
    assert err < 1e-2, f"mismatch vs reference: {err}"

    print("KERNEL_OK")
</pallas_src>

<mosaic_0001>
module attributes {stable_mosaic.version = 11 : i64} {
  func.func @_resnet_fused_kernel(%arg0: i32, %arg1: memref<1x36x9x4xbf16, #tpu.memory_space<vmem>>, %arg2: memref<36x4xbf16, #tpu.memory_space<vmem>>, %arg3: memref<1x4xf32, #tpu.memory_space<vmem>>, %arg4: memref<1x4xf32, #tpu.memory_space<vmem>>, %arg5: memref<1x4xf32, #tpu.memory_space<vmem>>, %arg6: memref<36x4xbf16, #tpu.memory_space<vmem>>, %arg7: memref<1x4xf32, #tpu.memory_space<vmem>>, %arg8: memref<1x4xf32, #tpu.memory_space<vmem>>, %arg9: memref<1x4xf32, #tpu.memory_space<vmem>>, %arg10: memref<1x8x64xf32, #tpu.memory_space<vmem>>, %arg11: memref<36x9x4xbf16, #tpu.memory_space<vmem>>, %arg12: memref<4x8x8x36xbf16, #tpu.memory_space<vmem>>, %arg13: memref<8x8x36xbf16, #tpu.memory_space<vmem>>) attributes {dimension_semantics = [#tpu.dimension_semantics<parallel>], iteration_bounds = array<i64: 2>, scalar_prefetch = 0 : i64, scratch_operands = 3 : i64, tpu.core_type = #tpu.core_type<tc>, window_params = [{transform_indices = @transform_0, window_bounds = array<i64: 1, 36, 9, 4>}, {pipeline_mode = #tpu.pipeline_mode<synchronous>, transform_indices = @transform_1, window_bounds = array<i64: 36, 4>}, {pipeline_mode = #tpu.pipeline_mode<synchronous>, transform_indices = @transform_2, window_bounds = array<i64: 1, 4>}, {pipeline_mode = #tpu.pipeline_mode<synchronous>, transform_indices = @transform_3, window_bounds = array<i64: 1, 4>}, {pipeline_mode = #tpu.pipeline_mode<synchronous>, transform_indices = @transform_4, window_bounds = array<i64: 1, 4>}, {pipeline_mode = #tpu.pipeline_mode<synchronous>, transform_indices = @transform_5, window_bounds = array<i64: 36, 4>}, {pipeline_mode = #tpu.pipeline_mode<synchronous>, transform_indices = @transform_6, window_bounds = array<i64: 1, 4>}, {pipeline_mode = #tpu.pipeline_mode<synchronous>, transform_indices = @transform_7, window_bounds = array<i64: 1, 4>}, {pipeline_mode = #tpu.pipeline_mode<synchronous>, transform_indices = @transform_8, window_bounds = array<i64: 1, 4>}, {transform_indices = @transform_9, window_bounds = array<i64: 1, 8, 64>}]} {
    %c0 = arith.constant 0 : index
    %c0_0 = arith.constant 0 : index
    %c0_1 = arith.constant 0 : index
    %c0_2 = arith.constant 0 : index
    %0 = vector.load %arg1[%c0, %c0_0, %c0_1, %c0_2] : memref<1x36x9x4xbf16, #tpu.memory_space<vmem>>, vector<1x9x9x4xbf16>
    %1 = vector.shape_cast %0 : vector<1x9x9x4xbf16> to vector<9x9x4xbf16>
    %c0_3 = arith.constant 0 : index
    %c9 = arith.constant 9 : index
    %c0_4 = arith.constant 0 : index
    %c0_5 = arith.constant 0 : index
    %2 = vector.load %arg1[%c0_3, %c9, %c0_4, %c0_5] : memref<1x36x9x4xbf16, #tpu.memory_space<vmem>>, vector<1x9x9x4xbf16>
    %3 = vector.shape_cast %2 : vector<1x9x9x4xbf16> to vector<9x9x4xbf16>
    %c0_6 = arith.constant 0 : index
    %c18 = arith.constant 18 : index
    %c0_7 = arith.constant 0 : index
    %c0_8 = arith.constant 0 : index
    %4 = vector.load %arg1[%c0_6, %c18, %c0_7, %c0_8] : memref<1x36x9x4xbf16, #tpu.memory_space<vmem>>, vector<1x9x9x4xbf16>
    %5 = vector.shape_cast %4 : vector<1x9x9x4xbf16> to vector<9x9x4xbf16>
    %c0_9 = arith.constant 0 : index
    %c27 = arith.constant 27 : index
    %c0_10 = arith.constant 0 : index
    %c0_11 = arith.constant 0 : index
    %6 = vector.load %arg1[%c0_9, %c27, %c0_10, %c0_11] : memref<1x36x9x4xbf16, #tpu.memory_space<vmem>>, vector<1x9x9x4xbf16>
    %7 = vector.shape_cast %6 : vector<1x9x9x4xbf16> to vector<9x9x4xbf16>
    %cst = arith.constant 0.000000e+00 : bf16
    %8 = vector.broadcast %cst : bf16 to vector<1x9x4xbf16>
    %c0_12 = arith.constant 0 : index
    %c0_13 = arith.constant 0 : index
    %c0_14 = arith.constant 0 : index
    %9 = vector.load %arg11[%c0_12, %c0_13, %c0_14] : memref<36x9x4xbf16, #tpu.memory_space<vmem>>, vector<1x9x4xbf16>
    tpu.vector_store %arg11[%c0_12, %c0_13, %c0_14], %8 {strides = array<i32>} : memref<36x9x4xbf16, #tpu.memory_space<vmem>>, vector<1x9x4xbf16>,
    %cst_15 = arith.constant 0.000000e+00 : bf16
    %10 = vector.broadcast %cst_15 : bf16 to vector<9x1x4xbf16>
    %c0_16 = arith.constant 0 : index
    %c0_17 = arith.constant 0 : index
    %c0_18 = arith.constant 0 : index
    %11 = vector.load %arg11[%c0_16, %c0_17, %c0_18] : memref<36x9x4xbf16, #tpu.memory_space<vmem>>, vector<9x1x4xbf16>
    tpu.vector_store %arg11[%c0_16, %c0_17, %c0_18], %10 {strides = array<i32>} : memref<36x9x4xbf16, #tpu.memory_space<vmem>>, vector<9x1x4xbf16>,
    %cst_19 = arith.constant 0.000000e+00 : bf16
    %12 = vector.broadcast %cst_19 : bf16 to vector<1x9x4xbf16>
    %c9_20 = arith.constant 9 : index
    %c0_21 = arith.constant 0 : index
    %c0_22 = arith.constant 0 : index
    %13 = vector.load %arg11[%c9_20, %c0_21, %c0_22] : memref<36x9x4xbf16, #tpu.memory_space<vmem>>, vector<1x9x4xbf16>
    tpu.vector_store %arg11[%c9_20, %c0_21, %c0_22], %12 {strides = array<i32>} : memref<36x9x4xbf16, #tpu.memory_space<vmem>>, vector<1x9x4xbf16>,
    %cst_23 = arith.constant 0.000000e+00 : bf16
    %14 = vector.broadcast %cst_23 : bf16 to vector<9x1x4xbf16>
    %c9_24 = arith.constant 9 : index
    %c0_25 = arith.constant 0 : index
    %c0_26 = arith.constant 0 : index
    %15 = vector.load %arg11[%c9_24, %c0_25, %c0_26] : memref<36x9x4xbf16, #tpu.memory_space<vmem>>, vector<9x1x4xbf16>
    tpu.vector_store %arg11[%c9_24, %c0_25, %c0_26], %14 {strides = array<i32>} : memref<36x9x4xbf16, #tpu.memory_space<vmem>>, vector<9x1x4xbf16>,
    %cst_27 = arith.constant 0.000000e+00 : bf16
    %16 = vector.broadcast %cst_27 : bf16 to vector<1x9x4xbf16>
    %c18_28 = arith.constant 18 : index
    %c0_29 = arith.constant 0 : index
    %c0_30 = arith.constant 0 : index
    %17 = vector.load %arg11[%c18_28, %c0_29, %c0_30] : memref<36x9x4xbf16, #tpu.memory_space<vmem>>, vector<1x9x4xbf16>
    tpu.vector_store %arg11[%c18_28, %c0_29, %c0_30], %16 {strides = array<i32>} : memref<36x9x4xbf16, #tpu.memory_space<vmem>>, vector<1x9x4xbf16>,
    %cst_31 = arith.constant 0.000000e+00 : bf16
    %18 = vector.broadcast %cst_31 : bf16 to vector<9x1x4xbf16>
    %c18_32 = arith.constant 18 : index
    %c0_33 = arith.constant 0 : index
    %c0_34 = arith.constant 0 : index
    %19 = vector.load %arg11[%c18_32, %c0_33, %c0_34] : memref<36x9x4xbf16, #tpu.memory_space<vmem>>, vector<9x1x4xbf16>
    tpu.vector_store %arg11[%c18_32, %c0_33, %c0_34], %18 {strides = array<i32>} : memref<36x9x4xbf16, #tpu.memory_space<vmem>>, vector<9x1x4xbf16>,
    %cst_35 = arith.constant 0.000000e+00 : bf16
    %20 = vector.broadcast %cst_35 : bf16 to vector<1x9x4xbf16>
    %c27_36 = arith.constant 27 : index
    %c0_37 = arith.constant 0 : index
    %c0_38 = arith.constant 0 : index
    %21 = vector.load %arg11[%c27_36, %c0_37, %c0_38] : memref<36x9x4xbf16, #tpu.memory_space<vmem>>, vector<1x9x4xbf16>
    tpu.vector_store %arg11[%c27_36, %c0_37, %c0_38], %20 {strides = array<i32>} : memref<36x9x4xbf16, #tpu.memory_space<vmem>>, vector<1x9x4xbf16>,
    %cst_39 = arith.constant 0.000000e+00 : bf16
    %22 = vector.broadcast %cst_39 : bf16 to vector<9x1x4xbf16>
    %c27_40 = arith.constant 27 : index
    %c0_41 = arith.constant 0 : index
    %c0_42 = arith.constant 0 : index
    %23 = vector.load %arg11[%c27_40, %c0_41, %c0_42] : memref<36x9x4xbf16, #tpu.memory_space<vmem>>, vector<9x1x4xbf16>
    tpu.vector_store %arg11[%c27_40, %c0_41, %c0_42], %22 {strides = array<i32>} : memref<36x9x4xbf16, #tpu.memory_space<vmem>>, vector<9x1x4xbf16>,
    %24 = vector.extract_strided_slice %1 {offsets = [0, 0, 0], sizes = [8, 8, 4], strides = [1, 1, 1]} : vector<9x9x4xbf16> to vector<8x8x4xbf16>
    %c0_43 = arith.constant 0 : index
    %c0_44 = arith.constant 0 : index
    %c0_45 = arith.constant 0 : index
    %c0_46 = arith.constant 0 : index
    %25 = vector.load %arg12[%c0_43, %c0_44, %c0_45, %c0_46] : memref<4x8x8x36xbf16, #tpu.memory_space<vmem>>, vector<1x8x8x4xbf16>
    %26 = vector.shape_cast %25 : vector<1x8x8x4xbf16> to vector<8x8x4xbf16>
    %27 = vector.shape_cast %24 : vector<8x8x4xbf16> to vector<1x8x8x4xbf16>
    tpu.vector_store %arg12[%c0_43, %c0_44, %c0_45, %c0_46], %27 {strides = array<i32>} : memref<4x8x8x36xbf16, #tpu.memory_space<vmem>>, vector<1x8x8x4xbf16>,
    %28 = vector.extract_strided_slice %3 {offsets = [0, 0, 0], sizes = [8, 8, 4], strides = [1, 1, 1]} : vector<9x9x4xbf16> to vector<8x8x4xbf16>
    %c0_47 = arith.constant 0 : index
    %c0_48 = arith.constant 0 : index
    %c0_49 = arith.constant 0 : index
    %c4 = arith.constant 4 : index
    %29 = vector.load %arg12[%c0_47, %c0_48, %c0_49, %c4] : memref<4x8x8x36xbf16, #tpu.memory_space<vmem>>, vector<1x8x8x4xbf16>
    %30 = vector.shape_cast %29 : vector<1x8x8x4xbf16> to vector<8x8x4xbf16>
    %31 = vector.shape_cast %28 : vector<8x8x4xbf16> to vector<1x8x8x4xbf16>
    tpu.vector_store %arg12[%c0_47, %c0_48, %c0_49, %c4], %31 {strides = array<i32>} : memref<4x8x8x36xbf16, #tpu.memory_space<vmem>>, vector<1x8x8x4xbf16>,
    %32 = vector.extract_strided_slice %1 {offsets = [0, 1, 0], sizes = [8, 8, 4], strides = [1, 1, 1]} : vector<9x9x4xbf16> to vector<8x8x4xbf16>
    %c0_50 = arith.constant 0 : index
    %c0_51 = arith.constant 0 : index
    %c0_52 = arith.constant 0 : index
    %c8 = arith.constant 8 : index
    %33 = vector.load %arg12[%c0_50, %c0_51, %c0_52, %c8] : memref<4x8x8x36xbf16, #tpu.memory_space<vmem>>, vector<1x8x8x4xbf16>
    %34 = vector.shape_cast %33 : vector<1x8x8x4xbf16> to vector<8x8x4xbf16>
    %35 = vector.shape_cast %32 : vector<8x8x4xbf16> to vector<1x8x8x4xbf16>
    tpu.vector_store %arg12[%c0_50, %c0_51, %c0_52, %c8], %35 {strides = array<i32>} : memref<4x8x8x36xbf16, #tpu.memory_space<vmem>>, vector<1x8x8x4xbf16>,
    %36 = vector.extract_strided_slice %5 {offsets = [0, 0, 0], sizes = [8, 8, 4], strides = [1, 1, 1]} : vector<9x9x4xbf16> to vector<8x8x4xbf16>
    %c0_53 = arith.constant 0 : index
    %c0_54 = arith.constant 0 : index
    %c0_55 = arith.constant 0 : index
    %c12 = arith.constant 12 : index
    %37 = vector.load %arg12[%c0_53, %c0_54, %c0_55, %c12] : memref<4x8x8x36xbf16, #tpu.memory_space<vmem>>, vector<1x8x8x4xbf16>
    %38 = vector.shape_cast %37 : vector<1x8x8x4xbf16> to vector<8x8x4xbf16>
    %39 = vector.shape_cast %36 : vector<8x8x4xbf16> to vector<1x8x8x4xbf16>
    tpu.vector_store %arg12[%c0_53, %c0_54, %c0_55, %c12], %39 {strides = array<i32>} : memref<4x8x8x36xbf16, #tpu.memory_space<vmem>>, vector<1x8x8x4xbf16>,
    %40 = vector.extract_strided_slice %7 {offsets = [0, 0, 0], sizes = [8, 8, 4], strides = [1, 1, 1]} : vector<9x9x4xbf16> to vector<8x8x4xbf16>
    %c0_56 = arith.constant 0 : index
    %c0_57 = arith.constant 0 : index
    %c0_58 = arith.constant 0 : index
    %c16 = arith.constant 16 : index
    %41 = vector.load %arg12[%c0_56, %c0_57, %c0_58, %c16] : memref<4x8x8x36xbf16, #tpu.memory_space<vmem>>, vector<1x8x8x4xbf16>
    %42 = vector.shape_cast %41 : vector<1x8x8x4xbf16> to vector<8x8x4xbf16>
    %43 = vector.shape_cast %40 : vector<8x8x4xbf16> to vector<1x8x8x4xbf16>
    tpu.vector_store %arg12[%c0_56, %c0_57, %c0_58, %c16], %43 {strides = array<i32>} : memref<4x8x8x36xbf16, #tpu.memory_space<vmem>>, vector<1x8x8x4xbf16>,
    %44 = vector.extract_strided_slice %5 {offsets = [0, 1, 0], sizes = [8, 8, 4], strides = [1, 1, 1]} : vector<9x9x4xbf16> to vector<8x8x4xbf16>
    %c0_59 = arith.constant 0 : index
    %c0_60 = arith.constant 0 : index
    %c0_61 = arith.constant 0 : index
    %c20 = arith.constant 20 : index
    %45 = vector.load %arg12[%c0_59, %c0_60, %c0_61, %c20] : memref<4x8x8x36xbf16, #tpu.memory_space<vmem>>, vector<1x8x8x4xbf16>
    %46 = vector.shape_cast %45 : vector<1x8x8x4xbf16> to vector<8x8x4xbf16>
    %47 = vector.shape_cast %44 : vector<8x8x4xbf16> to vector<1x8x8x4xbf16>
    tpu.vector_store %arg12[%c0_59, %c0_60, %c0_61, %c20], %47 {strides = array<i32>} : memref<4x8x8x36xbf16, #tpu.memory_space<vmem>>, vector<1x8x8x4xbf16>,
    %48 = vector.extract_strided_slice %1 {offsets = [1, 0, 0], sizes = [8, 8, 4], strides = [1, 1, 1]} : vector<9x9x4xbf16> to vector<8x8x4xbf16>
    %c0_62 = arith.constant 0 : index
    %c0_63 = arith.constant 0 : index
    %c0_64 = arith.constant 0 : index
    %c24 = arith.constant 24 : index
    %49 = vector.load %arg12[%c0_62, %c0_63, %c0_64, %c24] : memref<4x8x8x36xbf16, #tpu.memory_space<vmem>>, vector<1x8x8x4xbf16>
    %50 = vector.shape_cast %49 : vector<1x8x8x4xbf16> to vector<8x8x4xbf16>
    %51 = vector.shape_cast %48 : vector<8x8x4xbf16> to vector<1x8x8x4xbf16>
    tpu.vector_store %arg12[%c0_62, %c0_63, %c0_64, %c24], %51 {strides = array<i32>} : memref<4x8x8x36xbf16, #tpu.memory_space<vmem>>, vector<1x8x8x4xbf16>,
    %52 = vector.extract_strided_slice %3 {offsets = [1, 0, 0], sizes = [8, 8, 4], strides = [1, 1, 1]} : vector<9x9x4xbf16> to vector<8x8x4xbf16>
    %c0_65 = arith.constant 0 : index
    %c0_66 = arith.constant 0 : index
    %c0_67 = arith.constant 0 : index
    %c28 = arith.constant 28 : index
    %53 = vector.load %arg12[%c0_65, %c0_66, %c0_67, %c28] : memref<4x8x8x36xbf16, #tpu.memory_space<vmem>>, vector<1x8x8x4xbf16>
    %54 = vector.shape_cast %53 : vector<1x8x8x4xbf16> to vector<8x8x4xbf16>
    %55 = vector.shape_cast %52 : vector<8x8x4xbf16> to vector<1x8x8x4xbf16>
    tpu.vector_store %arg12[%c0_65, %c0_66, %c0_67, %c28], %55 {strides = array<i32>} : memref<4x8x8x36xbf16, #tpu.memory_space<vmem>>, vector<1x8x8x4xbf16>,
    %56 = vector.extract_strided_slice %1 {offsets = [1, 1, 0], sizes = [8, 8, 4], strides = [1, 1, 1]} : vector<9x9x4xbf16> to vector<8x8x4xbf16>
    %c0_68 = arith.constant 0 : index
    %c0_69 = arith.constant 0 : index
    %c0_70 = arith.constant 0 : index
    %c32 = arith.constant 32 : index
    %57 = vector.load %arg12[%c0_68, %c0_69, %c0_70, %c32] : memref<4x8x8x36xbf16, #tpu.memory_space<vmem>>, vector<1x8x8x4xbf16>
    %58 = vector.shape_cast %57 : vector<1x8x8x4xbf16> to vector<8x8x4xbf16>
    %59 = vector.shape_cast %56 : vector<8x8x4xbf16> to vector<1x8x8x4xbf16>
    tpu.vector_store %arg12[%c0_68, %c0_69, %c0_70, %c32], %59 {strides = array<i32>} : memref<4x8x8x36xbf16, #tpu.memory_space<vmem>>, vector<1x8x8x4xbf16>,
    %60 = vector.extract_strided_slice %3 {offsets = [0, 0, 0], sizes = [8, 8, 4], strides = [1, 1, 1]} : vector<9x9x4xbf16> to vector<8x8x4xbf16>
    %c1 = arith.constant 1 : index
    %c0_71 = arith.constant 0 : index
    %c0_72 = arith.constant 0 : index
    %c0_73 = arith.constant 0 : index
    %61 = vector.load %arg12[%c1, %c0_71, %c0_72, %c0_73] : memref<4x8x8x36xbf16, #tpu.memory_space<vmem>>, vector<1x8x8x4xbf16>
    %62 = vector.shape_cast %61 : vector<1x8x8x4xbf16> to vector<8x8x4xbf16>
    %63 = vector.shape_cast %60 : vector<8x8x4xbf16> to vector<1x8x8x4xbf16>
    tpu.vector_store %arg12[%c1, %c0_71, %c0_72, %c0_73], %63 {strides = array<i32>} : memref<4x8x8x36xbf16, #tpu.memory_space<vmem>>, vector<1x8x8x4xbf16>,
    %64 = vector.extract_strided_slice %1 {offsets = [0, 1, 0], sizes = [8, 8, 4], strides = [1, 1, 1]} : vector<9x9x4xbf16> to vector<8x8x4xbf16>
    %c1_74 = arith.constant 1 : index
    %c0_75 = arith.constant 0 : index
    %c0_76 = arith.constant 0 : index
    %c4_77 = arith.constant 4 : index
    %65 = vector.load %arg12[%c1_74, %c0_75, %c0_76, %c4_77] : memref<4x8x8x36xbf16, #tpu.memory_space<vmem>>, vector<1x8x8x4xbf16>
    %66 = vector.shape_cast %65 : vector<1x8x8x4xbf16> to vector<8x8x4xbf16>
    %67 = vector.shape_cast %64 : vector<8x8x4xbf16> to vector<1x8x8x4xbf16>
    tpu.vector_store %arg12[%c1_74, %c0_75, %c0_76, %c4_77], %67 {strides = array<i32>} : memref<4x8x8x36xbf16, #tpu.memory_space<vmem>>, vector<1x8x8x4xbf16>,
    %68 = vector.extract_strided_slice %3 {offsets = [0, 1, 0], sizes = [8, 8, 4], strides = [1, 1, 1]} : vector<9x9x4xbf16> to vector<8x8x4xbf16>
    %c1_78 = arith.constant 1 : index
    %c0_79 = arith.constant 0 : index
    %c0_80 = arith.constant 0 : index
    %c8_81 = arith.constant 8 : index
    %69 = vector.load %arg12[%c1_78, %c0_79, %c0_80, %c8_81] : memref<4x8x8x36xbf16, #tpu.memory_space<vmem>>, vector<1x8x8x4xbf16>
    %70 = vector.shape_cast %69 : vector<1x8x8x4xbf16> to vector<8x8x4xbf16>
    %71 = vector.shape_cast %68 : vector<8x8x4xbf16> to vector<1x8x8x4xbf16>
    tpu.vector_store %arg12[%c1_78, %c0_79, %c0_80, %c8_81], %71 {strides = array<i32>} : memref<4x8x8x36xbf16, #tpu.memory_space<vmem>>, vector<1x8x8x4xbf16>,
    %72 = vector.extract_strided_slice %7 {offsets = [0, 0, 0], sizes = [8, 8, 4], strides = [1, 1, 1]} : vector<9x9x4xbf16> to vector<8x8x4xbf16>
    %c1_82 = arith.constant 1 : index
    %c0_83 = arith.constant 0 : index
    %c0_84 = arith.constant 0 : index
    %c12_85 = arith.constant 12 : index
    %73 = vector.load %arg12[%c1_82, %c0_83, %c0_84, %c12_85] : memref<4x8x8x36xbf16, #tpu.memory_space<vmem>>, vector<1x8x8x4xbf16>
    %74 = vector.shape_cast %73 : vector<1x8x8x4xbf16> to vector<8x8x4xbf16>
    %75 = vector.shape_cast %72 : vector<8x8x4xbf16> to vector<1x8x8x4xbf16>
    tpu.vector_store %arg12[%c1_82, %c0_83, %c0_84, %c12_85], %75 {strides = array<i32>} : memref<4x8x8x36xbf16, #tpu.memory_space<vmem>>, vector<1x8x8x4xbf16>,
    %76 = vector.extract_strided_slice %5 {offsets = [0, 1, 0], sizes = [8, 8, 4], strides = [1, 1, 1]} : vector<9x9x4xbf16> to vector<8x8x4xbf16>
    %c1_86 = arith.constant 1 : index
    %c0_87 = arith.constant 0 : index
    %c0_88 = arith.constant 0 : index
    %c16_89 = arith.constant 16 : index
    %77 = vector.load %arg12[%c1_86, %c0_87, %c0_88, %c16_89] : memref<4x8x8x36xbf16, #tpu.memory_space<vmem>>, vector<1x8x8x4xbf16>
    %78 = vector.shape_cast %77 : vector<1x8x8x4xbf16> to vector<8x8x4xbf16>
    %79 = vector.shape_cast %76 : vector<8x8x4xbf16> to vector<1x8x8x4xbf16>
    tpu.vector_store %arg12[%c1_86, %c0_87, %c0_88, %c16_89], %79 {strides = array<i32>} : memref<4x8x8x36xbf16, #tpu.memory_space<vmem>>, vector<1x8x8x4xbf16>,
    %80 = vector.extract_strided_slice %7 {offsets = [0, 1, 0], sizes = [8, 8, 4], strides = [1, 1, 1]} : vector<9x9x4xbf16> to vector<8x8x4xbf16>
    %c1_90 = arith.constant 1 : index
    %c0_91 = arith.constant 0 : index
    %c0_92 = arith.constant 0 : index
    %c20_93 = arith.constant 20 : index
    %81 = vector.load %arg12[%c1_90, %c0_91, %c0_92, %c20_93] : memref<4x8x8x36xbf16, #tpu.memory_space<vmem>>, vector<1x8x8x4xbf16>
    %82 = vector.shape_cast %81 : vector<1x8x8x4xbf16> to vector<8x8x4xbf16>
    %83 = vector.shape_cast %80 : vector<8x8x4xbf16> to vector<1x8x8x4xbf16>
    tpu.vector_store %arg12[%c1_90, %c0_91, %c0_92, %c20_93], %83 {strides = array<i32>} : memref<4x8x8x36xbf16, #tpu.memory_space<vmem>>, vector<1x8x8x4xbf16>,
    %84 = vector.extract_strided_slice %3 {offsets = [1, 0, 0], sizes = [8, 8, 4], strides = [1, 1, 1]} : vector<9x9x4xbf16> to vector<8x8x4xbf16>
    %c1_94 = arith.constant 1 : index
    %c0_95 = arith.constant 0 : index
    %c0_96 = arith.constant 0 : index
    %c24_97 = arith.constant 24 : index
    %85 = vector.load %arg12[%c1_94, %c0_95, %c0_96, %c24_97] : memref<4x8x8x36xbf16, #tpu.memory_space<vmem>>, vector<1x8x8x4xbf16>
    %86 = vector.shape_cast %85 : vector<1x8x8x4xbf16> to vector<8x8x4xbf16>
    %87 = vector.shape_cast %84 : vector<8x8x4xbf16> to vector<1x8x8x4xbf16>
    tpu.vector_store %arg12[%c1_94, %c0_95, %c0_96, %c24_97], %87 {strides = array<i32>} : memref<4x8x8x36xbf16, #tpu.memory_space<vmem>>, vector<1x8x8x4xbf16>,
    %88 = vector.extract_strided_slice %1 {offsets = [1, 1, 0], sizes = [8, 8, 4], strides = [1, 1, 1]} : vector<9x9x4xbf16> to vector<8x8x4xbf16>
    %c1_98 = arith.constant 1 : index
    %c0_99 = arith.constant 0 : index
    %c0_100 = arith.constant 0 : index
    %c28_101 = arith.constant 28 : index
    %89 = vector.load %arg12[%c1_98, %c0_99, %c0_100, %c28_101] : memref<4x8x8x36xbf16, #tpu.memory_space<vmem>>, vector<1x8x8x4xbf16>
    %90 = vector.shape_cast %89 : vector<1x8x8x4xbf16> to vector<8x8x4xbf16>
    %91 = vector.shape_cast %88 : vector<8x8x4xbf16> to vector<1x8x8x4xbf16>
    tpu.vector_store %arg12[%c1_98, %c0_99, %c0_100, %c28_101], %91 {strides = array<i32>} : memref<4x8x8x36xbf16, #tpu.memory_space<vmem>>, vector<1x8x8x4xbf16>,
    %92 = vector.extract_strided_slice %3 {offsets = [1, 1, 0], sizes = [8, 8, 4], strides = [1, 1, 1]} : vector<9x9x4xbf16> to vector<8x8x4xbf16>
    %c1_102 = arith.constant 1 : index
    %c0_103 = arith.constant 0 : index
    %c0_104 = arith.constant 0 : index
    %c32_105 = arith.constant 32 : index
    %93 = vector.load %arg12[%c1_102, %c0_103, %c0_104, %c32_105] : memref<4x8x8x36xbf16, #tpu.memory_space<vmem>>, vector<1x8x8x4xbf16>
    %94 = vector.shape_cast %93 : vector<1x8x8x4xbf16> to vector<8x8x4xbf16>
    %95 = vector.shape_cast %92 : vector<8x8x4xbf16> to vector<1x8x8x4xbf16>
    tpu.vector_store %arg12[%c1_102, %c0_103, %c0_104, %c32_105], %95 {strides = array<i32>} : memref<4x8x8x36xbf16, #tpu.memory_space<vmem>>, vector<1x8x8x4xbf16>,
    %96 = vector.extract_strided_slice %5 {offsets = [0, 0, 0], sizes = [8, 8, 4], strides = [1, 1, 1]} : vector<9x9x4xbf16> to vector<8x8x4xbf16>
    %c2 = arith.constant 2 : index
    %c0_106 = arith.constant 0 : index
    %c0_107 = arith.constant 0 : index
    %c0_108 = arith.constant 0 : index
    %97 = vector.load %arg12[%c2, %c0_106, %c0_107, %c0_108] : memref<4x8x8x36xbf16, #tpu.memory_space<vmem>>, vector<1x8x8x4xbf16>
    %98 = vector.shape_cast %97 : vector<1x8x8x4xbf16> to vector<8x8x4xbf16>
    %99 = vector.shape_cast %96 : vector<8x8x4xbf16> to vector<1x8x8x4xbf16>
    tpu.vector_store %arg12[%c2, %c0_106, %c0_107, %c0_108], %99 {strides = array<i32>} : memref<4x8x8x36xbf16, #tpu.memory_space<vmem>>, vector<1x8x8x4xbf16>,
    %100 = vector.extract_strided_slice %7 {offsets = [0, 0, 0], sizes = [8, 8, 4], strides = [1, 1, 1]} : vector<9x9x4xbf16> to vector<8x8x4xbf16>
    %c2_109 = arith.constant 2 : index
    %c0_110 = arith.constant 0 : index
    %c0_111 = arith.constant 0 : index
    %c4_112 = arith.constant 4 : index
    %101 = vector.load %arg12[%c2_109, %c0_110, %c0_111, %c4_112] : memref<4x8x8x36xbf16, #tpu.memory_space<vmem>>, vector<1x8x8x4xbf16>
    %102 = vector.shape_cast %101 : vector<1x8x8x4xbf16> to vector<8x8x4xbf16>
    %103 = vector.shape_cast %100 : vector<8x8x4xbf16> to vector<1x8x8x4xbf16>
    tpu.vector_store %arg12[%c2_109, %c0_110, %c0_111, %c4_112], %103 {strides = array<i32>} : memref<4x8x8x36xbf16, #tpu.memory_space<vmem>>, vector<1x8x8x4xbf16>,
    %104 = vector.extract_strided_slice %5 {offsets = [0, 1, 0], sizes = [8, 8, 4], strides = [1, 1, 1]} : vector<9x9x4xbf16> to vector<8x8x4xbf16>
    %c2_113 = arith.constant 2 : index
    %c0_114 = arith.constant 0 : index
    %c0_115 = arith.constant 0 : index
    %c8_116 = arith.constant 8 : index
    %105 = vector.load %arg12[%c2_113, %c0_114, %c0_115, %c8_116] : memref<4x8x8x36xbf16, #tpu.memory_space<vmem>>, vector<1x8x8x4xbf16>
    %106 = vector.shape_cast %105 : vector<1x8x8x4xbf16> to vector<8x8x4xbf16>
    %107 = vector.shape_cast %104 : vector<8x8x4xbf16> to vector<1x8x8x4xbf16>
    tpu.vector_store %arg12[%c2_113, %c0_114, %c0_115, %c8_116], %107 {strides = array<i32>} : memref<4x8x8x36xbf16, #tpu.memory_space<vmem>>, vector<1x8x8x4xbf16>,
    %108 = vector.extract_strided_slice %1 {offsets = [1, 0, 0], sizes = [8, 8, 4], strides = [1, 1, 1]} : vector<9x9x4xbf16> to vector<8x8x4xbf16>
    %c2_117 = arith.constant 2 : index
    %c0_118 = arith.constant 0 : index
    %c0_119 = arith.constant 0 : index
    %c12_120 = arith.constant 12 : index
    %109 = vector.load %arg12[%c2_117, %c0_118, %c0_119, %c12_120] : memref<4x8x8x36xbf16, #tpu.memory_space<vmem>>, vector<1x8x8x4xbf16>
    %110 = vector.shape_cast %109 : vector<1x8x8x4xbf16> to vector<8x8x4xbf16>
    %111 = vector.shape_cast %108 : vector<8x8x4xbf16> to vector<1x8x8x4xbf16>
    tpu.vector_store %arg12[%c2_117, %c0_118, %c0_119, %c12_120], %111 {strides = array<i32>} : memref<4x8x8x36xbf16, #tpu.memory_space<vmem>>, vector<1x8x8x4xbf16>,
    %112 = vector.extract_strided_slice %3 {offsets = [1, 0, 0], sizes = [8, 8, 4], strides = [1, 1, 1]} : vector<9x9x4xbf16> to vector<8x8x4xbf16>
    %c2_121 = arith.constant 2 : index
    %c0_122 = arith.constant 0 : index
    %c0_123 = arith.constant 0 : index
    %c16_124 = arith.constant 16 : index
    %113 = vector.load %arg12[%c2_121, %c0_122, %c0_123, %c16_124] : memref<4x8x8x36xbf16, #tpu.memory_space<vmem>>, vector<1x8x8x4xbf16>
    %114 = vector.shape_cast %113 : vector<1x8x8x4xbf16> to vector<8x8x4xbf16>
    %115 = vector.shape_cast %112 : vector<8x8x4xbf16> to vector<1x8x8x4xbf16>
    tpu.vector_store %arg12[%c2_121, %c0_122, %c0_123, %c16_124], %115 {strides = array<i32>} : memref<4x8x8x36xbf16, #tpu.memory_space<vmem>>, vector<1x8x8x4xbf16>,
    %116 = vector.extract_strided_slice %1 {offsets = [1, 1, 0], sizes = [8, 8, 4], strides = [1, 1, 1]} : vector<9x9x4xbf16> to vector<8x8x4xbf16>
    %c2_125 = arith.constant 2 : index
    %c0_126 = arith.constant 0 : index
    %c0_127 = arith.constant 0 : index
    %c20_128 = arith.constant 20 : index
    %117 = vector.load %arg12[%c2_125, %c0_126, %c0_127, %c20_128] : memref<4x8x8x36xbf16, #tpu.memory_space<vmem>>, vector<1x8x8x4xbf16>
    %118 = vector.shape_cast %117 : vector<1x8x8x4xbf16> to vector<8x8x4xbf16>
    %119 = vector.shape_cast %116 : vector<8x8x4xbf16> to vector<1x8x8x4xbf16>
    tpu.vector_store %arg12[%c2_125, %c0_126, %c0_127, %c20_128], %119 {strides = array<i32>} : memref<4x8x8x36xbf16, #tpu.memory_space<vmem>>, vector<1x8x8x4xbf16>,
    %120 = vector.extract_strided_slice %5 {offsets = [1, 0, 0], sizes = [8, 8, 4], strides = [1, 1, 1]} : vector<9x9x4xbf16> to vector<8x8x4xbf16>
    %c2_129 = arith.constant 2 : index
    %c0_130 = arith.constant 0 : index
    %c0_131 = arith.constant 0 : index
    %c24_132 = arith.constant 24 : index
    %121 = vector.load %arg12[%c2_129, %c0_130, %c0_131, %c24_132] : memref<4x8x8x36xbf16, #tpu.memory_space<vmem>>, vector<1x8x8x4xbf16>
    %122 = vector.shape_cast %121 : vector<1x8x8x4xbf16> to vector<8x8x4xbf16>
    %123 = vector.shape_cast %120 : vector<8x8x4xbf16> to vector<1x8x8x4xbf16>
    tpu.vector_store %arg12[%c2_129, %c0_130, %c0_131, %c24_132], %123 {strides = array<i32>} : memref<4x8x8x36xbf16, #tpu.memory_space<vmem>>, vector<1x8x8x4xbf16>,
    %124 = vector.extract_strided_slice %7 {offsets = [1, 0, 0], sizes = [8, 8, 4], strides = [1, 1, 1]} : vector<9x9x4xbf16> to vector<8x8x4xbf16>
    %c2_133 = arith.constant 2 : index
    %c0_134 = arith.constant 0 : index
    %c0_135 = arith.constant 0 : index
    %c28_136 = arith.constant 28 : index
    %125 = vector.load %arg12[%c2_133, %c0_134, %c0_135, %c28_136] : memref<4x8x8x36xbf16, #tpu.memory_space<vmem>>, vector<1x8x8x4xbf16>
    %126 = vector.shape_cast %125 : vector<1x8x8x4xbf16> to vector<8x8x4xbf16>
    %127 = vector.shape_cast %124 : vector<8x8x4xbf16> to vector<1x8x8x4xbf16>
    tpu.vector_store %arg12[%c2_133, %c0_134, %c0_135, %c28_136], %127 {strides = array<i32>} : memref<4x8x8x36xbf16, #tpu.memory_space<vmem>>, vector<1x8x8x4xbf16>,
    %128 = vector.extract_strided_slice %5 {offsets = [1, 1, 0], sizes = [8, 8, 4], strides = [1, 1, 1]} : vector<9x9x4xbf16> to vector<8x8x4xbf16>
    %c2_137 = arith.constant 2 : index
    %c0_138 = arith.constant 0 : index
    %c0_139 = arith.constant 0 : index
    %c32_140 = arith.constant 32 : index
    %129 = vector.load %arg12[%c2_137, %c0_138, %c0_139, %c32_140] : memref<4x8x8x36xbf16, #tpu.memory_space<vmem>>, vector<1x8x8x4xbf16>
    %130 = vector.shape_cast %129 : vector<1x8x8x4xbf16> to vector<8x8x4xbf16>
    %131 = vector.shape_cast %128 : vector<8x8x4xbf16> to vector<1x8x8x4xbf16>
    tpu.vector_store %arg12[%c2_137, %c0_138, %c0_139, %c32_140], %131 {strides = array<i32>} : memref<4x8x8x36xbf16, #tpu.memory_space<vmem>>, vector<1x8x8x4xbf16>,
    %132 = vector.extract_strided_slice %7 {offsets = [0, 0, 0], sizes = [8, 8, 4], strides = [1, 1, 1]} : vector<9x9x4xbf16> to vector<8x8x4xbf16>
    %c3 = arith.constant 3 : index
    %c0_141 = arith.constant 0 : index
    %c0_142 = arith.constant 0 : index
    %c0_143 = arith.constant 0 : index
    %133 = vector.load %arg12[%c3, %c0_141, %c0_142, %c0_143] : memref<4x8x8x36xbf16, #tpu.memory_space<vmem>>, vector<1x8x8x4xbf16>
    %134 = vector.shape_cast %133 : vector<1x8x8x4xbf16> to vector<8x8x4xbf16>
    %135 = vector.shape_cast %132 : vector<8x8x4xbf16> to vector<1x8x8x4xbf16>
    tpu.vector_store %arg12[%c3, %c0_141, %c0_142, %c0_143], %135 {strides = array<i32>} : memref<4x8x8x36xbf16, #tpu.memory_space<vmem>>, vector<1x8x8x4xbf16>,
    %136 = vector.extract_strided_slice %5 {offsets = [0, 1, 0], sizes = [8, 8, 4], strides = [1, 1, 1]} : vector<9x9x4xbf16> to vector<8x8x4xbf16>
    %c3_144 = arith.constant 3 : index
    %c0_145 = arith.constant 0 : index
    %c0_146 = arith.constant 0 : index
    %c4_147 = arith.constant 4 : index
    %137 = vector.load %arg12[%c3_144, %c0_145, %c0_146, %c4_147] : memref<4x8x8x36xbf16, #tpu.memory_space<vmem>>, vector<1x8x8x4xbf16>
    %138 = vector.shape_cast %137 : vector<1x8x8x4xbf16> to vector<8x8x4xbf16>
    %139 = vector.shape_cast %136 : vector<8x8x4xbf16> to vector<1x8x8x4xbf16>
    tpu.vector_store %arg12[%c3_144, %c0_145, %c0_146, %c4_147], %139 {strides = array<i32>} : memref<4x8x8x36xbf16, #tpu.memory_space<vmem>>, vector<1x8x8x4xbf16>,
    %140 = vector.extract_strided_slice %7 {offsets = [0, 1, 0], sizes = [8, 8, 4], strides = [1, 1, 1]} : vector<9x9x4xbf16> to vector<8x8x4xbf16>
    %c3_148 = arith.constant 3 : index
    %c0_149 = arith.constant 0 : index
    %c0_150 = arith.constant 0 : index
    %c8_151 = arith.constant 8 : index
    %141 = vector.load %arg12[%c3_148, %c0_149, %c0_150, %c8_151] : memref<4x8x8x36xbf16, #tpu.memory_space<vmem>>, vector<1x8x8x4xbf16>
    %142 = vector.shape_cast %141 : vector<1x8x8x4xbf16> to vector<8x8x4xbf16>
    %143 = vector.shape_cast %140 : vector<8x8x4xbf16> to vector<1x8x8x4xbf16>
    tpu.vector_store %arg12[%c3_148, %c0_149, %c0_150, %c8_151], %143 {strides = array<i32>} : memref<4x8x8x36xbf16, #tpu.memory_space<vmem>>, vector<1x8x8x4xbf16>,
    %144 = vector.extract_strided_slice %3 {offsets = [1, 0, 0], sizes = [8, 8, 4], strides = [1, 1, 1]} : vector<9x9x4xbf16> to vector<8x8x4xbf16>
    %c3_152 = arith.constant 3 : index
    %c0_153 = arith.constant 0 : index
    %c0_154 = arith.constant 0 : index
    %c12_155 = arith.constant 12 : index
    %145 = vector.load %arg12[%c3_152, %c0_153, %c0_154, %c12_155] : memref<4x8x8x36xbf16, #tpu.memory_space<vmem>>, vector<1x8x8x4xbf16>
    %146 = vector.shape_cast %145 : vector<1x8x8x4xbf16> to vector<8x8x4xbf16>
    %147 = vector.shape_cast %144 : vector<8x8x4xbf16> to vector<1x8x8x4xbf16>
    tpu.vector_store %arg12[%c3_152, %c0_153, %c0_154, %c12_155], %147 {strides = array<i32>} : memref<4x8x8x36xbf16, #tpu.memory_space<vmem>>, vector<1x8x8x4xbf16>,
    %148 = vector.extract_strided_slice %1 {offsets = [1, 1, 0], sizes = [8, 8, 4], strides = [1, 1, 1]} : vector<9x9x4xbf16> to vector<8x8x4xbf16>
    %c3_156 = arith.constant 3 : index
    %c0_157 = arith.constant 0 : index
    %c0_158 = arith.constant 0 : index
    %c16_159 = arith.constant 16 : index
    %149 = vector.load %arg12[%c3_156, %c0_157, %c0_158, %c16_159] : memref<4x8x8x36xbf16, #tpu.memory_space<vmem>>, vector<1x8x8x4xbf16>
    %150 = vector.shape_cast %149 : vector<1x8x8x4xbf16> to vector<8x8x4xbf16>
    %151 = vector.shape_cast %148 : vector<8x8x4xbf16> to vector<1x8x8x4xbf16>
    tpu.vector_store %arg12[%c3_156, %c0_157, %c0_158, %c16_159], %151 {strides = array<i32>} : memref<4x8x8x36xbf16, #tpu.memory_space<vmem>>, vector<1x8x8x4xbf16>,
    %152 = vector.extract_strided_slice %3 {offsets = [1, 1, 0], sizes = [8, 8, 4], strides = [1, 1, 1]} : vector<9x9x4xbf16> to vector<8x8x4xbf16>
    %c3_160 = arith.constant 3 : index
    %c0_161 = arith.constant 0 : index
    %c0_162 = arith.constant 0 : index
    %c20_163 = arith.constant 20 : index
    %153 = vector.load %arg12[%c3_160, %c0_161, %c0_162, %c20_163] : memref<4x8x8x36xbf16, #tpu.memory_space<vmem>>, vector<1x8x8x4xbf16>
    %154 = vector.shape_cast %153 : vector<1x8x8x4xbf16> to vector<8x8x4xbf16>
    %155 = vector.shape_cast %152 : vector<8x8x4xbf16> to vector<1x8x8x4xbf16>
    tpu.vector_store %arg12[%c3_160, %c0_161, %c0_162, %c20_163], %155 {strides = array<i32>} : memref<4x8x8x36xbf16, #tpu.memory_space<vmem>>, vector<1x8x8x4xbf16>,
    %156 = vector.extract_strided_slice %7 {offsets = [1, 0, 0], sizes = [8, 8, 4], strides = [1, 1, 1]} : vector<9x9x4xbf16> to vector<8x8x4xbf16>
    %c3_164 = arith.constant 3 : index
    %c0_165 = arith.constant 0 : index
    %c0_166 = arith.constant 0 : index
    %c24_167 = arith.constant 24 : index
    %157 = vector.load %arg12[%c3_164, %c0_165, %c0_166, %c24_167] : memref<4x8x8x36xbf16, #tpu.memory_space<vmem>>, vector<1x8x8x4xbf16>
    %158 = vector.shape_cast %157 : vector<1x8x8x4xbf16> to vector<8x8x4xbf16>
    %159 = vector.shape_cast %156 : vector<8x8x4xbf16> to vector<1x8x8x4xbf16>
    tpu.vector_store %arg12[%c3_164, %c0_165, %c0_166, %c24_167], %159 {strides = array<i32>} : memref<4x8x8x36xbf16, #tpu.memory_space<vmem>>, vector<1x8x8x4xbf16>,
    %160 = vector.extract_strided_slice %5 {offsets = [1, 1, 0], sizes = [8, 8, 4], strides = [1, 1, 1]} : vector<9x9x4xbf16> to vector<8x8x4xbf16>
    %c3_168 = arith.constant 3 : index
    %c0_169 = arith.constant 0 : index
    %c0_170 = arith.constant 0 : index
    %c28_171 = arith.constant 28 : index
    %161 = vector.load %arg12[%c3_168, %c0_169, %c0_170, %c28_171] : memref<4x8x8x36xbf16, #tpu.memory_space<vmem>>, vector<1x8x8x4xbf16>
    %162 = vector.shape_cast %161 : vector<1x8x8x4xbf16> to vector<8x8x4xbf16>
    %163 = vector.shape_cast %160 : vector<8x8x4xbf16> to vector<1x8x8x4xbf16>
    tpu.vector_store %arg12[%c3_168, %c0_169, %c0_170, %c28_171], %163 {strides = array<i32>} : memref<4x8x8x36xbf16, #tpu.memory_space<vmem>>, vector<1x8x8x4xbf16>,
    %164 = vector.extract_strided_slice %7 {offsets = [1, 1, 0], sizes = [8, 8, 4], strides = [1, 1, 1]} : vector<9x9x4xbf16> to vector<8x8x4xbf16>
    %c3_172 = arith.constant 3 : index
    %c0_173 = arith.constant 0 : index
    %c0_174 = arith.constant 0 : index
    %c32_175 = arith.constant 32 : index
    %165 = vector.load %arg12[%c3_172, %c0_173, %c0_174, %c32_175] : memref<4x8x8x36xbf16, #tpu.memory_space<vmem>>, vector<1x8x8x4xbf16>
    %166 = vector.shape_cast %165 : vector<1x8x8x4xbf16> to vector<8x8x4xbf16>
    %167 = vector.shape_cast %164 : vector<8x8x4xbf16> to vector<1x8x8x4xbf16>
    tpu.vector_store %arg12[%c3_172, %c0_173, %c0_174, %c32_175], %167 {strides = array<i32>} : memref<4x8x8x36xbf16, #tpu.memory_space<vmem>>, vector<1x8x8x4xbf16>,
    %c0_176 = arith.constant 0 : index
    %c0_177 = arith.constant 0 : index
    %c0_178 = arith.constant 0 : index
    %c0_179 = arith.constant 0 : index
    %168 = vector.load %arg12[%c0_176, %c0_177, %c0_178, %c0_179] : memref<4x8x8x36xbf16, #tpu.memory_space<vmem>>, vector<4x8x8x36xbf16>
    %169 = vector.shape_cast %168 : vector<4x8x8x36xbf16> to vector<256x36xbf16>
    %c0_180 = arith.constant 0 : index
    %c0_181 = arith.constant 0 : index
    %170 = vector.load %arg2[%c0_180, %c0_181] : memref<36x4xbf16, #tpu.memory_space<vmem>>, vector<36x4xbf16>
    %cst_182 = arith.constant dense<0.000000e+00> : vector<256x4xf32>
    %171 = tpu.matmul %169, %170, %cst_182 {dimension_numbers = #tpu.dot_dimension_numbers<[1], [0], [0], [1], [0, 0, 1, 1], [], []>} : vector<256x36xbf16>, vector<36x4xbf16>, vector<256x4xf32> -> vector<256x4xf32>
    %c0_183 = arith.constant 0 : index
    %c0_184 = arith.constant 0 : index
    %172 = vector.load %arg3[%c0_183, %c0_184] : memref<1x4xf32, #tpu.memory_space<vmem>>, vector<1x4xf32>
    %173 = vector.broadcast %172 : vector<1x4xf32> to vector<256x4xf32>
    %174 = arith.addf %171, %173 : vector<256x4xf32>
    %cst_185 = arith.constant dense<0.000000e+00> : vector<4xf32>
    %175 = vector.multi_reduction <add>, %174, %cst_185 [0] : vector<256x4xf32> to vector<4xf32>
    %176 = vector.shape_cast %175 : vector<4xf32> to vector<1x4xf32>
    %cst_186 = arith.constant 3.906250e-03 : f32
    %177 = vector.broadcast %cst_186 : f32 to vector<1x4xf32>
    %178 = arith.mulf %176, %177 : vector<1x4xf32>
    %179 = vector.broadcast %178 : vector<1x4xf32> to vector<256x4xf32>
    %180 = arith.subf %174, %179 : vector<256x4xf32>
    %181 = arith.mulf %180, %180 : vector<256x4xf32>
    %cst_187 = arith.constant dense<0.000000e+00> : vector<4xf32>
    %182 = vector.multi_reduction <add>, %181, %cst_187 [0] : vector<256x4xf32> to vector<4xf32>
    %183 = vector.shape_cast %182 : vector<4xf32> to vector<1x4xf32>
    %cst_188 = arith.constant 3.906250e-03 : f32
    %184 = vector.broadcast %cst_188 : f32 to vector<1x4xf32>
    %185 = arith.mulf %183, %184 : vector<1x4xf32>
    %cst_189 = arith.constant 9.99999974E-6 : f32
    %186 = vector.broadcast %cst_189 : f32 to vector<1x4xf32>
    %187 = arith.addf %185, %186 : vector<1x4xf32>
    %188 = math.rsqrt %187 : vector<1x4xf32>
    %c0_190 = arith.constant 0 : index
    %c0_191 = arith.constant 0 : index
    %189 = vector.load %arg4[%c0_190, %c0_191] : memref<1x4xf32, #tpu.memory_space<vmem>>, vector<1x4xf32>
    %190 = arith.mulf %188, %189 : vector<1x4xf32>
    %191 = vector.broadcast %190 : vector<1x4xf32> to vector<256x4xf32>
    %192 = arith.mulf %180, %191 : vector<256x4xf32>
    %c0_192 = arith.constant 0 : index
    %c0_193 = arith.constant 0 : index
    %193 = vector.load %arg5[%c0_192, %c0_193] : memref<1x4xf32, #tpu.memory_space<vmem>>, vector<1x4xf32>
    %194 = vector.broadcast %193 : vector<1x4xf32> to vector<256x4xf32>
    %195 = arith.addf %192, %194 : vector<256x4xf32>
    %cst_194 = arith.constant 2.000000e+01 : f32
    %196 = vector.broadcast %cst_194 : f32 to vector<256x4xf32>
    %197 = arith.minimumf %195, %196 : vector<256x4xf32>
    %198 = math.exp %197 : vector<256x4xf32>
    %cst_195 = arith.constant 1.000000e+00 : f32
    %199 = vector.broadcast %cst_195 : f32 to vector<256x4xf32>
    %200 = arith.addf %199, %198 : vector<256x4xf32>
    %cst_196 = arith.constant 1.000000e+00 : f32
    %201 = vector.broadcast %cst_196 : f32 to vector<256x4xf32>
    %202 = arith.addf %201, %198 : vector<256x4xf32>
    %203 = arith.mulf %200, %202 : vector<256x4xf32>
    %cst_197 = arith.constant 1.000000e+00 : f32
    %204 = vector.broadcast %cst_197 : f32 to vector<256x4xf32>
    %205 = arith.addf %203, %204 : vector<256x4xf32>
    %206 = tpu.reciprocal %205 {approx = true} : vector<256x4xf32> -> vector<256x4xf32>
    %207 = arith.mulf %205, %206 : vector<256x4xf32>
    %cst_198 = arith.constant 2.000000e+00 : f32
    %208 = vector.broadcast %cst_198 : f32 to vector<256x4xf32>
    %209 = arith.subf %208, %207 : vector<256x4xf32>
    %210 = arith.mulf %206, %209 : vector<256x4xf32>
    %cst_199 = arith.constant 1.000000e+00 : f32
    %211 = vector.broadcast %cst_199 : f32 to vector<256x4xf32>
    %212 = arith.subf %203, %211 : vector<256x4xf32>
    %213 = arith.mulf %195, %212 : vector<256x4xf32>
    %214 = arith.mulf %213, %210 : vector<256x4xf32>
    %215 = vector.extract_strided_slice %214 {offsets = [0, 0], sizes = [64, 4], strides = [1, 1]} : vector<256x4xf32> to vector<64x4xf32>
    %216 = vector.shape_cast %215 : vector<64x4xf32> to vector<8x8x4xf32>
    %217 = arith.truncf %216 : vector<8x8x4xf32> to vector<8x8x4xbf16>
    %c1_200 = arith.constant 1 : index
    %c1_201 = arith.constant 1 : index
    %c0_202 = arith.constant 0 : index
    %218 = vector.load %arg11[%c1_200, %c1_201, %c0_202] : memref<36x9x4xbf16, #tpu.memory_space<vmem>>, vector<8x8x4xbf16>
    tpu.vector_store %arg11[%c1_200, %c1_201, %c0_202], %217 {strides = array<i32>} : memref<36x9x4xbf16, #tpu.memory_space<vmem>>, vector<8x8x4xbf16>,
    %219 = vector.extract_strided_slice %214 {offsets = [64, 0], sizes = [64, 4], strides = [1, 1]} : vector<256x4xf32> to vector<64x4xf32>
    %220 = vector.shape_cast %219 : vector<64x4xf32> to vector<8x8x4xf32>
    %221 = arith.truncf %220 : vector<8x8x4xf32> to vector<8x8x4xbf16>
    %c10 = arith.constant 10 : index
    %c1_203 = arith.constant 1 : index
    %c0_204 = arith.constant 0 : index
    %222 = vector.load %arg11[%c10, %c1_203, %c0_204] : memref<36x9x4xbf16, #tpu.memory_space<vmem>>, vector<8x8x4xbf16>
    tpu.vector_store %arg11[%c10, %c1_203, %c0_204], %221 {strides = array<i32>} : memref<36x9x4xbf16, #tpu.memory_space<vmem>>, vector<8x8x4xbf16>,
    %223 = vector.extract_strided_slice %214 {offsets = [128, 0], sizes = [64, 4], strides = [1, 1]} : vector<256x4xf32> to vector<64x4xf32>
    %224 = vector.shape_cast %223 : vector<64x4xf32> to vector<8x8x4xf32>
    %225 = arith.truncf %224 : vector<8x8x4xf32> to vector<8x8x4xbf16>
    %c19 = arith.constant 19 : index
    %c1_205 = arith.constant 1 : index
    %c0_206 = arith.constant 0 : index
    %226 = vector.load %arg11[%c19, %c1_205, %c0_206] : memref<36x9x4xbf16, #tpu.memory_space<vmem>>, vector<8x8x4xbf16>
    tpu.vector_store %arg11[%c19, %c1_205, %c0_206], %225 {strides = array<i32>} : memref<36x9x4xbf16, #tpu.memory_space<vmem>>, vector<8x8x4xbf16>,
    %227 = vector.extract_strided_slice %214 {offsets = [192, 0], sizes = [64, 4], strides = [1, 1]} : vector<256x4xf32> to vector<64x4xf32>
    %228 = vector.shape_cast %227 : vector<64x4xf32> to vector<8x8x4xf32>
    %229 = arith.truncf %228 : vector<8x8x4xf32> to vector<8x8x4xbf16>
    %c28_207 = arith.constant 28 : index
    %c1_208 = arith.constant 1 : index
    %c0_209 = arith.constant 0 : index
    %230 = vector.load %arg11[%c28_207, %c1_208, %c0_209] : memref<36x9x4xbf16, #tpu.memory_space<vmem>>, vector<8x8x4xbf16>
    tpu.vector_store %arg11[%c28_207, %c1_208, %c0_209], %229 {strides = array<i32>} : memref<36x9x4xbf16, #tpu.memory_space<vmem>>, vector<8x8x4xbf16>,
    %c27_210 = arith.constant 27 : index
    %c0_211 = arith.constant 0 : index
    %c0_212 = arith.constant 0 : index
    %231 = vector.load %arg11[%c27_210, %c0_211, %c0_212] : memref<36x9x4xbf16, #tpu.memory_space<vmem>>, vector<8x8x4xbf16>
    %c0_213 = arith.constant 0 : index
    %c0_214 = arith.constant 0 : index
    %c0_215 = arith.constant 0 : index
    %232 = vector.load %arg13[%c0_213, %c0_214, %c0_215] : memref<8x8x36xbf16, #tpu.memory_space<vmem>>, vector<8x8x4xbf16>
    tpu.vector_store %arg13[%c0_213, %c0_214, %c0_215], %231 {strides = array<i32>} : memref<8x8x36xbf16, #tpu.memory_space<vmem>>, vector<8x8x4xbf16>,
    %c18_216 = arith.constant 18 : index
    %c1_217 = arith.constant 1 : index
    %c0_218 = arith.constant 0 : index
    %233 = vector.load %arg11[%c18_216, %c1_217, %c0_218] : memref<36x9x4xbf16, #tpu.memory_space<vmem>>, vector<8x8x4xbf16>
    %c0_219 = arith.constant 0 : index
    %c0_220 = arith.constant 0 : index
    %c4_221 = arith.constant 4 : index
    %234 = vector.load %arg13[%c0_219, %c0_220, %c4_221] : memref<8x8x36xbf16, #tpu.memory_space<vmem>>, vector<8x8x4xbf16>
    tpu.vector_store %arg13[%c0_219, %c0_220, %c4_221], %233 {strides = array<i32>} : memref<8x8x36xbf16, #tpu.memory_space<vmem>>, vector<8x8x4xbf16>,
    %c27_222 = arith.constant 27 : index
    %c1_223 = arith.constant 1 : index
    %c0_224 = arith.constant 0 : index
    %235 = vector.load %arg11[%c27_222, %c1_223, %c0_224] : memref<36x9x4xbf16, #tpu.memory_space<vmem>>, vector<8x8x4xbf16>
    %c0_225 = arith.constant 0 : index
    %c0_226 = arith.constant 0 : index
    %c8_227 = arith.constant 8 : index
    %236 = vector.load %arg13[%c0_225, %c0_226, %c8_227] : memref<8x8x36xbf16, #tpu.memory_space<vmem>>, vector<8x8x4xbf16>
    tpu.vector_store %arg13[%c0_225, %c0_226, %c8_227], %235 {strides = array<i32>} : memref<8x8x36xbf16, #tpu.memory_space<vmem>>, vector<8x8x4xbf16>,
    %c10_228 = arith.constant 10 : index
    %c0_229 = arith.constant 0 : index
    %c0_230 = arith.constant 0 : index
    %237 = vector.load %arg11[%c10_228, %c0_229, %c0_230] : memref<36x9x4xbf16, #tpu.memory_space<vmem>>, vector<8x8x4xbf16>
    %c0_231 = arith.constant 0 : index
    %c0_232 = arith.constant 0 : index
    %c12_233 = arith.constant 12 : index
    %238 = vector.load %arg13[%c0_231, %c0_232, %c12_233] : memref<8x8x36xbf16, #tpu.memory_space<vmem>>, vector<8x8x4xbf16>
    tpu.vector_store %arg13[%c0_231, %c0_232, %c12_233], %237 {strides = array<i32>} : memref<8x8x36xbf16, #tpu.memory_space<vmem>>, vector<8x8x4xbf16>,
    %c1_234 = arith.constant 1 : index
    %c1_235 = arith.constant 1 : index
    %c0_236 = arith.constant 0 : index
    %239 = vector.load %arg11[%c1_234, %c1_235, %c0_236] : memref<36x9x4xbf16, #tpu.memory_space<vmem>>, vector<8x8x4xbf16>
    %c0_237 = arith.constant 0 : index
    %c0_238 = arith.constant 0 : index
    %c16_239 = arith.constant 16 : index
    %240 = vector.load %arg13[%c0_237, %c0_238, %c16_239] : memref<8x8x36xbf16, #tpu.memory_space<vmem>>, vector<8x8x4xbf16>
    tpu.vector_store %arg13[%c0_237, %c0_238, %c16_239], %239 {strides = array<i32>} : memref<8x8x36xbf16, #tpu.memory_space<vmem>>, vector<8x8x4xbf16>,
    %c10_240 = arith.constant 10 : index
    %c1_241 = arith.constant 1 : index
    %c0_242 = arith.constant 0 : index
    %241 = vector.load %arg11[%c10_240, %c1_241, %c0_242] : memref<36x9x4xbf16, #tpu.memory_space<vmem>>, vector<8x8x4xbf16>
    %c0_243 = arith.constant 0 : index
    %c0_244 = arith.constant 0 : index
    %c20_245 = arith.constant 20 : index
    %242 = vector.load %arg13[%c0_243, %c0_244, %c20_245] : memref<8x8x36xbf16, #tpu.memory_space<vmem>>, vector<8x8x4xbf16>
    tpu.vector_store %arg13[%c0_243, %c0_244, %c20_245], %241 {strides = array<i32>} : memref<8x8x36xbf16, #tpu.memory_space<vmem>>, vector<8x8x4xbf16>,
    %c28_246 = arith.constant 28 : index
    %c0_247 = arith.constant 0 : index
    %c0_248 = arith.constant 0 : index
    %243 = vector.load %arg11[%c28_246, %c0_247, %c0_248] : memref<36x9x4xbf16, #tpu.memory_space<vmem>>, vector<8x8x4xbf16>
    %c0_249 = arith.constant 0 : index
    %c0_250 = arith.constant 0 : index
    %c24_251 = arith.constant 24 : index
    %244 = vector.load %arg13[%c0_249, %c0_250, %c24_251] : memref<8x8x36xbf16, #tpu.memory_space<vmem>>, vector<8x8x4xbf16>
    tpu.vector_store %arg13[%c0_249, %c0_250, %c24_251], %243 {strides = array<i32>} : memref<8x8x36xbf16, #tpu.memory_space<vmem>>, vector<8x8x4xbf16>,
    %c19_252 = arith.constant 19 : index
    %c1_253 = arith.constant 1 : index
    %c0_254 = arith.constant 0 : index
    %245 = vector.load %arg11[%c19_252, %c1_253, %c0_254] : memref<36x9x4xbf16, #tpu.memory_space<vmem>>, vector<8x8x4xbf16>
    %c0_255 = arith.constant 0 : index
    %c0_256 = arith.constant 0 : index
    %c28_257 = arith.constant 28 : index
    %246 = vector.load %arg13[%c0_255, %c0_256, %c28_257] : memref<8x8x36xbf16, #tpu.memory_space<vmem>>, vector<8x8x4xbf16>
    tpu.vector_store %arg13[%c0_255, %c0_256, %c28_257], %245 {strides = array<i32>} : memref<8x8x36xbf16, #tpu.memory_space<vmem>>, vector<8x8x4xbf16>,
    %c28_258 = arith.constant 28 : index
    %c1_259 = arith.constant 1 : index
    %c0_260 = arith.constant 0 : index
    %247 = vector.load %arg11[%c28_258, %c1_259, %c0_260] : memref<36x9x4xbf16, #tpu.memory_space<vmem>>, vector<8x8x4xbf16>
    %c0_261 = arith.constant 0 : index
    %c0_262 = arith.constant 0 : index
    %c32_263 = arith.constant 32 : index
    %248 = vector.load %arg13[%c0_261, %c0_262, %c32_263] : memref<8x8x36xbf16, #tpu.memory_space<vmem>>, vector<8x8x4xbf16>
    tpu.vector_store %arg13[%c0_261, %c0_262, %c32_263], %247 {strides = array<i32>} : memref<8x8x36xbf16, #tpu.memory_space<vmem>>, vector<8x8x4xbf16>,
    %c0_264 = arith.constant 0 : index
    %c0_265 = arith.constant 0 : index
    %c0_266 = arith.constant 0 : index
    %249 = vector.load %arg13[%c0_264, %c0_265, %c0_266] : memref<8x8x36xbf16, #tpu.memory_space<vmem>>, vector<8x8x36xbf16>
    %250 = vector.shape_cast %249 : vector<8x8x36xbf16> to vector<64x36xbf16>
    %c0_267 = arith.constant 0 : index
    %c0_268 = arith.constant 0 : index
    %251 = vector.load %arg6[%c0_267, %c0_268] : memref<36x4xbf16, #tpu.memory_space<vmem>>, vector<36x4xbf16>
    %cst_269 = arith.constant dense<0.000000e+00> : vector<64x4xf32>
    %252 = tpu.matmul %250, %251, %cst_269 {dimension_numbers = #tpu.dot_dimension_numbers<[1], [0], [0], [1], [0, 0, 1, 1], [], []>} : vector<64x36xbf16>, vector<36x4xbf16>, vector<64x4xf32> -> vector<64x4xf32>
    %c0_270 = arith.constant 0 : index
    %c0_271 = arith.constant 0 : index
    %253 = vector.load %arg7[%c0_270, %c0_271] : memref<1x4xf32, #tpu.memory_space<vmem>>, vector<1x4xf32>
    %254 = vector.broadcast %253 : vector<1x4xf32> to vector<64x4xf32>
    %255 = arith.addf %252, %254 : vector<64x4xf32>
    %cst_272 = arith.constant dense<0.000000e+00> : vector<4xf32>
    %256 = vector.multi_reduction <add>, %255, %cst_272 [0] : vector<64x4xf32> to vector<4xf32>
    %257 = vector.shape_cast %256 : vector<4xf32> to vector<1x4xf32>
    %cst_273 = arith.constant 1.562500e-02 : f32
    %258 = vector.broadcast %cst_273 : f32 to vector<1x4xf32>
    %259 = arith.mulf %257, %258 : vector<1x4xf32>
    %260 = vector.broadcast %259 : vector<1x4xf32> to vector<64x4xf32>
    %261 = arith.subf %255, %260 : vector<64x4xf32>
    %262 = arith.mulf %261, %261 : vector<64x4xf32>
    %cst_274 = arith.constant dense<0.000000e+00> : vector<4xf32>
    %263 = vector.multi_reduction <add>, %262, %cst_274 [0] : vector<64x4xf32> to vector<4xf32>
    %264 = vector.shape_cast %263 : vector<4xf32> to vector<1x4xf32>
    %cst_275 = arith.constant 1.562500e-02 : f32
    %265 = vector.broadcast %cst_275 : f32 to vector<1x4xf32>
    %266 = arith.mulf %264, %265 : vector<1x4xf32>
    %cst_276 = arith.constant 9.99999974E-6 : f32
    %267 = vector.broadcast %cst_276 : f32 to vector<1x4xf32>
    %268 = arith.addf %266, %267 : vector<1x4xf32>
    %269 = math.rsqrt %268 : vector<1x4xf32>
    %c0_277 = arith.constant 0 : index
    %c0_278 = arith.constant 0 : index
    %270 = vector.load %arg8[%c0_277, %c0_278] : memref<1x4xf32, #tpu.memory_space<vmem>>, vector<1x4xf32>
    %271 = arith.mulf %269, %270 : vector<1x4xf32>
    %272 = vector.broadcast %271 : vector<1x4xf32> to vector<64x4xf32>
    %273 = arith.mulf %261, %272 : vector<64x4xf32>
    %c0_279 = arith.constant 0 : index
    %c0_280 = arith.constant 0 : index
    %274 = vector.load %arg9[%c0_279, %c0_280] : memref<1x4xf32, #tpu.memory_space<vmem>>, vector<1x4xf32>
    %275 = vector.broadcast %274 : vector<1x4xf32> to vector<64x4xf32>
    %276 = arith.addf %273, %275 : vector<64x4xf32>
    %cst_281 = arith.constant 2.000000e+01 : f32
    %277 = vector.broadcast %cst_281 : f32 to vector<64x4xf32>
    %278 = arith.minimumf %276, %277 : vector<64x4xf32>
    %279 = math.exp %278 : vector<64x4xf32>
    %cst_282 = arith.constant 1.000000e+00 : f32
    %280 = vector.broadcast %cst_282 : f32 to vector<64x4xf32>
    %281 = arith.addf %280, %279 : vector<64x4xf32>
    %cst_283 = arith.constant 1.000000e+00 : f32
    %282 = vector.broadcast %cst_283 : f32 to vector<64x4xf32>
    %283 = arith.addf %282, %279 : vector<64x4xf32>
    %284 = arith.mulf %281, %283 : vector<64x4xf32>
    %cst_284 = arith.constant 1.000000e+00 : f32
    %285 = vector.broadcast %cst_284 : f32 to vector<64x4xf32>
    %286 = arith.addf %284, %285 : vector<64x4xf32>
    %287 = tpu.reciprocal %286 {approx = true} : vector<64x4xf32> -> vector<64x4xf32>
    %288 = arith.mulf %286, %287 : vector<64x4xf32>
    %cst_285 = arith.constant 2.000000e+00 : f32
    %289 = vector.broadcast %cst_285 : f32 to vector<64x4xf32>
    %290 = arith.subf %289, %288 : vector<64x4xf32>
    %291 = arith.mulf %287, %290 : vector<64x4xf32>
    %cst_286 = arith.constant 1.000000e+00 : f32
    %292 = vector.broadcast %cst_286 : f32 to vector<64x4xf32>
    %293 = arith.subf %284, %292 : vector<64x4xf32>
    %294 = arith.mulf %276, %293 : vector<64x4xf32>
    %295 = arith.mulf %294, %291 : vector<64x4xf32>
    %296 = vector.extract_strided_slice %7 {offsets = [0, 0, 0], sizes = [8, 8, 4], strides = [1, 1, 1]} : vector<9x9x4xbf16> to vector<8x8x4xbf16>
    %297 = arith.extf %296 : vector<8x8x4xbf16> to vector<8x8x4xf32>
    %298 = vector.extract_strided_slice %5 {offsets = [0, 1, 0], sizes = [8, 8, 4], strides = [1, 1, 1]} : vector<9x9x4xbf16> to vector<8x8x4xbf16>
    %299 = arith.extf %298 : vector<8x8x4xbf16> to vector<8x8x4xf32>
    %300 = arith.maximumf %297, %299 : vector<8x8x4xf32>
    %301 = vector.extract_strided_slice %3 {offsets = [1, 0, 0], sizes = [8, 8, 4], strides = [1, 1, 1]} : vector<9x9x4xbf16> to vector<8x8x4xbf16>
    %302 = arith.extf %301 : vector<8x8x4xbf16> to vector<8x8x4xf32>
    %303 = vector.extract_strided_slice %1 {offsets = [1, 1, 0], sizes = [8, 8, 4], strides = [1, 1, 1]} : vector<9x9x4xbf16> to vector<8x8x4xbf16>
    %304 = arith.extf %303 : vector<8x8x4xbf16> to vector<8x8x4xf32>
    %305 = arith.maximumf %302, %304 : vector<8x8x4xf32>
    %306 = arith.maximumf %300, %305 : vector<8x8x4xf32>
    %307 = vector.shape_cast %306 : vector<8x8x4xf32> to vector<64x4xf32>
    %cst_287 = arith.constant 2.000000e+01 : f32
    %308 = vector.broadcast %cst_287 : f32 to vector<64x4xf32>
    %309 = arith.minimumf %307, %308 : vector<64x4xf32>
    %310 = math.exp %309 : vector<64x4xf32>
    %cst_288 = arith.constant 1.000000e+00 : f32
    %311 = vector.broadcast %cst_288 : f32 to vector<64x4xf32>
    %312 = arith.addf %311, %310 : vector<64x4xf32>
    %cst_289 = arith.constant 1.000000e+00 : f32
    %313 = vector.broadcast %cst_289 : f32 to vector<64x4xf32>
    %314 = arith.addf %313, %310 : vector<64x4xf32>
    %315 = arith.mulf %312, %314 : vector<64x4xf32>
    %cst_290 = arith.constant 1.000000e+00 : f32
    %316 = vector.broadcast %cst_290 : f32 to vector<64x4xf32>
    %317 = arith.addf %315, %316 : vector<64x4xf32>
    %318 = tpu.reciprocal %317 {approx = true} : vector<64x4xf32> -> vector<64x4xf32>
    %319 = arith.mulf %317, %318 : vector<64x4xf32>
    %cst_291 = arith.constant 2.000000e+00 : f32
    %320 = vector.broadcast %cst_291 : f32 to vector<64x4xf32>
    %321 = arith.subf %320, %319 : vector<64x4xf32>
    %322 = arith.mulf %318, %321 : vector<64x4xf32>
    %cst_292 = arith.constant 1.000000e+00 : f32
    %323 = vector.broadcast %cst_292 : f32 to vector<64x4xf32>
    %324 = arith.subf %315, %323 : vector<64x4xf32>
    %325 = arith.mulf %307, %324 : vector<64x4xf32>
    %326 = arith.mulf %325, %322 : vector<64x4xf32>
    %327 = tpu.transpose %295, [1, 0] : vector<64x4xf32> -> vector<4x64xf32>
    %c0_293 = arith.constant 0 : index
    %c0_294 = arith.constant 0 : index
    %c0_295 = arith.constant 0 : index
    %328 = vector.load %arg10[%c0_293, %c0_294, %c0_295] : memref<1x8x64xf32, #tpu.memory_space<vmem>>, vector<1x4x64xf32>
    %329 = vector.shape_cast %328 : vector<1x4x64xf32> to vector<4x64xf32>
    %330 = vector.shape_cast %327 : vector<4x64xf32> to vector<1x4x64xf32>
    tpu.vector_store %arg10[%c0_293, %c0_294, %c0_295], %330 {strides = array<i32>} : memref<1x8x64xf32, #tpu.memory_space<vmem>>, vector<1x4x64xf32>,
    %331 = tpu.transpose %326, [1, 0] : vector<64x4xf32> -> vector<4x64xf32>
    %c0_296 = arith.constant 0 : index
    %c4_297 = arith.constant 4 : index
    %c0_298 = arith.constant 0 : index
    %332 = vector.load %arg10[%c0_296, %c4_297, %c0_298] : memref<1x8x64xf32, #tpu.memory_space<vmem>>, vector<1x4x64xf32>
    %333 = vector.shape_cast %332 : vector<1x4x64xf32> to vector<4x64xf32>
    %334 = vector.shape_cast %331 : vector<4x64xf32> to vector<1x4x64xf32>
    tpu.vector_store %arg10[%c0_296, %c4_297, %c0_298], %334 {strides = array<i32>} : memref<1x8x64xf32, #tpu.memory_space<vmem>>, vector<1x4x64xf32>,
    return
  }
  func.func @transform_0(%arg0: i32) -> (i32, i32, i32, i32) {
    %c0_i32 = arith.constant 0 : i32
    %c0_i32_0 = arith.constant 0 : i32
    %c0_i32_1 = arith.constant 0 : i32
    %c0_i32_2 = arith.constant 0 : i32
    return %arg0, %c0_i32, %c0_i32_0, %c0_i32_1 : i32, i32, i32, i32
  }
  func.func @transform_1(%arg0: i32) -> (i32, i32) {
    %c0_i32 = arith.constant 0 : i32
    %c0_i32_0 = arith.constant 0 : i32
    %c0_i32_1 = arith.constant 0 : i32
    return %c0_i32, %c0_i32_0 : i32, i32
  }
  func.func @transform_2(%arg0: i32) -> (i32, i32) {
    %c0_i32 = arith.constant 0 : i32
    %c0_i32_0 = arith.constant 0 : i32
    %c0_i32_1 = arith.constant 0 : i32
    return %c0_i32, %c0_i32_0 : i32, i32
  }
  func.func @transform_3(%arg0: i32) -> (i32, i32) {
    %c0_i32 = arith.constant 0 : i32
    %c0_i32_0 = arith.constant 0 : i32
    %c0_i32_1 = arith.constant 0 : i32
    return %c0_i32, %c0_i32_0 : i32, i32
  }
  func.func @transform_4(%arg0: i32) -> (i32, i32) {
    %c0_i32 = arith.constant 0 : i32
    %c0_i32_0 = arith.constant 0 : i32
    %c0_i32_1 = arith.constant 0 : i32
    return %c0_i32, %c0_i32_0 : i32, i32
  }
  func.func @transform_5(%arg0: i32) -> (i32, i32) {
    %c0_i32 = arith.constant 0 : i32
    %c0_i32_0 = arith.constant 0 : i32
    %c0_i32_1 = arith.constant 0 : i32
    return %c0_i32, %c0_i32_0 : i32, i32
  }
  func.func @transform_6(%arg0: i32) -> (i32, i32) {
    %c0_i32 = arith.constant 0 : i32
    %c0_i32_0 = arith.constant 0 : i32
    %c0_i32_1 = arith.constant 0 : i32
    return %c0_i32, %c0_i32_0 : i32, i32
  }
  func.func @transform_7(%arg0: i32) -> (i32, i32) {
    %c0_i32 = arith.constant 0 : i32
    %c0_i32_0 = arith.constant 0 : i32
    %c0_i32_1 = arith.constant 0 : i32
    return %c0_i32, %c0_i32_0 : i32, i32
  }
  func.func @transform_8(%arg0: i32) -> (i32, i32) {
    %c0_i32 = arith.constant 0 : i32
    %c0_i32_0 = arith.constant 0 : i32
    %c0_i32_1 = arith.constant 0 : i32
    return %c0_i32, %c0_i32_0 : i32, i32
  }
  func.func @transform_9(%arg0: i32) -> (i32, i32, i32) {
    %c0_i32 = arith.constant 0 : i32
    %c0_i32_0 = arith.constant 0 : i32
    %c0_i32_1 = arith.constant 0 : i32
    return %arg0, %c0_i32, %c0_i32_0 : i32, i32, i32
  }
}

</mosaic_0001>

<bundles_post_ra>
// kernel: resnet_forward.1
= control target key start
LH: loop header
LB: loop body
LE: loop exit
PB: predicated region body
PF: predicated region fallthrough
CT: control target
= control target key end

     0   :  { %s6282_s30 = smov 0   ;;  %s9633_s0 = inlined_call_operand.vmem [shape: bf16[2,36,9,4], index: 0, kind: input, shape index: {}]   ;;  %s9634_s1 = inlined_call_operand.vmem [shape: bf16[36,4], index: 1, kind: input, shape index: {}]   ;;  %s9635_s2 = inlined_call_operand.vmem [shape: f32[1,4], index: 2, kind: input, shape index: {}]   ;;  %s9636_s3 = inlined_call_operand.vmem [shape: f32[1,4], index: 3, kind: input, shape index: {}]   ;;  %s9637_s4 = inlined_call_operand.vmem [shape: f32[1,4], index: 4, kind: input, shape index: {}]   ;;  %s9638_s5 = inlined_call_operand.vmem [shape: bf16[36,4], index: 5, kind: input, shape index: {}]   ;;  %s9639_s6 = inlined_call_operand.vmem [shape: f32[1,4], index: 6, kind: input, shape index: {}]   ;;  %s9640_s7 = inlined_call_operand.vmem [shape: f32[1,4], index: 7, kind: input, shape index: {}]   ;;  %s9641_s8 = inlined_call_operand.vmem [shape: f32[1,4], index: 8, kind: input, shape index: {}]   ;;  %s9642_s9 = inlined_call_operand.vmem [shape: f32[2,8,64], index: 9, kind: output, shape index: {}]  }
   0x1 LB: > { %s5642_s10 = sadd.s32 4294967295, %s6221_s30   ;;  %p5646_p0 = scmp.ge.s32.totalorder %s6221_s30, 1  ;;  %s6221_s30 = sphi %s6282_s30, %s19_s30  }
   0x2   : > { %p287_p1 = scmp.lt.s32.totalorder %s6221_s30, 3 }
   0x4   : > { %p288_p2 = pnand %p5646_p0, %p287_p1 }
   0x6   : > { %291 = sbr.rel (%p288_p2) target bundleno = 1873 (0x751), region = 56 }
   0xb   : > { %p322_p3 = scmp.lt.s32.totalorder %s5642_s10, 1  ;;  %vm407_vm0 = vcmask 27648   ;;  %s6223_s15 = smov 4   ;;  %vm587_vm1 = vsmask.f32 3328  ;;  %v9747_v32 = vmov 0 }
   0xc   : > { %vm588_vm2 = vsmask.f32 7440  ;;  %s6224_s16 = smov 12   ;;  %s6225_s17 = smov 8   ;;  %vm2335_vm4 = vcmask 1041408   ;;  %vm578_vm5 = vcmask 60448  }
   0xd   : > { %s9986_s10 = smov (!%p322_p3, %s5642_s10), 1  ;;  %vm6371_vm3 = vmor %vm587_vm1, %vm588_vm2  ;;  %s6226_s18 = smov 16   ;;  %vm726_vm6 = vcmask 93248   ;;  %vm767_vm7 = vcmask 126048   ;;  %vm808_vm8 = vcmask 158848   ;;  %vm953_vm9 = vcmask 191648  }
   0xe   : > { %s5954_s11 = smul.u32 288, %s9986_s10  ;;  %v9748_v32 = vsel %vm6371_vm3, 4294967295, %v9747_v32  ;;  %s6227_s19 = smov 20   ;;  %vm994_vm10 = vcmask 224448   ;;  %vm1028_vm11 = vcmask 257248   ;;  %vm1075_vm12 = vcmask 290048  }
   0xf   : > { %9749 = vst [vmem:[#allocation14_spill] sm:$0xff] %v9748_v32  ;;  %s6228_s20 = smov 24   ;;  %s6229_s21 = smov 28   ;;  %vm2286_vm13 = vcmask 293888   ;;  %vm409_vm14 = vcmask 24576   ;;  %vm2500_vm2 = vcmask 31744  }
  0x10   : > { %s6296_s14 = scalar_lea.vmem %s9633_s0, %s5954_s11  ;;  %s6230_s22 = smov 32   ;;  %vm410_vm15 = vsmask.f32 256 }
  0x11   : > { %v6299_v0 = vld [vmem:[%s6296_s14 + $0x58] sm:$0xf]  ;;  %v6302_v1 = vld [vmem:[%s6296_s14 + $0x48] sm:$0xf]  ;;  %v6305_v2 = vld [vmem:[%s6296_s14 + $0x60] sm:$0xf] }
  0x12   : > { %9738 = vst [vmem:[#allocation5_spill] sm:$0xff] %v6299_v0  ;;  %9739 = vst [vmem:[#allocation6_spill] sm:$0xff] %v6305_v2  ;;  %558 = vrot.lane.b32.xlu1 %v6299_v0, %s6223_s15  ;;  %554 = vrot.lane.b32.xlu0 %v6302_v1, %s6223_s15  ;;  %v6312_v3 = vld [vmem:[%s6296_s14 + $0x50] sm:$0xf]  ;;  %v6315_v4 = vld [vmem:[%s6296_s14 + $0x98] sm:$0xf] }
  0x13   : > { %9740 = vst [vmem:[#allocation7_spill] sm:$0xff] %v6312_v3  ;;  %9741 = vst [vmem:[#allocation8_spill] sm:$0xff] %v6315_v4  ;;  %v6324_v5 = vld [vmem:[%s6296_s14 + $0x90] sm:$0xf]  ;;  %v6327_v6 = vld [vmem:[%s6296_s14 + $0x8] sm:$0xf] }
  0x14   : > { %1085 = vst.msk [vmem:[#allocation3 + $0x20] sm:$0xf] %vm407_vm0, %v6302_v1  ;;  %1087 = vst.msk [vmem:[#allocation3 + $0x28] sm:$0xf] %vm407_vm0, %v6299_v0  ;;  %v335_v7 = vld [vmem:[%s6296_s14 + $0xc] sm:$0x1] }
  0x15   : > { %1088 = vst.msk [vmem:[#allocation3 + $0x2c] sm:$0xf] %vm407_vm0, %v6305_v2  ;;  %9742 = vst [vmem:[#allocation9_spill] sm:$0xff] %v6324_v5  ;;  %v605_v8 = vshrl.u32 %v6327_v6, 16  ;;  %v332_v9 = vld [vmem:[%s6296_s14] sm:$0xf] }
  0x16   : > { %9743 = vst [vmem:[#allocation10_spill] sm:$0xff] %v6327_v6  ;;  %1086 = vst.msk [vmem:[#allocation3 + $0x24] sm:$0xf] %vm407_vm0, %v6312_v3  ;;  %v608_v10 = vshll.u32 %v6327_v6, 16  ;;  %v614_v11 = vshll.u32 %v335_v7, 16  ;;  %v591_v13 = vshrl.u32 %v332_v9, 16  ;;  %560 = vrot.lane.b32.xlu1 %v6305_v2, %s6223_s15  ;;  %556 = vrot.lane.b32.xlu0 %v6312_v3, %s6223_s15 }
  0x17   : > { %1589 = vst.msk [vmem:[#allocation3 + $0x44] sm:$0xf] %vm407_vm0, %v6315_v4  ;;  %539 = vst.msk [vmem:[#allocation3 + $0x4] sm:$0xf] %vm407_vm0, %v6327_v6  ;;  %v333_v12 = vld [vmem:[%s6296_s14 + $0x4] sm:$0x1] }
  0x18   : > { %1588 = vst.msk [vmem:[#allocation3 + $0x40] sm:$0xf] %vm407_vm0, %v6324_v5  ;;  %538 = vst.msk [vmem:[#allocation3] sm:$0xf] %vm407_vm0, %v332_v9  ;;  %v607_v14 = vrot.slane %v605_v8, 4  ;;  %v594_v15 = vshll.u32 %v332_v9, 16 }
  0x19   : > { %v600_v16 = vshll.u32 %v333_v12, 16  ;;  %v6348_v17 = vld [vmem:[%s6296_s14 + $0x18] sm:$0xf]  ;;  %v610_v18 = vrot.slane %v608_v10, 5  ;;  %v593_v19 = vrot.slane %v591_v13, 4  ;;  %v616_v22 = vrot.slane %v614_v11, 5  ;;  %vm7037_vm1 = vmand %vm409_vm14, %vm410_vm15 }
  0x1a   : > { %9744 = vst [vmem:[#allocation11_spill] sm:$0xff] %v6348_v17  ;;  %v339_v20 = vld [vmem:[%s6296_s14 + $0x1c] sm:$0x1]  ;;  %v633_v21 = vshrl.u32 %v6348_v17, 16  ;;  %541 = vst.msk [vmem:[#allocation3 + $0xc] sm:$0xf] %vm407_vm0, %v6348_v17  ;;  %745 = vrot.lane.b32.xlu1 %v6315_v4, %s6224_s16  ;;  %743 = vrot.lane.b32.xlu0 %v6324_v5, %s6224_s16 }
  0x1b   : > { %v596_v23 = vrot.slane %v594_v15, 5  ;;  %v636_v24 = vshll.u32 %v6348_v17, 16  ;;  %v642_v25 = vshll.u32 %v339_v20, 16  ;;  %v6356_v26 = vld [vmem:[%s6296_s14 + $0x10] sm:$0xf]  ;;  %v611_v27 = vor.u32 %v610_v18, %v607_v14  ;;  %s5648_s28 = sshll.u32 %s9986_s10, 3 }
  0x1c   : > { %9745 = vst [vmem:[#allocation12_spill] sm:$0xff] %v6356_v26  ;;  %v635_v28 = vrot.slane %v633_v21, 4  ;;  %v337_v29 = vld [vmem:[%s6296_s14 + $0x14] sm:$0x1]  ;;  %v619_v30 = vshrl.u32 %v6356_v26, 16  ;;  %v602_v34 = vrot.slane %v600_v16, 5  ;;  %s330_s12 = scalar_lea.vmem %s9642_s9, %s5648_s28 }
  0x1d   : > { %v6361_v31 = vld [vmem:[%s6296_s14 + $0xa8] sm:$0xf]  ;;  %540 = vst.msk [vmem:[#allocation3 + $0x8] sm:$0xf] %vm407_vm0, %v6356_v26  ;;  %v597_v33 = vor.u32 %v596_v23, %v593_v19  ;;  %v638_v35 = vrot.slane %v636_v24, 5  ;;  %v622_v36 = vshll.u32 %v6356_v26, 16 }
  0x1e   : > { %9746 = vst [vmem:[#allocation13_spill] sm:$0xff] %v6361_v31  ;;  %v6377_v37 = vld [vmem:[%s6296_s14 + $0xa0] sm:$0xf]  ;;  %1591 = vst.msk [vmem:[#allocation3 + $0x4c] sm:$0xf] %vm407_vm0, %v6361_v31  ;;  %v612_v38 = vrot.slane %v611_v27, 4 }
  0x1f   : > { %9750 = vst [vmem:[#allocation15_spill] sm:$0xff] %v6377_v37  ;;  %v644_v39 = vrot.slane %v642_v25, 5  ;;  %v621_v40 = vrot.slane %v619_v30, 4  ;;  %v628_v41 = vshll.u32 %v337_v29, 16  ;;  %v6382_v42 = vld [vmem:[%s6296_s14 + $0xe0] sm:$0xf]  ;;  %v639_v44 = vor.u32 %v638_v35, %v635_v28 }
  0x20   : > { %9751 = vst [vmem:[#allocation16_spill] sm:$0xff] %v6382_v42  ;;  %1590 = vst.msk [vmem:[#allocation3 + $0x48] sm:$0xf] %vm407_vm0, %v6377_v37  ;;  %v598_v43 = vrot.slane %v597_v33, 4  ;;  %v624_v45 = vrot.slane %v622_v36, 5  ;;  %v6396_v48 = vsel %vm6371_vm3, %v612_v38, %v616_v22  ;;  %v832_v54 = vshrl.u32 %v6315_v4, 16 }
  0x21   : > { %v6387_v46 = vld [vmem:[%s6296_s14 + $0xd8] sm:$0xf]  ;;  %v6390_v47 = vld [vmem:[%s6296_s14 + $0xf0] sm:$0xf]  ;;  %1870 = vst.msk [vmem:[#allocation3 + $0x64] sm:$0xf] %vm407_vm0, %v6382_v42  ;;  %704 = vrot.lane.b32.xlu1 %v6396_v48, %s6225_s17 }
  0x22   : > { %9752 = vst [vmem:[#allocation17_spill] sm:$0xff] %v6387_v46  ;;  %9753 = vst [vmem:[#allocation18_spill] sm:$0xff] %v6390_v47  ;;  %v6399_v49 = vld [vmem:[%s6296_s14 + $0xe8] sm:$0xf]  ;;  %v6409_v50 = vsel %vm6371_vm3, %v598_v43, %v602_v34  ;;  %v640_v51 = vrot.slane %v639_v44, 4  ;;  %v625_v52 = vor.u32 %v624_v45, %v621_v40  ;;  %v630_v53 = vrot.slane %v628_v41, 5 }
  0x23   : > { %9754 = vst [vmem:[#allocation19_spill] sm:$0xff] %v6399_v49  ;;  %1869 = vst.msk [vmem:[#allocation3 + $0x60] sm:$0xf] %vm407_vm0, %v6387_v46  ;;  %702 = vrot.lane.b32.xlu0 %v6409_v50, %s6225_s17  ;;  %v835_v55 = vshll.u32 %v6315_v4, 16  ;;  %v818_v58 = vshrl.u32 %v6324_v5, 16  ;;  %v821_v59 = vshll.u32 %v6324_v5, 16 }
  0x24   : > { %1872 = vst.msk [vmem:[#allocation3 + $0x6c] sm:$0xf] %vm407_vm0, %v6390_v47  ;;  %1871 = vst.msk [vmem:[#allocation3 + $0x68] sm:$0xf] %vm407_vm0, %v6399_v49  ;;  %v6419_v56 = vsel %vm6371_vm3, %v640_v51, %v644_v39  ;;  %v626_v57 = vrot.slane %v625_v52, 4  ;;  %v834_v8 = vrot.slane %v832_v54, 4 }
  0x25   : > { %v6424_v60 = vld [vmem:[%s6296_s14 + $0x20] sm:$0xf]  ;;  %v6427_v61 = vld [vmem:[%s6296_s14 + $0x68] sm:$0xf]  ;;  %708 = vrot.lane.b32.xlu1 %v6419_v56, %s6225_s17  ;;  %v5670_v63 = vld [vmem:[%s6296_s14 + $0x9c] sm:$0x1] }
  0x26   : > { %9755 = vst [vmem:[#allocation20_spill] sm:$0xff] %v6424_v60  ;;  %9756 = vst [vmem:[#allocation21_spill] sm:$0xff] %v6427_v61  ;;  %v6435_v62 = vsel %vm6371_vm3, %v626_v57, %v630_v53  ;;  %v6439_v7 = vld [vmem:[%s6296_s14 + $0x70] sm:$0xf]  ;;  %v837_v9 = vrot.slane %v835_v55, 5  ;;  %v860_v10 = vshrl.u32 %v6361_v31, 16 }
  0x27   : > { %542 = vst.msk [vmem:[#allocation3 + $0x10] sm:$0xf] %vm407_vm0, %v6424_v60  ;;  %9757 = vst [vmem:[#allocation22_spill] sm:$0xff] %v6439_v7  ;;  %706 = vrot.lane.b32.xlu0 %v6435_v62, %s6225_s17  ;;  %v863_v11 = vshll.u32 %v6361_v31, 16  ;;  %v6448_v12 = vld [vmem:[%s6296_s14 + $0x80] sm:$0xf] }
  0x28   : > { %1089 = vst.msk [vmem:[#allocation3 + $0x30] sm:$0xf] %vm407_vm0, %v6427_v61  ;;  %9758 = vst [vmem:[#allocation23_spill] sm:$0xff] %v6448_v12  ;;  %v820_v13 = vrot.slane %v818_v58, 4  ;;  %v823_v14 = vrot.slane %v821_v59, 5  ;;  %v846_v19 = vshrl.u32 %v6377_v37, 16  ;;  %v838_v23 = vor.u32 %v837_v9, %v834_v8 }
  0x29   : > { %1090 = vst.msk [vmem:[#allocation3 + $0x34] sm:$0xf] %vm407_vm0, %v6439_v7  ;;  %v6453_v15 = vld [vmem:[%s6296_s14 + $0x78] sm:$0xf]  ;;  %v6456_v16 = vld [vmem:[%s6296_s14 + $0x28] sm:$0xf]  ;;  %749 = vrot.lane.b32.xlu1 %v6361_v31, %s6224_s16 }
  0x2a   : > { %9759 = vst [vmem:[#allocation24_spill] sm:$0xff] %v6453_v15  ;;  %9760 = vst [vmem:[#allocation25_spill] sm:$0xff] %v6456_v16  ;;  %v5668_v18 = vld [vmem:[%s6296_s14 + $0x94] sm:$0x1]  ;;  %v849_v20 = vshll.u32 %v6377_v37, 16  ;;  %v841_v21 = vshll.u32 %v5670_v63, 16  ;;  %v824_v28 = vor.u32 %v823_v14, %v820_v13 }
  0x2b   : > { %1092 = vst.msk [vmem:[#allocation3 + $0x3c] sm:$0xf] %vm407_vm0, %v6448_v12  ;;  %543 = vst.msk [vmem:[#allocation3 + $0x14] sm:$0xf] %vm407_vm0, %v6456_v16  ;;  %v6470_v22 = vld [vmem:[%s6296_s14 + $0x38] sm:$0xf]  ;;  %747 = vrot.lane.b32.xlu0 %v6377_v37, %s6224_s16 }
  0x2c   : > { %1091 = vst.msk [vmem:[#allocation3 + $0x38] sm:$0xf] %vm407_vm0, %v6453_v15  ;;  %9761 = vst [vmem:[#allocation26_spill] sm:$0xff] %v6470_v22  ;;  %v862_v24 = vrot.slane %v860_v10, 4  ;;  %v865_v25 = vrot.slane %v863_v11, 5  ;;  %v827_v29 = vshll.u32 %v5668_v18, 16 }
  0x2d   : > { %v6475_v27 = vld [vmem:[%s6296_s14 + $0x30] sm:$0xf]  ;;  %545 = vst.msk [vmem:[#allocation3 + $0x1c] sm:$0xf] %vm407_vm0, %v6470_v22  ;;  %v5674_v30 = vld [vmem:[%s6296_s14 + $0xac] sm:$0x1]  ;;  %786 = vrot.lane.b32.xlu1 %v6382_v42, %s6226_s18 }
  0x2e   : > { %9762 = vst [vmem:[#allocation27_spill] sm:$0xff] %v6475_v27  ;;  %v848_v33 = vrot.slane %v846_v19, 4  ;;  %v851_v34 = vrot.slane %v849_v20, 5  ;;  %544 = vst.msk [vmem:[#allocation3 + $0x18] sm:$0xf] %vm407_vm0, %v6475_v27  ;;  %v843_v39 = vrot.slane %v841_v21, 5  ;;  %v866_v43 = vor.u32 %v865_v25, %v862_v24 }
  0x2f   : > { %v5672_v35 = vld [vmem:[%s6296_s14 + $0xa4] sm:$0x1]  ;;  %v6484_v36 = vld [vmem:[%s6296_s14 + $0xb8] sm:$0xf]  ;;  %v6487_v38 = vld [vmem:[%s6296_s14 + $0xb0] sm:$0xf]  ;;  %784 = vrot.lane.b32.xlu0 %v6387_v46, %s6226_s18 }
  0x30   : > { %9763 = vst [vmem:[#allocation28_spill] sm:$0xff] %v6484_v36  ;;  %9764 = vst [vmem:[#allocation29_spill] sm:$0xff] %v6487_v38  ;;  %v6492_v40 = vld [vmem:[%s6296_s14 + $0xc8] sm:$0xf]  ;;  %v839_v41 = vrot.slane %v838_v23, 4  ;;  %v869_v44 = vshll.u32 %v5674_v30, 16  ;;  %v852_v54 = vor.u32 %v851_v34, %v848_v33 }
  0x31   : > { %9765 = vst [vmem:[#allocation30_spill] sm:$0xff] %v6492_v40  ;;  %1592 = vst.msk [vmem:[#allocation3 + $0x50] sm:$0xf] %vm407_vm0, %v6487_v38  ;;  %v6501_v45 = vld [vmem:[%s6296_s14 + $0xc0] sm:$0xf]  ;;  %v825_v52 = vrot.slane %v824_v28, 4  ;;  %790 = vrot.lane.b32.xlu1 %v6390_v47, %s6226_s18 }
  0x32   : > { %1593 = vst.msk [vmem:[#allocation3 + $0x54] sm:$0xf] %vm407_vm0, %v6484_v36  ;;  %9766 = vst [vmem:[#allocation31_spill] sm:$0xff] %v6501_v45  ;;  %v6504_v51 = vld [vmem:[%s6296_s14 + $0x100] sm:$0xf]  ;;  %v829_v53 = vrot.slane %v827_v29, 5  ;;  %v6531_v63 = vsel %vm6371_vm3, %v839_v41, %v843_v39 }
  0x33   : > { %9767 = vst [vmem:[#allocation32_spill] sm:$0xff] %v6504_v51  ;;  %1595 = vst.msk [vmem:[#allocation3 + $0x5c] sm:$0xf] %vm407_vm0, %v6492_v40  ;;  %v855_v55 = vshll.u32 %v5672_v35, 16  ;;  %v6509_v57 = vld [vmem:[%s6296_s14 + $0xf8] sm:$0xf]  ;;  %788 = vrot.lane.b32.xlu0 %v6399_v49, %s6226_s18 }
  0x34   : > { %9768 = vst [vmem:[#allocation33_spill] sm:$0xff] %v6509_v57  ;;  %1594 = vst.msk [vmem:[#allocation3 + $0x58] sm:$0xf] %vm407_vm0, %v6501_v45  ;;  %v6516_v58 = vld [vmem:[%s6296_s14 + $0x110] sm:$0xf]  ;;  %v867_v8 = vrot.slane %v866_v43, 4  ;;  %v6537_v10 = vsel %vm6371_vm3, %v825_v52, %v829_v53 }
  0x35   : > { %1874 = vst.msk [vmem:[#allocation3 + $0x74] sm:$0xf] %vm407_vm0, %v6504_v51  ;;  %9769 = vst [vmem:[#allocation34_spill] sm:$0xff] %v6516_v58  ;;  %v6523_v59 = vld [vmem:[%s6296_s14 + $0x108] sm:$0xf]  ;;  %v871_v9 = vrot.slane %v869_v44, 5  ;;  %931 = vrot.lane.b32.xlu1 %v6531_v63, %s6227_s19 }
  0x36   : > { %1873 = vst.msk [vmem:[#allocation3 + $0x70] sm:$0xf] %vm407_vm0, %v6509_v57  ;;  %9770 = vst [vmem:[#allocation35_spill] sm:$0xff] %v6523_v59  ;;  %v853_v11 = vrot.slane %v852_v54, 4  ;;  %v857_v13 = vrot.slane %v855_v55, 5  ;;  %v647_v19 = vshrl.u32 %v6424_v60, 16 }
  0x37   : > { %1876 = vst.msk [vmem:[#allocation3 + $0x7c] sm:$0xf] %vm407_vm0, %v6516_v58  ;;  %1875 = vst.msk [vmem:[#allocation3 + $0x78] sm:$0xf] %vm407_vm0, %v6523_v59  ;;  %929 = vrot.lane.b32.xlu0 %v6537_v10, %s6227_s19  ;;  %v6545_v14 = vsel %vm6371_vm3, %v867_v8, %v871_v9  ;;  %v650_v20 = vshll.u32 %v6424_v60, 16  ;;  %v661_v28 = vshrl.u32 %v6456_v16, 16 }
  0x38   : > { %v6549_v18 = vsel %vm6371_vm3, %v853_v11, %v857_v13  ;;  %v341_v21 = vld [vmem:[%s6296_s14 + $0x24] sm:$0x1]  ;;  %v649_v23 = vrot.slane %v647_v19, 4  ;;  %v664_v30 = vshll.u32 %v6456_v16, 16  ;;  %v343_v39 = vld [vmem:[%s6296_s14 + $0x2c] sm:$0x1] }
  0x39   : > { %935 = vrot.lane.b32.xlu1 %v6545_v14, %s6227_s19  ;;  %v652_v24 = vrot.slane %v650_v20, 5  ;;  %v656_v25 = vshll.u32 %v341_v21, 16  ;;  %v663_v34 = vrot.slane %v661_v28, 4  ;;  %v689_v43 = vshrl.u32 %v6470_v22, 16  ;;  %v347_v19 = vld [vmem:[%s6296_s14 + $0x3c] sm:$0x1] }
  0x3a   : > { %v666_v41 = vrot.slane %v664_v30, 5  ;;  %v692_v44 = vshll.u32 %v6470_v22, 16  ;;  %v675_v52 = vshrl.u32 %v6475_v27, 16  ;;  %v678_v53 = vshll.u32 %v6475_v27, 16 }
  0x3b   : > { %933 = vrot.lane.b32.xlu0 %v6549_v18, %s6227_s19  ;;  %v653_v29 = vor.u32 %v652_v24, %v649_v23  ;;  %v658_v33 = vrot.slane %v656_v25, 5  ;;  %v670_v54 = vshll.u32 %v343_v39, 16  ;;  %v5973_v55 = vld [vmem:[%s9634_s1 + $0x10] ss:$0 sps:$4 sm:$0x33]   ;;  %v691_v11 = vrot.slane %v689_v43, 4 }
  0x3c   : > { %v667_v9 = vor.u32 %v666_v41, %v663_v34  ;;  %v694_v13 = vrot.slane %v692_v44, 5  ;;  %v677_v20 = vrot.slane %v675_v52, 4  ;;  %v680_v21 = vrot.slane %v678_v53, 5  ;;  %v5974_v23 = vld [vmem:[%s9634_s1 + $0x8] sm:$0xff]   ;;  %v345_v24 = vld [vmem:[%s6296_s14 + $0x34] sm:$0x1]  ;;  %5951 = vmatprep.subr.msk.bf16.mxu0 %vm2335_vm4, %v5973_v55  ;;  %5952 = vmatprep.subr.msk.bf16.mxu1 %vm2335_vm4, %v5973_v55 }
  0x3d   : > { %972 = vrot.lane.b32.xlu1 %v6356_v26, %s6228_s20  ;;  %v654_v35 = vrot.slane %v653_v29, 4  ;;  %v2337_v25 = vsel %vm2335_vm4, %v5973_v55, 0  ;;  %v672_v29 = vrot.slane %v670_v54, 5  ;;  %v5976_v39 = vld [vmem:[%s9634_s1] sm:$0xff]   ;;  %vm3314_vm14 = vsmask.f32 7938 }
  0x3e   : > { %v668_v28 = vrot.slane %v667_v9, 4  ;;  %v695_v30 = vor.u32 %v694_v13, %v691_v11  ;;  %5894 = vmatpush3.bf16.msra.mxu0 %v2337_v25  ;;  %v681_v34 = vor.u32 %v680_v21, %v677_v20  ;;  %5948 = vmatpush3.bf16.msra.mxu1 %v2337_v25  ;;  %v888_v9 = vshrl.u32 %v6484_v36, 16  ;;  %v5678_v25 = vld [vmem:[%s6296_s14 + $0xbc] sm:$0x1]  ;;  %vm8242_vm15 = vmand %vm407_vm0, %vm3314_vm14 }
  0x3f   : > { %970 = vrot.lane.b32.xlu0 %v6327_v6, %s6228_s20  ;;  %v6594_v8 = vsel %vm6371_vm3, %v654_v35, %v658_v33  ;;  %v698_v33 = vshll.u32 %v347_v19, 16  ;;  %v684_v35 = vshll.u32 %v345_v24, 16  ;;  %5895 = vmatprep.subr.bf16.mxu0 %v5974_v23  ;;  %v891_v11 = vshll.u32 %v6484_v36, 16 }
  0x40   : > { %5946 = vmatprep.subr.bf16.mxu1 %v5974_v23  ;;  %v6617_v41 = vsel %vm6371_vm3, %v668_v28, %v672_v29  ;;  %v696_v43 = vrot.slane %v695_v30, 4  ;;  %v682_v52 = vrot.slane %v681_v34, 4  ;;  %v874_v13 = vshrl.u32 %v6487_v38, 16  ;;  %v5676_v34 = vld [vmem:[%s6296_s14 + $0xb4] sm:$0x1] }
  0x41   : > { %976 = vrot.lane.b32.xlu1 %v6424_v60, %s6228_s20  ;;  %v700_v44 = vrot.slane %v698_v33, 5  ;;  %v686_v53 = vrot.slane %v684_v35, 5  ;;  %v877_v19 = vshll.u32 %v6487_v38, 16  ;;  %v890_v20 = vrot.slane %v888_v9, 4  ;;  %v5682_v9 = vld [vmem:[%s6296_s14 + $0xcc] sm:$0x1] }
  0x42   : > { %5896 = vmatpush3.bf16.msra.mxu0 %v5974_v23  ;;  %5949 = vmatpush3.bf16.msra.mxu1 %v5974_v23  ;;  %v893_v21 = vrot.slane %v891_v11, 5  ;;  %v916_v23 = vshrl.u32 %v6492_v40, 16  ;;  %v919_v24 = vshll.u32 %v6492_v40, 16  ;;  %v876_v28 = vrot.slane %v874_v13, 4 }
  0x43   : > { %974 = vrot.lane.b32.xlu0 %v6348_v17, %s6228_s20  ;;  %5897 = vmatprep.subr.bf16.mxu0 %v5976_v39  ;;  %v6625_v54 = vsel %vm6371_vm3, %v696_v43, %v700_v44  ;;  %v6629_v55 = vsel %vm6371_vm3, %v682_v52, %v686_v53  ;;  %v879_v29 = vrot.slane %v877_v19, 5  ;;  %v902_v30 = vshrl.u32 %v6501_v45, 16  ;;  %v5680_v19 = vld [vmem:[%s6296_s14 + $0xc4] sm:$0x1] }
  0x44   : > { %5947 = vmatprep.subr.bf16.mxu1 %v5976_v39  ;;  %v905_v33 = vshll.u32 %v6501_v45, 16  ;;  %v894_v35 = vor.u32 %v893_v21, %v890_v20  ;;  %v918_v43 = vrot.slane %v916_v23, 4  ;;  %v921_v44 = vrot.slane %v919_v24, 5 }
  0x45   : > { %1006 = vrot.lane.b32.xlu1 %v6299_v0, %s6229_s21  ;;  %v880_v52 = vor.u32 %v879_v29, %v876_v28  ;;  %v883_v53 = vshll.u32 %v5676_v34, 16  ;;  %v904_v11 = vrot.slane %v902_v30, 4  ;;  %v911_v24 = vshll.u32 %v5680_v19, 16 }
  0x46   : > { %5898 = vmatpush3.bf16.msra.mxu0 %v5976_v39  ;;  %5950 = vmatpush3.bf16.msra.mxu1 %v5976_v39  ;;  %v897_v39 = vshll.u32 %v5678_v25, 16  ;;  %v907_v13 = vrot.slane %v905_v33, 5  ;;  %v895_v5 = vrot.slane %v894_v35, 4  ;;  %v1140_v19 = vshrl.u32 %v6312_v3, 16 }
  0x47   : > { %1004 = vrot.lane.b32.xlu0 %v6312_v3, %s6229_s21  ;;  %v881_v20 = vrot.slane %v880_v52, 4  ;;  %v885_v21 = vrot.slane %v883_v53, 5  ;;  %v913_v34 = vrot.slane %v911_v24, 5  ;;  %v6701_v52 = vld [vmem:[%s6296_s14 + $0x88] sm:$0xf]  ;;  %v1126_v24 = vshrl.u32 %v6302_v1, 16 }
  0x48   : > { %v908_v23 = vor.u32 %v907_v13, %v904_v11 }
  0x49   : > { %1010 = vrot.lane.b32.xlu1 %v6427_v61, %s6229_s21  ;;  %v6669_v30 = vsel %vm6371_vm3, %v881_v20, %v885_v21 }
  0x4a   : > { %v909_v33 = vrot.slane %v908_v23, 4  ;;  %v1143_v23 = vshll.u32 %v6312_v3, 16 }
  0x4b   : > { %1008 = vrot.lane.b32.xlu0 %v6305_v2, %s6229_s21 }
  0x4d   : > { %1053 = vrot.lane.b32.xlu1 %v6435_v62, %s6230_s22 }
  0x4f   : > { %1051 = vrot.lane.b32.xlu0 %v6396_v48, %s6230_s22 }
  0x51   : > { %564 = vrot.lane.b32.xlu1 %v6439_v7, %s6223_s15 }
  0x53   : > { %562 = vrot.lane.b32.xlu0 %v6427_v61, %s6223_s15 }
  0x55   : > { %1057 = vrot.lane.b32.xlu1 %v6594_v8, %s6230_s22 }
  0x57   : > { %1055 = vrot.lane.b32.xlu0 %v6419_v56, %s6230_s22 }
  0x59   : > { %568 = vrot.lane.b32.xlu1 %v6448_v12, %s6223_s15 }
  0x5b   : > { %566 = vrot.lane.b32.xlu0 %v6453_v15, %s6223_s15 }
  0x5d   : > { %712 = vrot.lane.b32.xlu1 %v6617_v41, %s6225_s17 }
  0x5f   : > { %710 = vrot.lane.b32.xlu0 %v6594_v8, %s6225_s17 }
  0x61   : > { %716 = vrot.lane.b32.xlu1 %v6625_v54, %s6225_s17 }
  0x63   : > { %714 = vrot.lane.b32.xlu0 %v6629_v55, %s6225_s17 }
  0x65   : > { %753 = vrot.lane.b32.xlu1 %v6484_v36, %s6224_s16  ;;  %v922_v36 = vor.u32 %v921_v44, %v918_v43  ;;  %v349_v44 = vld [vmem:[%s6296_s14 + $0x44] sm:$0x1] }
  0x67   : > { %751 = vrot.lane.b32.xlu0 %v6487_v38, %s6224_s16  ;;  %v923_v28 = vrot.slane %v922_v36, 4  ;;  %v348_v36 = vld [vmem:[%s6296_s14 + $0x40] sm:$0xf]  ;;  %v5654_v38 = vld [vmem:[%s6296_s14 + $0x5c] sm:$0x1] }
  0x69   : > { %757 = vrot.lane.b32.xlu1 %v6492_v40, %s6224_s16  ;;  %v899_v40 = vrot.slane %v897_v39, 5 }
  0x6b   : > { %755 = vrot.lane.b32.xlu0 %v6501_v45, %s6224_s16  ;;  %v925_v45 = vshll.u32 %v5682_v9, 16  ;;  %v6665_v25 = vsel %vm6371_vm3, %v895_v5, %v899_v40  ;;  %v6681_v5 = vsel %vm6371_vm3, %v909_v33, %v913_v34  ;;  %v1038_v40 = vshrl.u32 %v348_v36, 16 }
  0x6c   : > { %v1047_v9 = vshll.u32 %v349_v44, 16  ;;  %v1142_v34 = vrot.slane %v1140_v19, 4  ;;  %v5650_v19 = vld [vmem:[%s6296_s14 + $0x4c] sm:$0x1] }
  0x6d   : > { %794 = vrot.lane.b32.xlu1 %v6504_v51, %s6226_s18  ;;  %v927_v29 = vrot.slane %v925_v45, 5  ;;  %v1041_v45 = vshll.u32 %v348_v36, 16  ;;  %v1040_v39 = vrot.slane %v1038_v40, 4  ;;  %v1168_v40 = vshrl.u32 %v6305_v2, 16 }
  0x6e   : > { %v1049_v21 = vrot.slane %v1047_v9, 5  ;;  %v5652_v9 = vld [vmem:[%s6296_s14 + $0x54] sm:$0x1] }
  0x6f   : > { %792 = vrot.lane.b32.xlu0 %v6509_v57, %s6226_s18  ;;  %v6677_v35 = vsel %vm6371_vm3, %v923_v28, %v927_v29  ;;  %v1043_v43 = vrot.slane %v1041_v45, 5  ;;  %v1129_v28 = vshll.u32 %v6302_v1, 16  ;;  %v1145_v1 = vrot.slane %v1143_v23, 5 }
  0x70   : > { %v1171_v45 = vshll.u32 %v6305_v2, 16  ;;  %v1170_v23 = vrot.slane %v1168_v40, 4 }
  0x71   : > { %798 = vrot.lane.b32.xlu1 %v6516_v58, %s6226_s18  ;;  %v1044_v53 = vor.u32 %v1043_v43, %v1040_v39  ;;  %v1128_v39 = vrot.slane %v1126_v24, 4  ;;  %v1131_v43 = vrot.slane %v1129_v28, 5 }
  0x72   : > { %v1173_v24 = vrot.slane %v1171_v45, 5 }
  0x73   : > { %796 = vrot.lane.b32.xlu0 %v6523_v59, %s6226_s18  ;;  %v1045_v20 = vrot.slane %v1044_v53, 4 }
  0x74   : > { %v1174_v40 = vor.u32 %v1173_v24, %v1170_v23 }
  0x75   : > { %939 = vrot.lane.b32.xlu1 %v6665_v25, %s6227_s19 }
  0x77   : > { %937 = vrot.lane.b32.xlu0 %v6669_v30, %s6227_s19 }
  0x79   : > { %943 = vrot.lane.b32.xlu1 %v6677_v35, %s6227_s19 }
  0x7b   : > { %941 = vrot.lane.b32.xlu0 %v6681_v5, %s6227_s19 }
  0x7d   : > { %980 = vrot.lane.b32.xlu1 %v6475_v27, %s6228_s20 }
  0x7f   : > { %978 = vrot.lane.b32.xlu0 %v6456_v16, %s6228_s20 }
  0x81   : > { %984 = vrot.lane.b32.xlu1 %v348_v36, %s6228_s20  ;;  %v6721_v36 = vsel %vm6371_vm3, %v1045_v20, %v1049_v21  ;;  %v1146_v20 = vor.u32 %v1145_v1, %v1142_v34  ;;  %v1149_v21 = vshll.u32 %v5652_v9, 16 }
  0x83   : > { %982 = vrot.lane.b32.xlu0 %v6470_v22, %s6228_s20  ;;  %v5656_v22 = vld [vmem:[%s6296_s14 + $0x64] sm:$0x1]  ;;  %v1147_v34 = vrot.slane %v1146_v20, 4  ;;  %v1151_v1 = vrot.slane %v1149_v21, 5 }
  0x84   : > { %v559_v11 = vpop.permute.xlu1 %558  ;;  %v555_v13 = vpop.permute.xlu0 %554  ;;  %v1177_v45 = vshll.u32 %v5656_v22, 16  ;;  %v1175_v22 = vrot.slane %v1174_v40, 4 }
  0x85   : > { %1014 = vrot.lane.b32.xlu1 %v6453_v15, %s6229_s21  ;;  %581 = vst.msk [vmem:[#allocation3 + $0x8] sm:$0xf] %vm578_vm5, %v559_v11  ;;  %579 = vst.msk [vmem:[#allocation3] sm:$0xf] %vm578_vm5, %v555_v13  ;;  %v1154_v11 = vshrl.u32 %v6299_v0, 16  ;;  %v1157_v13 = vshll.u32 %v6299_v0, 16 }
  0x87   : > { %1012 = vrot.lane.b32.xlu0 %v6439_v7, %s6229_s21  ;;  %v1156_v16 = vrot.slane %v1154_v11, 4  ;;  %v1159_v27 = vrot.slane %v1157_v13, 5  ;;  %v1163_v13 = vshll.u32 %v5654_v38, 16 }
  0x88   : > { %v561_v29 = vpop.permute.xlu1 %560  ;;  %v557_v33 = vpop.permute.xlu0 %556 }
  0x89   : > { %1018 = vrot.lane.b32.xlu1 %v6701_v52, %s6229_s21  ;;  %582 = vst.msk [vmem:[#allocation3 + $0xc] sm:$0xf] %vm578_vm5, %v561_v29  ;;  %580 = vst.msk [vmem:[#allocation3 + $0x4] sm:$0xf] %vm578_vm5, %v557_v33  ;;  %v1132_v29 = vor.u32 %v1131_v43, %v1128_v39  ;;  %v1135_v33 = vshll.u32 %v5650_v19, 16  ;;  %v1160_v11 = vor.u32 %v1159_v27, %v1156_v16  ;;  %v1165_v38 = vrot.slane %v1163_v13, 5 }
  0x8a   : > { %v5688_v13 = vld [vmem:[%s6296_s14 + $0xe4] sm:$0x1] }
  0x8b   : > { %1016 = vrot.lane.b32.xlu0 %v6448_v12, %s6229_s21  ;;  %v1133_v43 = vrot.slane %v1132_v29, 4  ;;  %v1137_v9 = vrot.slane %v1135_v33, 5  ;;  %v1161_v27 = vrot.slane %v1160_v11, 4  ;;  %v1351_v29 = vshll.u32 %v6382_v42, 16 }
  0x8c   : > { %v746_v44 = vpop.permute.xlu1 %745  ;;  %v744_v53 = vpop.permute.xlu0 %743 }
  0x8d   : > { %1061 = vrot.lane.b32.xlu1 %v6629_v55, %s6230_s22  ;;  %v1138_v16 = vsel %vm6371_vm3, %v1133_v43, %v1137_v9  ;;  %v6766_v23 = vsel %vm6371_vm3, %v1161_v27, %v1165_v38  ;;  %v1376_v43 = vshrl.u32 %v6390_v47, 16  ;;  %v1379_v9 = vshll.u32 %v6390_v47, 16  ;;  %v5686_v27 = vld [vmem:[%s6296_s14 + $0xdc] sm:$0x1] }
  0x8e   : > { %9773 = vst [vmem:[#allocation38_spill] sm:$0xff] %v6766_v23 }
  0x8f   : > { %1059 = vrot.lane.b32.xlu0 %v6617_v41, %s6230_s22 }
  0x91   : > { %1065 = vrot.lane.b32.xlu1 %v6721_v36, %s6230_s22 }
  0x93   : > { %1063 = vrot.lane.b32.xlu0 %v6625_v54, %s6230_s22  ;;  %v705_v28 = vpop.permute.xlu1 %704 }
  0x94   : > { %728 = vst.msk [vmem:[#allocation3 + $0x4] sm:$0xf] %vm726_vm6, %v705_v28  ;;  %v1348_v28 = vshrl.u32 %v6382_v42, 16 }
  0x95   : > { %v703_v31 = vpop.permute.xlu0 %702  ;;  %1095 = vrot.lane.b32.xlu1 %v6396_v48, %s6223_s15  ;;  %769 = vst.msk [vmem:[#allocation3 + $0x4] sm:$0xf] %vm767_vm7, %v746_v44  ;;  %v1179_v44 = vrot.slane %v1177_v45, 5 }
  0x96   : > { %727 = vst.msk [vmem:[#allocation3] sm:$0xf] %vm726_vm6, %v703_v31  ;;  %v1350_v45 = vrot.slane %v1348_v28, 4 }
  0x97   : > { %1093 = vrot.lane.b32.xlu0 %v6409_v50, %s6223_s15  ;;  %768 = vst.msk [vmem:[#allocation3] sm:$0xf] %vm767_vm7, %v744_v53  ;;  %v709_v39 = vpop.permute.xlu1 %708  ;;  %v6751_v50 = vsel %vm6371_vm3, %v1147_v34, %v1151_v1  ;;  %v6762_v20 = vsel %vm6371_vm3, %v1175_v22, %v1179_v44  ;;  %v1334_v34 = vshrl.u32 %v6387_v46, 16  ;;  %v1337_v1 = vshll.u32 %v6387_v46, 16 }
  0x98   : > { %730 = vst.msk [vmem:[#allocation3 + $0xc] sm:$0xf] %vm726_vm6, %v709_v39  ;;  %9771 = vst [vmem:[#allocation36_spill] sm:$0xff] %v6751_v50  ;;  %v1353_v39 = vrot.slane %v1351_v29, 5  ;;  %v1362_v44 = vshrl.u32 %v6399_v49, 16 }
  0x99   : > { %v707_v31 = vpop.permute.xlu0 %706  ;;  %1099 = vrot.lane.b32.xlu1 %v6419_v56, %s6223_s15  ;;  %9772 = vst [vmem:[#allocation37_spill] sm:$0xff] %v6762_v20  ;;  %v1339_v22 = vrot.slane %v1337_v1, 5 }
  0x9a   : > { %729 = vst.msk [vmem:[#allocation3 + $0x8] sm:$0xf] %vm726_vm6, %v707_v31  ;;  %v1336_v31 = vrot.slane %v1334_v34, 4  ;;  %v1354_v38 = vor.u32 %v1353_v39, %v1350_v45  ;;  %v5692_v34 = vld [vmem:[%s6296_s14 + $0xf4] sm:$0x1]  ;;  %v1364_v1 = vrot.slane %v1362_v44, 4 }
  0x9b   : > { %1097 = vrot.lane.b32.xlu0 %v6435_v62, %s6223_s15  ;;  %v750_v53 = vpop.permute.xlu1 %749 }
  0x9c   : > { %771 = vst.msk [vmem:[#allocation3 + $0xc] sm:$0xf] %vm767_vm7, %v750_v53  ;;  %v1365_v53 = vshll.u32 %v6399_v49, 16  ;;  %v1340_v29 = vor.u32 %v1339_v22, %v1336_v31  ;;  %v1355_v45 = vrot.slane %v1354_v38, 4 }
  0x9d   : > { %v748_v19 = vpop.permute.xlu0 %747  ;;  %1239 = vrot.lane.b32.xlu1 %v6751_v50, %s6225_s17 }
  0x9e   : > { %770 = vst.msk [vmem:[#allocation3 + $0x8] sm:$0xf] %vm767_vm7, %v748_v19  ;;  %v1357_v19 = vshll.u32 %v5688_v13, 16  ;;  %v1341_v31 = vrot.slane %v1340_v29, 4 }
  0x9f   : > { %1237 = vrot.lane.b32.xlu0 %v1138_v16, %s6225_s17  ;;  %v787_v21 = vpop.permute.xlu1 %786 }
  0xa0   : > { %810 = vst.msk [vmem:[#allocation3 + $0x4] sm:$0xf] %vm808_vm8, %v787_v21  ;;  %v1378_v21 = vrot.slane %v1376_v43, 4  ;;  %v1359_v39 = vrot.slane %v1357_v19, 5 }
  0xa1   : > { %v785_v24 = vpop.permute.xlu0 %784  ;;  %1243 = vrot.lane.b32.xlu1 %v6762_v20, %s6225_s17 }
  0xa2   : > { %809 = vst.msk [vmem:[#allocation3] sm:$0xf] %vm808_vm8, %v785_v24  ;;  %v1381_v24 = vrot.slane %v1379_v9, 5  ;;  %v1385_v9 = vshll.u32 %v5692_v34, 16  ;;  %v6812_v38 = vsel %vm6371_vm3, %v1355_v45, %v1359_v39 }
  0xa3   : > { %1241 = vrot.lane.b32.xlu0 %v6766_v23, %s6225_s17  ;;  %v791_v33 = vpop.permute.xlu1 %790  ;;  %9774 = vst [vmem:[#allocation39_spill] sm:$0xff] %v6812_v38 }
  0xa4   : > { %812 = vst.msk [vmem:[#allocation3 + $0xc] sm:$0xf] %vm808_vm8, %v791_v33  ;;  %v1343_v33 = vshll.u32 %v5686_v27, 16  ;;  %v1382_v43 = vor.u32 %v1381_v24, %v1378_v21  ;;  %v1387_v21 = vrot.slane %v1385_v9, 5 }
  0xa5   : > { %v789_v40 = vpop.permute.xlu0 %788  ;;  %1271 = vrot.lane.b32.xlu1 %v6382_v42, %s6224_s16 }
  0xa6   : > { %811 = vst.msk [vmem:[#allocation3 + $0x8] sm:$0xf] %vm808_vm8, %v789_v40  ;;  %v1367_v40 = vrot.slane %v1365_v53, 5  ;;  %v1345_v22 = vrot.slane %v1343_v33, 5  ;;  %v1383_v19 = vrot.slane %v1382_v43, 4 }
  0xa7   : > { %1269 = vrot.lane.b32.xlu0 %v6387_v46, %s6224_s16  ;;  %v932_v11 = vpop.permute.xlu1 %931 }
  0xa8   : > { %955 = vst.msk [vmem:[#allocation3 + $0x4] sm:$0xf] %vm953_vm9, %v932_v11  ;;  %v1368_v44 = vor.u32 %v1367_v40, %v1364_v1  ;;  %v6826_v1 = vsel %vm6371_vm3, %v1383_v19, %v1387_v21 }
  0xa9   : > { %v930_v16 = vpop.permute.xlu0 %929  ;;  %1275 = vrot.lane.b32.xlu1 %v6390_v47, %s6224_s16  ;;  %9776 = vst [vmem:[#allocation41_spill] sm:$0xff] %v6826_v1 }
  0xaa   : > { %954 = vst.msk [vmem:[#allocation3] sm:$0xf] %vm953_vm9, %v930_v16  ;;  %v5690_v16 = vld [vmem:[%s6296_s14 + $0xec] sm:$0x1]  ;;  %v1369_v29 = vrot.slane %v1368_v44, 4 }
  0xab   : > { %1273 = vrot.lane.b32.xlu0 %v6399_v49, %s6224_s16  ;;  %v936_v28 = vpop.permute.xlu1 %935  ;;  %v1371_v53 = vshll.u32 %v5690_v16, 16 }
  0xac   : > { %957 = vst.msk [vmem:[#allocation3 + $0xc] sm:$0xf] %vm953_vm9, %v936_v28  ;;  %v6816_v28 = vsel %vm6371_vm3, %v1341_v31, %v1345_v22  ;;  %v1185_v31 = vshll.u32 %v6427_v61, 16 }
  0xad   : > { %v934_v11 = vpop.permute.xlu0 %933  ;;  %1303 = vrot.lane.b32.xlu1 %v6531_v63, %s6226_s18  ;;  %9775 = vst [vmem:[#allocation40_spill] sm:$0xff] %v6816_v28  ;;  %v1373_v33 = vrot.slane %v1371_v53, 5  ;;  %v5658_v53 = vld [vmem:[%s6296_s14 + $0x6c] sm:$0x1] }
  0xae   : > { %956 = vst.msk [vmem:[#allocation3 + $0x8] sm:$0xf] %vm953_vm9, %v934_v11  ;;  %v1187_v19 = vrot.slane %v1185_v31, 5  ;;  %v5660_v31 = vld [vmem:[%s6296_s14 + $0x74] sm:$0x1] }
  0xaf   : > { %1301 = vrot.lane.b32.xlu0 %v6537_v10, %s6226_s18  ;;  %v973_v13 = vpop.permute.xlu1 %972  ;;  %v6830_v11 = vsel %vm6371_vm3, %v1369_v29, %v1373_v33  ;;  %v1191_v33 = vshll.u32 %v5658_v53, 16  ;;  %v1227_v53 = vshll.u32 %v6448_v12, 16 }
  0xb0   : > { %996 = vst.msk [vmem:[#allocation3 + $0x4] sm:$0xf] %vm994_vm10, %v973_v13  ;;  %9777 = vst [vmem:[#allocation42_spill] sm:$0xff] %v6830_v11  ;;  %v1182_v13 = vshrl.u32 %v6427_v61, 16 }
  0xb1   : > { %v971_v27 = vpop.permute.xlu0 %970  ;;  %1307 = vrot.lane.b32.xlu1 %v6545_v14, %s6226_s18 }
  0xb2   : > { %995 = vst.msk [vmem:[#allocation3] sm:$0xf] %vm994_vm10, %v971_v27  ;;  %v1184_v27 = vrot.slane %v1182_v13, 4 }
  0xb3   : > { %1305 = vrot.lane.b32.xlu0 %v6549_v18, %s6226_s18  ;;  %v977_v24 = vpop.permute.xlu1 %976 }
  0xb4   : > { %998 = vst.msk [vmem:[#allocation3 + $0xc] sm:$0xf] %vm994_vm10, %v977_v24 }
  0xb5   : > { %v975_v34 = vpop.permute.xlu0 %974  ;;  %1447 = vrot.lane.b32.xlu1 %v6812_v38, %s6227_s19 }
  0xb6   : > { %997 = vst.msk [vmem:[#allocation3 + $0x8] sm:$0xf] %vm994_vm10, %v975_v34  ;;  %v1196_v34 = vshrl.u32 %v6439_v7, 16 }
  0xb7   : > { %1445 = vrot.lane.b32.xlu0 %v6816_v28, %s6227_s19  ;;  %v1007_v40 = vpop.permute.xlu1 %1006 }
  0xb8   : > { %1030 = vst.msk [vmem:[#allocation3 + $0x4] sm:$0xf] %vm1028_vm11, %v1007_v40  ;;  %v1188_v40 = vor.u32 %v1187_v19, %v1184_v27  ;;  %v1210_v19 = vshrl.u32 %v6453_v15, 16 }
  0xb9   : > { %v1005_v16 = vpop.permute.xlu0 %1004  ;;  %1451 = vrot.lane.b32.xlu1 %v6826_v1, %s6227_s19  ;;  %v5700_v1 = vld [vmem:[%s6296_s14 + $0x114] sm:$0x1] }
  0xba   : > { %1029 = vst.msk [vmem:[#allocation3] sm:$0xf] %vm1028_vm11, %v1005_v16  ;;  %v1199_v16 = vshll.u32 %v6439_v7, 16  ;;  %v1189_v13 = vrot.slane %v1188_v40, 4 }
  0xbb   : > { %1449 = vrot.lane.b32.xlu0 %v6830_v11, %s6227_s19  ;;  %v1011_v45 = vpop.permute.xlu1 %1010 }
  0xbc   : > { %1032 = vst.msk [vmem:[#allocation3 + $0xc] sm:$0xf] %vm1028_vm11, %v1011_v45 }
  0xbd   : > { %v1009_v39 = vpop.permute.xlu0 %1008  ;;  %1479 = vrot.lane.b32.xlu1 %v6299_v0, %s6228_s20 }
  0xbe   : > { %1031 = vst.msk [vmem:[#allocation3 + $0x8] sm:$0xf] %vm1028_vm11, %v1009_v39 }
  0xbf   : > { %1477 = vrot.lane.b32.xlu0 %v6312_v3, %s6228_s20  ;;  %v1054_v43 = vpop.permute.xlu1 %1053 }
  0xc0   : > { %1077 = vst.msk [vmem:[#allocation3 + $0x4] sm:$0xf] %vm1075_vm12, %v1054_v43  ;;  %v1193_v43 = vrot.slane %v1191_v33, 5  ;;  %v1205_v33 = vshll.u32 %v5660_v31, 16  ;;  %v5662_v31 = vld [vmem:[%s6296_s14 + $0x7c] sm:$0x1] }
  0xc1   : > { %v1052_v9 = vpop.permute.xlu0 %1051  ;;  %1483 = vrot.lane.b32.xlu1 %v6427_v61, %s6228_s20 }
  0xc2   : > { %1076 = vst.msk [vmem:[#allocation3] sm:$0xf] %vm1075_vm12, %v1052_v9  ;;  %v1198_v9 = vrot.slane %v1196_v34, 4  ;;  %v6888_v34 = vsel %vm6371_vm3, %v1189_v13, %v1193_v43 }
  0xc3   : > { %1481 = vrot.lane.b32.xlu0 %v6305_v2, %s6228_s20  ;;  %v565_v22 = vpop.permute.xlu1 %564  ;;  %9778 = vst [vmem:[#allocation43_spill] sm:$0xff] %v6888_v34 }
  0xc4   : > { %584 = vst.msk [vmem:[#allocation3 + $0x14] sm:$0xf] %vm578_vm5, %v565_v22  ;;  %v1201_v22 = vrot.slane %v1199_v16, 5 }
  0xc5   : > { %v563_v44 = vpop.permute.xlu0 %562  ;;  %1511 = vrot.lane.b32.xlu1 %v6435_v62, %s6229_s21 }
  0xc6   : > { %583 = vst.msk [vmem:[#allocation3 + $0x10] sm:$0xf] %vm578_vm5, %v563_v44  ;;  %v1224_v44 = vshrl.u32 %v6448_v12, 16  ;;  %v1202_v40 = vor.u32 %v1201_v22, %v1198_v9  ;;  %v1207_v9 = vrot.slane %v1205_v33, 5 }
  0xc7   : > { %1509 = vrot.lane.b32.xlu0 %v6396_v48, %s6229_s21  ;;  %v1058_v21 = vpop.permute.xlu1 %1057 }
  0xc8   : > { %1079 = vst.msk [vmem:[#allocation3 + $0xc] sm:$0xf] %vm1075_vm12, %v1058_v21  ;;  %v1213_v21 = vshll.u32 %v6453_v15, 16  ;;  %v1226_v16 = vrot.slane %v1224_v44, 4  ;;  %v1203_v43 = vrot.slane %v1202_v40, 4 }
  0xc9   : > { %v1056_v24 = vpop.permute.xlu0 %1055  ;;  %v5975_v29 = vld [vmem:[#allocation3] sm:$0xff]   ;;  %1515 = vrot.lane.b32.xlu1 %v6594_v8, %s6229_s21 }
  0xca   : > { %1078 = vst.msk [vmem:[#allocation3 + $0x8] sm:$0xf] %vm1075_vm12, %v1056_v24  ;;  %5899 = vmatprep.mubr.msk.bf16.mxu0 %vm2286_vm13, %v5975_v29 }
  0xcb   : > { %1513 = vrot.lane.b32.xlu0 %v6419_v56, %s6229_s21  ;;  %v569_v45 = vpop.permute.xlu1 %568 }
  0xcc   : > { %586 = vst.msk [vmem:[#allocation3 + $0x1c] sm:$0xf] %vm578_vm5, %v569_v45  ;;  %v1229_v45 = vrot.slane %v1227_v53, 5 }
  0xcd   : > { %v567_v39 = vpop.permute.xlu0 %566  ;;  %1557 = vrot.lane.b32.xlu1 %v6766_v23, %s6230_s22 }
  0xce   : > { %585 = vst.msk [vmem:[#allocation3 + $0x18] sm:$0xf] %vm578_vm5, %v567_v39  ;;  %v1230_v13 = vor.u32 %v1229_v45, %v1226_v16 }
  0xcf   : > { %1555 = vrot.lane.b32.xlu0 %v6751_v50, %s6230_s22  ;;  %v713_v27 = vpop.permute.xlu1 %712  ;;  %v1212_v50 = vrot.slane %v1210_v19, 4  ;;  %v1219_v19 = vshll.u32 %v5662_v31, 16 }
  0xd0   : > { %732 = vst.msk [vmem:[#allocation3 + $0x14] sm:$0xf] %vm726_vm6, %v713_v27  ;;  %v5664_v27 = vld [vmem:[%s6296_s14 + $0x84] sm:$0x1] }
  0xd1   : > { %v711_v24 = vpop.permute.xlu0 %710  ;;  %v5977_v29 = vld [vmem:[#allocation3 + $0x8] sm:$0xff]   ;;  %1103 = vrot.lane.b32.xlu1 %v6617_v41, %s6223_s15  ;;  %v1233_v22 = vshll.u32 %v5664_v27, 16  ;;  %v1221_v16 = vrot.slane %v1219_v19, 5 }
  0xd2   : > { %731 = vst.msk [vmem:[#allocation3 + $0x10] sm:$0xf] %vm726_vm6, %v711_v24  ;;  %5900 = vmatmul.mubr.msk.bf16.vlgmr.msra.gmra.mxu0 %vm2286_vm13, %v5977_v29  ;;  %v1215_v24 = vrot.slane %v1213_v21, 5  ;;  %v1231_v29 = vrot.slane %v1230_v13, 4 }
  0xd3   : > { %1101 = vrot.lane.b32.xlu0 %v6594_v8, %s6223_s15  ;;  %v717_v39 = vpop.permute.xlu1 %716  ;;  %v1235_v33 = vrot.slane %v1233_v22, 5  ;;  %v1390_v22 = vshrl.u32 %v6509_v57, 16 }
  0xd4   : > { %734 = vst.msk [vmem:[#allocation3 + $0x1c] sm:$0xf] %vm726_vm6, %v717_v39  ;;  %v1216_v53 = vor.u32 %v1215_v24, %v1212_v50 }
  0xd5   : > { %v715_v23 = vpop.permute.xlu0 %714  ;;  %1561 = vrot.lane.b32.xlu1 %v6888_v34, %s6230_s22  ;;  %v6916_v39 = vsel %vm6371_vm3, %v1231_v29, %v1235_v33  ;;  %v1432_v29 = vshrl.u32 %v6516_v58, 16  ;;  %v1435_v33 = vshll.u32 %v6516_v58, 16 }
  0xd6   : > { %733 = vst.msk [vmem:[#allocation3 + $0x18] sm:$0xf] %vm726_vm6, %v715_v23  ;;  %v6906_v23 = vsel %vm6371_vm3, %v1203_v43, %v1207_v9  ;;  %v1217_v50 = vrot.slane %v1216_v53, 4  ;;  %v1404_v43 = vshrl.u32 %v6504_v51, 16  ;;  %v1407_v9 = vshll.u32 %v6504_v51, 16 }
  0xd7   : > { %1559 = vrot.lane.b32.xlu0 %v6762_v20, %s6230_s22  ;;  %v754_v44 = vpop.permute.xlu1 %753 }
  0xd8   : > { %773 = vst.msk [vmem:[#allocation3 + $0x14] sm:$0xf] %vm767_vm7, %v754_v44  ;;  %v6920_v24 = vsel %vm6371_vm3, %v1217_v50, %v1221_v16  ;;  %v1393_v44 = vshll.u32 %v6509_v57, 16  ;;  %v1406_v19 = vrot.slane %v1404_v43, 4  ;;  %v5696_v50 = vld [vmem:[%s6296_s14 + $0x104] sm:$0x1] }
  0xd9   : > { %v752_v21 = vpop.permute.xlu0 %751  ;;  %1107 = vrot.lane.b32.xlu1 %v6625_v54, %s6223_s15  ;;  %v1392_v16 = vrot.slane %v1390_v22, 4  ;;  %v1434_v22 = vrot.slane %v1432_v29, 4 }
  0xda   : > { %772 = vst.msk [vmem:[#allocation3 + $0x10] sm:$0xf] %vm767_vm7, %v752_v21  ;;  %v1409_v21 = vrot.slane %v1407_v9, 5  ;;  %v1413_v9 = vshll.u32 %v5696_v50, 16 }
  0xdb   : > { %1105 = vrot.lane.b32.xlu0 %v6629_v55, %s6223_s15  ;;  %v758_v40 = vpop.permute.xlu1 %757 }
  0xdc   : > { %775 = vst.msk [vmem:[#allocation3 + $0x1c] sm:$0xf] %vm767_vm7, %v758_v40  ;;  %v1410_v43 = vor.u32 %v1409_v21, %v1406_v19  ;;  %v1415_v21 = vrot.slane %v1413_v9, 5 }
  0xdd   : > { %v756_v45 = vpop.permute.xlu0 %755  ;;  %1247 = vrot.lane.b32.xlu1 %v6906_v23, %s6225_s17 }
  0xde   : > { %774 = vst.msk [vmem:[#allocation3 + $0x18] sm:$0xf] %vm767_vm7, %v756_v45  ;;  %v1395_v45 = vrot.slane %v1393_v44, 5  ;;  %v1437_v44 = vrot.slane %v1435_v33, 5  ;;  %v1411_v19 = vrot.slane %v1410_v43, 4  ;;  %v1441_v33 = vshll.u32 %v5700_v1, 16 }
  0xdf   : > { %1245 = vrot.lane.b32.xlu0 %v6888_v34, %s6225_s17  ;;  %v795_v27 = vpop.permute.xlu1 %794 }
  0xe0   : > { %814 = vst.msk [vmem:[#allocation3 + $0x14] sm:$0xf] %vm808_vm8, %v795_v27  ;;  %v1418_v27 = vshrl.u32 %v6523_v59, 16  ;;  %v1396_v34 = vor.u32 %v1395_v45, %v1392_v16  ;;  %v1438_v29 = vor.u32 %v1437_v44, %v1434_v22 }
  0xe1   : > { %v793_v31 = vpop.permute.xlu0 %792  ;;  %1251 = vrot.lane.b32.xlu1 %v6916_v39, %s6225_s17 }
  0xe2   : > { %813 = vst.msk [vmem:[#allocation3 + $0x10] sm:$0xf] %vm808_vm8, %v793_v31  ;;  %v1421_v31 = vshll.u32 %v6523_v59, 16  ;;  %v1397_v16 = vrot.slane %v1396_v34, 4  ;;  %v1439_v1 = vrot.slane %v1438_v29, 4  ;;  %v1443_v34 = vrot.slane %v1441_v33, 5 }
  0xe3   : > { %1249 = vrot.lane.b32.xlu0 %v6920_v24, %s6225_s17  ;;  %v799_v13 = vpop.permute.xlu1 %798  ;;  %v1542_v29 = vshrl.u32 %v6701_v52, 16  ;;  %v1545_v33 = vshll.u32 %v6701_v52, 16 }
  0xe4   : > { %816 = vst.msk [vmem:[#allocation3 + $0x1c] sm:$0xf] %vm808_vm8, %v799_v13  ;;  %v1423_v28 = vrot.slane %v1421_v31, 5  ;;  %v6980_v22 = vsel %vm6371_vm3, %v1439_v1, %v1443_v34 }
  0xe5   : > { %v797_v53 = vpop.permute.xlu0 %796  ;;  %1279 = vrot.lane.b32.xlu1 %v6504_v51, %s6224_s16 }
  0xe6   : > { %815 = vst.msk [vmem:[#allocation3 + $0x18] sm:$0xf] %vm808_vm8, %v797_v53  ;;  %v5694_v53 = vld [vmem:[%s6296_s14 + $0xfc] sm:$0x1] }
  0xe7   : > { %1277 = vrot.lane.b32.xlu0 %v6509_v57, %s6224_s16  ;;  %v940_v40 = vpop.permute.xlu1 %939  ;;  %v1399_v11 = vshll.u32 %v5694_v53, 16 }
  0xe8   : > { %959 = vst.msk [vmem:[#allocation3 + $0x14] sm:$0xf] %vm953_vm9, %v940_v40  ;;  %v1420_v40 = vrot.slane %v1418_v27, 4 }
  0xe9   : > { %v938_v13 = vpop.permute.xlu0 %937  ;;  %1283 = vrot.lane.b32.xlu1 %v6516_v58, %s6224_s16  ;;  %v1401_v45 = vrot.slane %v1399_v11, 5 }
  0xea   : > { %958 = vst.msk [vmem:[#allocation3 + $0x10] sm:$0xf] %vm953_vm9, %v938_v13  ;;  %v5698_v13 = vld [vmem:[%s6296_s14 + $0x10c] sm:$0x1]  ;;  %v1424_v27 = vor.u32 %v1423_v28, %v1420_v40 }
  0xeb   : > { %1281 = vrot.lane.b32.xlu0 %v6523_v59, %s6224_s16  ;;  %v944_v20 = vpop.permute.xlu1 %943  ;;  %v1427_v31 = vshll.u32 %v5698_v13, 16  ;;  %v6970_v28 = vsel %vm6371_vm3, %v1397_v16, %v1401_v45  ;;  %v1544_v45 = vrot.slane %v1542_v29, 4 }
  0xec   : > { %961 = vst.msk [vmem:[#allocation3 + $0x1c] sm:$0xf] %vm953_vm9, %v944_v20  ;;  %v1425_v53 = vrot.slane %v1424_v27, 4  ;;  %v1547_v27 = vrot.slane %v1545_v33, 5 }
  0xed   : > { %v942_v38 = vpop.permute.xlu0 %941  ;;  %1311 = vrot.lane.b32.xlu1 %v6665_v25, %s6226_s18  ;;  %v1429_v43 = vrot.slane %v1427_v31, 5 }
  0xee   : > { %960 = vst.msk [vmem:[#allocation3 + $0x18] sm:$0xf] %vm953_vm9, %v942_v38  ;;  %v6966_v38 = vsel %vm6371_vm3, %v1411_v19, %v1415_v21  ;;  %v1548_v34 = vor.u32 %v1547_v27, %v1544_v45  ;;  %v412_v45 = vld [vmem:[#allocation2 + $0x4] sm:$0x1]  ;;  %v444_v27 = vld [vmem:[#allocation2 + $0x4c] sm:$0x1] }
  0xef   : > { %1309 = vrot.lane.b32.xlu0 %v6669_v30, %s6226_s18  ;;  %v981_v50 = vpop.permute.xlu1 %980  ;;  %v6984_v40 = vsel %vm6371_vm3, %v1425_v53, %v1429_v43 }
  0xf0   : > { %1000 = vst.msk [vmem:[#allocation3 + $0x14] sm:$0xf] %vm994_vm10, %v981_v50 }
  0xf1   : > { %v979_v20 = vpop.permute.xlu0 %978  ;;  %1315 = vrot.lane.b32.xlu1 %v6677_v35, %s6226_s18 }
  0xf2   : > { %999 = vst.msk [vmem:[#allocation3 + $0x10] sm:$0xf] %vm994_vm10, %v979_v20  ;;  %v5666_v20 = vld [vmem:[%s6296_s14 + $0x8c] sm:$0x1] }
  0xf3   : > { %1313 = vrot.lane.b32.xlu0 %v6681_v5, %s6226_s18  ;;  %v985_v11 = vpop.permute.xlu1 %984 }
  0xf4   : > { %1002 = vst.msk [vmem:[#allocation3 + $0x1c] sm:$0xf] %vm994_vm10, %v985_v11 }
  0xf5   : > { %v983_v9 = vpop.permute.xlu0 %982  ;;  %1455 = vrot.lane.b32.xlu1 %v6966_v38, %s6227_s19 }
  0xf6   : > { %1001 = vst.msk [vmem:[#allocation3 + $0x18] sm:$0xf] %vm994_vm10, %v983_v9  ;;  %v1549_v9 = vrot.slane %v1548_v34, 4 }
  0xf7   : > { %1453 = vrot.lane.b32.xlu0 %v6970_v28, %s6227_s19  ;;  %v1015_v44 = vpop.permute.xlu1 %1014 }
  0xf8   : > { %1034 = vst.msk [vmem:[#allocation3 + $0x14] sm:$0xf] %vm1028_vm11, %v1015_v44 }
  0xf9   : > { %v1013_v13 = vpop.permute.xlu0 %1012  ;;  %1459 = vrot.lane.b32.xlu1 %v6980_v22, %s6227_s19 }
  0xfa   : > { %1033 = vst.msk [vmem:[#allocation3 + $0x10] sm:$0xf] %vm1028_vm11, %v1013_v13 }
  0xfb   : > { %1457 = vrot.lane.b32.xlu0 %v6984_v40, %s6227_s19  ;;  %v1019_v19 = vpop.permute.xlu1 %1018 }
  0xfc   : > { %1036 = vst.msk [vmem:[#allocation3 + $0x1c] sm:$0xf] %vm1028_vm11, %v1019_v19 }
  0xfd   : > { %v1017_v21 = vpop.permute.xlu0 %1016  ;;  %1487 = vrot.lane.b32.xlu1 %v6453_v15, %s6228_s20 }
  0xfe   : > { %1035 = vst.msk [vmem:[#allocation3 + $0x18] sm:$0xf] %vm1028_vm11, %v1017_v21 }
  0xff   : > { %1485 = vrot.lane.b32.xlu0 %v6439_v7, %s6228_s20  ;;  %v1062_v50 = vpop.permute.xlu1 %1061 }
 0x100   : > { %1081 = vst.msk [vmem:[#allocation3 + $0x14] sm:$0xf] %vm1075_vm12, %v1062_v50 }
 0x101   : > { %v1060_v16 = vpop.permute.xlu0 %1059  ;;  %1491 = vrot.lane.b32.xlu1 %v6701_v52, %s6228_s20  ;;  %v1551_v52 = vshll.u32 %v5666_v20, 16 }
 0x102   : > { %1080 = vst.msk [vmem:[#allocation3 + $0x10] sm:$0xf] %vm1075_vm12, %v1060_v16  ;;  %v424_v16 = vld [vmem:[#allocation2 + $0x18] sm:$0x1] }
 0x103   : > { %1489 = vrot.lane.b32.xlu0 %v6448_v12, %s6228_s20  ;;  %v1066_v31 = vpop.permute.xlu1 %1065  ;;  %v1553_v44 = vrot.slane %v1551_v52, 5  ;;  %v425_v34 = vsel %vm7037_vm1, 0, %v424_v16  ;;  %v413_v52 = vsel %vm7037_vm1, 0, %v412_v45 }
 0x104   : > { %1083 = vst.msk [vmem:[#allocation3 + $0x1c] sm:$0xf] %vm1075_vm12, %v1066_v31  ;;  %426 = vst [vmem:[#allocation2 + $0x18] sm:$0x1] %v425_v34 }
 0x105   : > { %v1064_v1 = vpop.permute.xlu0 %1063  ;;  %1519 = vrot.lane.b32.xlu1 %v6629_v55, %s6229_s21  ;;  %v7029_v29 = vsel %vm6371_vm3, %v1549_v9, %v1553_v44  ;;  %414 = vst [vmem:[#allocation2 + $0x4] sm:$0x1] %v413_v52  ;;  %v427_v44 = vld [vmem:[#allocation2 + $0x20] sm:$0x1] }
 0x106   : > { %1082 = vst.msk [vmem:[#allocation3 + $0x18] sm:$0xf] %vm1075_vm12, %v1064_v1 }
 0x107   : > { %1517 = vrot.lane.b32.xlu0 %v6617_v41, %s6229_s21  ;;  %v1096_v11 = vpop.permute.xlu1 %1095 }
 0x108   : > { %1118 = vst.msk [vmem:[#allocation3 + $0x24] sm:$0xf] %vm578_vm5, %v1096_v11  ;;  %v445_v11 = vsel %vm7037_vm1, 0, %v444_v27 }
 0x109   : > { %v1094_v53 = vpop.permute.xlu0 %1093  ;;  %v5978_v43 = vld [vmem:[#allocation3 + $0x10] sm:$0xff]   ;;  %1523 = vrot.lane.b32.xlu1 %v6721_v36, %s6229_s21  ;;  %446 = vst [vmem:[#allocation2 + $0x4c] sm:$0x1] %v445_v11 }
 0x10a   : > { %1117 = vst.msk [vmem:[#allocation3 + $0x20] sm:$0xf] %vm578_vm5, %v1094_v53  ;;  %5903 = vmatprep.mubr.msk.bf16.mxu0 %vm2286_vm13, %v5978_v43  ;;  %v418_v53 = vld [vmem:[#allocation2 + $0x8] sm:$0x1] }
 0x10b   : > { %1521 = vrot.lane.b32.xlu0 %v6625_v54, %s6229_s21  ;;  %v1100_v13 = vpop.permute.xlu1 %1099  ;;  %v419_v9 = vsel %vm7037_vm1, 0, %v418_v53 }
 0x10c   : > { %1120 = vst.msk [vmem:[#allocation3 + $0x2c] sm:$0xf] %vm578_vm5, %v1100_v13  ;;  %420 = vst [vmem:[#allocation2 + $0x8] sm:$0x1] %v419_v9 }
 0x10d   : > { %v1098_v19 = vpop.permute.xlu0 %1097  ;;  %v5979_v21 = vld [vmem:[#allocation3 + $0x18] sm:$0xff]   ;;  %1565 = vrot.lane.b32.xlu1 %v6920_v24, %s6230_s22 }
 0x10e   : > { %1119 = vst.msk [vmem:[#allocation3 + $0x28] sm:$0xf] %vm578_vm5, %v1098_v19  ;;  %5904 = vmatmul.mubr.msk.bf16.gmra.mxu0 %vm2286_vm13, %v5979_v21  ;;  %v428_v19 = vsel %vm7037_vm1, 0, %v427_v44  ;;  %v421_v21 = vld [vmem:[#allocation2 + $0x10] sm:$0x1] }
 0x10f   : > { %1563 = vrot.lane.b32.xlu0 %v6906_v23, %s6230_s22  ;;  %v1240_v33 = vpop.permute.xlu1 %1239  ;;  %429 = vst [vmem:[#allocation2 + $0x20] sm:$0x1] %v428_v19 }
 0x110   : > { %1262 = vst.msk [vmem:[#allocation3 + $0x24] sm:$0xf] %vm726_vm6, %v1240_v33  ;;  %v422_v33 = vsel %vm7037_vm1, 0, %v421_v21 }
 0x111   : > { %v1238_v50 = vpop.permute.xlu0 %1237  ;;  %1569 = vrot.lane.b32.xlu1 %v7029_v29, %s6230_s22  ;;  %423 = vst [vmem:[#allocation2 + $0x10] sm:$0x1] %v422_v33 }
 0x112   : > { %1261 = vst.msk [vmem:[#allocation3 + $0x20] sm:$0xf] %vm726_vm6, %v1238_v50 }
 0x113   : > { %1567 = vrot.lane.b32.xlu0 %v6916_v39, %s6230_s22  ;;  %v1244_v31 = vpop.permute.xlu1 %1243 }
 0x114   : > { %1264 = vst.msk [vmem:[#allocation3 + $0x2c] sm:$0xf] %vm726_vm6, %v1244_v31 }
 0x115   : > { %v1242_v1 = vpop.permute.xlu0 %1241  ;;  %1598 = vrot.lane.b32.xlu1 %v6382_v42, %s6223_s15 }
 0x116   : > { %1263 = vst.msk [vmem:[#allocation3 + $0x28] sm:$0xf] %vm726_vm6, %v1242_v1 }
 0x117   : > { %1596 = vrot.lane.b32.xlu0 %v6387_v46, %s6223_s15  ;;  %v1272_v43 = vpop.permute.xlu1 %1271 }
 0x118   : > { %1294 = vst.msk [vmem:[#allocation3 + $0x24] sm:$0xf] %vm767_vm7, %v1272_v43 }
 0x119   : > { %v1270_v13 = vpop.permute.xlu0 %1269  ;;  %1602 = vrot.lane.b32.xlu1 %v6390_v47, %s6223_s15 }
 0x11a   : > { %1293 = vst.msk [vmem:[#allocation3 + $0x20] sm:$0xf] %vm767_vm7, %v1270_v13 }
 0x11b   : > { %1600 = vrot.lane.b32.xlu0 %v6399_v49, %s6223_s15  ;;  %v1276_v50 = vpop.permute.xlu1 %1275 }
 0x11c   : > { %1296 = vst.msk [vmem:[#allocation3 + $0x2c] sm:$0xf] %vm767_vm7, %v1276_v50 }
 0x11d   : > { %v1274_v16 = vpop.permute.xlu0 %1273  ;;  %1630 = vrot.lane.b32.xlu1 %v6531_v63, %s6225_s17 }
 0x11e   : > { %1295 = vst.msk [vmem:[#allocation3 + $0x28] sm:$0xf] %vm767_vm7, %v1274_v16 }
 0x11f   : > { %1628 = vrot.lane.b32.xlu0 %v6537_v10, %s6225_s17  ;;  %v1304_v45 = vpop.permute.xlu1 %1303 }
 0x120   : > { %1326 = vst.msk [vmem:[#allocation3 + $0x24] sm:$0xf] %vm808_vm8, %v1304_v45 }
 0x121   : > { %v1302_v27 = vpop.permute.xlu0 %1301  ;;  %1634 = vrot.lane.b32.xlu1 %v6545_v14, %s6225_s17 }
 0x122   : > { %1325 = vst.msk [vmem:[#allocation3 + $0x20] sm:$0xf] %vm808_vm8, %v1302_v27  ;;  %v9781_v27 = vld [vmem:[#allocation29_spill] sm:$0xff] }
 0x123   : > { %1632 = vrot.lane.b32.xlu0 %v6549_v18, %s6225_s17  ;;  %v1308_v31 = vpop.permute.xlu1 %1307 }
 0x124   : > { %1328 = vst.msk [vmem:[#allocation3 + $0x2c] sm:$0xf] %vm808_vm8, %v1308_v31  ;;  %v9782_v31 = vld [vmem:[#allocation13_spill] sm:$0xff] }
 0x125   : > { %v1306_v1 = vpop.permute.xlu0 %1305  ;;  %1662 = vrot.lane.b32.xlu1 %v6356_v26, %s6224_s16 }
 0x126   : > { %1327 = vst.msk [vmem:[#allocation3 + $0x28] sm:$0xf] %vm808_vm8, %v1306_v1 }
 0x127   : > { %1660 = vrot.lane.b32.xlu0 %v6327_v6, %s6224_s16  ;;  %v1448_v34 = vpop.permute.xlu1 %1447 }
 0x128   : > { %1470 = vst.msk [vmem:[#allocation3 + $0x24] sm:$0xf] %vm953_vm9, %v1448_v34 }
 0x129   : > { %v1446_v52 = vpop.permute.xlu0 %1445  ;;  %1666 = vrot.lane.b32.xlu1 %v6424_v60, %s6224_s16 }
 0x12a   : > { %1469 = vst.msk [vmem:[#allocation3 + $0x20] sm:$0xf] %vm953_vm9, %v1446_v52 }
 0x12b   : > { %1664 = vrot.lane.b32.xlu0 %v6348_v17, %s6224_s16  ;;  %v1452_v11 = vpop.permute.xlu1 %1451 }
 0x12c   : > { %1472 = vst.msk [vmem:[#allocation3 + $0x2c] sm:$0xf] %vm953_vm9, %v1452_v11 }
 0x12d   : > { %v1450_v53 = vpop.permute.xlu0 %1449  ;;  %1694 = vrot.lane.b32.xlu1 %v6299_v0, %s6226_s18 }
 0x12e   : > { %1471 = vst.msk [vmem:[#allocation3 + $0x28] sm:$0xf] %vm953_vm9, %v1450_v53 }
 0x12f   : > { %1692 = vrot.lane.b32.xlu0 %v6312_v3, %s6226_s18  ;;  %v1480_v43 = vpop.permute.xlu1 %1479 }
 0x130   : > { %1502 = vst.msk [vmem:[#allocation3 + $0x24] sm:$0xf] %vm994_vm10, %v1480_v43 }
 0x131   : > { %v1478_v9 = vpop.permute.xlu0 %1477  ;;  %1698 = vrot.lane.b32.xlu1 %v6427_v61, %s6226_s18 }
 0x132   : > { %1501 = vst.msk [vmem:[#allocation3 + $0x20] sm:$0xf] %vm994_vm10, %v1478_v9 }
 0x133   : > { %1696 = vrot.lane.b32.xlu0 %v6305_v2, %s6226_s18  ;;  %v1484_v44 = vpop.permute.xlu1 %1483 }
 0x134   : > { %1504 = vst.msk [vmem:[#allocation3 + $0x2c] sm:$0xf] %vm994_vm10, %v1484_v44  ;;  %v436_v44 = vld [vmem:[#allocation2 + $0x38] sm:$0x1] }
 0x135   : > { %v1482_v13 = vpop.permute.xlu0 %1481  ;;  %1726 = vrot.lane.b32.xlu1 %v6435_v62, %s6227_s19 }
 0x136   : > { %1503 = vst.msk [vmem:[#allocation3 + $0x28] sm:$0xf] %vm994_vm10, %v1482_v13 }
 0x137   : > { %1724 = vrot.lane.b32.xlu0 %v6396_v48, %s6227_s19  ;;  %v1512_v19 = vpop.permute.xlu1 %1511 }
 0x138   : > { %1534 = vst.msk [vmem:[#allocation3 + $0x24] sm:$0xf] %vm1028_vm11, %v1512_v19  ;;  %v437_v19 = vsel %vm7037_vm1, 0, %v436_v44 }
 0x139   : > { %v1510_v21 = vpop.permute.xlu0 %1509  ;;  %1730 = vrot.lane.b32.xlu1 %v6594_v8, %s6227_s19  ;;  %438 = vst [vmem:[#allocation2 + $0x38] sm:$0x1] %v437_v19 }
 0x13a   : > { %1533 = vst.msk [vmem:[#allocation3 + $0x20] sm:$0xf] %vm1028_vm11, %v1510_v21 }
 0x13b   : > { %1728 = vrot.lane.b32.xlu0 %v6419_v56, %s6227_s19  ;;  %v1516_v33 = vpop.permute.xlu1 %1515 }
 0x13c   : > { %1536 = vst.msk [vmem:[#allocation3 + $0x2c] sm:$0xf] %vm1028_vm11, %v1516_v33 }
 0x13d   : > { %v1514_v50 = vpop.permute.xlu0 %1513  ;;  %1759 = vrot.lane.b32.xlu1 %v6377_v37, %s6228_s20 }
 0x13e   : > { %1535 = vst.msk [vmem:[#allocation3 + $0x28] sm:$0xf] %vm1028_vm11, %v1514_v50  ;;  %v430_v50 = vld [vmem:[#allocation2 + $0x28] sm:$0x1] }
 0x13f   : > { %1757 = vrot.lane.b32.xlu0 %v6315_v4, %s6228_s20  ;;  %v1558_v16 = vpop.permute.xlu1 %1557 }
 0x140   : > { %1580 = vst.msk [vmem:[#allocation3 + $0x24] sm:$0xf] %vm1075_vm12, %v1558_v16  ;;  %v431_v16 = vsel %vm7037_vm1, 0, %v430_v50 }
 0x141   : > { %v1556_v45 = vpop.permute.xlu0 %1555  ;;  %1763 = vrot.lane.b32.xlu1 %v9781_v27, %s6228_s20  ;;  %432 = vst [vmem:[#allocation2 + $0x28] sm:$0x1] %v431_v16  ;;  %v9783_v16 = vld [vmem:[#allocation27_spill] sm:$0xff] }
 0x142   : > { %1579 = vst.msk [vmem:[#allocation3 + $0x20] sm:$0xf] %vm1075_vm12, %v1556_v45 }
 0x143   : > { %1761 = vrot.lane.b32.xlu0 %v9782_v31, %s6228_s20  ;;  %v1104_v1 = vpop.permute.xlu1 %1103 }
 0x144   : > { %1122 = vst.msk [vmem:[#allocation3 + $0x34] sm:$0xf] %vm578_vm5, %v1104_v1 }
 0x145   : > { %v1102_v34 = vpop.permute.xlu0 %1101  ;;  %1792 = vrot.lane.b32.xlu1 %v6399_v49, %s6229_s21 }
 0x146   : > { %1121 = vst.msk [vmem:[#allocation3 + $0x30] sm:$0xf] %vm578_vm5, %v1102_v34  ;;  %v439_v34 = vld [vmem:[#allocation2 + $0x40] sm:$0x1] }
 0x147   : > { %1790 = vrot.lane.b32.xlu0 %v6382_v42, %s6229_s21  ;;  %v1562_v52 = vpop.permute.xlu1 %1561 }
 0x148   : > { %1582 = vst.msk [vmem:[#allocation3 + $0x2c] sm:$0xf] %vm1075_vm12, %v1562_v52  ;;  %v440_v52 = vsel %vm7037_vm1, 0, %v439_v34 }
 0x149   : > { %v1560_v11 = vpop.permute.xlu0 %1559  ;;  %v5980_v53 = vld [vmem:[#allocation3 + $0x20] sm:$0xff]   ;;  %1796 = vrot.lane.b32.xlu1 %v6509_v57, %s6229_s21  ;;  %441 = vst [vmem:[#allocation2 + $0x40] sm:$0x1] %v440_v52 }
 0x14a   : > { %1581 = vst.msk [vmem:[#allocation3 + $0x28] sm:$0xf] %vm1075_vm12, %v1560_v11  ;;  %5907 = vmatprep.mubr.msk.bf16.mxu0 %vm2286_vm13, %v5980_v53  ;;  %v433_v11 = vld [vmem:[#allocation2 + $0x30] sm:$0x1]  ;;  %v6195_v52 = vld [vmem:[%s6296_s14 + $0x40] sm:$0xf] }
 0x14b   : > { %1794 = vrot.lane.b32.xlu0 %v6390_v47, %s6229_s21  ;;  %v1108_v43 = vpop.permute.xlu1 %1107  ;;  %v434_v53 = vsel %vm7037_vm1, 0, %v433_v11  ;;  %v9785_v11 = vld [vmem:[#allocation26_spill] sm:$0xff] }
 0x14c   : > { %1124 = vst.msk [vmem:[#allocation3 + $0x3c] sm:$0xf] %vm578_vm5, %v1108_v43  ;;  %435 = vst [vmem:[#allocation2 + $0x30] sm:$0x1] %v434_v53 }
 0x14d   : > { %v1106_v9 = vpop.permute.xlu0 %1105  ;;  %1838 = vrot.lane.b32.xlu1 %v6549_v18, %s6230_s22 }
 0x14e   : > { %1123 = vst.msk [vmem:[#allocation3 + $0x38] sm:$0xf] %vm578_vm5, %v1106_v9 }
 0x14f   : > { %1836 = vrot.lane.b32.xlu0 %v6531_v63, %s6230_s22  ;;  %v1248_v13 = vpop.permute.xlu1 %1247 }
 0x150   : > { %1266 = vst.msk [vmem:[#allocation3 + $0x34] sm:$0xf] %vm726_vm6, %v1248_v13 }
 0x151   : > { %v1246_v21 = vpop.permute.xlu0 %1245  ;;  %v5981_v33 = vld [vmem:[#allocation3 + $0x28] sm:$0xff]   ;;  %1606 = vrot.lane.b32.xlu1 %v6504_v51, %s6223_s15 }
 0x152   : > { %1265 = vst.msk [vmem:[#allocation3 + $0x30] sm:$0xf] %vm726_vm6, %v1246_v21  ;;  %5908 = vmatmul.mubr.msk.bf16.gmra.mxu0 %vm2286_vm13, %v5981_v33 }
 0x153   : > { %1604 = vrot.lane.b32.xlu0 %v6509_v57, %s6223_s15  ;;  %v1252_v45 = vpop.permute.xlu1 %1251 }
 0x154   : > { %1268 = vst.msk [vmem:[#allocation3 + $0x3c] sm:$0xf] %vm726_vm6, %v1252_v45  ;;  %v9784_v45 = vld [vmem:[#allocation25_spill] sm:$0xff] }
 0x155   : > { %v1250_v1 = vpop.permute.xlu0 %1249  ;;  %1842 = vrot.lane.b32.xlu1 %v6669_v30, %s6230_s22 }
 0x156   : > { %1267 = vst.msk [vmem:[#allocation3 + $0x38] sm:$0xf] %vm726_vm6, %v1250_v1 }
 0x157   : > { %1840 = vrot.lane.b32.xlu0 %v6545_v14, %s6230_s22  ;;  %v1280_v43 = vpop.permute.xlu1 %1279 }
 0x158   : > { %1298 = vst.msk [vmem:[#allocation3 + $0x34] sm:$0xf] %vm767_vm7, %v1280_v43 }
 0x159   : > { %v1278_v9 = vpop.permute.xlu0 %1277  ;;  %1610 = vrot.lane.b32.xlu1 %v6516_v58, %s6223_s15 }
 0x15a   : > { %1297 = vst.msk [vmem:[#allocation3 + $0x30] sm:$0xf] %vm767_vm7, %v1278_v9 }
 0x15b   : > { %1608 = vrot.lane.b32.xlu0 %v6523_v59, %s6223_s15  ;;  %v1284_v44 = vpop.permute.xlu1 %1283 }
 0x15c   : > { %1300 = vst.msk [vmem:[#allocation3 + $0x3c] sm:$0xf] %vm767_vm7, %v1284_v44 }
 0x15d   : > { %v1282_v13 = vpop.permute.xlu0 %1281  ;;  %1638 = vrot.lane.b32.xlu1 %v6665_v25, %s6225_s17 }
 0x15e   : > { %1299 = vst.msk [vmem:[#allocation3 + $0x38] sm:$0xf] %vm767_vm7, %v1282_v13  ;;  %v7204_v13 = vld [vmem:[%s6296_s14 + $0x88] sm:$0xf] }
 0x15f   : > { %1636 = vrot.lane.b32.xlu0 %v6669_v30, %s6225_s17  ;;  %v1312_v19 = vpop.permute.xlu1 %1311 }
 0x160   : > { %1330 = vst.msk [vmem:[#allocation3 + $0x34] sm:$0xf] %vm808_vm8, %v1312_v19 }
 0x161   : > { %v1310_v21 = vpop.permute.xlu0 %1309  ;;  %1642 = vrot.lane.b32.xlu1 %v6677_v35, %s6225_s17 }
 0x162   : > { %1329 = vst.msk [vmem:[#allocation3 + $0x30] sm:$0xf] %vm808_vm8, %v1310_v21 }
 0x163   : > { %1640 = vrot.lane.b32.xlu0 %v6681_v5, %s6225_s17  ;;  %v1316_v33 = vpop.permute.xlu1 %1315 }
 0x164   : > { %1332 = vst.msk [vmem:[#allocation3 + $0x3c] sm:$0xf] %vm808_vm8, %v1316_v33 }
 0x165   : > { %v1314_v50 = vpop.permute.xlu0 %1313  ;;  %1670 = vrot.lane.b32.xlu1 %v9783_v16, %s6224_s16 }
 0x166   : > { %1331 = vst.msk [vmem:[#allocation3 + $0x38] sm:$0xf] %vm808_vm8, %v1314_v50 }
 0x167   : > { %1668 = vrot.lane.b32.xlu0 %v9784_v45, %s6224_s16  ;;  %v1456_v1 = vpop.permute.xlu1 %1455 }
 0x168   : > { %1474 = vst.msk [vmem:[#allocation3 + $0x34] sm:$0xf] %vm953_vm9, %v1456_v1 }
 0x169   : > { %v1454_v34 = vpop.permute.xlu0 %1453  ;;  %1674 = vrot.lane.b32.xlu1 %v6195_v52, %s6224_s16  ;;  %v9786_v52 = vld [vmem:[#allocation31_spill] sm:$0xff] }
 0x16a   : > { %1473 = vst.msk [vmem:[#allocation3 + $0x30] sm:$0xf] %vm953_vm9, %v1454_v34 }
 0x16b   : > { %1672 = vrot.lane.b32.xlu0 %v9785_v11, %s6224_s16  ;;  %v1460_v53 = vpop.permute.xlu1 %1459  ;;  %v5684_v11 = vld [vmem:[%s6296_s14 + $0xd4] sm:$0x1] }
 0x16c   : > { %1476 = vst.msk [vmem:[#allocation3 + $0x3c] sm:$0xf] %vm953_vm9, %v1460_v53  ;;  %v5683_v53 = vld [vmem:[%s6296_s14 + $0xd0] sm:$0xf] }
 0x16d   : > { %v1458_v43 = vpop.permute.xlu0 %1457  ;;  %1702 = vrot.lane.b32.xlu1 %v6453_v15, %s6226_s18 }
 0x16e   : > { %1475 = vst.msk [vmem:[#allocation3 + $0x38] sm:$0xf] %vm953_vm9, %v1458_v43  ;;  %v9787_v43 = vld [vmem:[#allocation28_spill] sm:$0xff] }
 0x16f   : > { %1700 = vrot.lane.b32.xlu0 %v6439_v7, %s6226_s18  ;;  %v1488_v9 = vpop.permute.xlu1 %1487 }
 0x170   : > { %1506 = vst.msk [vmem:[#allocation3 + $0x34] sm:$0xf] %vm994_vm10, %v1488_v9  ;;  %v1823_v9 = vshrl.u32 %v5683_v53, 16 }
 0x171   : > { %v1486_v44 = vpop.permute.xlu0 %1485  ;;  %1706 = vrot.lane.b32.xlu1 %v7204_v13, %s6226_s18 }
 0x172   : > { %1505 = vst.msk [vmem:[#allocation3 + $0x30] sm:$0xf] %vm994_vm10, %v1486_v44  ;;  %v1826_v44 = vshll.u32 %v5683_v53, 16 }
 0x173   : > { %1704 = vrot.lane.b32.xlu0 %v6448_v12, %s6226_s18  ;;  %v1492_v19 = vpop.permute.xlu1 %1491 }
 0x174   : > { %1508 = vst.msk [vmem:[#allocation3 + $0x3c] sm:$0xf] %vm994_vm10, %v1492_v19 }
 0x175   : > { %v1490_v21 = vpop.permute.xlu0 %1489  ;;  %1734 = vrot.lane.b32.xlu1 %v6629_v55, %s6227_s19 }
 0x176   : > { %1507 = vst.msk [vmem:[#allocation3 + $0x38] sm:$0xf] %vm994_vm10, %v1490_v21 }
 0x177   : > { %1732 = vrot.lane.b32.xlu0 %v6617_v41, %s6227_s19  ;;  %v1520_v33 = vpop.permute.xlu1 %1519 }
 0x178   : > { %1538 = vst.msk [vmem:[#allocation3 + $0x34] sm:$0xf] %vm1028_vm11, %v1520_v33  ;;  %v1825_v33 = vrot.slane %v1823_v9, 4  ;;  %v1832_v9 = vshll.u32 %v5684_v11, 16 }
 0x179   : > { %v1518_v50 = vpop.permute.xlu0 %1517  ;;  %1738 = vrot.lane.b32.xlu1 %v6721_v36, %s6227_s19 }
 0x17a   : > { %1537 = vst.msk [vmem:[#allocation3 + $0x30] sm:$0xf] %vm1028_vm11, %v1518_v50  ;;  %v1828_v50 = vrot.slane %v1826_v44, 5 }
 0x17b   : > { %1736 = vrot.lane.b32.xlu0 %v6625_v54, %s6227_s19  ;;  %v1524_v1 = vpop.permute.xlu1 %1523 }
 0x17c   : > { %1540 = vst.msk [vmem:[#allocation3 + $0x3c] sm:$0xf] %vm1028_vm11, %v1524_v1  ;;  %v9788_v1 = vld [vmem:[#allocation30_spill] sm:$0xff] }
 0x17d   : > { %v1522_v34 = vpop.permute.xlu0 %1521  ;;  %1767 = vrot.lane.b32.xlu1 %v9786_v52, %s6228_s20 }
 0x17e   : > { %1539 = vst.msk [vmem:[#allocation3 + $0x38] sm:$0xf] %vm1028_vm11, %v1522_v34 }
 0x17f   : > { %1765 = vrot.lane.b32.xlu0 %v9787_v43, %s6228_s20  ;;  %v1566_v19 = vpop.permute.xlu1 %1565 }
 0x180   : > { %1584 = vst.msk [vmem:[#allocation3 + $0x34] sm:$0xf] %vm1075_vm12, %v1566_v19  ;;  %v1829_v19 = vor.u32 %v1828_v50, %v1825_v33  ;;  %v1834_v33 = vrot.slane %v1832_v9, 5 }
 0x181   : > { %v1564_v21 = vpop.permute.xlu0 %1563  ;;  %1771 = vrot.lane.b32.xlu1 %v5683_v53, %s6228_s20  ;;  %v7242_v53 = vld [vmem:[%s6296_s14 + $0x118] sm:$0xf] }
 0x182   : > { %1583 = vst.msk [vmem:[#allocation3 + $0x30] sm:$0xf] %vm1075_vm12, %v1564_v21 }
 0x183   : > { %1769 = vrot.lane.b32.xlu0 %v9788_v1, %s6228_s20  ;;  %v1570_v34 = vpop.permute.xlu1 %1569 }
 0x184   : > { %1586 = vst.msk [vmem:[#allocation3 + $0x3c] sm:$0xf] %vm1075_vm12, %v1570_v34 }
 0x185   : > { %v1568_v52 = vpop.permute.xlu0 %1567  ;;  %1800 = vrot.lane.b32.xlu1 %v6523_v59, %s6229_s21 }
 0x186   : > { %1585 = vst.msk [vmem:[#allocation3 + $0x38] sm:$0xf] %vm1075_vm12, %v1568_v52  ;;  %v1830_v52 = vrot.slane %v1829_v19, 4 }
 0x187   : > { %1798 = vrot.lane.b32.xlu0 %v6504_v51, %s6229_s21  ;;  %v1599_v44 = vpop.permute.xlu1 %1598 }
 0x188   : > { %1621 = vst.msk [vmem:[#allocation3 + $0x44] sm:$0xf] %vm578_vm5, %v1599_v44  ;;  %v456_v44 = vld [vmem:[#allocation2 + $0x60] sm:$0x1] }
 0x189   : > { %v1597_v21 = vpop.permute.xlu0 %1596  ;;  %v5982_v1 = vld [vmem:[#allocation3 + $0x30] sm:$0xff]   ;;  %1804 = vrot.lane.b32.xlu1 %v7242_v53, %s6229_s21 }
 0x18a   : > { %1620 = vst.msk [vmem:[#allocation3 + $0x40] sm:$0xf] %vm578_vm5, %v1597_v21  ;;  %5911 = vmatprep.mubr.msk.bf16.mxu0 %vm2286_vm13, %v5982_v1  ;;  %v7260_v1 = vsel %vm6371_vm3, %v1830_v52, %v1834_v33  ;;  %v450_v33 = vld [vmem:[#allocation2 + $0x50] sm:$0x1] }
 0x18b   : > { %1802 = vrot.lane.b32.xlu0 %v6516_v58, %s6229_s21  ;;  %v1603_v50 = vpop.permute.xlu1 %1602 }
 0x18c   : > { %1623 = vst.msk [vmem:[#allocation3 + $0x4c] sm:$0xf] %vm578_vm5, %v1603_v50  ;;  %v457_v50 = vsel %vm7037_vm1, 0, %v456_v44 }
 0x18d   : > { %v1601_v11 = vpop.permute.xlu0 %1600  ;;  %v5983_v34 = vld [vmem:[#allocation3 + $0x38] sm:$0xff]   ;;  %1846 = vrot.lane.b32.xlu1 %v6681_v5, %s6230_s22  ;;  %458 = vst [vmem:[#allocation2 + $0x60] sm:$0x1] %v457_v50 }
 0x18e   : > { %1622 = vst.msk [vmem:[#allocation3 + $0x48] sm:$0xf] %vm578_vm5, %v1601_v11  ;;  %5912 = vmatmul.mubr.msk.bf16.gmra.mxu0 %vm2286_vm13, %v5983_v34  ;;  %v451_v11 = vsel %vm7037_vm1, 0, %v450_v33  ;;  %v9789_v33 = vld [vmem:[#allocation39_spill] sm:$0xff] }
 0x18f   : > { %1844 = vrot.lane.b32.xlu0 %v6665_v25, %s6230_s22  ;;  %v1631_v19 = vpop.permute.xlu1 %1630  ;;  %452 = vst [vmem:[#allocation2 + $0x50] sm:$0x1] %v451_v11  ;;  %v9790_v11 = vld [vmem:[#allocation40_spill] sm:$0xff] }
 0x190   : > { %1653 = vst.msk [vmem:[#allocation3 + $0x44] sm:$0xf] %vm726_vm6, %v1631_v19 }
 0x191   : > { %v1629_v9 = vpop.permute.xlu0 %1628  ;;  %1850 = vrot.lane.b32.xlu1 %v7260_v1, %s6230_s22 }
 0x192   : > { %1652 = vst.msk [vmem:[#allocation3 + $0x40] sm:$0xf] %vm726_vm6, %v1629_v9  ;;  %v459_v9 = vld [vmem:[#allocation2 + $0x68] sm:$0x1] }
 0x193   : > { %1848 = vrot.lane.b32.xlu0 %v6677_v35, %s6230_s22  ;;  %v1635_v21 = vpop.permute.xlu1 %1634  ;;  %v460_v44 = vsel %vm7037_vm1, 0, %v459_v9  ;;  %v9791_v9 = vld [vmem:[#allocation41_spill] sm:$0xff] }
 0x194   : > { %1655 = vst.msk [vmem:[#allocation3 + $0x4c] sm:$0xf] %vm726_vm6, %v1635_v21  ;;  %v453_v21 = vld [vmem:[#allocation2 + $0x58] sm:$0x1]  ;;  %461 = vst [vmem:[#allocation2 + $0x68] sm:$0x1] %v460_v44 }
 0x195   : > { %v1633_v52 = vpop.permute.xlu0 %1632  ;;  %1879 = vrot.lane.b32.xlu1 %v6531_v63, %s6223_s15  ;;  %v9792_v44 = vld [vmem:[#allocation42_spill] sm:$0xff] }
 0x196   : > { %1654 = vst.msk [vmem:[#allocation3 + $0x48] sm:$0xf] %vm726_vm6, %v1633_v52 }
 0x197   : > { %1877 = vrot.lane.b32.xlu0 %v6537_v10, %s6223_s15  ;;  %v1663_v34 = vpop.permute.xlu1 %1662  ;;  %v454_v10 = vsel %vm7037_vm1, 0, %v453_v21 }
 0x198   : > { %1685 = vst.msk [vmem:[#allocation3 + $0x44] sm:$0xf] %vm767_vm7, %v1663_v34  ;;  %455 = vst [vmem:[#allocation2 + $0x58] sm:$0x1] %v454_v10 }
 0x199   : > { %v1661_v19 = vpop.permute.xlu0 %1660  ;;  %1883 = vrot.lane.b32.xlu1 %v6545_v14, %s6223_s15 }
 0x19a   : > { %1684 = vst.msk [vmem:[#allocation3 + $0x40] sm:$0xf] %vm767_vm7, %v1661_v19 }
 0x19b   : > { %1881 = vrot.lane.b32.xlu0 %v6549_v18, %s6223_s15  ;;  %v1667_v50 = vpop.permute.xlu1 %1666 }
 0x19c   : > { %1687 = vst.msk [vmem:[#allocation3 + $0x4c] sm:$0xf] %vm767_vm7, %v1667_v50 }
 0x19d   : > { %v1665_v52 = vpop.permute.xlu0 %1664  ;;  %1911 = vrot.lane.b32.xlu1 %v9789_v33, %s6225_s17 }
 0x19e   : > { %1686 = vst.msk [vmem:[#allocation3 + $0x48] sm:$0xf] %vm767_vm7, %v1665_v52 }
 0x19f   : > { %1909 = vrot.lane.b32.xlu0 %v9790_v11, %s6225_s17  ;;  %v1695_v34 = vpop.permute.xlu1 %1694 }
 0x1a0   : > { %1717 = vst.msk [vmem:[#allocation3 + $0x44] sm:$0xf] %vm808_vm8, %v1695_v34 }
 0x1a1   : > { %v1693_v19 = vpop.permute.xlu0 %1692  ;;  %1915 = vrot.lane.b32.xlu1 %v9791_v9, %s6225_s17 }
 0x1a2   : > { %1716 = vst.msk [vmem:[#allocation3 + $0x40] sm:$0xf] %vm808_vm8, %v1693_v19 }
 0x1a3   : > { %1913 = vrot.lane.b32.xlu0 %v9792_v44, %s6225_s17  ;;  %v1699_v21 = vpop.permute.xlu1 %1698 }
 0x1a4   : > { %1719 = vst.msk [vmem:[#allocation3 + $0x4c] sm:$0xf] %vm808_vm8, %v1699_v21 }
 0x1a5   : > { %v1697_v10 = vpop.permute.xlu0 %1696  ;;  %1943 = vrot.lane.b32.xlu1 %v6299_v0, %s6224_s16 }
 0x1a6   : > { %1718 = vst.msk [vmem:[#allocation3 + $0x48] sm:$0xf] %vm808_vm8, %v1697_v10 }
 0x1a7   : > { %1941 = vrot.lane.b32.xlu0 %v6312_v3, %s6224_s16  ;;  %v1727_v50 = vpop.permute.xlu1 %1726 }
 0x1a8   : > { %1749 = vst.msk [vmem:[#allocation3 + $0x44] sm:$0xf] %vm953_vm9, %v1727_v50 }
 0x1a9   : > { %v1725_v52 = vpop.permute.xlu0 %1724  ;;  %1947 = vrot.lane.b32.xlu1 %v6427_v61, %s6224_s16 }
 0x1aa   : > { %1748 = vst.msk [vmem:[#allocation3 + $0x40] sm:$0xf] %vm953_vm9, %v1725_v52 }
 0x1ab   : > { %1945 = vrot.lane.b32.xlu0 %v6305_v2, %s6224_s16  ;;  %v1731_v11 = vpop.permute.xlu1 %1730 }
 0x1ac   : > { %1751 = vst.msk [vmem:[#allocation3 + $0x4c] sm:$0xf] %vm953_vm9, %v1731_v11 }
 0x1ad   : > { %v1729_v34 = vpop.permute.xlu0 %1728  ;;  %1975 = vrot.lane.b32.xlu1 %v6435_v62, %s6226_s18  ;;  %v9794_v62 = vld [vmem:[#allocation36_spill] sm:$0xff] }
 0x1ae   : > { %1750 = vst.msk [vmem:[#allocation3 + $0x48] sm:$0xf] %vm953_vm9, %v1729_v34 }
 0x1af   : > { %1973 = vrot.lane.b32.xlu0 %v6396_v48, %s6226_s18  ;;  %v1760_v19 = vpop.permute.xlu1 %1759  ;;  %v9793_v48 = vld [vmem:[#allocation38_spill] sm:$0xff] }
 0x1b0   : > { %1782 = vst.msk [vmem:[#allocation3 + $0x44] sm:$0xf] %vm994_vm10, %v1760_v19 }
 0x1b1   : > { %v1758_v21 = vpop.permute.xlu0 %1757  ;;  %1979 = vrot.lane.b32.xlu1 %v6594_v8, %s6226_s18  ;;  %v9796_v8 = vld [vmem:[#allocation37_spill] sm:$0xff] }
 0x1b2   : > { %1781 = vst.msk [vmem:[#allocation3 + $0x40] sm:$0xf] %vm994_vm10, %v1758_v21 }
 0x1b3   : > { %1977 = vrot.lane.b32.xlu0 %v6419_v56, %s6226_s18  ;;  %v1764_v10 = vpop.permute.xlu1 %1763  ;;  %v9795_v56 = vld [vmem:[#allocation43_spill] sm:$0xff] }
 0x1b4   : > { %1784 = vst.msk [vmem:[#allocation3 + $0x4c] sm:$0xf] %vm994_vm10, %v1764_v10 }
 0x1b5   : > { %v1762_v50 = vpop.permute.xlu0 %1761  ;;  %2007 = vrot.lane.b32.xlu1 %v9793_v48, %s6227_s19 }
 0x1b6   : > { %1783 = vst.msk [vmem:[#allocation3 + $0x48] sm:$0xf] %vm994_vm10, %v1762_v50 }
 0x1b7   : > { %2005 = vrot.lane.b32.xlu0 %v9794_v62, %s6227_s19  ;;  %v1793_v52 = vpop.permute.xlu1 %1792 }
 0x1b8   : > { %1815 = vst.msk [vmem:[#allocation3 + $0x44] sm:$0xf] %vm1028_vm11, %v1793_v52 }
 0x1b9   : > { %v1791_v11 = vpop.permute.xlu0 %1790  ;;  %2011 = vrot.lane.b32.xlu1 %v9795_v56, %s6227_s19 }
 0x1ba   : > { %1814 = vst.msk [vmem:[#allocation3 + $0x40] sm:$0xf] %vm1028_vm11, %v1791_v11 }
 0x1bb   : > { %2009 = vrot.lane.b32.xlu0 %v9796_v8, %s6227_s19  ;;  %v1797_v34 = vpop.permute.xlu1 %1796 }
 0x1bc   : > { %1817 = vst.msk [vmem:[#allocation3 + $0x4c] sm:$0xf] %vm1028_vm11, %v1797_v34 }
 0x1bd   : > { %v1795_v19 = vpop.permute.xlu0 %1794  ;;  %2039 = vrot.lane.b32.xlu1 %v6399_v49, %s6228_s20 }
 0x1be   : > { %1816 = vst.msk [vmem:[#allocation3 + $0x48] sm:$0xf] %vm1028_vm11, %v1795_v19 }
 0x1bf   : > { %2037 = vrot.lane.b32.xlu0 %v6382_v42, %s6228_s20  ;;  %v1839_v21 = vpop.permute.xlu1 %1838 }
 0x1c0   : > { %1861 = vst.msk [vmem:[#allocation3 + $0x44] sm:$0xf] %vm1075_vm12, %v1839_v21  ;;  %v462_v21 = vld [vmem:[#allocation2 + $0x70] sm:$0x1] }
 0x1c1   : > { %v1837_v10 = vpop.permute.xlu0 %1836  ;;  %2043 = vrot.lane.b32.xlu1 %v6509_v57, %s6228_s20 }
 0x1c2   : > { %1860 = vst.msk [vmem:[#allocation3 + $0x40] sm:$0xf] %vm1075_vm12, %v1837_v10 }
 0x1c3   : > { %2041 = vrot.lane.b32.xlu0 %v6390_v47, %s6228_s20  ;;  %v1607_v50 = vpop.permute.xlu1 %1606 }
 0x1c4   : > { %1625 = vst.msk [vmem:[#allocation3 + $0x54] sm:$0xf] %vm578_vm5, %v1607_v50  ;;  %v471_v50 = vld [vmem:[#allocation2 + $0x88] sm:$0x1] }
 0x1c5   : > { %v1605_v48 = vpop.permute.xlu0 %1604  ;;  %2071 = vrot.lane.b32.xlu1 %v6549_v18, %s6229_s21 }
 0x1c6   : > { %1624 = vst.msk [vmem:[#allocation3 + $0x50] sm:$0xf] %vm578_vm5, %v1605_v48  ;;  %v472_v48 = vsel %vm7037_vm1, 0, %v471_v50 }
 0x1c7   : > { %2069 = vrot.lane.b32.xlu0 %v6531_v63, %s6229_s21  ;;  %v1843_v62 = vpop.permute.xlu1 %1842  ;;  %v468_v63 = vld [vmem:[#allocation2 + $0x80] sm:$0x1]  ;;  %473 = vst [vmem:[#allocation2 + $0x88] sm:$0x1] %v472_v48 }
 0x1c8   : > { %1863 = vst.msk [vmem:[#allocation3 + $0x4c] sm:$0xf] %vm1075_vm12, %v1843_v62  ;;  %v469_v8 = vsel %vm7037_vm1, 0, %v468_v63 }
 0x1c9   : > { %v1841_v52 = vpop.permute.xlu0 %1840  ;;  %v5984_v11 = vld [vmem:[#allocation3 + $0x40] sm:$0xff]   ;;  %2075 = vrot.lane.b32.xlu1 %v6669_v30, %s6229_s21  ;;  %470 = vst [vmem:[#allocation2 + $0x80] sm:$0x1] %v469_v8 }
 0x1ca   : > { %1862 = vst.msk [vmem:[#allocation3 + $0x48] sm:$0xf] %vm1075_vm12, %v1841_v52  ;;  %5915 = vmatprep.mubr.msk.bf16.mxu0 %vm2286_vm13, %v5984_v11 }
 0x1cb   : > { %2073 = vrot.lane.b32.xlu0 %v6545_v14, %s6229_s21  ;;  %v1611_v56 = vpop.permute.xlu1 %1610 }
 0x1cc   : > { %1627 = vst.msk [vmem:[#allocation3 + $0x5c] sm:$0xf] %vm578_vm5, %v1611_v56 }
 0x1cd   : > { %v1609_v18 = vpop.permute.xlu0 %1608  ;;  %2117 = vrot.lane.b32.xlu1 %v9792_v44, %s6230_s22 }
 0x1ce   : > { %1626 = vst.msk [vmem:[#allocation3 + $0x58] sm:$0xf] %vm578_vm5, %v1609_v18 }
 0x1cf   : > { %2115 = vrot.lane.b32.xlu0 %v9789_v33, %s6230_s22  ;;  %v1639_v34 = vpop.permute.xlu1 %1638  ;;  %v463_v33 = vsel %vm7037_vm1, 0, %v462_v21 }
 0x1d0   : > { %1657 = vst.msk [vmem:[#allocation3 + $0x54] sm:$0xf] %vm726_vm6, %v1639_v34  ;;  %464 = vst [vmem:[#allocation2 + $0x70] sm:$0x1] %v463_v33 }
 0x1d1   : > { %v1637_v14 = vpop.permute.xlu0 %1636  ;;  %v5985_v19 = vld [vmem:[#allocation3 + $0x48] sm:$0xff]   ;;  %1887 = vrot.lane.b32.xlu1 %v6665_v25, %s6223_s15 }
 0x1d2   : > { %1656 = vst.msk [vmem:[#allocation3 + $0x50] sm:$0xf] %vm726_vm6, %v1637_v14  ;;  %5916 = vmatmul.mubr.msk.bf16.gmra.mxu0 %vm2286_vm13, %v5985_v19 }
 0x1d3   : > { %1885 = vrot.lane.b32.xlu0 %v6669_v30, %s6223_s15  ;;  %v1643_v44 = vpop.permute.xlu1 %1642  ;;  %v465_v30 = vld [vmem:[#allocation2 + $0x78] sm:$0x1] }
 0x1d4   : > { %1659 = vst.msk [vmem:[#allocation3 + $0x5c] sm:$0xf] %vm726_vm6, %v1643_v44  ;;  %v466_v62 = vsel %vm7037_vm1, 0, %v465_v30 }
 0x1d5   : > { %v1641_v10 = vpop.permute.xlu0 %1640  ;;  %2121 = vrot.lane.b32.xlu1 %v6970_v28, %s6230_s22  ;;  %467 = vst [vmem:[#allocation2 + $0x78] sm:$0x1] %v466_v62  ;;  %v5702_v62 = vld [vmem:[%s6296_s14 + $0x11c] sm:$0x1] }
 0x1d6   : > { %1658 = vst.msk [vmem:[#allocation3 + $0x58] sm:$0xf] %vm726_vm6, %v1641_v10 }
 0x1d7   : > { %2119 = vrot.lane.b32.xlu0 %v9791_v9, %s6230_s22  ;;  %v1671_v52 = vpop.permute.xlu1 %1670 }
 0x1d8   : > { %1689 = vst.msk [vmem:[#allocation3 + $0x54] sm:$0xf] %vm767_vm7, %v1671_v52 }
 0x1d9   : > { %v1669_v11 = vpop.permute.xlu0 %1668  ;;  %1891 = vrot.lane.b32.xlu1 %v6677_v35, %s6223_s15 }
 0x1da   : > { %1688 = vst.msk [vmem:[#allocation3 + $0x50] sm:$0xf] %vm767_vm7, %v1669_v11 }
 0x1db   : > { %1889 = vrot.lane.b32.xlu0 %v6681_v5, %s6223_s15  ;;  %v1675_v56 = vpop.permute.xlu1 %1674 }
 0x1dc   : > { %1691 = vst.msk [vmem:[#allocation3 + $0x5c] sm:$0xf] %vm767_vm7, %v1675_v56 }
 0x1dd   : > { %v1673_v9 = vpop.permute.xlu0 %1672  ;;  %1919 = vrot.lane.b32.xlu1 %v6966_v38, %s6225_s17 }
 0x1de   : > { %1690 = vst.msk [vmem:[#allocation3 + $0x58] sm:$0xf] %vm767_vm7, %v1673_v9 }
 0x1df   : > { %1917 = vrot.lane.b32.xlu0 %v6970_v28, %s6225_s17  ;;  %v1703_v18 = vpop.permute.xlu1 %1702 }
 0x1e0   : > { %1721 = vst.msk [vmem:[#allocation3 + $0x54] sm:$0xf] %vm808_vm8, %v1703_v18 }
 0x1e1   : > { %v1701_v63 = vpop.permute.xlu0 %1700  ;;  %1923 = vrot.lane.b32.xlu1 %v6980_v22, %s6225_s17 }
 0x1e2   : > { %1720 = vst.msk [vmem:[#allocation3 + $0x50] sm:$0xf] %vm808_vm8, %v1701_v63 }
 0x1e3   : > { %1921 = vrot.lane.b32.xlu0 %v6984_v40, %s6225_s17  ;;  %v1707_v8 = vpop.permute.xlu1 %1706 }
 0x1e4   : > { %1723 = vst.msk [vmem:[#allocation3 + $0x5c] sm:$0xf] %vm808_vm8, %v1707_v8 }
 0x1e5   : > { %v1705_v34 = vpop.permute.xlu0 %1704  ;;  %1951 = vrot.lane.b32.xlu1 %v6453_v15, %s6224_s16 }
 0x1e6   : > { %1722 = vst.msk [vmem:[#allocation3 + $0x58] sm:$0xf] %vm808_vm8, %v1705_v34 }
 0x1e7   : > { %1949 = vrot.lane.b32.xlu0 %v6439_v7, %s6224_s16  ;;  %v1735_v28 = vpop.permute.xlu1 %1734 }
 0x1e8   : > { %1753 = vst.msk [vmem:[#allocation3 + $0x54] sm:$0xf] %vm953_vm9, %v1735_v28 }
 0x1e9   : > { %v1733_v14 = vpop.permute.xlu0 %1732  ;;  %1955 = vrot.lane.b32.xlu1 %v7204_v13, %s6224_s16 }
 0x1ea   : > { %1752 = vst.msk [vmem:[#allocation3 + $0x50] sm:$0xf] %vm953_vm9, %v1733_v14 }
 0x1eb   : > { %1953 = vrot.lane.b32.xlu0 %v6448_v12, %s6224_s16  ;;  %v1739_v19 = vpop.permute.xlu1 %1738 }
 0x1ec   : > { %1755 = vst.msk [vmem:[#allocation3 + $0x5c] sm:$0xf] %vm953_vm9, %v1739_v19 }
 0x1ed   : > { %v1737_v21 = vpop.permute.xlu0 %1736  ;;  %1983 = vrot.lane.b32.xlu1 %v6629_v55, %s6226_s18 }
 0x1ee   : > { %1754 = vst.msk [vmem:[#allocation3 + $0x58] sm:$0xf] %vm953_vm9, %v1737_v21  ;;  %v482_v21 = vld [vmem:[#allocation2 + $0x98] sm:$0x1] }
 0x1ef   : > { %1981 = vrot.lane.b32.xlu0 %v6617_v41, %s6226_s18  ;;  %v1768_v33 = vpop.permute.xlu1 %1767 }
 0x1f0   : > { %1786 = vst.msk [vmem:[#allocation3 + $0x54] sm:$0xf] %vm994_vm10, %v1768_v33  ;;  %v483_v33 = vsel %vm7037_vm1, 0, %v482_v21 }
 0x1f1   : > { %v1766_v44 = vpop.permute.xlu0 %1765  ;;  %1987 = vrot.lane.b32.xlu1 %v6721_v36, %s6226_s18  ;;  %484 = vst [vmem:[#allocation2 + $0x98] sm:$0x1] %v483_v33 }
 0x1f2   : > { %1785 = vst.msk [vmem:[#allocation3 + $0x50] sm:$0xf] %vm994_vm10, %v1766_v44 }
 0x1f3   : > { %1985 = vrot.lane.b32.xlu0 %v6625_v54, %s6226_s18  ;;  %v1772_v13 = vpop.permute.xlu1 %1771 }
 0x1f4   : > { %1788 = vst.msk [vmem:[#allocation3 + $0x5c] sm:$0xf] %vm994_vm10, %v1772_v13 }
 0x1f5   : > { %v1770_v10 = vpop.permute.xlu0 %1769  ;;  %2015 = vrot.lane.b32.xlu1 %v6920_v24, %s6227_s19  ;;  %v2105_v24 = vshll.u32 %v7242_v53, 16 }
 0x1f6   : > { %1787 = vst.msk [vmem:[#allocation3 + $0x58] sm:$0xf] %vm994_vm10, %v1770_v10  ;;  %v491_v10 = vld [vmem:[#allocation2 + $0xb0] sm:$0x1] }
 0x1f7   : > { %2013 = vrot.lane.b32.xlu0 %v6906_v23, %s6227_s19  ;;  %v1801_v41 = vpop.permute.xlu1 %1800  ;;  %v2102_v23 = vshrl.u32 %v7242_v53, 16  ;;  %v2107_v48 = vrot.slane %v2105_v24, 5 }
 0x1f8   : > { %1819 = vst.msk [vmem:[#allocation3 + $0x54] sm:$0xf] %vm1028_vm11, %v1801_v41  ;;  %v485_v41 = vld [vmem:[#allocation2 + $0xa0] sm:$0x1] }
 0x1f9   : > { %v1799_v55 = vpop.permute.xlu0 %1798  ;;  %2019 = vrot.lane.b32.xlu1 %v7029_v29, %s6227_s19  ;;  %v2104_v50 = vrot.slane %v2102_v23, 4  ;;  %v500_v23 = vld [vmem:[#allocation2 + $0xc8] sm:$0x1] }
 0x1fa   : > { %1818 = vst.msk [vmem:[#allocation3 + $0x50] sm:$0xf] %vm1028_vm11, %v1799_v55  ;;  %v486_v55 = vsel %vm7037_vm1, 0, %v485_v41 }
 0x1fb   : > { %2017 = vrot.lane.b32.xlu0 %v6916_v39, %s6227_s19  ;;  %v1805_v54 = vpop.permute.xlu1 %1804  ;;  %v2108_v11 = vor.u32 %v2107_v48, %v2104_v50  ;;  %487 = vst [vmem:[#allocation2 + $0xa0] sm:$0x1] %v486_v55 }
 0x1fc   : > { %1821 = vst.msk [vmem:[#allocation3 + $0x5c] sm:$0xf] %vm1028_vm11, %v1805_v54 }
 0x1fd   : > { %v1803_v36 = vpop.permute.xlu0 %1802  ;;  %2047 = vrot.lane.b32.xlu1 %v6523_v59, %s6228_s20 }
 0x1fe   : > { %1820 = vst.msk [vmem:[#allocation3 + $0x58] sm:$0xf] %vm1028_vm11, %v1803_v36 }
 0x1ff   : > { %2045 = vrot.lane.b32.xlu0 %v6504_v51, %s6228_s20  ;;  %v1847_v29 = vpop.permute.xlu1 %1846 }
 0x200   : > { %1865 = vst.msk [vmem:[#allocation3 + $0x54] sm:$0xf] %vm1075_vm12, %v1847_v29  ;;  %v501_v29 = vsel %vm7037_vm1, 0, %v500_v23  ;;  %v497_v23 = vld [vmem:[#allocation2 + $0xc0] sm:$0x1] }
 0x201   : > { %v1845_v39 = vpop.permute.xlu0 %1844  ;;  %2051 = vrot.lane.b32.xlu1 %v7242_v53, %s6228_s20  ;;  %v2111_v53 = vshll.u32 %v5702_v62, 16  ;;  %502 = vst [vmem:[#allocation2 + $0xc8] sm:$0x1] %v501_v29 }
 0x202   : > { %1864 = vst.msk [vmem:[#allocation3 + $0x50] sm:$0xf] %vm1075_vm12, %v1845_v39 }
 0x203   : > { %2049 = vrot.lane.b32.xlu0 %v6516_v58, %s6228_s20  ;;  %v1851_v30 = vpop.permute.xlu1 %1850  ;;  %v2113_v63 = vrot.slane %v2111_v53, 5 }
 0x204   : > { %1867 = vst.msk [vmem:[#allocation3 + $0x5c] sm:$0xf] %vm1075_vm12, %v1851_v30 }
 0x205   : > { %v1849_v52 = vpop.permute.xlu0 %1848  ;;  %2079 = vrot.lane.b32.xlu1 %v6681_v5, %s6229_s21  ;;  %v2109_v5 = vrot.slane %v2108_v11, 4 }
 0x206   : > { %1866 = vst.msk [vmem:[#allocation3 + $0x58] sm:$0xf] %vm1075_vm12, %v1849_v52 }
 0x207   : > { %2077 = vrot.lane.b32.xlu0 %v6665_v25, %s6229_s21  ;;  %v1880_v56 = vpop.permute.xlu1 %1879 }
 0x208   : > { %1902 = vst.msk [vmem:[#allocation3 + $0x64] sm:$0xf] %vm578_vm5, %v1880_v56 }
 0x209   : > { %v1878_v9 = vpop.permute.xlu0 %1877  ;;  %v5986_v18 = vld [vmem:[#allocation3 + $0x50] sm:$0xff]   ;;  %2083 = vrot.lane.b32.xlu1 %v7260_v1, %s6229_s21  ;;  %v488_v1 = vld [vmem:[#allocation2 + $0xa8] sm:$0x1] }
 0x20a   : > { %1901 = vst.msk [vmem:[#allocation3 + $0x60] sm:$0xf] %vm578_vm5, %v1878_v9  ;;  %5919 = vmatprep.mubr.msk.bf16.mxu1 %vm2286_vm13, %v5986_v18  ;;  %v489_v14 = vsel %vm7037_vm1, 0, %v488_v1 }
 0x20b   : > { %2081 = vrot.lane.b32.xlu0 %v6677_v35, %s6229_s21  ;;  %v1884_v25 = vpop.permute.xlu1 %1883  ;;  %v2114_v35 = vsel %vm6371_vm3, %v2109_v5, %v2113_v63  ;;  %490 = vst [vmem:[#allocation2 + $0xa8] sm:$0x1] %v489_v14 }
 0x20c   : > { %1904 = vst.msk [vmem:[#allocation3 + $0x6c] sm:$0xf] %vm578_vm5, %v1884_v25 }
 0x20d   : > { %v1882_v8 = vpop.permute.xlu0 %1881  ;;  %v5987_v34 = vld [vmem:[#allocation3 + $0x58] sm:$0xff]   ;;  %2125 = vrot.lane.b32.xlu1 %v6984_v40, %s6230_s22 }
 0x20e   : > { %1903 = vst.msk [vmem:[#allocation3 + $0x68] sm:$0xf] %vm578_vm5, %v1882_v8  ;;  %5920 = vmatmul.mubr.msk.bf16.vlgmr.msra.gmra.mxu1 %vm2286_vm13, %v5987_v34 }
 0x20f   : > { %2123 = vrot.lane.b32.xlu0 %v6966_v38, %s6230_s22  ;;  %v1912_v28 = vpop.permute.xlu1 %1911 }
 0x210   : > { %1934 = vst.msk [vmem:[#allocation3 + $0x64] sm:$0xf] %vm726_vm6, %v1912_v28 }
 0x211   : > { %v1910_v19 = vpop.permute.xlu0 %1909  ;;  %2129 = vrot.lane.b32.xlu1 %v2114_v35, %s6230_s22 }
 0x212   : > { %1933 = vst.msk [vmem:[#allocation3 + $0x60] sm:$0xf] %vm726_vm6, %v1910_v19 }
 0x213   : > { %2127 = vrot.lane.b32.xlu0 %v6980_v22, %s6230_s22  ;;  %v1916_v38 = vpop.permute.xlu1 %1915  ;;  %v492_v22 = vsel %vm7037_vm1, 0, %v491_v10  ;;  %v494_v10 = vld [vmem:[#allocation2 + $0xb8] sm:$0x1] }
 0x214   : > { %1936 = vst.msk [vmem:[#allocation3 + $0x6c] sm:$0xf] %vm726_vm6, %v1916_v38  ;;  %493 = vst [vmem:[#allocation2 + $0xb0] sm:$0x1] %v492_v22  ;;  %v495_v41 = vsel %vm7037_vm1, 0, %v494_v10 }
 0x215   : > { %v1914_v40 = vpop.permute.xlu0 %1913  ;;  %496 = vst [vmem:[#allocation2 + $0xb8] sm:$0x1] %v495_v41  ;;  %v514_v10 = vld [vmem:[#allocation2 + $0xe0] sm:$0x1]  ;;  %v523_v41 = vld [vmem:[#allocation2 + $0xf8] sm:$0x1] }
 0x216   : > { %1935 = vst.msk [vmem:[#allocation3 + $0x68] sm:$0xf] %vm726_vm6, %v1914_v40 }
 0x217   : > { %v1944_v44 = vpop.permute.xlu1 %1943 }
 0x218   : > { %1966 = vst.msk [vmem:[#allocation3 + $0x64] sm:$0xf] %vm767_vm7, %v1944_v44 }
 0x219   : > { %v1942_v13 = vpop.permute.xlu0 %1941 }
 0x21a   : > { %1965 = vst.msk [vmem:[#allocation3 + $0x60] sm:$0xf] %vm767_vm7, %v1942_v13 }
 0x21b   : > { %v1948_v54 = vpop.permute.xlu1 %1947 }
 0x21c   : > { %1968 = vst.msk [vmem:[#allocation3 + $0x6c] sm:$0xf] %vm767_vm7, %v1948_v54  ;;  %v503_v54 = vld [vmem:[#allocation2 + $0xd0] sm:$0x1] }
 0x21d   : > { %v1946_v36 = vpop.permute.xlu0 %1945 }
 0x21e   : > { %1967 = vst.msk [vmem:[#allocation3 + $0x68] sm:$0xf] %vm767_vm7, %v1946_v36  ;;  %v504_v36 = vsel %vm7037_vm1, 0, %v503_v54  ;;  %v517_v54 = vld [vmem:[#allocation2 + $0xe8] sm:$0x1] }
 0x21f   : > { %v1976_v24 = vpop.permute.xlu1 %1975  ;;  %505 = vst [vmem:[#allocation2 + $0xd0] sm:$0x1] %v504_v36  ;;  %v518_v36 = vsel %vm7037_vm1, 0, %v517_v54 }
 0x220   : > { %1998 = vst.msk [vmem:[#allocation3 + $0x64] sm:$0xf] %vm808_vm8, %v1976_v24  ;;  %v498_v24 = vsel %vm7037_vm1, 0, %v497_v23  ;;  %519 = vst [vmem:[#allocation2 + $0xe8] sm:$0x1] %v518_v36 }
 0x221   : > { %v1974_v39 = vpop.permute.xlu0 %1973  ;;  %499 = vst [vmem:[#allocation2 + $0xc0] sm:$0x1] %v498_v24  ;;  %v532_v23 = vld [vmem:[#allocation2 + $0x110] sm:$0x1] }
 0x222   : > { %1997 = vst.msk [vmem:[#allocation3 + $0x60] sm:$0xf] %vm808_vm8, %v1974_v39  ;;  %v533_v24 = vsel %vm7037_vm1, 0, %v532_v23 }
 0x223   : > { %v1980_v50 = vpop.permute.xlu1 %1979  ;;  %534 = vst [vmem:[#allocation2 + $0x110] sm:$0x1] %v533_v24 }
 0x224   : > { %2000 = vst.msk [vmem:[#allocation3 + $0x6c] sm:$0xf] %vm808_vm8, %v1980_v50  ;;  %v520_v50 = vld [vmem:[#allocation2 + $0xf0] sm:$0x1] }
 0x225   : > { %v1978_v48 = vpop.permute.xlu0 %1977 }
 0x226   : > { %1999 = vst.msk [vmem:[#allocation3 + $0x68] sm:$0xf] %vm808_vm8, %v1978_v48 }
 0x227   : > { %v2008_v30 = vpop.permute.xlu1 %2007 }
 0x228   : > { %2030 = vst.msk [vmem:[#allocation3 + $0x64] sm:$0xf] %vm953_vm9, %v2008_v30  ;;  %v521_v30 = vsel %vm7037_vm1, 0, %v520_v50  ;;  %v535_v50 = vld [vmem:[#allocation2 + $0x118] sm:$0x1] }
 0x229   : > { %v2006_v62 = vpop.permute.xlu0 %2005  ;;  %522 = vst [vmem:[#allocation2 + $0xf0] sm:$0x1] %v521_v30  ;;  %v529_v30 = vld [vmem:[#allocation2 + $0x108] sm:$0x1] }
 0x22a   : > { %2029 = vst.msk [vmem:[#allocation3 + $0x60] sm:$0xf] %vm953_vm9, %v2006_v62 }
 0x22b   : > { %v2012_v52 = vpop.permute.xlu1 %2011 }
 0x22c   : > { %2032 = vst.msk [vmem:[#allocation3 + $0x6c] sm:$0xf] %vm953_vm9, %v2012_v52 }
 0x22d   : > { %v2010_v11 = vpop.permute.xlu0 %2009 }
 0x22e   : > { %2031 = vst.msk [vmem:[#allocation3 + $0x68] sm:$0xf] %vm953_vm9, %v2010_v11 }
 0x22f   : > { %v2040_v53 = vpop.permute.xlu1 %2039 }
 0x230   : > { %2062 = vst.msk [vmem:[#allocation3 + $0x64] sm:$0xf] %vm994_vm10, %v2040_v53 }
 0x231   : > { %v2038_v56 = vpop.permute.xlu0 %2037 }
 0x232   : > { %2061 = vst.msk [vmem:[#allocation3 + $0x60] sm:$0xf] %vm994_vm10, %v2038_v56 }
 0x233   : > { %v2044_v9 = vpop.permute.xlu1 %2043 }
 0x234   : > { %2064 = vst.msk [vmem:[#allocation3 + $0x6c] sm:$0xf] %vm994_vm10, %v2044_v9 }
 0x235   : > { %v2042_v18 = vpop.permute.xlu0 %2041 }
 0x236   : > { %2063 = vst.msk [vmem:[#allocation3 + $0x68] sm:$0xf] %vm994_vm10, %v2042_v18 }
 0x237   : > { %v2072_v5 = vpop.permute.xlu1 %2071 }
 0x238   : > { %2094 = vst.msk [vmem:[#allocation3 + $0x64] sm:$0xf] %vm1028_vm11, %v2072_v5 }
 0x239   : > { %v2070_v63 = vpop.permute.xlu0 %2069 }
 0x23a   : > { %2093 = vst.msk [vmem:[#allocation3 + $0x60] sm:$0xf] %vm1028_vm11, %v2070_v63 }
 0x23b   : > { %v2076_v25 = vpop.permute.xlu1 %2075 }
 0x23c   : > { %2096 = vst.msk [vmem:[#allocation3 + $0x6c] sm:$0xf] %vm1028_vm11, %v2076_v25 }
 0x23d   : > { %v2074_v8 = vpop.permute.xlu0 %2073 }
 0x23e   : > { %2095 = vst.msk [vmem:[#allocation3 + $0x68] sm:$0xf] %vm1028_vm11, %v2074_v8 }
 0x23f   : > { %v2118_v34 = vpop.permute.xlu1 %2117 }
 0x240   : > { %2140 = vst.msk [vmem:[#allocation3 + $0x64] sm:$0xf] %vm1075_vm12, %v2118_v34 }
 0x241   : > { %v2116_v35 = vpop.permute.xlu0 %2115 }
 0x242   : > { %2139 = vst.msk [vmem:[#allocation3 + $0x60] sm:$0xf] %vm1075_vm12, %v2116_v35 }
 0x243   : > { %v1888_v1 = vpop.permute.xlu1 %1887 }
 0x244   : > { %1906 = vst.msk [vmem:[#allocation3 + $0x74] sm:$0xf] %vm578_vm5, %v1888_v1 }
 0x245   : > { %v1886_v28 = vpop.permute.xlu0 %1885 }
 0x246   : > { %1905 = vst.msk [vmem:[#allocation3 + $0x70] sm:$0xf] %vm578_vm5, %v1886_v28 }
 0x247   : > { %v2122_v14 = vpop.permute.xlu1 %2121 }
 0x248   : > { %2142 = vst.msk [vmem:[#allocation3 + $0x6c] sm:$0xf] %vm1075_vm12, %v2122_v14 }
 0x249   : > { %v2120_v19 = vpop.permute.xlu0 %2119  ;;  %v5988_v38 = vld [vmem:[#allocation3 + $0x60] sm:$0xff]  }
 0x24a   : > { %2141 = vst.msk [vmem:[#allocation3 + $0x68] sm:$0xf] %vm1075_vm12, %v2120_v19  ;;  %5923 = vmatprep.mubr.msk.bf16.mxu1 %vm2286_vm13, %v5988_v38 }
 0x24b   : > { %v1892_v40 = vpop.permute.xlu1 %1891 }
 0x24c   : > { %1908 = vst.msk [vmem:[#allocation3 + $0x7c] sm:$0xf] %vm578_vm5, %v1892_v40 }
 0x24d   : > { %v1890_v21 = vpop.permute.xlu0 %1889 }
 0x24e   : > { %1907 = vst.msk [vmem:[#allocation3 + $0x78] sm:$0xf] %vm578_vm5, %v1890_v21 }
 0x24f   : > { %v1920_v33 = vpop.permute.xlu1 %1919 }
 0x250   : > { %1938 = vst.msk [vmem:[#allocation3 + $0x74] sm:$0xf] %vm726_vm6, %v1920_v33 }
 0x251   : > { %v1918_v44 = vpop.permute.xlu0 %1917  ;;  %v5989_v13 = vld [vmem:[#allocation3 + $0x68] sm:$0xff]  }
 0x252   : > { %1937 = vst.msk [vmem:[#allocation3 + $0x70] sm:$0xf] %vm726_vm6, %v1918_v44  ;;  %5924 = vmatmul.mubr.msk.bf16.gmra.mxu1 %vm2286_vm13, %v5989_v13 }
 0x253   : > { %v1924_v22 = vpop.permute.xlu1 %1923 }
 0x254   : > { %1940 = vst.msk [vmem:[#allocation3 + $0x7c] sm:$0xf] %vm726_vm6, %v1924_v22  ;;  %v515_v22 = vsel %vm7037_vm1, 0, %v514_v10 }
 0x255   : > { %v1922_v55 = vpop.permute.xlu0 %1921  ;;  %516 = vst [vmem:[#allocation2 + $0xe0] sm:$0x1] %v515_v22 }
 0x256   : > { %1939 = vst.msk [vmem:[#allocation3 + $0x78] sm:$0xf] %vm726_vm6, %v1922_v55  ;;  %v524_v55 = vsel %vm7037_vm1, 0, %v523_v41 }
 0x257   : > { %v1952_v29 = vpop.permute.xlu1 %1951  ;;  %525 = vst [vmem:[#allocation2 + $0xf8] sm:$0x1] %v524_v55 }
 0x258   : > { %1970 = vst.msk [vmem:[#allocation3 + $0x74] sm:$0xf] %vm767_vm7, %v1952_v29  ;;  %v526_v29 = vld [vmem:[#allocation2 + $0x100] sm:$0x1] }
 0x259   : > { %v1950_v39 = vpop.permute.xlu0 %1949 }
 0x25a   : > { %1969 = vst.msk [vmem:[#allocation3 + $0x70] sm:$0xf] %vm767_vm7, %v1950_v39  ;;  %v527_v39 = vsel %vm7037_vm1, 0, %v526_v29 }
 0x25b   : > { %v1956_v48 = vpop.permute.xlu1 %1955  ;;  %528 = vst [vmem:[#allocation2 + $0x100] sm:$0x1] %v527_v39 }
 0x25c   : > { %1972 = vst.msk [vmem:[#allocation3 + $0x7c] sm:$0xf] %vm767_vm7, %v1956_v48  ;;  %v536_v48 = vsel %vm7037_vm1, 0, %v535_v50 }
 0x25d   : > { %v1954_v62 = vpop.permute.xlu0 %1953  ;;  %537 = vst [vmem:[#allocation2 + $0x118] sm:$0x1] %v536_v48 }
 0x25e   : > { %1971 = vst.msk [vmem:[#allocation3 + $0x78] sm:$0xf] %vm767_vm7, %v1954_v62  ;;  %v530_v62 = vsel %vm7037_vm1, 0, %v529_v30 }
 0x25f   : > { %v1984_v52 = vpop.permute.xlu1 %1983  ;;  %531 = vst [vmem:[#allocation2 + $0x108] sm:$0x1] %v530_v62 }
 0x260   : > { %2002 = vst.msk [vmem:[#allocation3 + $0x74] sm:$0xf] %vm808_vm8, %v1984_v52  ;;  %v5901_v52 = vpop.f32.mrf.mxu0 }
 0x261   : > { %v1982_v11 = vpop.permute.xlu0 %1981 }
 0x262   : > { %2001 = vst.msk [vmem:[#allocation3 + $0x70] sm:$0xf] %vm808_vm8, %v1982_v11  ;;  %v2373_v11 = vpop.f32.mrf.mxu0 }
 0x263   : > { %v1988_v53 = vpop.permute.xlu1 %1987 }
 0x264   : > { %2004 = vst.msk [vmem:[#allocation3 + $0x7c] sm:$0xf] %vm808_vm8, %v1988_v53  ;;  %v5902_v53 = vpop.f32.mrf.mxu0 }
 0x265   : > { %v1986_v56 = vpop.permute.xlu0 %1985 }
 0x266   : > { %2003 = vst.msk [vmem:[#allocation3 + $0x78] sm:$0xf] %vm808_vm8, %v1986_v56  ;;  %v2376_v56 = vpop.f32.mrf.mxu0 }
 0x267   : > { %v2016_v9 = vpop.permute.xlu1 %2015 }
 0x268   : > { %2034 = vst.msk [vmem:[#allocation3 + $0x74] sm:$0xf] %vm953_vm9, %v2016_v9  ;;  %v5905_v9 = vpop.f32.mrf.mxu0 }
 0x269   : > { %v2014_v18 = vpop.permute.xlu0 %2013 }
 0x26a   : > { %2033 = vst.msk [vmem:[#allocation3 + $0x70] sm:$0xf] %vm953_vm9, %v2014_v18  ;;  %v2389_v18 = vpop.f32.mrf.mxu0 }
 0x26b   : > { %v2020_v5 = vpop.permute.xlu1 %2019 }
 0x26c   : > { %2036 = vst.msk [vmem:[#allocation3 + $0x7c] sm:$0xf] %vm953_vm9, %v2020_v5  ;;  %v7581_v5 = vld [vmem:[%s9635_s2] ss:$0 sm:$0xff] }
 0x26d   : > { %v2018_v63 = vpop.permute.xlu0 %2017  ;;  %v7614_v24 = vadd.f32 %v5905_v9, %v7581_v5 }
 0x26e   : > { %2035 = vst.msk [vmem:[#allocation3 + $0x78] sm:$0xf] %vm953_vm9, %v2018_v63  ;;  %v5906_v63 = vpop.f32.mrf.mxu0 }
 0x26f   : > { %v2048_v25 = vpop.permute.xlu1 %2047  ;;  %v2512_v50 = vsel %vm2500_vm2, %v7614_v24, 0.0  ;;  %v7619_v48 = vadd.f32 %v5906_v63, %v7581_v5 }
 0x270   : > { %2066 = vst.msk [vmem:[#allocation3 + $0x74] sm:$0xf] %vm994_vm10, %v2048_v25  ;;  %v7584_v25 = vadd.f32 %v7581_v5, %v2376_v56 }
 0x271   : > { %v2046_v8 = vpop.permute.xlu0 %2045 }
 0x272   : > { %2065 = vst.msk [vmem:[#allocation3 + $0x70] sm:$0xf] %vm994_vm10, %v2046_v8  ;;  %v7587_v8 = vadd.f32 %v7581_v5, %v2373_v11 }
 0x273   : > { %v2052_v34 = vpop.permute.xlu1 %2051 }
 0x274   : > { %2068 = vst.msk [vmem:[#allocation3 + $0x7c] sm:$0xf] %vm994_vm10, %v2052_v34  ;;  %v2392_v34 = vpop.f32.mrf.mxu0 }
 0x275   : > { %v2050_v35 = vpop.permute.xlu0 %2049 }
 0x276   : > { %2067 = vst.msk [vmem:[#allocation3 + $0x78] sm:$0xf] %vm994_vm10, %v2050_v35  ;;  %v2502_v35 = vsel %vm2500_vm2, %v7584_v25, 0.0 }
 0x277   : > { %v2080_v1 = vpop.permute.xlu1 %2079 }
 0x278   : > { %2098 = vst.msk [vmem:[#allocation3 + $0x74] sm:$0xf] %vm1028_vm11, %v2080_v1  ;;  %v5909_v1 = vpop.f32.mrf.mxu0 }
 0x279   : > { %v2078_v28 = vpop.permute.xlu0 %2077 }
 0x27a   : > { %2097 = vst.msk [vmem:[#allocation3 + $0x70] sm:$0xf] %vm1028_vm11, %v2078_v28  ;;  %v7592_v28 = vadd.f32 %v5901_v52, %v7581_v5 }
 0x27b   : > { %v2084_v14 = vpop.permute.xlu1 %2083 }
 0x27c   : > { %2100 = vst.msk [vmem:[#allocation3 + $0x7c] sm:$0xf] %vm1028_vm11, %v2084_v14  ;;  %v2501_v14 = vsel %vm2500_vm2, %v7587_v8, 0.0 }
 0x27d   : > { %v2082_v19 = vpop.permute.xlu0 %2081 }
 0x27e   : > { %2099 = vst.msk [vmem:[#allocation3 + $0x78] sm:$0xf] %vm1028_vm11, %v2082_v19  ;;  %v2503_v19 = vadd.f32 %v2502_v35, %v2501_v14  ;;  %v7634_v35 = vadd.f32 %v5909_v1, %v7581_v5 }
 0x27f   : > { %v2126_v38 = vpop.permute.xlu1 %2125 }
 0x280   : > { %2144 = vst.msk [vmem:[#allocation3 + $0x74] sm:$0xf] %vm1075_vm12, %v2126_v38  ;;  %v2405_v38 = vpop.f32.mrf.mxu0 }
 0x281   : > { %v2124_v40 = vpop.permute.xlu0 %2123  ;;  %v7622_v30 = vadd.f32 %v7581_v5, %v2405_v38 }
 0x282   : > { %2143 = vst.msk [vmem:[#allocation3 + $0x70] sm:$0xf] %vm1075_vm12, %v2124_v40  ;;  %v2504_v40 = vsel %vm2500_vm2, %v7592_v28, 0.0  ;;  %v5910_v10 = vpop.f32.mrf.mxu0 }
 0x283   : > { %v2130_v21 = vpop.permute.xlu1 %2129  ;;  %v2516_v56 = vsel %vm2500_vm2, %v7622_v30, 0.0 }
 0x284   : > { %2146 = vst.msk [vmem:[#allocation3 + $0x7c] sm:$0xf] %vm1075_vm12, %v2130_v21  ;;  %v7599_v21 = vadd.f32 %v5902_v53, %v7581_v5  ;;  %v2408_v23 = vpop.f32.mrf.mxu0  ;;  %v2514_v53 = vsel %vm2500_vm2, %v7619_v48, 0.0 }
 0x285   : > { %v2128_v33 = vpop.permute.xlu0 %2127  ;;  %v7625_v11 = vadd.f32 %v7581_v5, %v2408_v23 }
 0x286   : > { %2145 = vst.msk [vmem:[#allocation3 + $0x78] sm:$0xf] %vm1075_vm12, %v2128_v33  ;;  %v7602_v33 = vadd.f32 %v7581_v5, %v2389_v18  ;;  %v2506_v22 = vsel %vm2500_vm2, %v7599_v21, 0.0  ;;  %v5913_v39 = vpop.f32.mrf.mxu0 }
 0x287   : > { %v2518_v63 = vsel %vm2500_vm2, %v7625_v11, 0.0 }
 0x288   : > { %v2508_v41 = vsel %vm2500_vm2, %v7602_v33, 0.0  ;;  %v2421_v52 = vpop.f32.mrf.mxu0 }
 0x289   : > { %v5990_v44 = vld [vmem:[#allocation3 + $0x70] sm:$0xff]  }
 0x28a   : > { %5927 = vmatprep.mubr.msk.bf16.mxu1 %vm2286_vm13, %v5990_v44  ;;  %v2505_v44 = vadd.f32 %v2504_v40, %v2503_v19  ;;  %v5914_v18 = vpop.f32.mrf.mxu0  ;;  %v2520_v40 = vsel %vm2500_vm2, %v7634_v35, 0.0 }
 0x28c   : > { %v2507_v55 = vadd.f32 %v2506_v22, %v2505_v44  ;;  %v2424_v19 = vpop.f32.mrf.mxu0  ;;  %v7639_v44 = vadd.f32 %v5910_v10, %v7581_v5  ;;  %v7642_v22 = vadd.f32 %v7581_v5, %v2421_v52 }
 0x28d   : > { %v5991_v13 = vld [vmem:[#allocation3 + $0x78] sm:$0xff]  }
 0x28e   : > { %5928 = vmatmul.mubr.msk.bf16.gmra.mxu1 %vm2286_vm13, %v5991_v13  ;;  %v7605_v13 = vadd.f32 %v7581_v5, %v2392_v34  ;;  %v2509_v36 = vadd.f32 %v2508_v41, %v2507_v55  ;;  %v7645_v55 = vadd.f32 %v7581_v5, %v2424_v19  ;;  %v2522_v1 = vsel %vm2500_vm2, %v7639_v44, 0.0 }
 0x290   : > { %v2510_v54 = vsel %vm2500_vm2, %v7605_v13, 0.0 }
 0x291   : > { %v2511_v29 = vadd.f32 %v2510_v54, %v2509_v36  ;;  %v2524_v36 = vsel %vm2500_vm2, %v7642_v22, 0.0 }
 0x292   : > { %v5917_v38 = vpop.f32.mrf.mxu0 }
 0x293   : > { %v2513_v62 = vadd.f32 %v2512_v50, %v2511_v29  ;;  %v2526_v29 = vsel %vm2500_vm2, %v7645_v55, 0.0 }
 0x294   : > { %v2437_v54 = vpop.f32.mrf.mxu0 }
 0x295   : > { %v2515_v9 = vadd.f32 %v2514_v53, %v2513_v62  ;;  %v7654_v62 = vadd.f32 %v5913_v39, %v7581_v5 }
 0x296   : > { %v5918_v50 = vpop.f32.mrf.mxu0 }
 0x297   : > { %v2517_v34 = vadd.f32 %v2516_v56, %v2515_v9  ;;  %v2528_v9 = vsel %vm2500_vm2, %v7654_v62, 0.0 }
 0x298   : > { %v2440_v56 = vpop.f32.mrf.mxu0 }
 0x299   : > { %v2519_v14 = vadd.f32 %v2518_v63, %v2517_v34  ;;  %v7659_v63 = vadd.f32 %v5914_v18, %v7581_v5  ;;  %v7662_v34 = vadd.f32 %v7581_v5, %v2437_v54  ;;  %v7674_v54 = vadd.f32 %v5917_v38, %v7581_v5 }
 0x29b   : > { %v2521_v41 = vadd.f32 %v2520_v40, %v2519_v14  ;;  %v7665_v40 = vadd.f32 %v7581_v5, %v2440_v56  ;;  %v2530_v39 = vsel %vm2500_vm2, %v7659_v63, 0.0  ;;  %v2536_v56 = vsel %vm2500_vm2, %v7674_v54, 0.0 }
 0x29d   : > { %v2523_v23 = vadd.f32 %v2522_v1, %v2521_v41  ;;  %v2532_v41 = vsel %vm2500_vm2, %v7662_v34, 0.0  ;;  %v2534_v18 = vsel %vm2500_vm2, %v7665_v40, 0.0 }
 0x29f   : > { %v2525_v10 = vadd.f32 %v2524_v36, %v2523_v23 }
 0x2a1   : > { %v2527_v52 = vadd.f32 %v2526_v29, %v2525_v10 }
 0x2a3   : > { %v2529_v14 = vadd.f32 %v2528_v9, %v2527_v52  ;;  %v7679_v9 = vadd.f32 %v5918_v50, %v7581_v5 }
 0x2a5   : > { %v2531_v1 = vadd.f32 %v2530_v39, %v2529_v14  ;;  %v2538_v38 = vsel %vm2500_vm2, %v7679_v9, 0.0 }
 0x2a7   : > { %v2533_v23 = vadd.f32 %v2532_v41, %v2531_v1 }
 0x2a9   : > { %v2535_v29 = vadd.f32 %v2534_v18, %v2533_v23 }
 0x2ab   : > { %v2537_v14 = vadd.f32 %v2536_v56, %v2535_v29 }
 0x2ad   : > { %v2539_v18 = vadd.f32 %v2538_v38, %v2537_v14 }
 0x2ce   : > { %v5921_v53 = vpop.f32.mrf.mxu1 }
 0x2d0   : > { %v2453_v19 = vpop.f32.mrf.mxu1 }
 0x2d1   : > { %v7682_v58 = vadd.f32 %v7581_v5, %v2453_v19  ;;  %v7694_v19 = vadd.f32 %v5921_v53, %v7581_v5 }
 0x2d2   : > { %v5922_v36 = vpop.f32.mrf.mxu1 }
 0x2d3   : > { %v2540_v1 = vsel %vm2500_vm2, %v7682_v58, 0.0  ;;  %v7699_v59 = vadd.f32 %v5922_v36, %v7581_v5 }
 0x2d4   : > { %v2456_v10 = vpop.f32.mrf.mxu1  ;;  %v2541_v50 = vadd.f32 %v2540_v1, %v2539_v18 }
 0x2d5   : > { %v7685_v39 = vadd.f32 %v7581_v5, %v2456_v10  ;;  %v2544_v10 = vsel %vm2500_vm2, %v7694_v19, 0.0  ;;  %v2546_v1 = vsel %vm2500_vm2, %v7699_v59, 0.0 }
 0x2d7   : > { %v2542_v23 = vsel %vm2500_vm2, %v7685_v39, 0.0 }
 0x2d8   : > { %v2543_v29 = vadd.f32 %v2542_v23, %v2541_v50 }
 0x2da   : > { %v2545_v14 = vadd.f32 %v2544_v10, %v2543_v29 }
 0x2dc   : > { %v2547_v18 = vadd.f32 %v2546_v1, %v2545_v14 }
 0x312   : > { %v5925_v52 = vpop.f32.mrf.mxu1 }
 0x313   : > { %v7714_v36 = vadd.f32 %v5925_v52, %v7581_v5 }
 0x314   : > { %v2469_v41 = vpop.f32.mrf.mxu1 }
 0x315   : > { %v7702_v16 = vadd.f32 %v7581_v5, %v2469_v41  ;;  %v2552_v29 = vsel %vm2500_vm2, %v7714_v36, 0.0 }
 0x316   : > { %v5926_v12 = vpop.f32.mrf.mxu1 }
 0x317   : > { %v2548_v53 = vsel %vm2500_vm2, %v7702_v16, 0.0 }
 0x318   : > { %v2472_v56 = vpop.f32.mrf.mxu1  ;;  %v2549_v50 = vadd.f32 %v2548_v53, %v2547_v18 }
 0x319   : > { %v7705_v38 = vadd.f32 %v7581_v5, %v2472_v56  ;;  %v7719_v56 = vadd.f32 %v5926_v12, %v7581_v5 }
 0x31b   : > { %v2550_v23 = vsel %vm2500_vm2, %v7705_v38, 0.0  ;;  %v2554_v1 = vsel %vm2500_vm2, %v7719_v56, 0.0 }
 0x31c   : > { %v2551_v41 = vadd.f32 %v2550_v23, %v2549_v50 }
 0x31e   : > { %v2553_v10 = vadd.f32 %v2552_v29, %v2551_v41 }
 0x320   : > { %v2555_v53 = vadd.f32 %v2554_v1, %v2553_v10 }
 0x34e   : > { %v5929_v15 = vpop.f32.mrf.mxu1 }
 0x34f   : > { %v7729_v23 = vadd.f32 %v5929_v15, %v7581_v5 }
 0x350   : > { %v2485_v51 = vpop.f32.mrf.mxu1 }
 0x351   : > { %v7722_v43 = vadd.f32 %v7581_v5, %v2485_v51  ;;  %v2560_v7 = vsel %vm2500_vm2, %v7729_v23, 0.0 }
 0x352   : > { %v5930_v14 = vpop.f32.mrf.mxu1 }
 0x353   : > { %v2556_v52 = vsel %vm2500_vm2, %v7722_v43, 0.0  ;;  %v7735_v41 = vadd.f32 %v5930_v14, %v7581_v5 }
 0x354   : > { %v2488_v18 = vpop.f32.mrf.mxu1  ;;  %v2557_v50 = vadd.f32 %v2556_v52, %v2555_v53 }
 0x355   : > { %v7732_v12 = vadd.f32 %v7581_v5, %v2488_v18  ;;  %v2562_v10 = vsel %vm2500_vm2, %v7735_v41, 0.0 }
 0x357   : > { %v2558_v51 = vsel %vm2500_vm2, %v7732_v12, 0.0 }
 0x358   : > { %v2559_v29 = vadd.f32 %v2558_v51, %v2557_v50 }
 0x35a   : > { %v2561_v57 = vadd.f32 %v2560_v7, %v2559_v29 }
 0x35c   : > { %v2563_v15 = vadd.f32 %v2562_v10, %v2561_v57 }
 0x35e   : > { %v2564_v1 = vrot.slane %v2563_v15, 4 }
 0x360   : > { %v2565_v45 = vadd.f32 %v2564_v1, %v2563_v15 }
 0x362   : > { %v2566_v18 = vrot.slane %v2565_v45, 2 }
 0x364   : > { %v2567_v27 = vadd.f32 %v2566_v18, %v2565_v45 }
 0x366   : > { %v2568_v52 = vrot.slane %v2567_v27, 1 }
 0x368   : > { %v2569_v53 = vadd.f32 %v2568_v52, %v2567_v27 }
 0x36a   : > { %v7743_v5 = vmul.f32 0.00390625, %v2569_v53 }
 0x36c   : > { %v7747_v14 = vsub.f32 %v7587_v8, %v7743_v5  ;;  %v7751_v50 = vsub.f32 %v7584_v25, %v7743_v5  ;;  %v7755_v7 = vsub.f32 %v7592_v28, %v7743_v5  ;;  %v7759_v57 = vsub.f32 %v7599_v21, %v7743_v5 }
 0x36d   : > { %v7767_v8 = vsub.f32 %v7602_v33, %v7743_v5  ;;  %v7773_v28 = vsub.f32 %v7605_v13, %v7743_v5  ;;  %v7781_v15 = vsub.f32 %v7614_v24, %v7743_v5  ;;  %v7788_v13 = vsub.f32 %v7619_v48, %v7743_v5 }
 0x36e   : > { %v2603_v27 = vmul.f32 %v7747_v14, %v7747_v14  ;;  %v2604_v45 = vmul.f32 %v7751_v50, %v7751_v50  ;;  %v2605_v25 = vmul.f32 %v7755_v7, %v7755_v7  ;;  %v2606_v21 = vmul.f32 %v7759_v57, %v7759_v57 }
 0x36f   : > { %v2607_v33 = vmul.f32 %v7767_v8, %v7767_v8  ;;  %v2608_v52 = vmul.f32 %v7773_v28, %v7773_v28  ;;  %v7795_v24 = vsub.f32 %v7622_v30, %v7743_v5  ;;  %v7802_v48 = vsub.f32 %v7625_v11, %v7743_v5 }
 0x370   : > { %v2635_v51 = vsel %vm2500_vm2, %v2603_v27, 0.0  ;;  %v2636_v29 = vsel %vm2500_vm2, %v2604_v45, 0.0  ;;  %v2638_v1 = vsel %vm2500_vm2, %v2605_v25, 0.0  ;;  %v2640_v53 = vsel %vm2500_vm2, %v2606_v21, 0.0 }
 0x371   : > { %v2637_v10 = vadd.f32 %v2636_v29, %v2635_v51  ;;  %v2609_v45 = vmul.f32 %v7781_v15, %v7781_v15  ;;  %v2642_v25 = vsel %vm2500_vm2, %v2607_v33, 0.0  ;;  %v2610_v29 = vmul.f32 %v7788_v13, %v7788_v13 }
 0x372   : > { %v2644_v21 = vsel %vm2500_vm2, %v2608_v52, 0.0  ;;  %v7809_v30 = vsub.f32 %v7634_v35, %v7743_v5  ;;  %v7820_v52 = vsub.f32 %v7639_v44, %v7743_v5  ;;  %v2612_v35 = vmul.f32 %v7802_v48, %v7802_v48 }
 0x373   : > { %v2639_v18 = vadd.f32 %v2638_v1, %v2637_v10  ;;  %v2611_v1 = vmul.f32 %v7795_v24, %v7795_v24  ;;  %v2646_v33 = vsel %vm2500_vm2, %v2609_v45, 0.0  ;;  %v7827_v45 = vsub.f32 %v7642_v22, %v7743_v5 }
 0x374   : > { %v7834_v44 = vsub.f32 %v7645_v55, %v7743_v5  ;;  %v7841_v22 = vsub.f32 %v7654_v62, %v7743_v5  ;;  %v7884_v60 = vsub.f32 %v7682_v58, %v7743_v5  ;;  %v508_v58 = vld [vmem:[#allocation2 + $0xdc] sm:$0x1] }
 0x375   : > { %v2641_v27 = vadd.f32 %v2640_v53, %v2639_v18  ;;  %v6231_v18 = vmov 0   ;;  %v2648_v53 = vsel %vm2500_vm2, %v2610_v29, 0.0  ;;  %v2652_v29 = vsel %vm2500_vm2, %v2612_v35, 0.0 }
 0x376   : > { %408 = vst.msk [vmem:[#allocation2] sm:$0xf] %vm407_vm0, %v6231_v18  ;;  %443 = vst.msk [vmem:[#allocation2 + $0x48] sm:$0xf] %vm407_vm0, %v6231_v18  ;;  %v2616_v35 = vmul.f32 %v7834_v44, %v7834_v44 }
 0x377   : > { %v2643_v51 = vadd.f32 %v2642_v25, %v2641_v27  ;;  %475 = vst.msk [vmem:[#allocation2 + $0x90] sm:$0xf] %vm407_vm0, %v6231_v18  ;;  %507 = vst.msk [vmem:[#allocation2 + $0xd8] sm:$0xf] %vm407_vm0, %v6231_v18  ;;  %v2613_v25 = vmul.f32 %v7809_v30, %v7809_v30 }
 0x379   : > { %v2645_v10 = vadd.f32 %v2644_v21, %v2643_v51  ;;  %v2650_v51 = vsel %vm2500_vm2, %v2611_v1, 0.0  ;;  %v2654_v1 = vsel %vm2500_vm2, %v2613_v25, 0.0  ;;  %v2617_v25 = vmul.f32 %v7841_v22, %v7841_v22 }
 0x37b   : > { %v2647_v11 = vadd.f32 %v2646_v33, %v2645_v10  ;;  %v2614_v10 = vmul.f32 %v7820_v52, %v7820_v52 }
 0x37d   : > { %v2649_v27 = vadd.f32 %v2648_v53, %v2647_v11  ;;  %v2615_v11 = vmul.f32 %v7827_v45, %v7827_v45  ;;  %v2656_v62 = vsel %vm2500_vm2, %v2614_v10, 0.0  ;;  %v7870_v10 = vsub.f32 %v7674_v54, %v7743_v5  ;;  %v447_v61 = vld [vmem:[#allocation2 + $0x48] sm:$0x1] }
 0x37e   : > { %v479_v18 = vld [vmem:[#allocation2 + $0x90] sm:$0x1] }
 0x37f   : > { %v2651_v21 = vadd.f32 %v2650_v51, %v2649_v27  ;;  %v480_v55 = vsel %vm7037_vm1, 0, %v479_v18  ;;  %v7850_v27 = vsub.f32 %v7659_v63, %v7743_v5 }
 0x380   : > { %481 = vst [vmem:[#allocation2 + $0x90] sm:$0x1] %v480_v55  ;;  %v2660_v55 = vsel %vm2500_vm2, %v2616_v35, 0.0 }
 0x381   : > { %v2653_v33 = vadd.f32 %v2652_v29, %v2651_v21  ;;  %v476_v21 = vld [vmem:[#allocation2 + $0x94] sm:$0x1]  ;;  %v7857_v29 = vsub.f32 %v7662_v34, %v7743_v5  ;;  %v2618_v34 = vmul.f32 %v7850_v27, %v7850_v27 }
 0x382   : > { %v477_v63 = vsel %vm7037_vm1, 0, %v476_v21 }
 0x383   : > { %v2655_v53 = vadd.f32 %v2654_v1, %v2653_v33  ;;  %v2658_v33 = vsel %vm2500_vm2, %v2615_v11, 0.0  ;;  %478 = vst [vmem:[#allocation2 + $0x94] sm:$0x1] %v477_v63  ;;  %v7866_v1 = vsub.f32 %v7665_v40, %v7743_v5  ;;  %v2619_v11 = vmul.f32 %v7857_v29, %v7857_v29  ;;  %v511_v63 = vld [vmem:[#allocation2 + $0xd8] sm:$0x1] }
 0x384   : > { %v7880_v40 = vsub.f32 %v7679_v9, %v7743_v5 }
 0x385   : > { %v2657_v51 = vadd.f32 %v2656_v62, %v2655_v53  ;;  %v2662_v62 = vsel %vm2500_vm2, %v2617_v25, 0.0  ;;  %v2620_v35 = vmul.f32 %v7866_v1, %v7866_v1  ;;  %v2664_v25 = vsel %vm2500_vm2, %v2618_v34, 0.0 }
 0x386   : > { %v2666_v31 = vsel %vm2500_vm2, %v2619_v11, 0.0  ;;  %v509_v34 = vsel %vm7037_vm1, 0, %v508_v58  ;;  %v2622_v11 = vmul.f32 %v7880_v40, %v7880_v40 }
 0x387   : > { %v2659_v18 = vadd.f32 %v2658_v33, %v2657_v51  ;;  %v3863_v51 = vld [vmem:[#allocation2 + $0x90] sm:$0xf]  ;;  %510 = vst [vmem:[#allocation2 + $0xdc] sm:$0x1] %v509_v34 }
 0x388   : > { %v3880_v33 = vshrl.u32 %v3863_v51, 16  ;;  %v3883_v54 = vshll.u32 %v3863_v51, 16 }
 0x389   : > { %v2661_v53 = vadd.f32 %v2660_v55, %v2659_v18  ;;  %v2621_v18 = vmul.f32 %v7870_v10, %v7870_v10  ;;  %v415_v55 = vld [vmem:[#allocation2] sm:$0x1] }
 0x38a   : > { %v3882_v51 = vrot.slane %v3880_v33, 4  ;;  %v3864_v47 = vld [vmem:[#allocation2 + $0x94] sm:$0x1]  ;;  %v3885_v17 = vrot.slane %v3883_v54, 5  ;;  %v2668_v33 = vsel %vm2500_vm2, %v2620_v35, 0.0 }
 0x38b   : > { %v2663_v21 = vadd.f32 %v2662_v62, %v2661_v53  ;;  %v416_v53 = vsel %vm7037_vm1, 0, %v415_v55  ;;  %v448_v62 = vsel %vm7037_vm1, 0, %v447_v61  ;;  %v3889_v2 = vshll.u32 %v3864_v47, 16 }
 0x38c   : > { %417 = vst [vmem:[#allocation2] sm:$0x1] %v416_v53  ;;  %449 = vst [vmem:[#allocation2 + $0x48] sm:$0x1] %v448_v62  ;;  %v7902_v61 = vsub.f32 %v7685_v39, %v7743_v5  ;;  %v3886_v54 = vor.u32 %v3885_v17, %v3882_v51  ;;  %v7909_v62 = vsub.f32 %v7694_v19, %v7743_v5 }
 0x38d   : > { %v2665_v9 = vadd.f32 %v2664_v25, %v2663_v21  ;;  %v512_v21 = vsel %vm7037_vm1, 0, %v511_v63  ;;  %v3891_v53 = vrot.slane %v3889_v2, 5  ;;  %v2623_v47 = vmul.f32 %v7884_v60, %v7884_v60 }
 0x38e   : > { %513 = vst [vmem:[#allocation2 + $0xd8] sm:$0x1] %v512_v21  ;;  %v3887_v63 = vrot.slane %v3886_v54, 4  ;;  %v2624_v17 = vmul.f32 %v7902_v61, %v7902_v61  ;;  %v2672_v2 = vsel %vm2500_vm2, %v2622_v11, 0.0  ;;  %v2625_v51 = vmul.f32 %v7909_v62, %v7909_v62  ;;  %v4024_v34 = vld [vmem:[#allocation2 + $0xdc] sm:$0x1] }
 0x38f   : > { %v2667_v25 = vadd.f32 %v2666_v31, %v2665_v9  ;;  %v2670_v31 = vsel %vm2500_vm2, %v2621_v18, 0.0  ;;  %v7916_v9 = vsub.f32 %v7699_v59, %v7743_v5  ;;  %v7926_v18 = vsub.f32 %v7702_v16, %v7743_v5 }
 0x390   : > { %v3892_v19 = vsel %vm6371_vm3, %v3887_v63, %v3891_v53  ;;  %v2674_v59 = vsel %vm2500_vm2, %v2623_v47, 0.0  ;;  %v7933_v54 = vsub.f32 %v7705_v38, %v7743_v5  ;;  %v2676_v16 = vsel %vm2500_vm2, %v2624_v17, 0.0 }
 0x391   : > { %v2669_v55 = vadd.f32 %v2668_v33, %v2667_v25  ;;  %3991 = vrot.lane.b32.xlu0 %v3892_v19, %s6223_s15  ;;  %v4049_v33 = vshll.u32 %v4024_v34, 16  ;;  %v7940_v47 = vsub.f32 %v7714_v36, %v7743_v5 }
 0x392   : > { %v2628_v17 = vmul.f32 %v7933_v54, %v7933_v54 }
 0x393   : > { %v2671_v39 = vadd.f32 %v2670_v31, %v2669_v55  ;;  %v2626_v55 = vmul.f32 %v7916_v9, %v7916_v9 }
 0x395   : > { %v2673_v35 = vadd.f32 %v2672_v2, %v2671_v39  ;;  %v4023_v58 = vld [vmem:[#allocation2 + $0xd8] sm:$0xf]  ;;  %v2627_v39 = vmul.f32 %v7926_v18, %v7926_v18  ;;  %v2678_v2 = vsel %vm2500_vm2, %v2625_v51, 0.0  ;;  %v2629_v51 = vmul.f32 %v7940_v47, %v7940_v47 }
 0x396   : > { %v4040_v25 = vshrl.u32 %v4023_v58, 16  ;;  %v4043_v11 = vshll.u32 %v4023_v58, 16  ;;  %v2680_v58 = vsel %vm2500_vm2, %v2626_v55, 0.0 }
 0x397   : > { %v2675_v21 = vadd.f32 %v2674_v59, %v2673_v35  ;;  %v4051_v35 = vrot.slane %v4049_v33, 5  ;;  %v7947_v59 = vsub.f32 %v7719_v56, %v7743_v5  ;;  %v2600_v33 = vsub.f32 %v7732_v12, %v7743_v5 }
 0x398   : > { %v4042_v31 = vrot.slane %v4040_v25, 4  ;;  %v4045_v63 = vrot.slane %v4043_v11, 5  ;;  %v2682_v25 = vsel %vm2500_vm2, %v2627_v39, 0.0  ;;  %v7976_v12 = vsub.f32 %v7735_v41, %v7743_v5 }
 0x399   : > { %v2677_v53 = vadd.f32 %v2676_v16, %v2675_v21  ;;  %v7954_v21 = vsub.f32 %v7722_v43, %v7743_v5  ;;  %v2630_v55 = vmul.f32 %v7947_v59, %v7947_v59  ;;  %v2684_v16 = vsel %vm2500_vm2, %v2628_v17, 0.0 }
 0x39a   : > { %v4046_v38 = vor.u32 %v4045_v63, %v4042_v31  ;;  %v2686_v63 = vsel %vm2500_vm2, %v2629_v51, 0.0 }
 0x39b   : > { %v2679_v19 = vadd.f32 %v2678_v2, %v2677_v53  ;;  %v7969_v53 = vsub.f32 %v7729_v23, %v7743_v5  ;;  %v2631_v31 = vmul.f32 %v7954_v21, %v7954_v21  ;;  %v2632_v2 = vmul.f32 %v2600_v33, %v2600_v33 }
 0x39c   : > { %v4047_v36 = vrot.slane %v4046_v38, 4 }
 0x39d   : > { %v2681_v34 = vadd.f32 %v2680_v58, %v2679_v19  ;;  %v2688_v19 = vsel %vm2500_vm2, %v2630_v55, 0.0  ;;  %v2690_v23 = vsel %vm2500_vm2, %v2631_v31, 0.0  ;;  %v2634_v58 = vmul.f32 %v7976_v12, %v7976_v12 }
 0x39e   : > { %v4052_v56 = vsel %vm6371_vm3, %v4047_v36, %v4051_v35  ;;  %v2633_v35 = vmul.f32 %v7969_v53, %v7969_v53 }
 0x39f   : > { %v2683_v11 = vadd.f32 %v2682_v25, %v2681_v34  ;;  %4151 = vrot.lane.b32.xlu0 %v4052_v56, %s6225_s17  ;;  %v2692_v34 = vsel %vm2500_vm2, %v2632_v2, 0.0  ;;  %v2696_v5 = vsel %vm2500_vm2, %v2634_v58, 0.0  ;;  %v2707_v2 = vld [vmem:[%s9636_s3] sm:$0x1] }
 0x3a0   : > { %v2694_v51 = vsel %vm2500_vm2, %v2633_v35, 0.0 }
 0x3a1   : > { %v2685_v43 = vadd.f32 %v2684_v16, %v2683_v11 }
 0x3a3   : > { %v2687_v39 = vadd.f32 %v2686_v63, %v2685_v43 }
 0x3a5   : > { %v2689_v38 = vadd.f32 %v2688_v19, %v2687_v39  ;;  %v2709_v19 = vlaneseq }
 0x3a7   : > { %v2691_v17 = vadd.f32 %v2690_v23, %v2689_v38  ;;  %v7987_v38 = vshrl.u32 %v2709_v19, 7 }
 0x3a9   : > { %v2693_v36 = vadd.f32 %v2692_v34, %v2691_v17  ;;  %9797 = vst [vmem:[#allocation39_spill] sm:$0xff] %v7987_v38  ;;  %v9683_v35 = vsub.s32 0, %v7987_v38  ;;  %v8000_v34 = vld [vmem:[%s9637_s4] ss:$0 sm:$0xff] }
 0x3ab   : > { %v2695_v41 = vadd.f32 %v2694_v51, %v2693_v36 }
 0x3ad   : > { %v2697_v25 = vadd.f32 %v2696_v5, %v2695_v41 }
 0x3af   : > { %v2698_v11 = vrot.slane %v2697_v25, 4 }
 0x3b1   : > { %v2699_v56 = vadd.f32 %v2698_v11, %v2697_v25 }
 0x3b3   : > { %v2700_v55 = vrot.slane %v2699_v56, 2 }
 0x3b5   : > { %v2701_v16 = vadd.f32 %v2700_v55, %v2699_v56 }
 0x3b7   : > { %v2702_v43 = vrot.slane %v2701_v16, 1 }
 0x3b9   : > { %v2703_v63 = vadd.f32 %v2702_v43, %v2701_v16 }
 0x3bb   : > { %v2704_v31 = vmul.f32 0.00390625, %v2703_v63 }
 0x3bd   : > { %v2705_v39 = vadd.f32 1e-05, %v2704_v31 }
 0x3bf   : > { %5999 = vrsqrt.f32 %v2705_v39 }
 0x3cc   : > { %v6000_v23 = vpop.eup %5999 }
 0x3cd   : > { %v2708_v17 = vmul.f32 %v6000_v23, %v2707_v2 }
 0x3cf   : > { %v7995_v58 = vrot.slane %v2708_v17, %v9683_v35 }
 0x3d1   : > { %v2742_v36 = vmul.f32 %v7995_v58, %v2600_v33  ;;  %v2713_v41 = vmul.f32 %v7995_v58, %v7747_v14  ;;  %v2714_v5 = vmul.f32 %v7995_v58, %v7751_v50  ;;  %v2715_v25 = vmul.f32 %v7995_v58, %v7755_v7 }
 0x3d2   : > { %v2716_v11 = vmul.f32 %v7995_v58, %v7759_v57  ;;  %v2717_v56 = vmul.f32 %v7995_v58, %v7767_v8  ;;  %v2718_v33 = vmul.f32 %v7995_v58, %v7773_v28  ;;  %v2719_v14 = vmul.f32 %v7995_v58, %v7781_v15 }
 0x3d3   : > { %v8004_v51 = vadd.f32 %v8000_v34, %v2742_v36  ;;  %v2720_v50 = vmul.f32 %v7995_v58, %v7788_v13  ;;  %v2722_v7 = vmul.f32 %v7995_v58, %v7802_v48  ;;  %v2725_v57 = vmul.f32 %v7995_v58, %v7827_v45 }
 0x3d4   : > { %v2726_v8 = vmul.f32 %v7995_v58, %v7834_v44  ;;  %v2727_v28 = vmul.f32 %v7995_v58, %v7841_v22  ;;  %v2728_v16 = vmul.f32 %v7995_v58, %v7850_v27  ;;  %v2729_v15 = vmul.f32 %v7995_v58, %v7857_v29 }
 0x3d5   : > { %v2813_v55 = vmin.f32 %v8004_v51, 20.0  ;;  %v2730_v13 = vmul.f32 %v7995_v58, %v7866_v1  ;;  %v2731_v48 = vmul.f32 %v7995_v58, %v7870_v10  ;;  %v2732_v45 = vmul.f32 %v7995_v58, %v7880_v40 }
 0x3d6   : > { %v2733_v44 = vmul.f32 %v7995_v58, %v7884_v60  ;;  %v2734_v22 = vmul.f32 %v7995_v58, %v7902_v61  ;;  %v2735_v27 = vmul.f32 %v7995_v58, %v7909_v62  ;;  %v2736_v29 = vmul.f32 %v7995_v58, %v7916_v9 }
 0x3d7   : > { %v2874_v43 = vmul.f32 1.442695, %v2813_v55  ;;  %v2737_v1 = vmul.f32 %v7995_v58, %v7926_v18  ;;  %v2739_v10 = vmul.f32 %v7995_v58, %v7940_v47  ;;  %v8054_v40 = vadd.f32 %v8000_v34, %v2713_v41 }
 0x3d8   : > { %v8057_v60 = vadd.f32 %v8000_v34, %v2714_v5  ;;  %v8060_v61 = vadd.f32 %v8000_v34, %v2715_v25  ;;  %v8063_v62 = vadd.f32 %v8000_v34, %v2716_v11  ;;  %v8066_v9 = vadd.f32 %v8000_v34, %v2717_v56 }
 0x3d9   : > { %6001 = vpow2.f32 %v2874_v43  ;;  %v8069_v18 = vadd.f32 %v8000_v34, %v2718_v33  ;;  %v8072_v47 = vadd.f32 %v8000_v34, %v2719_v14  ;;  %v8075_v63 = vadd.f32 %v8000_v34, %v2720_v50 }
 0x3da   : > { %9798 = vst [vmem:[#allocation40_spill] sm:$0xff] %v8066_v9  ;;  %v2740_v31 = vmul.f32 %v7995_v58, %v7947_v59  ;;  %v2741_v39 = vmul.f32 %v7995_v58, %v7954_v21  ;;  %v2743_v19 = vmul.f32 %v7995_v58, %v7969_v53  ;;  %v2744_v2 = vmul.f32 %v7995_v58, %v7976_v12 }
 0x3db   : > { %9799 = vst [vmem:[#allocation41_spill] sm:$0xff] %v8069_v18  ;;  %9800 = vst [vmem:[#allocation42_spill] sm:$0xff] %v8072_v47  ;;  %v8086_v23 = vadd.f32 %v8000_v34, %v2725_v57  ;;  %v8089_v17 = vadd.f32 %v8000_v34, %v2726_v8  ;;  %v8092_v36 = vadd.f32 %v8000_v34, %v2727_v28 }
 0x3dc   : > { %9801 = vst [vmem:[#allocation38_spill] sm:$0xff] %v8075_v63  ;;  %v8095_v59 = vadd.f32 %v8000_v34, %v2728_v16  ;;  %v8098_v21 = vadd.f32 %v8000_v34, %v2729_v15  ;;  %v8101_v53 = vadd.f32 %v8000_v34, %v2730_v13  ;;  %v8104_v12 = vadd.f32 %v8000_v34, %v2731_v48 }
 0x3dd   : > { %9802 = vst [vmem:[#allocation36_spill] sm:$0xff] %v8086_v23  ;;  %9803 = vst [vmem:[#allocation43_spill] sm:$0xff] %v8089_v17  ;;  %v8107_v41 = vadd.f32 %v8000_v34, %v2732_v45  ;;  %v8110_v5 = vadd.f32 %v8000_v34, %v2733_v44  ;;  %v8113_v25 = vadd.f32 %v8000_v34, %v2734_v22  ;;  %v2784_v45 = vmin.f32 %v8054_v40, 20.0 }
 0x3de   : > { %9804 = vst [vmem:[#allocation37_spill] sm:$0xff] %v8092_v36  ;;  %9805 = vst [vmem:[#allocation44_spill] sm:$0xff] %v8095_v59  ;;  %v8116_v11 = vadd.f32 %v8000_v34, %v2735_v27  ;;  %v8119_v56 = vadd.f32 %v8000_v34, %v2736_v29  ;;  %v8122_v33 = vadd.f32 %v8000_v34, %v2737_v1  ;;  %v2787_v27 = vmin.f32 %v8063_v62, 20.0 }
 0x3df   : > { %9806 = vst [vmem:[#allocation45_spill] sm:$0xff] %v8098_v21  ;;  %9807 = vst [vmem:[#allocation46_spill] sm:$0xff] %v8101_v53  ;;  %v8125_v55 = vadd.f32 %v8000_v34, %v2739_v10  ;;  %v8128_v14 = vadd.f32 %v8000_v34, %v2740_v31  ;;  %v2721_v50 = vmul.f32 %v7995_v58, %v7795_v24  ;;  %v2788_v1 = vmin.f32 %v8066_v9, 20.0 }
 0x3e0   : > { %9808 = vst [vmem:[#allocation47_spill] sm:$0xff] %v8104_v12  ;;  %9809 = vst [vmem:[#allocation48_spill] sm:$0xff] %v8107_v41  ;;  %v8133_v57 = vadd.f32 %v8000_v34, %v2741_v39  ;;  %v8136_v8 = vadd.f32 %v8000_v34, %v2743_v19  ;;  %v8139_v28 = vadd.f32 %v8000_v34, %v2744_v2  ;;  %v2789_v10 = vmin.f32 %v8069_v18, 20.0  ;;  %v3480_v18 = vld [vmem:[#allocation2 + $0x54] sm:$0x1] }
 0x3e1   : > { %9810 = vst [vmem:[#allocation49_spill] sm:$0xff] %v8110_v5  ;;  %9811 = vst [vmem:[#allocation50_spill] sm:$0xff] %v8113_v25  ;;  %v8142_v16 = vadd.f32 %v8000_v34, %v2722_v7  ;;  %v2723_v43 = vmul.f32 %v7995_v58, %v7809_v30  ;;  %v2724_v15 = vmul.f32 %v7995_v58, %v7820_v52  ;;  %v2790_v39 = vmin.f32 %v8072_v47, 20.0 }
 0x3e2   : > { %9812 = vst [vmem:[#allocation51_spill] sm:$0xff] %v8116_v11  ;;  %9813 = vst [vmem:[#allocation52_spill] sm:$0xff] %v8119_v56  ;;  %v2738_v24 = vmul.f32 %v7995_v58, %v7933_v54  ;;  %v8151_v13 = vadd.f32 %v8000_v34, %v2721_v50  ;;  %v2785_v54 = vmin.f32 %v8057_v60, 20.0  ;;  %v2786_v58 = vmin.f32 %v8060_v61, 20.0 }
 0x3e3   : > { %9814 = vst [vmem:[#allocation53_spill] sm:$0xff] %v8125_v55  ;;  %9815 = vst [vmem:[#allocation54_spill] sm:$0xff] %v8128_v14  ;;  %v2793_v44 = vmin.f32 %v8142_v16, 20.0  ;;  %v8156_v7 = vadd.f32 %v8000_v34, %v2723_v43  ;;  %v8159_v30 = vadd.f32 %v8000_v34, %v2724_v15  ;;  %v2791_v19 = vmin.f32 %v8075_v63, 20.0 }
 0x3e4   : > { %9816 = vst [vmem:[#allocation55_spill] sm:$0xff] %v8133_v57  ;;  %9817 = vst [vmem:[#allocation56_spill] sm:$0xff] %v8136_v8  ;;  %v8162_v52 = vadd.f32 %v8000_v34, %v2738_v24  ;;  %v2792_v31 = vmin.f32 %v8151_v13, 20.0  ;;  %v2816_v34 = vmul.f32 1.442695, %v2784_v45  ;;  %v2796_v24 = vmin.f32 %v8086_v23, 20.0 }
 0x3e5   : > { %9818 = vst [vmem:[#allocation57_spill] sm:$0xff] %v8139_v28  ;;  %v2834_v2 = vmul.f32 1.442695, %v2793_v44  ;;  %v2794_v43 = vmin.f32 %v8156_v7, 20.0  ;;  %v2795_v15 = vmin.f32 %v8159_v30, 20.0  ;;  %v2799_v38 = vmin.f32 %v8095_v59, 20.0 }
 0x3e6   : > { %v6002_v48 = vpop.eup %6001  ;;  %v2818_v35 = vmul.f32 1.442695, %v2785_v54  ;;  %v2820_v44 = vmul.f32 1.442695, %v2786_v58  ;;  %v2832_v45 = vmul.f32 1.442695, %v2792_v31 }
 0x3e7   : > { %v2909_v22 = vadd.f32 1.0, %v6002_v48  ;;  %v2797_v48 = vmin.f32 %v8089_v17, 20.0  ;;  %6003 = vpow2.f32 %v2834_v2  ;;  %v2800_v49 = vmin.f32 %v8098_v21, 20.0 }
 0x3e8   : > { %v2801_v37 = vmin.f32 %v8101_v53, 20.0  ;;  %v2822_v0 = vmul.f32 1.442695, %v2787_v27  ;;  %v2802_v26 = vmin.f32 %v8104_v12, 20.0  ;;  %v2803_v42 = vmin.f32 %v8107_v41, 20.0 }
 0x3e9   : > { %v2941_v29 = vmul.f32 %v2909_v22, %v2909_v22  ;;  %v2798_v22 = vmin.f32 %v8092_v36, 20.0  ;;  %v2824_v4 = vmul.f32 1.442695, %v2788_v1  ;;  %v2804_v54 = vmin.f32 %v8110_v5, 20.0 }
 0x3ea   : > { %v2805_v2 = vmin.f32 %v8113_v25, 20.0  ;;  %v2826_v3 = vmul.f32 1.442695, %v2789_v10  ;;  %v2806_v58 = vmin.f32 %v8116_v11, 20.0  ;;  %v2807_v31 = vmin.f32 %v8119_v56, 20.0 }
 0x3eb   : > { %v8172_v50 = vadd.f32 1.0, %v2941_v29  ;;  %v2828_v6 = vmul.f32 1.442695, %v2790_v39  ;;  %v5769_v27 = vadd.f32 -1.0, %v2941_v29  ;;  %v2830_v46 = vmul.f32 1.442695, %v2791_v19 }
 0x3ec   : > { %v2809_v1 = vmin.f32 %v8162_v52, 20.0  ;;  %v2836_v32 = vmul.f32 1.442695, %v2794_v43  ;;  %v2811_v10 = vmin.f32 %v8128_v14, 20.0  ;;  %v2838_v11 = vmul.f32 1.442695, %v2795_v15 }
 0x3ed   : > { %6005 = vrcp.f32 %v8172_v50  ;;  %v2814_v39 = vmin.f32 %v8136_v8, 20.0  ;;  %v2815_v29 = vmin.f32 %v8139_v28, 20.0  ;;  %v2842_v19 = vmul.f32 1.442695, %v2797_v48 }
 0x3ee   : > { %6007 = vpow2.f32 %v2816_v34  ;;  %v2808_v34 = vmin.f32 %v8122_v33, 20.0  ;;  %v2844_v56 = vmul.f32 1.442695, %v2798_v22  ;;  %v2848_v43 = vmul.f32 1.442695, %v2800_v49 }
 0x3ef   : > { %6009 = vpow2.f32 %v2832_v45  ;;  %v2810_v45 = vmin.f32 %v8125_v55, 20.0  ;;  %v2846_v55 = vmul.f32 1.442695, %v2799_v38  ;;  %v2852_v14 = vmul.f32 1.442695, %v2802_v26 }
 0x3f0   : > { %6011 = vpow2.f32 %v2818_v35  ;;  %v2812_v35 = vmin.f32 %v8133_v57, 20.0  ;;  %v2854_v25 = vmul.f32 1.442695, %v2803_v42  ;;  %v2856_v57 = vmul.f32 1.442695, %v2804_v54 }
 0x3f1   : > { %6013 = vpow2.f32 %v2820_v44  ;;  %v2840_v44 = vmul.f32 1.442695, %v2796_v24  ;;  %v2858_v15 = vmul.f32 1.442695, %v2805_v2  ;;  %v2860_v8 = vmul.f32 1.442695, %v2806_v58 }
 0x3f2   : > { %6015 = vpow2.f32 %v2822_v0  ;;  %v3165_v0 = vmul.f32 %v5769_v27, %v8004_v51  ;;  %v8197_v5 = vmul.f32 1.442695, %v2807_v31  ;;  %v8199_v51 = vmul.f32 1.442695, %v2808_v34 }
 0x3f3   : > { %6017 = vpow2.f32 %v2824_v4  ;;  %v2850_v4 = vmul.f32 1.442695, %v2801_v37  ;;  %v8201_v48 = vmul.f32 1.442695, %v2809_v1  ;;  %v8204_v26 = vmul.f32 1.442695, %v2810_v45 }
 0x3f4   : > { %6019 = vpow2.f32 %v2826_v3  ;;  %v6004_v3 = vpop.eup %6003  ;;  %v8206_v37 = vmul.f32 1.442695, %v2811_v10  ;;  %v8208_v38 = vmul.f32 1.442695, %v2812_v35  ;;  %v8212_v2 = vmul.f32 1.442695, %v2815_v29 }
 0x3f5   : > { %6021 = vpow2.f32 %v2828_v6  ;;  %v2889_v24 = vadd.f32 1.0, %v6004_v3 }
 0x3f6   : > { %6023 = vpow2.f32 %v2830_v46 }
 0x3f7   : > { %6025 = vpow2.f32 %v2836_v32  ;;  %v2921_v49 = vmul.f32 %v2889_v24, %v2889_v24 }
 0x3f8   : > { %6027 = vpow2.f32 %v2838_v11  ;;  %v8210_v11 = vmul.f32 1.442695, %v2814_v39 }
 0x3f9   : > { %6029 = vpow2.f32 %v2840_v44  ;;  %v8214_v31 = vadd.f32 1.0, %v2921_v49  ;;  %v5749_v27 = vadd.f32 -1.0, %v2921_v49 }
 0x3fa   : > { %v6006_v6 = vpop.eup %6005  ;;  %6031 = vpow2.f32 %v2842_v19 }
 0x3fb   : > { %v6008_v46 = vpop.eup %6007  ;;  %v3037_v32 = vmul.f32 %v6006_v6, %v8172_v50  ;;  %6033 = vpow2.f32 %v2844_v56 }
 0x3fc   : > { %v6010_v42 = vpop.eup %6009  ;;  %6035 = vpow2.f32 %v2846_v55  ;;  %v2880_v56 = vadd.f32 1.0, %v6008_v46  ;;  %v8218_v55 = vmul.f32 %v5749_v27, %v8142_v16 }
 0x3fd   : > { %v6012_v22 = vpop.eup %6011  ;;  %v3069_v54 = vsub.f32 2.0, %v3037_v32  ;;  %v2888_v58 = vadd.f32 1.0, %v6010_v42  ;;  %6037 = vpow2.f32 %v2848_v43 }
 0x3fe   : > { %v6014_v50 = vpop.eup %6013  ;;  %6039 = vpow2.f32 %v2850_v4  ;;  %v2881_v10 = vadd.f32 1.0, %v6012_v22 }
 0x3ff   : > { %v6016_v34 = vpop.eup %6015  ;;  %v3101_v1 = vmul.f32 %v6006_v6, %v3069_v54  ;;  %v2920_v45 = vmul.f32 %v2888_v58, %v2888_v58  ;;  %6041 = vpow2.f32 %v2852_v14  ;;  %v2882_v39 = vadd.f32 1.0, %v6014_v50 }
 0x400   : > { %v6018_v35 = vpop.eup %6017  ;;  %6043 = vrcp.f32 %v8214_v31  ;;  %v2883_v29 = vadd.f32 1.0, %v6016_v34  ;;  %v8222_v14 = vmul.f32 %v2880_v56, %v2880_v56  ;;  %v8228_v42 = vmul.f32 %v2881_v10, %v2881_v10 }
 0x401   : > { %v6020_v44 = vpop.eup %6019  ;;  %v3197_v19 = vmul.f32 %v3165_v0, %v3101_v1  ;;  %v8220_v43 = vadd.f32 1.0, %v2920_v45  ;;  %v5748_v3 = vadd.f32 -1.0, %v2920_v45  ;;  %6045 = vpow2.f32 %v2854_v25 }
 0x402   : > { %v6022_v4 = vpop.eup %6021  ;;  %6047 = vpow2.f32 %v2856_v57  ;;  %v2884_v6 = vadd.f32 1.0, %v6018_v35  ;;  %v2885_v24 = vadd.f32 1.0, %v6020_v44  ;;  %v8230_v25 = vmul.f32 %v2882_v39, %v2882_v39  ;;  %v3829_v39 = vld [vmem:[#allocation2 + $0x108] sm:$0xf] }
 0x403   : > { %v6024_v46 = vpop.eup %6023  ;;  %v5864_v32 = vpack.c.bf16 %v3197_v19, %v3197_v19  ;;  %6049 = vrcp.f32 %v8220_v43  ;;  %v8226_v16 = vmul.f32 %v5748_v3, %v8151_v13  ;;  %v2886_v49 = vadd.f32 1.0, %v6022_v4 }
 0x404   : > { %v6026_v0 = vpop.eup %6025  ;;  %6051 = vpow2.f32 %v2858_v15  ;;  %v2887_v22 = vadd.f32 1.0, %v6024_v46  ;;  %v8232_v50 = vmul.f32 %v2883_v29, %v2883_v29  ;;  %v8235_v34 = vmul.f32 %v2884_v6, %v2884_v6  ;;  %v3832_v29 = vld [vmem:[#allocation2 + $0x10c] sm:$0x1] }
 0x405   : > { %v6028_v57 = vpop.eup %6027  ;;  %v3759_v54 = vshrl.u32 %v5864_v32, 16  ;;  %6053 = vpow2.f32 %v2860_v8  ;;  %v2890_v58 = vadd.f32 1.0, %v6026_v0  ;;  %v3762_v56 = vshll.u32 %v5864_v32, 16 }
 0x406   : > { %v6030_v27 = vpop.eup %6029  ;;  %6055 = vpow2.f32 %v8197_v5  ;;  %v2891_v13 = vadd.f32 1.0, %v6028_v57  ;;  %v8238_v10 = vmul.f32 %v2885_v24, %v2885_v24  ;;  %v8248_v6 = vmul.f32 %v2886_v49, %v2886_v49 }
 0x407   : > { %v6032_v1 = vpop.eup %6031  ;;  %v3761_v45 = vrot.slane %v3759_v54, 7  ;;  %6057 = vpow2.f32 %v8199_v51  ;;  %v2892_v15 = vadd.f32 1.0, %v6030_v27  ;;  %v2922_v19 = vmul.f32 %v2890_v58, %v2890_v58 }
 0x408   : > { %v6034_v35 = vpop.eup %6033  ;;  %6059 = vpow2.f32 %v8201_v48  ;;  %v2923_v5 = vmul.f32 %v2891_v13, %v2891_v13  ;;  %v2893_v44 = vadd.f32 1.0, %v6032_v1 }
 0x409   : > { %v6036_v3 = vpop.eup %6035  ;;  %v3764_v4 = vor.u32 %v3762_v56, %v3761_v45  ;;  %v3765_v51 = vrot.slane %v3761_v45, 4  ;;  %6061 = vpow2.f32 %v8204_v26  ;;  %v2894_v0 = vadd.f32 1.0, %v6034_v35 }
 0x40a   : > { %v6038_v24 = vpop.eup %6037  ;;  %6063 = vpow2.f32 %v8206_v37  ;;  %v8251_v46 = vadd.f32 1.0, %v2923_v5  ;;  %v5751_v32 = vadd.f32 -1.0, %v2923_v5  ;;  %v2895_v58 = vadd.f32 1.0, %v6036_v3 }
 0x40b   : > { %v6040_v57 = vpop.eup %6039  ;;  %v3830_v48 = vsel %vm8242_vm15, %v3764_v4, %v3829_v39  ;;  %v3833_v54 = vsel %vm7037_vm1, %v3765_v51, %v3832_v29  ;;  %6065 = vpow2.f32 %v8208_v38  ;;  %v2896_v49 = vadd.f32 1.0, %v6038_v24 }
 0x40c   : > { %v6042_v26 = vpop.eup %6041  ;;  %3831 = vst [vmem:[#allocation2 + $0x108] sm:$0xf] %v3830_v48  ;;  %3834 = vst [vmem:[#allocation2 + $0x10c] sm:$0x1] %v3833_v54  ;;  %6067 = vpow2.f32 %v8210_v11  ;;  %v8260_v37 = vmul.f32 %v5751_v32, %v8159_v30  ;;  %v8262_v27 = vadd.f32 1.0, %v2922_v19  ;;  %v2897_v13 = vadd.f32 1.0, %v6040_v57 }
 0x40d   : > { %v6044_v56 = vpop.eup %6043  ;;  %6069 = vpow2.f32 %v8212_v2  ;;  %v2898_v1 = vadd.f32 1.0, %v6042_v26  ;;  %v5750_v45 = vadd.f32 -1.0, %v2922_v19  ;;  %v8267_v39 = vmul.f32 %v2887_v22, %v2887_v22 }
 0x40e   : > { %v6046_v35 = vpop.eup %6045  ;;  %v3017_v38 = vmul.f32 %v6044_v56, %v8214_v31  ;;  %6071 = vrcp.f32 %v8251_v46  ;;  %v8269_v11 = vmul.f32 %v2892_v15, %v2892_v15  ;;  %v8275_v2 = vmul.f32 %v2893_v44, %v2893_v44 }
 0x40f   : > { %v6048_v30 = vpop.eup %6047  ;;  %v2899_v29 = vadd.f32 1.0, %v6046_v35  ;;  %6073 = vrcp.f32 %v8262_v27  ;;  %v8273_v5 = vmul.f32 %v5750_v45, %v8156_v7  ;;  %v8277_v51 = vmul.f32 %v2894_v0, %v2894_v0 }
 0x410   : > { %v6050_v3 = vpop.eup %6049  ;;  %v3049_v19 = vsub.f32 2.0, %v3017_v38  ;;  %v2900_v4 = vadd.f32 1.0, %v6048_v30  ;;  %v8279_v31 = vmul.f32 %v2895_v58, %v2895_v58  ;;  %v8282_v24 = vmul.f32 %v2896_v49, %v2896_v49 }
 0x411   : > { %v6052_v22 = vpop.eup %6051  ;;  %v3016_v15 = vmul.f32 %v6050_v3, %v8220_v43  ;;  %v8284_v32 = vmul.f32 %v2897_v13, %v2897_v13  ;;  %v8286_v57 = vmul.f32 %v2898_v1, %v2898_v1  ;;  %v8288_v54 = vmul.f32 %v2899_v29, %v2899_v29 }
 0x412   : > { %v6054_v7 = vpop.eup %6053  ;;  %v3081_v48 = vmul.f32 %v6044_v56, %v3049_v19  ;;  %v2901_v44 = vadd.f32 1.0, %v6052_v22  ;;  %v8290_v26 = vmul.f32 %v2900_v4, %v2900_v4  ;;  %v8293_v35 = vadd.f32 1.0, %v8222_v14 }
 0x413   : > { %v6056_v0 = vpop.eup %6055  ;;  %v3048_v45 = vsub.f32 2.0, %v3016_v15  ;;  %v2902_v58 = vadd.f32 1.0, %v6054_v7  ;;  %v8296_v43 = vadd.f32 1.0, %v8228_v42  ;;  %v8302_v56 = vadd.f32 1.0, %v8230_v25 }
 0x414   : > { %v6058_v49 = vpop.eup %6057  ;;  %v3177_v13 = vmul.f32 %v8218_v55, %v3081_v48  ;;  %v2903_v1 = vadd.f32 1.0, %v6056_v0  ;;  %v8299_v38 = vmul.f32 %v2901_v44, %v2901_v44  ;;  %v8307_v22 = vadd.f32 1.0, %v8232_v50 }
 0x415   : > { %v6060_v30 = vpop.eup %6059  ;;  %v3080_v29 = vmul.f32 %v6050_v3, %v3048_v45  ;;  %v2904_v19 = vadd.f32 1.0, %v6058_v49  ;;  %v8304_v4 = vmul.f32 %v2902_v58, %v2902_v58  ;;  %v8312_v55 = vadd.f32 1.0, %v8235_v34 }
 0x416   : > { %9821 = vst [vmem:[#allocation58_spill] sm:$0xff] %v8307_v22  ;;  %v6062_v15 = vpop.eup %6061  ;;  %v5844_v7 = vpack.c.bf16 %v3177_v13, %v3177_v13  ;;  %v2905_v28 = vadd.f32 1.0, %v6060_v30  ;;  %v8309_v41 = vmul.f32 %v2903_v1, %v2903_v1  ;;  %v8318_v3 = vadd.f32 1.0, %v8238_v10 }
 0x417   : > { %9822 = vst [vmem:[#allocation59_spill] sm:$0xff] %v8312_v55  ;;  %v6064_v48 = vpop.eup %6063  ;;  %v3176_v44 = vmul.f32 %v8226_v16, %v3080_v29  ;;  %v2906_v0 = vadd.f32 1.0, %v6062_v15  ;;  %v8315_v12 = vmul.f32 %v2904_v19, %v2904_v19  ;;  %v8321_v13 = vadd.f32 1.0, %v8248_v6  ;;  %v3486_v29 = vld [vmem:[#allocation2 + $0x5c] sm:$0x1] }
 0x418   : > { %9823 = vst [vmem:[#allocation60_spill] sm:$0xff] %v8318_v3  ;;  %v6066_v45 = vpop.eup %6065  ;;  %v3405_v58 = vshrl.u32 %v5844_v7, 16  ;;  %v2907_v49 = vadd.f32 1.0, %v6064_v48  ;;  %v2937_v53 = vmul.f32 %v2905_v28, %v2905_v28  ;;  %v3408_v30 = vshll.u32 %v5844_v7, 16  ;;  %v3483_v28 = vld [vmem:[#allocation2 + $0x58] sm:$0xf] }
 0x419   : > { %9824 = vst [vmem:[#allocation61_spill] sm:$0xff] %v8321_v13  ;;  %v6068_v1 = vpop.eup %6067  ;;  %v5843_v21 = vpack.c.bf16 %v3176_v44, %v3176_v44  ;;  %v2908_v59 = vadd.f32 1.0, %v6066_v45  ;;  %v8323_v36 = vmul.f32 %v2906_v0, %v2906_v0  ;;  %v8328_v3 = vadd.f32 1.0, %v8267_v39 }
 0x41a   : > { %v6070_v16 = vpop.eup %6069  ;;  %v3407_v19 = vrot.slane %v3405_v58, 7  ;;  %v2910_v15 = vadd.f32 1.0, %v6068_v1  ;;  %v8325_v17 = vadd.f32 1.0, %v2937_v53  ;;  %v8330_v63 = vmul.f32 %v2907_v49, %v2907_v49 }
 0x41b   : > { %9825 = vst [vmem:[#allocation62_spill] sm:$0xff] %v8328_v3  ;;  %v6072_v48 = vpop.eup %6071  ;;  %v3397_v23 = vshrl.u32 %v5843_v21, 16  ;;  %v3400_v55 = vshll.u32 %v5843_v21, 16  ;;  %v2911_v13 = vadd.f32 1.0, %v6070_v16  ;;  %v8333_v22 = vmul.f32 %v2908_v59, %v2908_v59  ;;  %v3477_v3 = vld [vmem:[#allocation2 + $0x50] sm:$0xf] }
 0x41c   : > { %v6074_v7 = vpop.eup %6073  ;;  %v3410_v44 = vor.u32 %v3408_v30, %v3407_v19  ;;  %v3411_v0 = vrot.slane %v3407_v19, 4  ;;  %v3019_v45 = vmul.f32 %v6072_v48, %v8251_v46  ;;  %v8336_v47 = vmul.f32 %v2910_v15, %v2910_v15 }
 0x41d   : > { %v3399_v58 = vrot.slane %v3397_v23, 7  ;;  %v3018_v1 = vmul.f32 %v6074_v7, %v8262_v27  ;;  %6075 = vrcp.f32 %v8325_v17  ;;  %v5765_v16 = vadd.f32 -1.0, %v2937_v53 }
 0x41e   : > { %v3484_v21 = vsel %vm8242_vm15, %v3410_v44, %v3483_v28  ;;  %v3487_v49 = vsel %vm7037_vm1, %v3411_v0, %v3486_v29  ;;  %v3051_v30 = vsub.f32 2.0, %v3019_v45  ;;  %v8343_v27 = vmul.f32 %v2911_v13, %v2911_v13 }
 0x41f   : > { %3485 = vst [vmem:[#allocation2 + $0x58] sm:$0xf] %v3484_v21  ;;  %v3402_v59 = vor.u32 %v3400_v55, %v3399_v58  ;;  %v3403_v46 = vrot.slane %v3399_v58, 4  ;;  %3488 = vst [vmem:[#allocation2 + $0x5c] sm:$0x1] %v3487_v49  ;;  %v3050_v23 = vsub.f32 2.0, %v3018_v1  ;;  %v8346_v15 = vmul.f32 %v5765_v16, %v8162_v52 }
 0x420   : > { %v3083_v19 = vmul.f32 %v6072_v48, %v3051_v30  ;;  %v8349_v9 = vadd.f32 1.0, %v8269_v11  ;;  %v8352_v28 = vadd.f32 1.0, %v8275_v2  ;;  %v8359_v13 = vadd.f32 1.0, %v8277_v51 }
 0x421   : > { %v3478_v53 = vsel %vm8242_vm15, %v3402_v59, %v3477_v3  ;;  %v3481_v55 = vsel %vm7037_vm1, %v3403_v46, %v3480_v18  ;;  %v3082_v29 = vmul.f32 %v6074_v7, %v3050_v23  ;;  %v8363_v48 = vadd.f32 1.0, %v8279_v31 }
 0x422   : > { %3479 = vst [vmem:[#allocation2 + $0x50] sm:$0xf] %v3478_v53  ;;  %v3179_v52 = vmul.f32 %v8260_v37, %v3083_v19  ;;  %3482 = vst [vmem:[#allocation2 + $0x54] sm:$0x1] %v3481_v55  ;;  %v8366_v44 = vadd.f32 1.0, %v8282_v24  ;;  %v8369_v0 = vadd.f32 1.0, %v8284_v32 }
 0x423   : > { %v3178_v3 = vmul.f32 %v8273_v5, %v3082_v29  ;;  %v8373_v18 = vadd.f32 1.0, %v8286_v57  ;;  %v8376_v7 = vadd.f32 1.0, %v8288_v54  ;;  %v8379_v37 = vadd.f32 1.0, %v8290_v26  ;;  %v3498_v55 = vld [vmem:[#allocation2 + $0x6c] sm:$0x1] }
 0x424   : > { %v5846_v45 = vpack.c.bf16 %v3179_v52, %v3179_v52  ;;  %v8382_v58 = vadd.f32 1.0, %v8299_v38  ;;  %v8385_v1 = vadd.f32 1.0, %v8304_v4  ;;  %v8388_v21 = vadd.f32 1.0, %v8309_v41 }
 0x425   : > { %9826 = vst [vmem:[#allocation63_spill] sm:$0xff] %v8373_v18  ;;  %9827 = vst [vmem:[#allocation64_spill] sm:$0xff] %v8376_v7  ;;  %v5845_v5 = vpack.c.bf16 %v3178_v3, %v3178_v3  ;;  %v8391_v49 = vadd.f32 1.0, %v8315_v12  ;;  %v8394_v30 = vadd.f32 1.0, %v8323_v36  ;;  %v8397_v16 = vadd.f32 1.0, %v8330_v63 }
 0x426   : > { %9828 = vst [vmem:[#allocation65_spill] sm:$0xff] %v8379_v37  ;;  %9829 = vst [vmem:[#allocation66_spill] sm:$0xff] %v8382_v58  ;;  %v4184_v59 = vld [vmem:[#allocation2 + $0x58] sm:$0xf]  ;;  %v3421_v46 = vshrl.u32 %v5846_v45, 16  ;;  %v3424_v23 = vshll.u32 %v5846_v45, 16 }
 0x427   : > { %9830 = vst [vmem:[#allocation67_spill] sm:$0xff] %v8385_v1  ;;  %9831 = vst [vmem:[#allocation68_spill] sm:$0xff] %v8388_v21  ;;  %v8400_v19 = vadd.f32 1.0, %v8333_v22  ;;  %v8403_v53 = vadd.f32 1.0, %v8336_v47  ;;  %4201 = vrot.lane.b32.xlu1 %v4184_v59, %s6224_s16  ;;  %v3413_v29 = vshrl.u32 %v5845_v5, 16  ;;  %v3416_v52 = vshll.u32 %v5845_v5, 16 }
 0x428   : > { %9832 = vst [vmem:[#allocation69_spill] sm:$0xff] %v8394_v30  ;;  %9833 = vst [vmem:[#allocation70_spill] sm:$0xff] %v8397_v16  ;;  %v8407_v3 = vadd.f32 1.0, %v8343_v27  ;;  %v5740_v30 = vadd.f32 -1.0, %v8222_v14  ;;  %v3495_v16 = vld [vmem:[#allocation2 + $0x68] sm:$0xf]  ;;  %6077 = vrcp.f32 %v8391_v49 }
 0x429   : > { %9834 = vst [vmem:[#allocation71_spill] sm:$0xff] %v8400_v19  ;;  %9835 = vst [vmem:[#allocation72_spill] sm:$0xff] %v8403_v53  ;;  %v3423_v21 = vrot.slane %v3421_v46, 7  ;;  %v5741_v45 = vadd.f32 -1.0, %v8228_v42  ;;  %v5742_v1 = vadd.f32 -1.0, %v8230_v25  ;;  %v5743_v19 = vadd.f32 -1.0, %v8232_v50 }
 0x42a   : > { %9836 = vst [vmem:[#allocation73_spill] sm:$0xff] %v8407_v3  ;;  %v4183_v58 = vld [vmem:[#allocation2 + $0x50] sm:$0xf]  ;;  %v3415_v53 = vrot.slane %v3413_v29, 7  ;;  %v5744_v37 = vadd.f32 -1.0, %v8235_v34  ;;  %v5745_v59 = vadd.f32 -1.0, %v8238_v10  ;;  %v6076_v7 = vpop.eup %6075  ;;  %6079 = vrcp.f32 %v8293_v35 }
 0x42b   : > { %v5746_v5 = vadd.f32 -1.0, %v8248_v6  ;;  %v3489_v3 = vld [vmem:[#allocation2 + $0x60] sm:$0xf]  ;;  %4199 = vrot.lane.b32.xlu0 %v4183_v58, %s6224_s16  ;;  %v3426_v14 = vor.u32 %v3424_v23, %v3423_v21  ;;  %v3427_v46 = vrot.slane %v3423_v21, 4  ;;  %v5747_v42 = vadd.f32 -1.0, %v8267_v39 }
 0x42c   : > { %v5752_v25 = vadd.f32 -1.0, %v8269_v11  ;;  %v3418_v18 = vor.u32 %v3416_v52, %v3415_v53  ;;  %v3419_v50 = vrot.slane %v3415_v53, 4  ;;  %v3033_v29 = vmul.f32 %v6076_v7, %v8325_v17 }
 0x42d   : > { %v5753_v34 = vadd.f32 -1.0, %v8275_v2  ;;  %v3496_v10 = vsel %vm8242_vm15, %v3426_v14, %v3495_v16  ;;  %v3499_v6 = vsel %vm7037_vm1, %v3427_v46, %v3498_v55  ;;  %v5754_v58 = vadd.f32 -1.0, %v8277_v51  ;;  %v3492_v2 = vld [vmem:[#allocation2 + $0x64] sm:$0x1]  ;;  %v9847_v46 = vld [vmem:[#allocation36_spill] sm:$0xff] }
 0x42e   : > { %v5755_v21 = vadd.f32 -1.0, %v8279_v31  ;;  %3497 = vst [vmem:[#allocation2 + $0x68] sm:$0xf] %v3496_v10  ;;  %v3490_v39 = vsel %vm8242_vm15, %v3418_v18, %v3489_v3  ;;  %v3065_v11 = vsub.f32 2.0, %v3033_v29  ;;  %v5756_v23 = vadd.f32 -1.0, %v8282_v24  ;;  %v9849_v29 = vld [vmem:[#allocation37_spill] sm:$0xff] }
 0x42f   : > { %v5757_v17 = vadd.f32 -1.0, %v8284_v32  ;;  %3500 = vst [vmem:[#allocation2 + $0x6c] sm:$0x1] %v3499_v6  ;;  %3491 = vst [vmem:[#allocation2 + $0x60] sm:$0xf] %v3490_v39  ;;  %v5758_v16 = vadd.f32 -1.0, %v8286_v57  ;;  %6081 = vrcp.f32 %v8296_v43  ;;  %v8490_v10 = vmul.f32 %v5754_v58, %v9849_v29 }
 0x430   : > { %v5759_v53 = vadd.f32 -1.0, %v8288_v54  ;;  %v5760_v51 = vadd.f32 -1.0, %v8290_v26  ;;  %v5761_v31 = vadd.f32 -1.0, %v8299_v38  ;;  %v3097_v55 = vmul.f32 %v6076_v7, %v3065_v11  ;;  %v9851_v39 = vld [vmem:[#allocation60_spill] sm:$0xff]  ;;  %v4392_v29 = vld [vmem:[#allocation2 + $0x54] sm:$0x1] }
 0x431   : > { %v5762_v52 = vadd.f32 -1.0, %v8304_v4  ;;  %v5763_v18 = vadd.f32 -1.0, %v8309_v41  ;;  %v5764_v24 = vadd.f32 -1.0, %v8315_v12  ;;  %v5766_v32 = vadd.f32 -1.0, %v8323_v36  ;;  %v9852_v11 = vld [vmem:[#allocation44_spill] sm:$0xff] }
 0x432   : > { %v5767_v3 = vadd.f32 -1.0, %v8330_v63  ;;  %v5768_v14 = vadd.f32 -1.0, %v8333_v22  ;;  %v5770_v57 = vadd.f32 -1.0, %v8336_v47  ;;  %v3193_v54 = vmul.f32 %v8346_v15, %v3097_v55  ;;  %v9837_v22 = vld [vmem:[#allocation40_spill] sm:$0xff] }
 0x433   : > { %v8444_v26 = vadd.f32 -1.0, %v8343_v27  ;;  %v3493_v38 = vsel %vm7037_vm1, %v3419_v50, %v3492_v2  ;;  %v8450_v12 = vmul.f32 %v5764_v24, %v8122_v33  ;;  %v8454_v63 = vmul.f32 %v5740_v30, %v8054_v40  ;;  %v9839_v40 = vld [vmem:[#allocation41_spill] sm:$0xff]  ;;  %v9848_v50 = vld [vmem:[#allocation43_spill] sm:$0xff]  ;;  %v3805_v24 = vld [vmem:[#allocation2 + $0xe8] sm:$0xf] }
 0x434   : > { %v8457_v47 = vmul.f32 %v5741_v45, %v8057_v60  ;;  %3494 = vst [vmem:[#allocation2 + $0x64] sm:$0x1] %v3493_v38  ;;  %v5860_v36 = vpack.c.bf16 %v3193_v54, %v3193_v54  ;;  %v8461_v41 = vmul.f32 %v5742_v1, %v8060_v61  ;;  %v8464_v4 = vmul.f32 %v5743_v19, %v8063_v62  ;;  %v9841_v60 = vld [vmem:[#allocation42_spill] sm:$0xff]  ;;  %v9856_v54 = vld [vmem:[#allocation61_spill] sm:$0xff]  ;;  %v9861_v58 = vld [vmem:[#allocation48_spill] sm:$0xff] }
 0x435   : > { %v4186_v33 = vld [vmem:[#allocation2 + $0x68] sm:$0xf]  ;;  %6083 = vrcp.f32 %v8302_v56  ;;  %v8468_v27 = vmul.f32 %v5744_v37, %v9837_v22  ;;  %v8471_v15 = vmul.f32 %v5745_v59, %v9839_v40  ;;  %v8474_v7 = vmul.f32 %v5746_v5, %v9841_v60  ;;  %v9846_v37 = vld [vmem:[#allocation59_spill] sm:$0xff]  ;;  %v3808_v22 = vld [vmem:[#allocation2 + $0xec] sm:$0x1] }
 0x436   : > { %4205 = vrot.lane.b32.xlu1 %v4186_v33, %s6224_s16  ;;  %v4185_v30 = vld [vmem:[#allocation2 + $0x60] sm:$0xf]  ;;  %v3727_v61 = vshrl.u32 %v5860_v36, 16  ;;  %v3730_v1 = vshll.u32 %v5860_v36, 16  ;;  %v9843_v45 = vld [vmem:[#allocation58_spill] sm:$0xff]  ;;  %v8484_v59 = vmul.f32 %v5752_v25, %v9847_v46  ;;  %v8487_v5 = vmul.f32 %v5753_v34, %v9848_v50  ;;  %v9859_v34 = vld [vmem:[#allocation47_spill] sm:$0xff] }
 0x437   : > { %9838 = vst [vmem:[#allocation40_spill] sm:$0xff] %v8468_v27  ;;  %9840 = vst [vmem:[#allocation41_spill] sm:$0xff] %v8471_v15  ;;  %6085 = vrcp.f32 %v9843_v45  ;;  %v9844_v62 = vld [vmem:[#allocation38_spill] sm:$0xff]  ;;  %4203 = vrot.lane.b32.xlu0 %v4185_v30, %s6224_s16  ;;  %v8494_v2 = vmul.f32 %v5755_v21, %v9852_v11  ;;  %v8504_v36 = vmul.f32 %v5758_v16, %v9859_v34  ;;  %v9864_v30 = vld [vmem:[#allocation49_spill] sm:$0xff] }
 0x438   : > { %9842 = vst [vmem:[#allocation42_spill] sm:$0xff] %v8474_v7  ;;  %v8479_v19 = vmul.f32 %v5747_v42, %v9844_v62  ;;  %6087 = vrcp.f32 %v9846_v37  ;;  %9850 = vst [vmem:[#allocation38_spill] sm:$0xff] %v8490_v10  ;;  %v3729_v6 = vrot.slane %v3727_v61, 7  ;;  %v9854_v42 = vld [vmem:[#allocation45_spill] sm:$0xff]  ;;  %v9857_v25 = vld [vmem:[#allocation46_spill] sm:$0xff]  ;;  %v8507_v33 = vmul.f32 %v5759_v53, %v9861_v58 }
 0x439   : > { %6089 = vrcp.f32 %v9851_v39  ;;  %9853 = vst [vmem:[#allocation59_spill] sm:$0xff] %v8494_v2  ;;  %v8497_v55 = vmul.f32 %v5756_v23, %v9854_v42  ;;  %v8501_v38 = vmul.f32 %v5757_v17, %v9857_v25  ;;  %9860 = vst [vmem:[#allocation37_spill] sm:$0xff] %v8504_v36  ;;  %v9863_v21 = vld [vmem:[#allocation62_spill] sm:$0xff]  ;;  %v8511_v23 = vmul.f32 %v5760_v51, %v9864_v30  ;;  %v9868_v17 = vld [vmem:[#allocation51_spill] sm:$0xff]  ;;  %v6078_v30 = vpop.eup %6077 }
 0x43a   : > { %9845 = vst [vmem:[#allocation58_spill] sm:$0xff] %v8479_v19  ;;  %6091 = vrcp.f32 %v9856_v54  ;;  %9862 = vst [vmem:[#allocation60_spill] sm:$0xff] %v8507_v33  ;;  %v3732_v40 = vor.u32 %v3730_v1, %v3729_v6  ;;  %v3733_v60 = vrot.slane %v3729_v6, 4  ;;  %v9866_v61 = vld [vmem:[#allocation50_spill] sm:$0xff]  ;;  %v8518_v46 = vmul.f32 %v5762_v52, %v9868_v17  ;;  %v9870_v16 = vld [vmem:[#allocation52_spill] sm:$0xff] }
 0x43b   : > { %9855 = vst [vmem:[#allocation36_spill] sm:$0xff] %v8497_v55  ;;  %9858 = vst [vmem:[#allocation43_spill] sm:$0xff] %v8501_v38  ;;  %6093 = vrcp.f32 %v9863_v21  ;;  %v8515_v62 = vmul.f32 %v5761_v31, %v9866_v61  ;;  %v8521_v50 = vmul.f32 %v5763_v18, %v9870_v16  ;;  %v4391_v53 = vld [vmem:[#allocation2 + $0x50] sm:$0xf]  ;;  %v9872_v51 = vld [vmem:[#allocation53_spill] sm:$0xff]  ;;  %v4417_v58 = vshll.u32 %v4392_v29, 16 }
 0x43c   : > { %9865 = vst [vmem:[#allocation44_spill] sm:$0xff] %v8511_v23  ;;  %6095 = vrcp.f32 %v8349_v9  ;;  %9869 = vst [vmem:[#allocation61_spill] sm:$0xff] %v8518_v46  ;;  %v3806_v1 = vsel %vm8242_vm15, %v3732_v40, %v3805_v24  ;;  %v8527_v6 = vmul.f32 %v5766_v32, %v9872_v51  ;;  %v9873_v11 = vld [vmem:[#allocation54_spill] sm:$0xff]  ;;  %v8532_v31 = vld [vmem:[#allocation2 + $0x60] sm:$0xf]  ;;  %v3809_v24 = vsel %vm7037_vm1, %v3733_v60, %v3808_v22  ;;  %v6080_v22 = vpop.eup %6079 }
 0x43d   : > { %9867 = vst [vmem:[#allocation45_spill] sm:$0xff] %v8515_v62  ;;  %9871 = vst [vmem:[#allocation46_spill] sm:$0xff] %v8521_v50  ;;  %6097 = vrcp.f32 %v8352_v28  ;;  %v8530_v42 = vmul.f32 %v5767_v3, %v9873_v11  ;;  %v9875_v52 = vld [vmem:[#allocation55_spill] sm:$0xff]  ;;  %v9877_v25 = vld [vmem:[#allocation56_spill] sm:$0xff]  ;;  %v4408_v32 = vshrl.u32 %v4391_v53, 16  ;;  %v4411_v3 = vshll.u32 %v4391_v53, 16  ;;  %v6082_v29 = vpop.eup %6081 }
 0x43e   : > { %9874 = vst [vmem:[#allocation47_spill] sm:$0xff] %v8532_v31  ;;  %3807 = vst [vmem:[#allocation2 + $0xe8] sm:$0xf] %v3806_v1  ;;  %6099 = vrcp.f32 %v8359_v13  ;;  %v8536_v18 = vmul.f32 %v5768_v14, %v9875_v52  ;;  %v8539_v34 = vmul.f32 %v5770_v57, %v9877_v25  ;;  %v8544_v40 = vld [vmem:[#allocation2 + $0x64] sm:$0x1]  ;;  %v4436_v57 = vshrl.u32 %v8532_v31, 16 }
 0x43f   : > { %6101 = vrcp.f32 %v8363_v48  ;;  %3810 = vst [vmem:[#allocation2 + $0xec] sm:$0x1] %v3809_v24  ;;  %9879 = vst [vmem:[#allocation49_spill] sm:$0xff] %v8544_v40  ;;  %v9880_v61 = vld [vmem:[#allocation57_spill] sm:$0xff]  ;;  %v3032_v60 = vmul.f32 %v6078_v30, %v8391_v49  ;;  %v8555_v16 = vrot.slane %v4408_v32, 4  ;;  %v8557_v53 = vrot.slane %v4411_v3, 5 }
 0x440   : > { %9876 = vst [vmem:[#allocation48_spill] sm:$0xff] %v8536_v18  ;;  %9878 = vst [vmem:[#allocation62_spill] sm:$0xff] %v8539_v34  ;;  %6103 = vrcp.f32 %v8366_v44  ;;  %v8549_v14 = vmul.f32 %v8444_v26, %v9880_v61  ;;  %v9884_v1 = vld [vmem:[#allocation63_spill] sm:$0xff]  ;;  %v3008_v51 = vmul.f32 %v6080_v22, %v8293_v35  ;;  %v8561_v26 = vrot.slane %v4417_v58, 5  ;;  %v9886_v24 = vld [vmem:[#allocation64_spill] sm:$0xff] }
 0x441   : > { %6105 = vrcp.f32 %v8369_v0  ;;  %9882 = vst [vmem:[#allocation51_spill] sm:$0xff] %v8555_v16  ;;  %9883 = vst [vmem:[#allocation52_spill] sm:$0xff] %v8557_v53  ;;  %v3064_v25 = vsub.f32 2.0, %v3032_v60  ;;  %v3009_v49 = vmul.f32 %v6082_v29, %v8296_v43  ;;  %v8566_v61 = vrot.slane %v4436_v57, 4  ;;  %v9888_v3 = vld [vmem:[#allocation65_spill] sm:$0xff]  ;;  %v9889_v40 = vld [vmem:[#allocation66_spill] sm:$0xff] }
 0x442   : > { %9881 = vst [vmem:[#allocation50_spill] sm:$0xff] %v8549_v14  ;;  %6107 = vrcp.f32 %v9884_v1  ;;  %9885 = vst [vmem:[#allocation53_spill] sm:$0xff] %v8561_v26  ;;  %v6084_v52 = vpop.eup %6083  ;;  %v3040_v31 = vsub.f32 2.0, %v3008_v51  ;;  %v9890_v57 = vld [vmem:[#allocation67_spill] sm:$0xff]  ;;  %v9891_v16 = vld [vmem:[#allocation68_spill] sm:$0xff] }
 0x443   : > { %6109 = vrcp.f32 %v9886_v24  ;;  %9887 = vst [vmem:[#allocation54_spill] sm:$0xff] %v8566_v61  ;;  %v3010_v17 = vmul.f32 %v6084_v52, %v8302_v56  ;;  %v3096_v11 = vmul.f32 %v6078_v30, %v3064_v25  ;;  %v3041_v14 = vsub.f32 2.0, %v3009_v49  ;;  %v9892_v49 = vld [vmem:[#allocation69_spill] sm:$0xff]  ;;  %v9894_v50 = vld [vmem:[#allocation71_spill] sm:$0xff] }
 0x444   : > { %v6086_v32 = vpop.eup %6085  ;;  %6111 = vrcp.f32 %v9888_v3  ;;  %v8577_v51 = vmul.f32 %v6080_v22, %v3040_v31  ;;  %v9893_v31 = vld [vmem:[#allocation70_spill] sm:$0xff]  ;;  %v9896_v23 = vld [vmem:[#allocation73_spill] sm:$0xff] }
 0x445   : > { %v6088_v58 = vpop.eup %6087  ;;  %v4552_v26 = vld [vmem:[#allocation2 + $0xe8] sm:$0xf]  ;;  %6113 = vrcp.f32 %v9889_v40  ;;  %v3011_v60 = vmul.f32 %v6086_v32, %v9843_v45  ;;  %v3042_v56 = vsub.f32 2.0, %v3010_v17  ;;  %v3192_v35 = vmul.f32 %v8450_v12, %v3096_v11  ;;  %v3802_v55 = vld [vmem:[#allocation2 + $0xe4] sm:$0x1] }
 0x446   : > { %v6090_v43 = vpop.eup %6089  ;;  %4569 = vrot.lane.b32.xlu1 %v4552_v26, %s6228_s20  ;;  %6115 = vrcp.f32 %v9890_v57  ;;  %v3012_v61 = vmul.f32 %v6088_v58, %v9846_v37  ;;  %v8584_v18 = vmul.f32 %v6082_v29, %v3041_v14  ;;  %v9895_v14 = vld [vmem:[#allocation72_spill] sm:$0xff] }
 0x447   : > { %v6092_v34 = vpop.eup %6091  ;;  %6117 = vrcp.f32 %v9891_v16  ;;  %v3013_v30 = vmul.f32 %v6090_v43, %v9851_v39  ;;  %v3043_v25 = vsub.f32 2.0, %v3011_v60  ;;  %v5859_v17 = vpack.c.bf16 %v3192_v35, %v3192_v35 }
 0x448   : > { %v6094_v45 = vpop.eup %6093  ;;  %6119 = vrcp.f32 %v9892_v49  ;;  %v3014_v26 = vmul.f32 %v6092_v34, %v9856_v54  ;;  %v3044_v53 = vsub.f32 2.0, %v3012_v61  ;;  %v8590_v46 = vmul.f32 %v6084_v52, %v3042_v56 }
 0x449   : > { %v6096_v37 = vpop.eup %6095  ;;  %6121 = vrcp.f32 %v9893_v31  ;;  %v3015_v22 = vmul.f32 %v6094_v45, %v9863_v21  ;;  %v3045_v12 = vsub.f32 2.0, %v3013_v30  ;;  %v3719_v54 = vshrl.u32 %v5859_v17, 16 }
 0x44a   : > { %v6098_v11 = vpop.eup %6097  ;;  %6123 = vrcp.f32 %v9894_v50  ;;  %v3020_v39 = vmul.f32 %v6096_v37, %v8349_v9  ;;  %v3046_v60 = vsub.f32 2.0, %v3014_v26  ;;  %v3722_v61 = vshll.u32 %v5859_v17, 16  ;;  %v3799_v17 = vld [vmem:[#allocation2 + $0xe0] sm:$0xf] }
 0x44b   : > { %v6100_v62 = vpop.eup %6099  ;;  %6125 = vrcp.f32 %v9895_v14  ;;  %v3021_v29 = vmul.f32 %v6098_v11, %v8352_v28  ;;  %v3047_v30 = vsub.f32 2.0, %v3015_v22  ;;  %v3721_v38 = vrot.slane %v3719_v54, 7 }
 0x44c   : > { %v6102_v35 = vpop.eup %6101  ;;  %6127 = vrcp.f32 %v9896_v23  ;;  %v3022_v21 = vmul.f32 %v6100_v62, %v8359_v13  ;;  %v3052_v33 = vsub.f32 2.0, %v3020_v39  ;;  %v8597_v56 = vmul.f32 %v6086_v32, %v3043_v25 }
 0x44d   : > { %v6104_v36 = vpop.eup %6103  ;;  %v3023_v9 = vmul.f32 %v6102_v35, %v8363_v48  ;;  %v3053_v52 = vsub.f32 2.0, %v3021_v29  ;;  %v8600_v10 = vmul.f32 %v6088_v58, %v3044_v53  ;;  %v8602_v19 = vmul.f32 %v6090_v43, %v3045_v12 }
 0x44e   : > { %v6106_v26 = vpop.eup %6105  ;;  %v3024_v2 = vmul.f32 %v6104_v36, %v8366_v44  ;;  %v3054_v28 = vsub.f32 2.0, %v3022_v21  ;;  %v3724_v22 = vor.u32 %v3722_v61, %v3721_v38  ;;  %v3725_v39 = vrot.slane %v3721_v38, 4 }
 0x44f   : > { %v6108_v13 = vpop.eup %6107  ;;  %v3025_v54 = vmul.f32 %v6106_v26, %v8369_v0  ;;  %v3055_v7 = vsub.f32 2.0, %v3023_v9  ;;  %v3085_v29 = vmul.f32 %v6098_v11, %v3053_v52  ;;  %v8606_v15 = vmul.f32 %v6092_v34, %v3046_v60 }
 0x450   : > { %v6110_v48 = vpop.eup %6109  ;;  %v3026_v32 = vmul.f32 %v6108_v13, %v9884_v1  ;;  %v3056_v25 = vsub.f32 2.0, %v3024_v2  ;;  %v3800_v44 = vsel %vm8242_vm15, %v3724_v22, %v3799_v17  ;;  %v3803_v58 = vsel %vm7037_vm1, %v3725_v39, %v3802_v55 }
 0x451   : > { %v6112_v27 = vpop.eup %6111  ;;  %v3027_v53 = vmul.f32 %v6110_v48, %v9886_v24  ;;  %v3057_v38 = vsub.f32 2.0, %v3025_v54  ;;  %3801 = vst [vmem:[#allocation2 + $0xe0] sm:$0xf] %v3800_v44  ;;  %3804 = vst [vmem:[#allocation2 + $0xe4] sm:$0x1] %v3803_v58  ;;  %v3181_v2 = vmul.f32 %v8487_v5, %v3085_v29  ;;  %v8615_v34 = vmul.f32 %v6094_v45, %v3047_v30 }
 0x452   : > { %v6114_v43 = vpop.eup %6113  ;;  %v3028_v0 = vmul.f32 %v6112_v27, %v9888_v3  ;;  %v3058_v12 = vsub.f32 2.0, %v3026_v32  ;;  %v3084_v61 = vmul.f32 %v6096_v37, %v3052_v33  ;;  %v8618_v24 = vmul.f32 %v6100_v62, %v3054_v28 }
 0x453   : > { %v6116_v1 = vpop.eup %6115  ;;  %v3029_v11 = vmul.f32 %v6114_v43, %v9889_v40  ;;  %v3059_v60 = vsub.f32 2.0, %v3027_v53  ;;  %v5848_v52 = vpack.c.bf16 %v3181_v2, %v3181_v2  ;;  %v8621_v17 = vmul.f32 %v6102_v35, %v3055_v7 }
 0x454   : > { %v6118_v21 = vpop.eup %6117  ;;  %v3030_v55 = vmul.f32 %v6116_v1, %v9890_v57  ;;  %v3060_v9 = vsub.f32 2.0, %v3028_v0  ;;  %v8624_v45 = vmul.f32 %v6104_v36, %v3056_v25  ;;  %v8626_v30 = vmul.f32 %v6106_v26, %v3057_v38 }
 0x455   : > { %v6120_v3 = vpop.eup %6119  ;;  %v3031_v22 = vmul.f32 %v6118_v21, %v9891_v16  ;;  %v3061_v5 = vsub.f32 2.0, %v3029_v11  ;;  %v3437_v37 = vshrl.u32 %v5848_v52, 16  ;;  %v3440_v28 = vshll.u32 %v5848_v52, 16 }
 0x456   : > { %v6122_v40 = vpop.eup %6121  ;;  %v3034_v33 = vmul.f32 %v6120_v3, %v9892_v49  ;;  %v3062_v62 = vsub.f32 2.0, %v3030_v55  ;;  %v8630_v7 = vmul.f32 %v6108_v13, %v3058_v12  ;;  %v8632_v35 = vmul.f32 %v6110_v48, %v3059_v60  ;;  %v3507_v49 = vld [vmem:[#allocation2 + $0x78] sm:$0xf] }
 0x457   : > { %v6124_v39 = vpop.eup %6123  ;;  %v3035_v57 = vmul.f32 %v6122_v40, %v9893_v31  ;;  %v3063_v54 = vsub.f32 2.0, %v3031_v22  ;;  %v8635_v26 = vrot.slane %v3437_v37, 7  ;;  %v3092_v25 = vmul.f32 %v6112_v27, %v3060_v9  ;;  %v9899_v37 = vld [vmem:[#allocation42_spill] sm:$0xff] }
 0x458   : > { %v6126_v16 = vpop.eup %6125  ;;  %v3036_v36 = vmul.f32 %v6124_v39, %v9894_v50  ;;  %v3066_v32 = vsub.f32 2.0, %v3034_v33  ;;  %v4551_v44 = vld [vmem:[#allocation2 + $0xe0] sm:$0xf]  ;;  %v3093_v38 = vmul.f32 %v6114_v43, %v3061_v5  ;;  %v3094_v31 = vmul.f32 %v6116_v1, %v3062_v62  ;;  %v9897_v33 = vld [vmem:[#allocation40_spill] sm:$0xff] }
 0x459   : > { %v6128_v29 = vpop.eup %6127  ;;  %v3067_v53 = vsub.f32 2.0, %v3035_v57  ;;  %v3038_v58 = vmul.f32 %v6126_v16, %v9895_v14  ;;  %4567 = vrot.lane.b32.xlu0 %v4551_v44, %s6228_s20  ;;  %v3442_v50 = vor.u32 %v3440_v28, %v8635_v26  ;;  %v3095_v11 = vmul.f32 %v6118_v21, %v3063_v54  ;;  %v9900_v54 = vld [vmem:[#allocation58_spill] sm:$0xff] }
 0x45a   : > { %v3039_v13 = vmul.f32 %v6128_v29, %v9896_v23  ;;  %v3098_v48 = vmul.f32 %v6120_v3, %v3066_v32  ;;  %v3068_v0 = vsub.f32 2.0, %v3036_v36  ;;  %v3443_v27 = vrot.slane %v8635_v26, 4  ;;  %v3811_v32 = vld [vmem:[#allocation2 + $0xf0] sm:$0xf] }
 0x45b   : > { %v3099_v12 = vmul.f32 %v6122_v40, %v3067_v53  ;;  %v3070_v2 = vsub.f32 2.0, %v3038_v58  ;;  %v3508_v14 = vsel %vm8242_vm15, %v3442_v50, %v3507_v49  ;;  %v3180_v9 = vmul.f32 %v8484_v59, %v3084_v61  ;;  %v9904_v53 = vld [vmem:[#allocation43_spill] sm:$0xff]  ;;  %v9905_v50 = vld [vmem:[#allocation37_spill] sm:$0xff] }
 0x45c   : > { %v3194_v60 = vmul.f32 %v8527_v6, %v3098_v48  ;;  %v3071_v55 = vsub.f32 2.0, %v3039_v13  ;;  %v3100_v43 = vmul.f32 %v6124_v39, %v3068_v0  ;;  %3509 = vst [vmem:[#allocation2 + $0x78] sm:$0xf] %v3508_v14  ;;  %v3168_v52 = vmul.f32 %v8454_v63, %v8577_v51  ;;  %v9898_v63 = vld [vmem:[#allocation41_spill] sm:$0xff]  ;;  %v3817_v13 = vld [vmem:[#allocation2 + $0xf8] sm:$0xf] }
 0x45d   : > { %v3195_v1 = vmul.f32 %v8530_v42, %v3099_v12  ;;  %v3102_v23 = vmul.f32 %v6126_v16, %v3070_v2  ;;  %v3169_v22 = vmul.f32 %v8457_v47, %v8584_v18  ;;  %v3170_v6 = vmul.f32 %v8461_v41, %v8590_v46  ;;  %v3501_v46 = vld [vmem:[#allocation2 + $0x70] sm:$0xf]  ;;  %v3820_v48 = vld [vmem:[#allocation2 + $0xfc] sm:$0x1] }
 0x45e   : > { %v5861_v3 = vpack.c.bf16 %v3194_v60, %v3194_v60  ;;  %v3103_v21 = vmul.f32 %v6128_v29, %v3071_v55  ;;  %v5847_v40 = vpack.c.bf16 %v3180_v9, %v3180_v9  ;;  %v3171_v42 = vmul.f32 %v8464_v4, %v8597_v56  ;;  %v9901_v56 = vld [vmem:[#allocation38_spill] sm:$0xff]  ;;  %v9902_v16 = vld [vmem:[#allocation59_spill] sm:$0xff]  ;;  %v9906_v12 = vld [vmem:[#allocation60_spill] sm:$0xff] }
 0x45f   : > { %v5862_v5 = vpack.c.bf16 %v3195_v1, %v3195_v1  ;;  %v3172_v62 = vmul.f32 %v9897_v33, %v8600_v10  ;;  %v3173_v51 = vmul.f32 %v9898_v63, %v8602_v19  ;;  %v3174_v28 = vmul.f32 %v9899_v37, %v8606_v15  ;;  %v3814_v19 = vld [vmem:[#allocation2 + $0xf4] sm:$0x1]  ;;  %v9903_v15 = vld [vmem:[#allocation36_spill] sm:$0xff]  ;;  %v9912_v37 = vld [vmem:[#allocation62_spill] sm:$0xff] }
 0x460   : > { %v3735_v59 = vshrl.u32 %v5861_v3, 16  ;;  %v3738_v61 = vshll.u32 %v5861_v3, 16  ;;  %v3429_v39 = vshrl.u32 %v5847_v40, 16  ;;  %v3432_v41 = vshll.u32 %v5847_v40, 16  ;;  %v9907_v14 = vld [vmem:[#allocation44_spill] sm:$0xff]  ;;  %v9908_v3 = vld [vmem:[#allocation45_spill] sm:$0xff] }
 0x461   : > { %v3743_v47 = vshrl.u32 %v5862_v5, 16  ;;  %v3746_v18 = vshll.u32 %v5862_v5, 16  ;;  %v3175_v4 = vmul.f32 %v9900_v54, %v8615_v34  ;;  %v3182_v10 = vmul.f32 %v9901_v56, %v8618_v24  ;;  %v3510_v9 = vld [vmem:[#allocation2 + $0x7c] sm:$0x1]  ;;  %v9909_v40 = vld [vmem:[#allocation61_spill] sm:$0xff] }
 0x462   : > { %v3737_v57 = vrot.slane %v3735_v59, 7  ;;  %v3183_v36 = vmul.f32 %v9902_v16, %v8621_v17  ;;  %v3431_v49 = vrot.slane %v3429_v39, 7  ;;  %v3184_v44 = vmul.f32 %v9903_v15, %v8624_v45  ;;  %v9910_v59 = vld [vmem:[#allocation46_spill] sm:$0xff]  ;;  %v9911_v63 = vld [vmem:[#allocation48_spill] sm:$0xff] }
 0x463   : > { %v3745_v29 = vrot.slane %v3743_v47, 7  ;;  %v3185_v58 = vmul.f32 %v9904_v53, %v8626_v30  ;;  %v3186_v24 = vmul.f32 %v9905_v50, %v8630_v7  ;;  %v3187_v17 = vmul.f32 %v9906_v12, %v8632_v35  ;;  %v9913_v47 = vld [vmem:[#allocation50_spill] sm:$0xff] }
 0x464   : > { %v3740_v0 = vor.u32 %v3738_v61, %v3737_v57  ;;  %v3741_v34 = vrot.slane %v3737_v57, 4  ;;  %v3434_v55 = vor.u32 %v3432_v41, %v3431_v49  ;;  %v3188_v1 = vmul.f32 %v9907_v14, %v3092_v25  ;;  %v3504_v41 = vld [vmem:[#allocation2 + $0x74] sm:$0x1] }
 0x465   : > { %v3748_v2 = vor.u32 %v3746_v18, %v3745_v29  ;;  %v3749_v60 = vrot.slane %v3745_v29, 4  ;;  %v3189_v5 = vmul.f32 %v9908_v3, %v3093_v38  ;;  %v3190_v33 = vmul.f32 %v9909_v40, %v3094_v31 }
 0x466   : > { %v3812_v45 = vsel %vm8242_vm15, %v3740_v0, %v3811_v32  ;;  %v3815_v30 = vsel %vm7037_vm1, %v3741_v34, %v3814_v19  ;;  %v3502_v25 = vsel %vm8242_vm15, %v3434_v55, %v3501_v46  ;;  %v3191_v61 = vmul.f32 %v9910_v59, %v3095_v11  ;;  %v3522_v0 = vld [vmem:[#allocation2 + $0x8c] sm:$0x1] }
 0x467   : > { %v3818_v7 = vsel %vm8242_vm15, %v3748_v2, %v3817_v13  ;;  %3813 = vst [vmem:[#allocation2 + $0xf0] sm:$0xf] %v3812_v45  ;;  %v3821_v35 = vsel %vm7037_vm1, %v3749_v60, %v3820_v48  ;;  %3816 = vst [vmem:[#allocation2 + $0xf4] sm:$0x1] %v3815_v30  ;;  %v3196_v38 = vmul.f32 %v9911_v63, %v3100_v43  ;;  %v3435_v39 = vrot.slane %v3431_v49, 4 }
 0x468   : > { %3819 = vst [vmem:[#allocation2 + $0xf8] sm:$0xf] %v3818_v7  ;;  %3822 = vst [vmem:[#allocation2 + $0xfc] sm:$0x1] %v3821_v35  ;;  %v3198_v31 = vmul.f32 %v9912_v37, %v3102_v23  ;;  %v3199_v18 = vmul.f32 %v9913_v47, %v3103_v21  ;;  %v3511_v57 = vsel %vm7037_vm1, %v3443_v27, %v3510_v9 }
 0x469   : > { %3503 = vst [vmem:[#allocation2 + $0x70] sm:$0xf] %v3502_v25  ;;  %v5850_v46 = vpack.c.bf16 %v3183_v36, %v3183_v36  ;;  %v8696_v54 = vpack.c.bf16 %v3168_v52, %v3168_v52  ;;  %v8698_v11 = vpack.c.bf16 %v3169_v22, %v3169_v22  ;;  %v8700_v56 = vpack.c.bf16 %v3170_v6, %v3170_v6 }
 0x46a   : > { %v8702_v16 = vpack.c.bf16 %v3171_v42, %v3171_v42  ;;  %v8704_v43 = vpack.c.bf16 %v3172_v62, %v3172_v62  ;;  %v8706_v23 = vpack.c.bf16 %v3173_v51, %v3173_v51  ;;  %3512 = vst [vmem:[#allocation2 + $0x7c] sm:$0x1] %v3511_v57  ;;  %v8708_v26 = vpack.c.bf16 %v3174_v28, %v3174_v28  ;;  %v3519_v28 = vld [vmem:[#allocation2 + $0x88] sm:$0xf] }
 0x46b   : > { %v3453_v21 = vshrl.u32 %v5850_v46, 16  ;;  %v3456_v32 = vshll.u32 %v5850_v46, 16  ;;  %v8710_v19 = vpack.c.bf16 %v3175_v4, %v3175_v4  ;;  %v5849_v27 = vpack.c.bf16 %v3182_v10, %v3182_v10 }
 0x46c   : > { %v3505_v52 = vsel %vm7037_vm1, %v3435_v39, %v3504_v41  ;;  %v8714_v22 = vpack.c.bf16 %v3184_v44, %v3184_v44  ;;  %v8716_v6 = vpack.c.bf16 %v3185_v58, %v3185_v58  ;;  %v8718_v62 = vpack.c.bf16 %v3186_v24, %v3186_v24 }
 0x46d   : > { %v3455_v42 = vrot.slane %v3453_v21, 7  ;;  %v8720_v51 = vpack.c.bf16 %v3187_v17, %v3187_v17  ;;  %v8722_v36 = vpack.c.bf16 %v3188_v1, %v3188_v1  ;;  %3506 = vst [vmem:[#allocation2 + $0x74] sm:$0x1] %v3505_v52  ;;  %v8724_v4 = vpack.c.bf16 %v3189_v5, %v3189_v5  ;;  %v3513_v17 = vld [vmem:[#allocation2 + $0x80] sm:$0xf]  ;;  %v3992_v52 = vpop.permute.xlu0 %3991 }
 0x46e   : > { %v4553_v29 = vld [vmem:[#allocation2 + $0xf0] sm:$0xf]  ;;  %v8726_v10 = vpack.c.bf16 %v3190_v33, %v3190_v33  ;;  %v8728_v49 = vpack.c.bf16 %v3191_v61, %v3191_v61  ;;  %v8730_v15 = vpack.c.bf16 %v3196_v38, %v3196_v38  ;;  %v8733_v13 = vpack.c.bf16 %v3198_v31, %v3198_v31  ;;  %v4188_v5 = vld [vmem:[#allocation2 + $0x78] sm:$0xf] }
 0x46f   : > { %v4554_v44 = vld [vmem:[#allocation2 + $0xf8] sm:$0xf]  ;;  %4571 = vrot.lane.b32.xlu0 %v4553_v29, %s6228_s20  ;;  %v3458_v53 = vor.u32 %v3456_v32, %v3455_v42  ;;  %v3459_v58 = vrot.slane %v3455_v42, 4  ;;  %v8735_v48 = vpack.c.bf16 %v3199_v18, %v3199_v18  ;;  %v3445_v34 = vshrl.u32 %v5849_v27, 16 }
 0x470   : > { %4573 = vrot.lane.b32.xlu1 %v4554_v44, %s6228_s20  ;;  %v3448_v50 = vshll.u32 %v5849_v27, 16  ;;  %v3233_v24 = vshrl.u32 %v8696_v54, 16  ;;  %v3236_v12 = vshll.u32 %v8696_v54, 16  ;;  %v3241_v60 = vshrl.u32 %v8698_v11, 16  ;;  %v4187_v1 = vld [vmem:[#allocation2 + $0x70] sm:$0xf] }
 0x471   : > { %v3520_v2 = vsel %vm8242_vm15, %v3458_v53, %v3519_v28  ;;  %v3244_v55 = vshll.u32 %v8698_v11, 16  ;;  %v3249_v14 = vshrl.u32 %v8700_v56, 16  ;;  %v8745_v9 = vrot.slane %v3445_v34, 7  ;;  %v3516_v44 = vld [vmem:[#allocation2 + $0x84] sm:$0x1] }
 0x472   : > { %3521 = vst [vmem:[#allocation2 + $0x88] sm:$0xf] %v3520_v2  ;;  %v3252_v45 = vshll.u32 %v8700_v56, 16  ;;  %v3257_v30 = vshrl.u32 %v8702_v16, 16  ;;  %v3260_v3 = vshll.u32 %v8702_v16, 16  ;;  %v3265_v40 = vshrl.u32 %v8704_v43, 16 }
 0x473   : > { %4207 = vrot.lane.b32.xlu0 %v4187_v1, %s6224_s16  ;;  %v3268_v33 = vshll.u32 %v8704_v43, 16  ;;  %v3273_v7 = vshrl.u32 %v8706_v23, 16  ;;  %v3276_v35 = vshll.u32 %v8706_v23, 16  ;;  %v3450_v25 = vor.u32 %v3448_v50, %v8745_v9  ;;  %v3847_v29 = vld [vmem:[#allocation2 + $0xd8] sm:$0xf] }
 0x474   : > { %4209 = vrot.lane.b32.xlu1 %v4188_v5, %s6224_s16  ;;  %v3281_v59 = vshrl.u32 %v8708_v26, 16  ;;  %v3284_v61 = vshll.u32 %v8708_v26, 16  ;;  %v3289_v63 = vshrl.u32 %v8710_v19, 16  ;;  %v3451_v37 = vrot.slane %v8745_v9, 4  ;;  %v3638_v50 = vld [vmem:[#allocation2 + $0x98] sm:$0xf] }
 0x475   : > { %v3523_v31 = vsel %vm7037_vm1, %v3459_v58, %v3522_v0  ;;  %v3558_v47 = vshrl.u32 %v8714_v22, 16  ;;  %v3514_v18 = vsel %vm8242_vm15, %v3450_v25, %v3513_v17  ;;  %v3561_v39 = vshll.u32 %v8714_v22, 16  ;;  %v3641_v17 = vld [vmem:[#allocation2 + $0x9c] sm:$0x1]  ;;  %3855 = vst.msk [vmem:[#allocation4] sm:$0xf] %vm407_vm0, %v3847_v29 }
 0x476   : > { %v3566_v41 = vshrl.u32 %v8716_v6, 16  ;;  %v3569_v57 = vshll.u32 %v8716_v6, 16  ;;  %3524 = vst [vmem:[#allocation2 + $0x8c] sm:$0x1] %v3523_v31  ;;  %3515 = vst [vmem:[#allocation2 + $0x80] sm:$0xf] %v3514_v18 }
 0x477   : > { %v3574_v46 = vshrl.u32 %v8718_v62, 16  ;;  %v3582_v32 = vshrl.u32 %v8720_v51, 16  ;;  %v3590_v42 = vshrl.u32 %v8722_v36, 16  ;;  %v3598_v22 = vshrl.u32 %v8724_v4, 16  ;;  %4015 = vst.msk [vmem:[#allocation4] sm:$0xf] %vm578_vm5, %v3992_v52 }
 0x478   : > { %v3606_v58 = vshrl.u32 %v8726_v10, 16  ;;  %v3614_v34 = vshrl.u32 %v8728_v49, 16  ;;  %v3751_v2 = vshrl.u32 %v8730_v15, 16  ;;  %v3767_v9 = vshrl.u32 %v8733_v13, 16  ;;  %v3647_v29 = vld [vmem:[#allocation2 + $0xa4] sm:$0x1] }
 0x479   : > { %v4190_v53 = vld [vmem:[#allocation2 + $0x88] sm:$0xf]  ;;  %v3775_v25 = vshrl.u32 %v8735_v48, 16  ;;  %v3560_v18 = vrot.slane %v3558_v47, 7  ;;  %v8789_v0 = vrot.slane %v3233_v24, 7  ;;  %v8791_v28 = vrot.slane %v3241_v60, 7  ;;  %v4152_v24 = vpop.permute.xlu0 %4151 }
 0x47a   : > { %4213 = vrot.lane.b32.xlu1 %v4190_v53, %s6224_s16  ;;  %v8793_v53 = vrot.slane %v3249_v14, 7  ;;  %v8795_v27 = vrot.slane %v3257_v30, 7  ;;  %v8797_v1 = vrot.slane %v3265_v40, 7  ;;  %v8800_v38 = vrot.slane %v3273_v7, 7  ;;  %4175 = vst.msk [vmem:[#allocation4] sm:$0xf] %vm726_vm6, %v4152_v24 }
 0x47b   : > { %v3563_v5 = vor.u32 %v3561_v39, %v3560_v18  ;;  %v3564_v21 = vrot.slane %v3560_v18, 4  ;;  %v8802_v31 = vrot.slane %v3281_v59, 7  ;;  %v8805_v60 = vrot.slane %v3289_v63, 7  ;;  %v3644_v39 = vld [vmem:[#allocation2 + $0xa0] sm:$0xf] }
 0x47c   : > { %v3517_v14 = vsel %vm7037_vm1, %v3451_v37, %v3516_v44  ;;  %v3568_v30 = vrot.slane %v3566_v41, 7  ;;  %v8809_v40 = vrot.slane %v3574_v46, 7  ;;  %v8817_v63 = vrot.slane %v3582_v32, 7  ;;  %v3848_v18 = vld [vmem:[#allocation2 + $0xe0] sm:$0xf] }
 0x47d   : > { %v4189_v47 = vld [vmem:[#allocation2 + $0x80] sm:$0xf]  ;;  %v3639_v7 = vsel %vm8242_vm15, %v3563_v5, %v3638_v50  ;;  %v3642_v59 = vsel %vm7037_vm1, %v3564_v21, %v3641_v17  ;;  %v8819_v52 = vrot.slane %v3590_v42, 7  ;;  %3518 = vst [vmem:[#allocation2 + $0x84] sm:$0x1] %v3517_v14  ;;  %v8821_v37 = vrot.slane %v3598_v22, 7 }
 0x47e   : > { %4211 = vrot.lane.b32.xlu0 %v4189_v47, %s6224_s16  ;;  %3640 = vst [vmem:[#allocation2 + $0x98] sm:$0xf] %v3639_v7  ;;  %3643 = vst [vmem:[#allocation2 + $0x9c] sm:$0x1] %v3642_v59  ;;  %v8823_v41 = vrot.slane %v3606_v58, 7  ;;  %v8825_v46 = vrot.slane %v3614_v34, 7  ;;  %v3571_v21 = vor.u32 %v3569_v57, %v3568_v30  ;;  %v8839_v22 = vor.u32 %v3236_v12, %v8789_v0 }
 0x47f   : > { %v8827_v44 = vrot.slane %v3751_v2, 7  ;;  %v8829_v50 = vrot.slane %v3767_v9, 7  ;;  %v8831_v5 = vrot.slane %v3775_v25, 7  ;;  %v3572_v32 = vrot.slane %v3568_v30, 4  ;;  %3856 = vst.msk [vmem:[#allocation4 + $0x4] sm:$0xf] %vm407_vm0, %v3848_v18 }
 0x480   : > { %v3849_v42 = vld [vmem:[#allocation2 + $0xe8] sm:$0xf]  ;;  %v8845_v34 = vor.u32 %v3244_v55, %v8791_v28  ;;  %v3850_v6 = vld [vmem:[#allocation2 + $0xf0] sm:$0xf]  ;;  %v3851_v57 = vld [vmem:[#allocation2 + $0xf8] sm:$0xf]  ;;  %v3645_v2 = vsel %vm8242_vm15, %v3571_v21, %v3644_v39  ;;  %v8856_v12 = vor.u32 %v3252_v45, %v8793_v53  ;;  %v8864_v9 = vor.u32 %v3260_v3, %v8795_v27 }
 0x481   : > { %9914 = vst [vmem:[#allocation55_spill] sm:$0xff] %v8829_v50  ;;  %3857 = vst.msk [vmem:[#allocation4 + $0x8] sm:$0xf] %vm407_vm0, %v3849_v42  ;;  %v3648_v54 = vsel %vm7037_vm1, %v3572_v32, %v3647_v29  ;;  %v3853_v55 = vld [vmem:[#allocation2 + $0x108] sm:$0xf]  ;;  %v8870_v56 = vor.u32 %v3268_v33, %v8797_v1  ;;  %v8877_v24 = vor.u32 %v3276_v35, %v8800_v38  ;;  %v9915_v33 = vshll.u32 %v8710_v19, 16 }
 0x482   : > { %3858 = vst.msk [vmem:[#allocation4 + $0xc] sm:$0xf] %vm407_vm0, %v3850_v6  ;;  %3859 = vst.msk [vmem:[#allocation4 + $0x10] sm:$0xf] %vm407_vm0, %v3851_v57  ;;  %v8883_v3 = vor.u32 %v3284_v61, %v8802_v31  ;;  %v9916_v23 = vshll.u32 %v8718_v62, 16  ;;  %v3580_v30 = vrot.slane %v8809_v40, 4 }
 0x483   : > { %3646 = vst [vmem:[#allocation2 + $0xa0] sm:$0xf] %v3645_v2  ;;  %3649 = vst [vmem:[#allocation2 + $0xa4] sm:$0x1] %v3648_v54  ;;  %v8889_v47 = vor.u32 %v9915_v33, %v8805_v60  ;;  %v9917_v26 = vshll.u32 %v8720_v51, 16  ;;  %v9918_v19 = vshll.u32 %v8722_v36, 16 }
 0x484   : > { %3861 = vst.msk [vmem:[#allocation4 + $0x18] sm:$0xf] %vm407_vm0, %v3853_v55  ;;  %v3579_v35 = vor.u32 %v9916_v23, %v8809_v40  ;;  %v9919_v40 = vshll.u32 %v8724_v4, 16  ;;  %v3653_v51 = vld [vmem:[#allocation2 + $0xac] sm:$0x1]  ;;  %v9920_v57 = vshll.u32 %v8726_v10, 16 }
 0x485   : > { %v3865_v39 = vld [vmem:[#allocation2 + $0x98] sm:$0xf]  ;;  %v3866_v29 = vld [vmem:[#allocation2 + $0x9c] sm:$0x1]  ;;  %v8899_v61 = vor.u32 %v9917_v26, %v8817_v63  ;;  %v8905_v59 = vor.u32 %v9918_v19, %v8819_v52  ;;  %v9921_v54 = vshll.u32 %v8728_v49, 16  ;;  %v9922_v36 = vshll.u32 %v8730_v15, 16 }
 0x486   : > { %v3894_v62 = vshrl.u32 %v3865_v39, 16  ;;  %v3897_v21 = vshll.u32 %v3865_v39, 16  ;;  %v3903_v32 = vshll.u32 %v3866_v29, 16  ;;  %v8911_v42 = vor.u32 %v9919_v40, %v8821_v37  ;;  %v3316_v33 = vld [vmem:[#allocation2 + $0x8] sm:$0xf] }
 0x487   : > { %v8917_v2 = vor.u32 %v9920_v57, %v8823_v41  ;;  %v8923_v55 = vor.u32 %v9921_v54, %v8825_v46  ;;  %v3319_v23 = vld [vmem:[#allocation2 + $0xc] sm:$0x1]  ;;  %v3325_v4 = vld [vmem:[#allocation2 + $0x14] sm:$0x1]  ;;  %v3650_v39 = vld [vmem:[#allocation2 + $0xa8] sm:$0xf]  ;;  %v8929_v7 = vor.u32 %v9922_v36, %v8827_v44 }
 0x488   : > { %v3896_v29 = vrot.slane %v3894_v62, 4  ;;  %v3899_v26 = vrot.slane %v3897_v21, 5  ;;  %v3905_v19 = vrot.slane %v3903_v32, 5  ;;  %v3328_v6 = vld [vmem:[#allocation2 + $0x18] sm:$0xf]  ;;  %v9923_v54 = vshll.u32 %v8733_v13, 16 }
 0x489   : > { %v3331_v10 = vld [vmem:[#allocation2 + $0x1c] sm:$0x1]  ;;  %v3334_v21 = vld [vmem:[#allocation2 + $0x20] sm:$0xf]  ;;  %v3337_v32 = vld [vmem:[#allocation2 + $0x24] sm:$0x1]  ;;  %v3654_v62 = vsel %vm7037_vm1, %v3580_v30, %v3653_v51 }
 0x48a   : > { %v3867_v57 = vld [vmem:[#allocation2 + $0xa0] sm:$0xf]  ;;  %v3868_v18 = vld [vmem:[#allocation2 + $0xa4] sm:$0x1]  ;;  %v8935_v14 = vor.u32 %v9923_v54, %v8829_v50  ;;  %v3322_v40 = vld [vmem:[#allocation2 + $0x10] sm:$0xf]  ;;  %v3900_v43 = vor.u32 %v3899_v26, %v3896_v29  ;;  %v3651_v54 = vsel %vm8242_vm15, %v3579_v35, %v3650_v39  ;;  %v3317_v35 = vsel %vm8242_vm15, %v8839_v22, %v3316_v33 }
 0x48b   : > { %v3908_v16 = vshrl.u32 %v3867_v57, 16  ;;  %v3911_v45 = vshll.u32 %v3867_v57, 16  ;;  %v3917_v25 = vshll.u32 %v3868_v18, 16  ;;  %v8938_v11 = vld [vmem:[#allocation2 + $0x38] sm:$0xf]  ;;  %v9924_v36 = vshll.u32 %v8735_v48, 16 }
 0x48c   : > { %v3343_v15 = vld [vmem:[#allocation2 + $0x2c] sm:$0x1]  ;;  %v3781_v13 = vrot.slane %v8831_v5, 4  ;;  %v3355_v29 = vld [vmem:[#allocation2 + $0x3c] sm:$0x1]  ;;  %v3901_v18 = vrot.slane %v3900_v43, 4  ;;  %v3329_v33 = vsel %vm8242_vm15, %v8856_v12, %v3328_v6 }
 0x48d   : > { %v8943_v49 = vor.u32 %v9924_v36, %v8831_v5  ;;  %v3340_v26 = vld [vmem:[#allocation2 + $0x28] sm:$0xf]  ;;  %v3361_v57 = vld [vmem:[#allocation2 + $0x44] sm:$0x1]  ;;  %v3910_v17 = vrot.slane %v3908_v16, 4  ;;  %v3913_v58 = vrot.slane %v3911_v45, 5  ;;  %v3323_v45 = vsel %vm8242_vm15, %v8845_v34, %v3322_v40 }
 0x48e   : > { %v8950_v50 = vrot.slane %v3917_v25, 5  ;;  %3652 = vst [vmem:[#allocation2 + $0xa8] sm:$0xf] %v3651_v54  ;;  %3655 = vst [vmem:[#allocation2 + $0xac] sm:$0x1] %v3654_v62  ;;  %v9926_v39 = vrot.slane %v8789_v0, 4  ;;  %v3906_v22 = vsel %vm6371_vm3, %v3901_v18, %v3905_v19  ;;  %v3341_v12 = vsel %vm8242_vm15, %v8870_v56, %v3340_v26 }
 0x48f   : > { %9925 = vst [vmem:[#allocation56_spill] sm:$0xff] %v8943_v49  ;;  %v3358_v48 = vld [vmem:[#allocation2 + $0x40] sm:$0xf]  ;;  %v3346_v36 = vld [vmem:[#allocation2 + $0x30] sm:$0xf]  ;;  %v9927_v25 = vrot.slane %v8791_v28, 4  ;;  %v3914_v0 = vor.u32 %v3913_v58, %v3910_v17  ;;  %3993 = vrot.lane.b32.xlu1 %v3906_v22, %s6223_s15  ;;  %v3335_v58 = vsel %vm8242_vm15, %v8864_v9, %v3334_v21 }
 0x490   : > { %v3349_v49 = vld [vmem:[#allocation2 + $0x34] sm:$0x1]  ;;  %v3320_v30 = vsel %vm7037_vm1, %v9926_v39, %v3319_v23  ;;  %v3656_v43 = vld [vmem:[#allocation2 + $0xb0] sm:$0xf]  ;;  %v8966_v62 = vld [vmem:[#allocation2 + $0xc8] sm:$0xf] }
 0x491   : > { %v3326_v16 = vsel %vm7037_vm1, %v9927_v25, %v3325_v4  ;;  %v3659_v51 = vld [vmem:[#allocation2 + $0xb4] sm:$0x1]  ;;  %v9929_v23 = vrot.slane %v8793_v53, 4  ;;  %3318 = vst [vmem:[#allocation2 + $0x8] sm:$0xf] %v3317_v35  ;;  %v9930_v17 = vrot.slane %v8795_v27, 4  ;;  %v3347_v27 = vsel %vm8242_vm15, %v8877_v24, %v3346_v36 }
 0x492   : > { %3321 = vst [vmem:[#allocation2 + $0xc] sm:$0x1] %v3320_v30  ;;  %3324 = vst [vmem:[#allocation2 + $0x10] sm:$0xf] %v3323_v45  ;;  %v3677_v34 = vld [vmem:[#allocation2 + $0xcc] sm:$0x1]  ;;  %v3359_v24 = vsel %vm8242_vm15, %v8889_v47, %v3358_v48 }
 0x493   : > { %v3332_v28 = vsel %vm7037_vm1, %v9929_v23, %v3331_v10  ;;  %3327 = vst [vmem:[#allocation2 + $0x14] sm:$0x1] %v3326_v16  ;;  %v3662_v4 = vld [vmem:[#allocation2 + $0xb8] sm:$0xf]  ;;  %v3665_v40 = vld [vmem:[#allocation2 + $0xbc] sm:$0x1]  ;;  %v3338_v53 = vsel %vm7037_vm1, %v9930_v17, %v3337_v32  ;;  %v3675_v16 = vsel %vm8242_vm15, %v8917_v2, %v8966_v62 }
 0x494   : > { %v9931_v6 = vrot.slane %v8797_v1, 4  ;;  %3330 = vst [vmem:[#allocation2 + $0x18] sm:$0xf] %v3329_v33  ;;  %3333 = vst [vmem:[#allocation2 + $0x1c] sm:$0x1] %v3332_v28  ;;  %v3915_v9 = vrot.slane %v3914_v0, 4  ;;  %v3353_v1 = vsel %vm8242_vm15, %v8883_v3, %v8938_v11  ;;  %v3657_v3 = vsel %vm8242_vm15, %v8899_v61, %v3656_v43 }
 0x495   : > { %v3683_v10 = vld [vmem:[#allocation2 + $0xd4] sm:$0x1]  ;;  %v3668_v18 = vld [vmem:[#allocation2 + $0xc0] sm:$0xf]  ;;  %v3671_v35 = vld [vmem:[#allocation2 + $0xc4] sm:$0x1] }
 0x496   : > { %v3344_v19 = vsel %vm7037_vm1, %v9931_v6, %v3343_v15  ;;  %v9932_v21 = vrot.slane %v8800_v38, 4  ;;  %3336 = vst [vmem:[#allocation2 + $0x20] sm:$0xf] %v3335_v58  ;;  %3339 = vst [vmem:[#allocation2 + $0x24] sm:$0x1] %v3338_v53  ;;  %v9933_v39 = vrot.slane %v8802_v31, 4  ;;  %v3669_v25 = vsel %vm8242_vm15, %v8911_v42, %v3668_v18 }
 0x497   : > { %3342 = vst [vmem:[#allocation2 + $0x28] sm:$0xf] %v3341_v12  ;;  %3345 = vst [vmem:[#allocation2 + $0x2c] sm:$0x1] %v3344_v19  ;;  %v3680_v32 = vld [vmem:[#allocation2 + $0xd0] sm:$0xf] }
 0x498   : > { %v3350_v56 = vsel %vm7037_vm1, %v9932_v21, %v3349_v49  ;;  %v3835_v15 = vld [vmem:[#allocation2 + $0x110] sm:$0xf]  ;;  %v3838_v26 = vld [vmem:[#allocation2 + $0x114] sm:$0x1]  ;;  %v3356_v38 = vsel %vm7037_vm1, %v9933_v39, %v3355_v29  ;;  %v9934_v49 = vrot.slane %v8805_v60, 4  ;;  %v3920_v29 = vsel %vm6371_vm3, %v3915_v9, %v8950_v50 }
 0x499   : > { %3348 = vst [vmem:[#allocation2 + $0x30] sm:$0xf] %v3347_v27  ;;  %3351 = vst [vmem:[#allocation2 + $0x34] sm:$0x1] %v3350_v56  ;;  %v3823_v31 = vld [vmem:[#allocation2 + $0x100] sm:$0xf]  ;;  %3995 = vrot.lane.b32.xlu0 %v3920_v29, %s6223_s15 }
 0x49a   : > { %v3362_v11 = vsel %vm7037_vm1, %v9934_v49, %v3361_v57  ;;  %3354 = vst [vmem:[#allocation2 + $0x38] sm:$0xf] %v3353_v1  ;;  %v3826_v36 = vld [vmem:[#allocation2 + $0x104] sm:$0x1]  ;;  %v3844_v30 = vld [vmem:[#allocation2 + $0x11c] sm:$0x1]  ;;  %v3663_v57 = vsel %vm8242_vm15, %v8905_v59, %v3662_v4  ;;  %v3824_v28 = vsel %vm8242_vm15, %v8929_v7, %v3823_v31  ;;  %v3836_v4 = vsel %vm8242_vm15, %v8935_v14, %v3835_v15 }
 0x49b   : > { %v9935_v47 = vrot.slane %v8817_v63, 4  ;;  %v9936_v61 = vrot.slane %v8819_v52, 4  ;;  %3357 = vst [vmem:[#allocation2 + $0x3c] sm:$0x1] %v3356_v38  ;;  %3360 = vst [vmem:[#allocation2 + $0x40] sm:$0xf] %v3359_v24  ;;  %v3845_v18 = vsel %vm7037_vm1, %v3781_v13, %v3844_v30 }
 0x49c   : > { %3363 = vst [vmem:[#allocation2 + $0x44] sm:$0x1] %v3362_v11  ;;  %3658 = vst [vmem:[#allocation2 + $0xb0] sm:$0xf] %v3657_v3  ;;  %v3841_v45 = vld [vmem:[#allocation2 + $0x118] sm:$0xf] }
 0x49d   : > { %v3660_v60 = vsel %vm7037_vm1, %v9935_v47, %v3659_v51  ;;  %v3666_v48 = vsel %vm7037_vm1, %v9936_v61, %v3665_v40  ;;  %v3869_v63 = vld [vmem:[#allocation2 + $0xa8] sm:$0xf]  ;;  %v3870_v50 = vld [vmem:[#allocation2 + $0xac] sm:$0x1]  ;;  %v9937_v59 = vrot.slane %v8821_v37, 4  ;;  %v9938_v43 = vrot.slane %v8823_v41, 4  ;;  %v4200_v61 = vpop.permute.xlu0 %4199 }
 0x49e   : > { %3661 = vst [vmem:[#allocation2 + $0xb4] sm:$0x1] %v3660_v60  ;;  %3664 = vst [vmem:[#allocation2 + $0xb8] sm:$0xf] %v3663_v57  ;;  %v3922_v22 = vshrl.u32 %v3869_v63, 16  ;;  %v3925_v42 = vshll.u32 %v3869_v63, 16  ;;  %v3681_v37 = vsel %vm8242_vm15, %v8923_v55, %v3680_v32 }
 0x49f   : > { %v3672_v52 = vsel %vm7037_vm1, %v9937_v59, %v3671_v35  ;;  %v3678_v51 = vsel %vm7037_vm1, %v9938_v43, %v3677_v34  ;;  %3667 = vst [vmem:[#allocation2 + $0xbc] sm:$0x1] %v3666_v48  ;;  %v4027_v0 = vld [vmem:[#allocation2 + $0xe8] sm:$0xf]  ;;  %3670 = vst [vmem:[#allocation2 + $0xc0] sm:$0xf] %v3669_v25 }
 0x4a0   : > { %3673 = vst [vmem:[#allocation2 + $0xc4] sm:$0x1] %v3672_v52  ;;  %3676 = vst [vmem:[#allocation2 + $0xc8] sm:$0xf] %v3675_v16  ;;  %v9939_v2 = vld [vmem:[#allocation47_spill] sm:$0xff]  ;;  %v9941_v33 = vrot.slane %v8825_v46, 4 }
 0x4a1   : > { %3679 = vst [vmem:[#allocation2 + $0xcc] sm:$0x1] %v3678_v51  ;;  %v9940_v62 = vshll.u32 %v9939_v2, 16  ;;  %v9942_v55 = vrot.slane %v8827_v44, 4  ;;  %v4028_v40 = vld [vmem:[#allocation2 + $0xec] sm:$0x1] }
 0x4a2   : > { %v3684_v23 = vsel %vm7037_vm1, %v9941_v33, %v3683_v10  ;;  %3682 = vst [vmem:[#allocation2 + $0xd0] sm:$0xf] %v3681_v37  ;;  %v4025_v58 = vld [vmem:[#allocation2 + $0xe0] sm:$0xf]  ;;  %v4026_v46 = vld [vmem:[#allocation2 + $0xe4] sm:$0x1] }
 0x4a3   : > { %v9052_v41 = vrot.slane %v9940_v62, 5  ;;  %v3827_v34 = vsel %vm7037_vm1, %v9942_v55, %v3826_v36  ;;  %v3924_v17 = vrot.slane %v3922_v22, 4  ;;  %v3927_v53 = vrot.slane %v3925_v42, 5  ;;  %v9943_v6 = vld [vmem:[#allocation55_spill] sm:$0xff]  ;;  %3685 = vst [vmem:[#allocation2 + $0xd4] sm:$0x1] %v3684_v23 }
 0x4a4   : > { %v3931_v12 = vshll.u32 %v3870_v50, 16  ;;  %v9944_v19 = vrot.slane %v9943_v6, 4  ;;  %3825 = vst [vmem:[#allocation2 + $0x100] sm:$0xf] %v3824_v28  ;;  %3828 = vst [vmem:[#allocation2 + $0x104] sm:$0x1] %v3827_v34 }
 0x4a5   : > { %3837 = vst [vmem:[#allocation2 + $0x110] sm:$0xf] %v3836_v4  ;;  %v4231_v44 = vld [vmem:[#allocation2 + $0x8] sm:$0xf]  ;;  %v9945_v10 = vld [vmem:[#allocation56_spill] sm:$0xff]  ;;  %v4068_v35 = vshrl.u32 %v4027_v0, 16  ;;  %v3928_v27 = vor.u32 %v3927_v53, %v3924_v17 }
 0x4a6   : > { %v3839_v7 = vsel %vm7037_vm1, %v9944_v19, %v3838_v26  ;;  %v3842_v14 = vsel %vm8242_vm15, %v9945_v10, %v3841_v45  ;;  %v4071_v9 = vshll.u32 %v4027_v0, 16  ;;  %v4077_v21 = vshll.u32 %v4028_v40, 16  ;;  %3846 = vst [vmem:[#allocation2 + $0x11c] sm:$0x1] %v3845_v18  ;;  %v4029_v32 = vld [vmem:[#allocation2 + $0xf0] sm:$0xf] }
 0x4a7   : > { %3840 = vst [vmem:[#allocation2 + $0x114] sm:$0x1] %v3839_v7  ;;  %3843 = vst [vmem:[#allocation2 + $0x118] sm:$0xf] %v3842_v14  ;;  %v4054_v56 = vshrl.u32 %v4025_v58, 16  ;;  %v4057_v1 = vshll.u32 %v4025_v58, 16 }
 0x4a8   : > { %v4070_v15 = vrot.slane %v4068_v35, 4  ;;  %v4073_v26 = vrot.slane %v4071_v9, 5  ;;  %v4063_v39 = vshll.u32 %v4026_v46, 16  ;;  %v4232_v8 = vld [vmem:[#allocation2 + $0xc] sm:$0x1]  ;;  %v4248_v38 = vshrl.u32 %v4231_v44, 16 }
 0x4a9   : > { %v3929_v24 = vrot.slane %v3928_v27, 4  ;;  %v3933_v5 = vrot.slane %v3931_v12, 5  ;;  %v4056_v49 = vrot.slane %v4054_v56, 4  ;;  %v4059_v20 = vrot.slane %v4057_v1, 5  ;;  %v4030_v13 = vld [vmem:[#allocation2 + $0xf4] sm:$0x1] }
 0x4aa   : > { %v4074_v11 = vor.u32 %v4073_v26, %v4070_v15  ;;  %v4079_v3 = vrot.slane %v4077_v21, 5  ;;  %v4250_v31 = vrot.slane %v4248_v38, 4  ;;  %v4251_v36 = vshll.u32 %v4231_v44, 16  ;;  %v4235_v30 = vld [vmem:[#allocation2 + $0x18] sm:$0xf]  ;;  %v9947_v6 = vld [vmem:[#allocation51_spill] sm:$0xff] }
 0x4ab   : > { %v3934_v29 = vsel %vm6371_vm3, %v3929_v24, %v3933_v5  ;;  %v4060_v47 = vor.u32 %v4059_v20, %v4056_v49  ;;  %v4257_v60 = vshll.u32 %v4232_v8, 16  ;;  %v4082_v57 = vshrl.u32 %v4029_v32, 16  ;;  %v4236_v25 = vld [vmem:[#allocation2 + $0x1c] sm:$0x1]  ;;  %4223 = vst.msk [vmem:[#allocation4] sm:$0xf] %vm767_vm7, %v4200_v61 }
 0x4ac   : > { %3997 = vrot.lane.b32.xlu1 %v3934_v29, %s6223_s15  ;;  %v4075_v48 = vrot.slane %v4074_v11, 4  ;;  %v4065_v45 = vrot.slane %v4063_v39, 5  ;;  %v4253_v63 = vrot.slane %v4251_v36, 5  ;;  %v4085_v50 = vshll.u32 %v4029_v32, 16  ;;  %v4233_v51 = vld [vmem:[#allocation2 + $0x10] sm:$0xf] }
 0x4ad   : > { %v4061_v59 = vrot.slane %v4060_v47, 4  ;;  %v4084_v52 = vrot.slane %v4082_v57, 4  ;;  %v4091_v16 = vshll.u32 %v4030_v13, 16  ;;  %v4276_v43 = vshrl.u32 %v4235_v30, 16  ;;  %v4234_v2 = vld [vmem:[#allocation2 + $0x14] sm:$0x1] }
 0x4ae   : > { %v4080_v22 = vsel %vm6371_vm3, %v4075_v48, %v4079_v3  ;;  %v4254_v42 = vor.u32 %v4253_v63, %v4250_v31  ;;  %v4259_v37 = vrot.slane %v4257_v60, 5  ;;  %v4087_v0 = vrot.slane %v4085_v50, 5  ;;  %v4237_v58 = vld [vmem:[#allocation2 + $0x20] sm:$0xf]  ;;  %v9946_v12 = vld [vmem:[#allocation52_spill] sm:$0xff]  ;;  %v9950_v20 = vld [vmem:[#allocation54_spill] sm:$0xff] }
 0x4af   : > { %4155 = vrot.lane.b32.xlu0 %v4080_v22, %s6225_s17  ;;  %v4066_v62 = vsel %vm6371_vm3, %v4061_v59, %v4065_v45  ;;  %v4278_v33 = vrot.slane %v4276_v43, 4  ;;  %v4279_v23 = vshll.u32 %v4235_v30, 16  ;;  %v4285_v28 = vshll.u32 %v4236_v25, 16  ;;  %v4238_v35 = vld [vmem:[#allocation2 + $0x24] sm:$0x1] }
 0x4b0   : > { %4153 = vrot.lane.b32.xlu1 %v4066_v62, %s6225_s17  ;;  %v4255_v55 = vrot.slane %v4254_v42, 4  ;;  %v4088_v34 = vor.u32 %v4087_v0, %v4084_v52  ;;  %v4262_v4 = vshrl.u32 %v4233_v51, 16  ;;  %v4265_v40 = vshll.u32 %v4233_v51, 16  ;;  %v4393_v1 = vld [vmem:[#allocation2 + $0x58] sm:$0xf]  ;;  %v9949_v26 = vld [vmem:[#allocation53_spill] sm:$0xff] }
 0x4b1   : > { %v4093_v46 = vrot.slane %v4091_v16, 5  ;;  %v4281_v17 = vrot.slane %v4279_v23, 5  ;;  %v4271_v53 = vshll.u32 %v4234_v2, 16  ;;  %v9948_v19 = vor.u32 %v9946_v12, %v9947_v6  ;;  %v4394_v38 = vld [vmem:[#allocation2 + $0x5c] sm:$0x1]  ;;  %v9951_v36 = vld [vmem:[#allocation49_spill] sm:$0xff] }
 0x4b2   : > { %v4260_v44 = vsel %vm6371_vm3, %v4255_v55, %v4259_v37  ;;  %v4089_v10 = vrot.slane %v4088_v34, 4  ;;  %v4264_v14 = vrot.slane %v4262_v4, 4  ;;  %v4267_v18 = vrot.slane %v4265_v40, 5  ;;  %v4599_v11 = vld [vmem:[#allocation2 + $0x98] sm:$0xf] }
 0x4b3   : > { %v4415_v7 = vrot.slane %v9948_v19, 4  ;;  %4359 = vrot.lane.b32.xlu0 %v4260_v44, %s6226_s18  ;;  %v4282_v9 = vor.u32 %v4281_v17, %v4278_v33  ;;  %v4287_v27 = vrot.slane %v4285_v28, 5  ;;  %v4273_v21 = vrot.slane %v4271_v53, 5  ;;  %v4397_v60 = vld [vmem:[#allocation2 + $0x68] sm:$0xf] }
 0x4b4   : > { %v4290_v56 = vshrl.u32 %v4237_v58, 16  ;;  %v4094_v32 = vsel %vm6371_vm3, %v4089_v10, %v4093_v46  ;;  %v4268_v15 = vor.u32 %v4267_v18, %v4264_v14  ;;  %v4293_v8 = vshll.u32 %v4237_v58, 16  ;;  %v4600_v63 = vld [vmem:[#allocation2 + $0x9c] sm:$0x1]  ;;  %v4398_v52 = vld [vmem:[#allocation2 + $0x6c] sm:$0x1] }
 0x4b5   : > { %v4420_v39 = vsel %vm6371_vm3, %v4415_v7, %v9949_v26  ;;  %4157 = vrot.lane.b32.xlu1 %v4094_v32, %s6225_s17  ;;  %v4283_v24 = vrot.slane %v4282_v9, 4  ;;  %v4299_v49 = vshll.u32 %v4238_v35, 16  ;;  %v4442_v13 = vor.u32 %v9052_v41, %v9950_v20  ;;  %v4603_v42 = vld [vmem:[#allocation2 + $0xa8] sm:$0xf]  ;;  %v4601_v33 = vld [vmem:[#allocation2 + $0xa0] sm:$0xf] }
 0x4b6   : > { %v4292_v5 = vrot.slane %v4290_v56, 4  ;;  %v4269_v3 = vrot.slane %v4268_v15, 4  ;;  %v4295_v31 = vrot.slane %v4293_v8, 5  ;;  %v9952_v30 = vshll.u32 %v9951_v36, 16  ;;  %v4604_v4 = vld [vmem:[#allocation2 + $0xac] sm:$0x1] }
 0x4b7   : > { %v4422_v47 = vshrl.u32 %v4393_v1, 16  ;;  %v4288_v57 = vsel %vm6371_vm3, %v4283_v24, %v4287_v27  ;;  %v4443_v61 = vrot.slane %v4442_v13, 4  ;;  %v4425_v48 = vshll.u32 %v4393_v1, 16  ;;  %v4602_v7 = vld [vmem:[#allocation2 + $0xa4] sm:$0x1] }
 0x4b8   : > { %v4447_v29 = vrot.slane %v9952_v30, 5  ;;  %v4431_v45 = vshll.u32 %v4394_v38, 16  ;;  %4363 = vrot.lane.b32.xlu0 %v4288_v57, %s6226_s18  ;;  %v4274_v41 = vsel %vm6371_vm3, %v4269_v3, %v4273_v21  ;;  %v4296_v50 = vor.u32 %v4295_v31, %v4292_v5  ;;  %v4759_v35 = vld [vmem:[#allocation2 + $0xe0] sm:$0xf]  ;;  %v4760_v1 = vld [vmem:[#allocation2 + $0xe4] sm:$0x1] }
 0x4b9   : > { %v4424_v25 = vrot.slane %v4422_v47, 4  ;;  %v4616_v59 = vshrl.u32 %v4599_v11, 16  ;;  %4361 = vrot.lane.b32.xlu1 %v4274_v41, %s6226_s18  ;;  %v4301_v16 = vrot.slane %v4299_v49, 5  ;;  %v4427_v51 = vrot.slane %v4425_v48, 5  ;;  %v4605_v8 = vld [vmem:[#allocation2 + $0xb0] sm:$0xf] }
 0x4ba   : > { %v4448_v43 = vsel %vm6371_vm3, %v4443_v61, %v4447_v29  ;;  %v4619_v22 = vshll.u32 %v4599_v11, 16  ;;  %v4297_v37 = vrot.slane %v4296_v50, 4  ;;  %v4625_v2 = vshll.u32 %v4600_v63, 16  ;;  %v4606_v31 = vld [vmem:[#allocation2 + $0xb4] sm:$0x1] }
 0x4bb   : > { %v4618_v0 = vrot.slane %v4616_v59, 4  ;;  %v4450_v62 = vshrl.u32 %v4397_v60, 16  ;;  %v4428_v23 = vor.u32 %v4427_v51, %v4424_v25  ;;  %v4453_v55 = vshll.u32 %v4397_v60, 16  ;;  %v3871_v36 = vld [vmem:[#allocation2 + $0xb0] sm:$0xf] }
 0x4bc   : > { %v4621_v28 = vrot.slane %v4619_v22, 5  ;;  %v4459_v34 = vshll.u32 %v4398_v52, 16  ;;  %4519 = vrot.lane.b32.xlu0 %v4420_v39, %s6227_s19  ;;  %v4302_v40 = vsel %vm6371_vm3, %v4297_v37, %v4301_v16  ;;  %v4433_v58 = vrot.slane %v4431_v45, 5  ;;  %v4761_v57 = vld [vmem:[#allocation2 + $0xe8] sm:$0xf] }
 0x4bd   : > { %v4452_v46 = vrot.slane %v4450_v62, 4  ;;  %v4644_v17 = vshrl.u32 %v4603_v42, 16  ;;  %4365 = vrot.lane.b32.xlu1 %v4302_v40, %s6226_s18  ;;  %v4429_v53 = vrot.slane %v4428_v23, 4  ;;  %v4627_v6 = vrot.slane %v4625_v2, 5  ;;  %v3872_v41 = vld [vmem:[#allocation2 + $0xb4] sm:$0x1] }
 0x4be   : > { %v4622_v12 = vor.u32 %v4621_v28, %v4618_v0  ;;  %v4455_v19 = vrot.slane %v4453_v55, 5  ;;  %v4647_v10 = vshll.u32 %v4603_v42, 16  ;;  %v4653_v14 = vshll.u32 %v4604_v4, 16  ;;  %v4762_v16 = vld [vmem:[#allocation2 + $0xec] sm:$0x1] }
 0x4bf   : > { %v4646_v44 = vrot.slane %v4644_v17, 4  ;;  %v4630_v18 = vshrl.u32 %v4601_v33, 16  ;;  %v4461_v21 = vrot.slane %v4459_v34, 5  ;;  %v4633_v56 = vshll.u32 %v4601_v33, 16  ;;  %v4763_v37 = vld [vmem:[#allocation2 + $0xf0] sm:$0xf] }
 0x4c0   : > { %v4623_v9 = vrot.slane %v4622_v12, 4  ;;  %v4456_v27 = vor.u32 %v4455_v19, %v4452_v46  ;;  %4523 = vrot.lane.b32.xlu0 %v4448_v43, %s6227_s19  ;;  %v4434_v32 = vsel %vm6371_vm3, %v4429_v53, %v4433_v58  ;;  %v4649_v15 = vrot.slane %v4647_v10, 5  ;;  %v4764_v23 = vld [vmem:[#allocation2 + $0xf4] sm:$0x1]  ;;  %v3873_v28 = vld [vmem:[#allocation2 + $0xb8] sm:$0xf] }
 0x4c1   : > { %v4632_v26 = vrot.slane %v4630_v18, 4  ;;  %v4639_v39 = vshll.u32 %v4602_v7, 16  ;;  %4521 = vrot.lane.b32.xlu1 %v4434_v32, %s6227_s19  ;;  %v4655_v24 = vrot.slane %v4653_v14, 5  ;;  %v4635_v5 = vrot.slane %v4633_v56, 5  ;;  %v3852_v58 = vld [vmem:[#allocation2 + $0x100] sm:$0xf] }
 0x4c2   : > { %v4457_v38 = vrot.slane %v4456_v27, 4  ;;  %v4776_v49 = vshrl.u32 %v4759_v35, 16  ;;  %v4628_v20 = vsel %vm6371_vm3, %v4623_v9, %v4627_v6  ;;  %v4650_v13 = vor.u32 %v4649_v15, %v4646_v44  ;;  %3860 = vst.msk [vmem:[#allocation4 + $0x14] sm:$0xf] %vm407_vm0, %v3852_v58  ;;  %v3854_v6 = vld [vmem:[#allocation2 + $0x110] sm:$0xf] }
 0x4c3   : > { %v4779_v11 = vshll.u32 %v4759_v35, 16  ;;  %v4785_v3 = vshll.u32 %v4760_v1, 16  ;;  %v4636_v30 = vor.u32 %v4635_v5, %v4632_v26  ;;  %v4641_v29 = vrot.slane %v4639_v39, 5  ;;  %v3874_v14 = vld [vmem:[#allocation2 + $0xbc] sm:$0x1] }
 0x4c4   : > { %v4778_v47 = vrot.slane %v4776_v49, 4  ;;  %v4658_v60 = vshrl.u32 %v4605_v8, 16  ;;  %4727 = vrot.lane.b32.xlu0 %v4628_v20, %s6229_s21  ;;  %v4462_v61 = vsel %vm6371_vm3, %v4457_v38, %v4461_v21  ;;  %v4651_v48 = vrot.slane %v4650_v13, 4  ;;  %3862 = vst.msk [vmem:[#allocation4 + $0x1c] sm:$0xf] %vm407_vm0, %v3854_v6 }
 0x4c5   : > { %v4781_v45 = vrot.slane %v4779_v11, 5  ;;  %v4661_v63 = vshll.u32 %v4605_v8, 16  ;;  %4525 = vrot.lane.b32.xlu1 %v4462_v61, %s6227_s19  ;;  %v4637_v50 = vrot.slane %v4636_v30, 4  ;;  %v4667_v59 = vshll.u32 %v4606_v31, 16  ;;  %v3875_v21 = vld [vmem:[#allocation2 + $0xc0] sm:$0xf] }
 0x4c6   : > { %v4660_v25 = vrot.slane %v4658_v60, 4  ;;  %v3936_v52 = vshrl.u32 %v3871_v36, 16  ;;  %v4787_v51 = vrot.slane %v4785_v3, 5  ;;  %v3939_v42 = vshll.u32 %v3871_v36, 16  ;;  %v4765_v56 = vld [vmem:[#allocation2 + $0xf8] sm:$0xf] }
 0x4c7   : > { %v4782_v43 = vor.u32 %v4781_v45, %v4778_v47  ;;  %v4663_v22 = vrot.slane %v4661_v63, 5  ;;  %v4656_v0 = vsel %vm6371_vm3, %v4651_v48, %v4655_v24  ;;  %v4642_v2 = vsel %vm6371_vm3, %v4637_v50, %v4641_v29  ;;  %v9143_v39 = vld [vmem:[%s9638_s5 + $0x10] ss:$0 sps:$4 sm:$0x33]   ;;  %v3876_v49 = vld [vmem:[#allocation2 + $0xc4] sm:$0x1] }
 0x4c8   : > { %v3938_v62 = vrot.slane %v3936_v52, 4  ;;  %v3945_v33 = vshll.u32 %v3872_v41, 16  ;;  %4731 = vrot.lane.b32.xlu0 %v4656_v0, %s6229_s21  ;;  %v3941_v4 = vrot.slane %v3939_v42, 5  ;;  %v4790_v40 = vshrl.u32 %v4761_v57, 16  ;;  %5953 = vmatprep.subr.msk.bf16.mxu1 %vm2335_vm4, %v9143_v39  ;;  %v4766_v47 = vld [vmem:[#allocation2 + $0xfc] sm:$0x1] }
 0x4c9   : > { %v4783_v55 = vrot.slane %v4782_v43, 4  ;;  %v4664_v34 = vor.u32 %v4663_v22, %v4660_v25  ;;  %4729 = vrot.lane.b32.xlu1 %v4642_v2, %s6229_s21  ;;  %v4669_v46 = vrot.slane %v4667_v59, 5  ;;  %v4793_v17 = vshll.u32 %v4761_v57, 16  ;;  %v4031_v45 = vld [vmem:[#allocation2 + $0xf8] sm:$0xf] }
 0x4ca   : > { %v4799_v53 = vshll.u32 %v4762_v16, 16  ;;  %v4804_v12 = vshrl.u32 %v4763_v37, 16  ;;  %v3942_v7 = vor.u32 %v3941_v4, %v3938_v62  ;;  %v3947_v44 = vrot.slane %v3945_v33, 5  ;;  %v4032_v59 = vld [vmem:[#allocation2 + $0xfc] sm:$0x1] }
 0x4cb   : > { %v4665_v19 = vrot.slane %v4664_v34, 4  ;;  %v4792_v10 = vrot.slane %v4790_v40, 4  ;;  %v4788_v18 = vsel %vm6371_vm3, %v4783_v55, %v4787_v51  ;;  %v4795_v35 = vrot.slane %v4793_v17, 5  ;;  %v3877_v22 = vld [vmem:[#allocation2 + $0xc8] sm:$0xf] }
 0x4cc   : > { %v4806_v9 = vrot.slane %v4804_v12, 4  ;;  %v4807_v27 = vshll.u32 %v4763_v37, 16  ;;  %4887 = vrot.lane.b32.xlu0 %v4788_v18, %s6230_s22  ;;  %v3943_v32 = vrot.slane %v3942_v7, 4  ;;  %v4813_v15 = vshll.u32 %v4764_v23, 16  ;;  %v4035_v62 = vld [vmem:[#allocation2 + $0x108] sm:$0xf] }
 0x4cd   : > { %v4670_v1 = vsel %vm6371_vm3, %v4665_v19, %v4669_v46  ;;  %v3950_v26 = vshrl.u32 %v3873_v28, 16  ;;  %v4796_v8 = vor.u32 %v4795_v35, %v4792_v10  ;;  %v4801_v38 = vrot.slane %v4799_v53, 5  ;;  %v3878_v34 = vld [vmem:[#allocation2 + $0xcc] sm:$0x1]  ;;  %v4033_v18 = vld [vmem:[#allocation2 + $0x100] sm:$0xf] }
 0x4ce   : > { %4733 = vrot.lane.b32.xlu1 %v4670_v1, %s6229_s21  ;;  %v4809_v24 = vrot.slane %v4807_v27, 5  ;;  %v3953_v5 = vshll.u32 %v3873_v28, 16  ;;  %v3948_v20 = vsel %vm6371_vm3, %v3943_v32, %v3947_v44  ;;  %v3959_v11 = vshll.u32 %v3874_v14, 16  ;;  %v4036_v19 = vld [vmem:[#allocation2 + $0x10c] sm:$0x1] }
 0x4cf   : > { %v3952_v13 = vrot.slane %v3950_v26, 4  ;;  %v3964_v3 = vshrl.u32 %v3875_v21, 16  ;;  %v4797_v31 = vrot.slane %v4796_v8, 4  ;;  %v4815_v30 = vrot.slane %v4813_v15, 5  ;;  %v4239_v1 = vld [vmem:[#allocation2 + $0x28] sm:$0xf] }
 0x4d0   : > { %v4810_v36 = vor.u32 %v4809_v24, %v4806_v9  ;;  %v3955_v29 = vrot.slane %v3953_v5, 5  ;;  %3999 = vrot.lane.b32.xlu0 %v3948_v20, %s6223_s15  ;;  %v3967_v57 = vshll.u32 %v3875_v21, 16  ;;  %v3973_v61 = vshll.u32 %v3876_v49, 16  ;;  %v4240_v20 = vld [vmem:[#allocation2 + $0x2c] sm:$0x1] }
 0x4d1   : > { %v3966_v60 = vrot.slane %v3964_v3, 4  ;;  %v4818_v48 = vshrl.u32 %v4765_v56, 16  ;;  %v4802_v63 = vsel %vm6371_vm3, %v4797_v31, %v4801_v38  ;;  %v4821_v25 = vshll.u32 %v4765_v56, 16  ;;  %v4034_v56 = vld [vmem:[#allocation2 + $0x104] sm:$0x1] }
 0x4d2   : > { %v4811_v41 = vrot.slane %v4810_v36, 4  ;;  %v3956_v50 = vor.u32 %v3955_v29, %v3952_v13  ;;  %4889 = vrot.lane.b32.xlu1 %v4802_v63, %s6230_s22  ;;  %v3961_v52 = vrot.slane %v3959_v11, 5  ;;  %v3969_v16 = vrot.slane %v3967_v57, 5  ;;  %v4037_v36 = vld [vmem:[#allocation2 + $0x110] sm:$0xf] }
 0x4d3   : > { %v4820_v43 = vrot.slane %v4818_v48, 4  ;;  %v4827_v51 = vshll.u32 %v4766_v47, 16  ;;  %v4823_v0 = vrot.slane %v4821_v25, 5  ;;  %v4096_v2 = vshrl.u32 %v4031_v45, 16  ;;  %v4038_v57 = vld [vmem:[#allocation2 + $0x114] sm:$0x1] }
 0x4d4   : > { %v4816_v42 = vsel %vm6371_vm3, %v4811_v41, %v4815_v30  ;;  %v3957_v37 = vrot.slane %v3956_v50, 4  ;;  %v3970_v33 = vor.u32 %v3969_v16, %v3966_v60  ;;  %v3975_v23 = vrot.slane %v3973_v61, 5  ;;  %v4243_v41 = vld [vmem:[#allocation2 + $0x38] sm:$0xf]  ;;  %v4244_v16 = vld [vmem:[#allocation2 + $0x3c] sm:$0x1] }
 0x4d5   : > { %4891 = vrot.lane.b32.xlu0 %v4816_v42, %s6230_s22  ;;  %v4099_v28 = vshll.u32 %v4031_v45, 16  ;;  %v4105_v55 = vshll.u32 %v4032_v59, 16  ;;  %v4824_v40 = vor.u32 %v4823_v0, %v4820_v43  ;;  %v4098_v58 = vrot.slane %v4096_v2, 4 }
 0x4d6   : > { %v3962_v4 = vsel %vm6371_vm3, %v3957_v37, %v3961_v52  ;;  %v3978_v46 = vshrl.u32 %v3877_v22, 16  ;;  %v3971_v17 = vrot.slane %v3970_v33, 4  ;;  %v4829_v53 = vrot.slane %v4827_v51, 5  ;;  %v4241_v37 = vld [vmem:[#allocation2 + $0x30] sm:$0xf] }
 0x4d7   : > { %4001 = vrot.lane.b32.xlu1 %v3962_v4, %s6223_s15  ;;  %v4101_v12 = vrot.slane %v4099_v28, 5  ;;  %v3981_v6 = vshll.u32 %v3877_v22, 16  ;;  %v4825_v7 = vrot.slane %v4824_v40, 4  ;;  %v3987_v10 = vshll.u32 %v3878_v34, 16  ;;  %v4242_v4 = vld [vmem:[#allocation2 + $0x34] sm:$0x1] }
 0x4d8   : > { %v3980_v44 = vrot.slane %v3978_v46, 4  ;;  %v4124_v14 = vshrl.u32 %v4035_v62, 16  ;;  %v3976_v35 = vsel %vm6371_vm3, %v3971_v17, %v3975_v23  ;;  %v4127_v21 = vshll.u32 %v4035_v62, 16 }
 0x4d9   : > { %v4102_v9 = vor.u32 %v4101_v12, %v4098_v58  ;;  %v3983_v27 = vrot.slane %v3981_v6, 5  ;;  %4003 = vrot.lane.b32.xlu0 %v3976_v35, %s6223_s15  ;;  %v4830_v32 = vsel %vm6371_vm3, %v4825_v7, %v4829_v53  ;;  %v4107_v15 = vrot.slane %v4105_v55, 5  ;;  %v4399_v53 = vld [vmem:[#allocation2 + $0x70] sm:$0xf] }
 0x4da   : > { %v4126_v26 = vrot.slane %v4124_v14, 4  ;;  %v4133_v8 = vshll.u32 %v4036_v19, 16  ;;  %v4129_v5 = vrot.slane %v4127_v21, 5  ;;  %v4110_v49 = vshrl.u32 %v4033_v18, 16 }
 0x4db   : > { %4893 = vrot.lane.b32.xlu1 %v4830_v32, %s6230_s22  ;;  %v4103_v38 = vrot.slane %v4102_v9, 4  ;;  %v3984_v24 = vor.u32 %v3983_v27, %v3980_v44  ;;  %v3989_v13 = vrot.slane %v3987_v10, 5  ;;  %v4113_v11 = vshll.u32 %v4033_v18, 16  ;;  %v4400_v44 = vld [vmem:[#allocation2 + $0x74] sm:$0x1] }
 0x4dc   : > { %v4119_v3 = vshll.u32 %v4034_v56, 16  ;;  %v4304_v31 = vshrl.u32 %v4239_v1, 16  ;;  %v4130_v47 = vor.u32 %v4129_v5, %v4126_v26  ;;  %v4112_v60 = vrot.slane %v4110_v49, 4  ;;  %v4245_v9 = vld [vmem:[#allocation2 + $0x40] sm:$0xf] }
 0x4dd   : > { %v4108_v30 = vsel %vm6371_vm3, %v4103_v38, %v4107_v15  ;;  %v3985_v29 = vrot.slane %v3984_v24, 4  ;;  %v4135_v61 = vrot.slane %v4133_v8, 5  ;;  %v4115_v48 = vrot.slane %v4113_v11, 5  ;;  %v4403_v32 = vld [vmem:[#allocation2 + $0x80] sm:$0xf] }
 0x4de   : > { %4159 = vrot.lane.b32.xlu0 %v4108_v30, %s6225_s17  ;;  %v4306_v45 = vrot.slane %v4304_v31, 4  ;;  %v4307_v63 = vshll.u32 %v4239_v1, 16  ;;  %v4131_v25 = vrot.slane %v4130_v47, 4  ;;  %v4313_v59 = vshll.u32 %v4240_v20, 16  ;;  %v4246_v24 = vld [vmem:[#allocation2 + $0x44] sm:$0x1] }
 0x4df   : > { %v3990_v50 = vsel %vm6371_vm3, %v3985_v29, %v3989_v13  ;;  %v4138_v52 = vshrl.u32 %v4037_v36, 16  ;;  %v4116_v43 = vor.u32 %v4115_v48, %v4112_v60  ;;  %v4121_v51 = vrot.slane %v4119_v3, 5  ;;  %v4404_v30 = vld [vmem:[#allocation2 + $0x84] sm:$0x1] }
 0x4e0   : > { %4005 = vrot.lane.b32.xlu1 %v3990_v50, %s6223_s15  ;;  %v4309_v22 = vrot.slane %v4307_v63, 5  ;;  %v4141_v42 = vshll.u32 %v4037_v36, 16  ;;  %v4136_v0 = vsel %vm6371_vm3, %v4131_v25, %v4135_v61  ;;  %v4147_v62 = vshll.u32 %v4038_v57, 16  ;;  %v4401_v61 = vld [vmem:[#allocation2 + $0x78] sm:$0xf] }
 0x4e1   : > { %v4140_v2 = vrot.slane %v4138_v52, 4  ;;  %v4332_v33 = vshrl.u32 %v4243_v41, 16  ;;  %v4117_v23 = vrot.slane %v4116_v43, 4  ;;  %v4315_v55 = vrot.slane %v4313_v59, 5  ;;  %v4402_v50 = vld [vmem:[#allocation2 + $0x7c] sm:$0x1] }
 0x4e2   : > { %4163 = vrot.lane.b32.xlu0 %v4136_v0, %s6225_s17  ;;  %v4310_v28 = vor.u32 %v4309_v22, %v4306_v45  ;;  %v4143_v34 = vrot.slane %v4141_v42, 5  ;;  %v4335_v58 = vshll.u32 %v4243_v41, 16  ;;  %v4341_v46 = vshll.u32 %v4244_v16, 16  ;;  %v4405_v25 = vld [vmem:[#allocation2 + $0x88] sm:$0xf]  ;;  %v9190_v0 = vpop.permute.xlu1 %4201 }
 0x4e3   : > { %v4334_v40 = vrot.slane %v4332_v33, 4  ;;  %v4318_v17 = vshrl.u32 %v4241_v37, 16  ;;  %v4122_v12 = vsel %vm6371_vm3, %v4117_v23, %v4121_v51  ;;  %v4321_v7 = vshll.u32 %v4241_v37, 16 }
 0x4e4   : > { %v4311_v6 = vrot.slane %v4310_v28, 4  ;;  %v4144_v19 = vor.u32 %v4143_v34, %v4140_v2  ;;  %4161 = vrot.lane.b32.xlu1 %v4122_v12, %s6225_s17  ;;  %v4149_v10 = vrot.slane %v4147_v62, 5  ;;  %v4337_v14 = vrot.slane %v4335_v58, 5  ;;  %v4607_v28 = vld [vmem:[#allocation2 + $0xb8] sm:$0xf] }
 0x4e5   : > { %v4320_v18 = vrot.slane %v4318_v17, 4  ;;  %v4327_v35 = vshll.u32 %v4242_v4, 16  ;;  %v4323_v56 = vrot.slane %v4321_v7, 5  ;;  %v4464_v1 = vshrl.u32 %v4399_v53, 16  ;;  %v4406_v7 = vld [vmem:[#allocation2 + $0x8c] sm:$0x1] }
 0x4e6   : > { %v4316_v27 = vsel %vm6371_vm3, %v4311_v6, %v4315_v55  ;;  %v4145_v21 = vrot.slane %v4144_v19, 4  ;;  %v4338_v15 = vor.u32 %v4337_v14, %v4334_v40  ;;  %v4343_v26 = vrot.slane %v4341_v46, 5 }
 0x4e7   : > { %4367 = vrot.lane.b32.xlu0 %v4316_v27, %s6226_s18  ;;  %v4467_v8 = vshll.u32 %v4399_v53, 16  ;;  %v4473_v38 = vshll.u32 %v4400_v44, 16  ;;  %v4324_v49 = vor.u32 %v4323_v56, %v4320_v18  ;;  %v4466_v20 = vrot.slane %v4464_v1, 4  ;;  %v4611_v53 = vld [vmem:[#allocation2 + $0xc8] sm:$0xf]  ;;  %v9200_v1 = vpop.permute.xlu1 %4205 }
 0x4e8   : > { %v4150_v5 = vsel %vm6371_vm3, %v4145_v21, %v4149_v10  ;;  %v4346_v13 = vshrl.u32 %v4245_v9, 16  ;;  %v4339_v11 = vrot.slane %v4338_v15, 4  ;;  %v4329_v3 = vrot.slane %v4327_v35, 5  ;;  %v4609_v35 = vld [vmem:[#allocation2 + $0xc0] sm:$0xf] }
 0x4e9   : > { %4165 = vrot.lane.b32.xlu1 %v4150_v5, %s6225_s17  ;;  %v4469_v31 = vrot.slane %v4467_v8, 5  ;;  %v4349_v36 = vshll.u32 %v4245_v9, 16  ;;  %v4325_v29 = vrot.slane %v4324_v49, 4  ;;  %v4355_v60 = vshll.u32 %v4246_v24, 16  ;;  %v4608_v8 = vld [vmem:[#allocation2 + $0xbc] sm:$0x1] }
 0x4ea   : > { %v4348_v47 = vrot.slane %v4346_v13, 4  ;;  %v4492_v57 = vshrl.u32 %v4403_v32, 16  ;;  %v4344_v48 = vsel %vm6371_vm3, %v4339_v11, %v4343_v26  ;;  %v4495_v41 = vshll.u32 %v4403_v32, 16  ;;  %v4555_v11 = vld [vmem:[#allocation2 + $0x100] sm:$0xf] }
 0x4eb   : > { %v4470_v45 = vor.u32 %v4469_v31, %v4466_v20  ;;  %v4351_v63 = vrot.slane %v4349_v36, 5  ;;  %4371 = vrot.lane.b32.xlu0 %v4344_v48, %s6226_s18  ;;  %v4330_v59 = vsel %vm6371_vm3, %v4325_v29, %v4329_v3  ;;  %v4475_v52 = vrot.slane %v4473_v38, 5  ;;  %v4767_v20 = vld [vmem:[#allocation2 + $0x100] sm:$0xf]  ;;  %v4610_v48 = vld [vmem:[#allocation2 + $0xc4] sm:$0x1] }
 0x4ec   : > { %v4494_v16 = vrot.slane %v4492_v57, 4  ;;  %v4501_v43 = vshll.u32 %v4404_v30, 16  ;;  %v4497_v42 = vrot.slane %v4495_v41, 5  ;;  %v4478_v37 = vshrl.u32 %v4401_v61, 16  ;;  %v4612_v30 = vld [vmem:[#allocation2 + $0xcc] sm:$0x1] }
 0x4ed   : > { %4369 = vrot.lane.b32.xlu1 %v4330_v59, %s6226_s18  ;;  %v4471_v51 = vrot.slane %v4470_v45, 4  ;;  %v4352_v22 = vor.u32 %v4351_v63, %v4348_v47  ;;  %v4357_v2 = vrot.slane %v4355_v60, 5  ;;  %v4481_v62 = vshll.u32 %v4401_v61, 16  ;;  %v4613_v47 = vld [vmem:[#allocation2 + $0xd0] sm:$0xf]  ;;  %v9206_v60 = vpop.permute.xlu0 %4203  ;;  %v9209_v59 = vpop.permute.xlu1 %4569 }
 0x4ee   : > { %v4487_v33 = vshll.u32 %v4402_v50, 16  ;;  %v4506_v23 = vshrl.u32 %v4405_v25, 16  ;;  %v4498_v4 = vor.u32 %v4497_v42, %v4494_v16  ;;  %v4480_v40 = vrot.slane %v4478_v37, 4 }
 0x4ef   : > { %v4476_v55 = vsel %vm6371_vm3, %v4471_v51, %v4475_v52  ;;  %v4353_v34 = vrot.slane %v4352_v22, 4  ;;  %v4483_v58 = vrot.slane %v4481_v62, 5  ;;  %v4509_v17 = vshll.u32 %v4405_v25, 16  ;;  %v4771_v25 = vld [vmem:[#allocation2 + $0x110] sm:$0xf] }
 0x4f0   : > { %4527 = vrot.lane.b32.xlu0 %v4476_v55, %s6227_s19  ;;  %v4508_v46 = vrot.slane %v4506_v23, 4  ;;  %v4499_v6 = vrot.slane %v4498_v4, 4  ;;  %v4503_v19 = vrot.slane %v4501_v43, 5  ;;  %v4672_v44 = vshrl.u32 %v4607_v28, 16  ;;  %v4557_v22 = vld [vmem:[#allocation2 + $0x110] sm:$0xf] }
 0x4f1   : > { %v4358_v12 = vsel %vm6371_vm3, %v4353_v34, %v4357_v2  ;;  %v4484_v10 = vor.u32 %v4483_v58, %v4480_v40  ;;  %v4511_v14 = vrot.slane %v4509_v17, 5  ;;  %v4675_v18 = vshll.u32 %v4607_v28, 16  ;;  %v4769_v55 = vld [vmem:[#allocation2 + $0x108] sm:$0xf] }
 0x4f2   : > { %4373 = vrot.lane.b32.xlu1 %v4358_v12, %s6226_s18  ;;  %v4504_v9 = vsel %vm6371_vm3, %v4499_v6, %v4503_v19  ;;  %v4489_v27 = vrot.slane %v4487_v33, 5  ;;  %v4674_v21 = vrot.slane %v4672_v44, 4  ;;  %v4700_v56 = vshrl.u32 %v4611_v53, 16  ;;  %v4556_v17 = vld [vmem:[#allocation2 + $0x108] sm:$0xf] }
 0x4f3   : > { %v4485_v32 = vrot.slane %v4484_v10, 4  ;;  %v4512_v15 = vor.u32 %v4511_v14, %v4508_v46  ;;  %v4515_v26 = vshll.u32 %v4406_v7, 16  ;;  %v4677_v38 = vrot.slane %v4675_v18, 5  ;;  %v9215_v46 = vpop.permute.xlu0 %4567  ;;  %v4768_v6 = vld [vmem:[#allocation2 + $0x104] sm:$0x1]  ;;  %v9220_v18 = vpop.permute.xlu1 %4573 }
 0x4f4   : > { %4531 = vrot.lane.b32.xlu0 %v4504_v9, %s6227_s19  ;;  %v4702_v24 = vrot.slane %v4700_v56, 4  ;;  %v4703_v5 = vshll.u32 %v4611_v53, 16  ;;  %v4686_v49 = vshrl.u32 %v4609_v35, 16  ;;  %v4689_v36 = vshll.u32 %v4609_v35, 16  ;;  %v4773_v14 = vld [vmem:[#allocation2 + $0x118] sm:$0xf] }
 0x4f5   : > { %v4490_v13 = vsel %vm6371_vm3, %v4485_v32, %v4489_v27  ;;  %v4513_v3 = vrot.slane %v4512_v15, 4  ;;  %v4678_v31 = vor.u32 %v4677_v38, %v4674_v21  ;;  %v4517_v57 = vrot.slane %v4515_v26, 5  ;;  %v4558_v35 = vld [vmem:[#allocation2 + $0x118] sm:$0xf]  ;;  %v4614_v15 = vld [vmem:[#allocation2 + $0xd4] sm:$0x1] }
 0x4f6   : > { %4529 = vrot.lane.b32.xlu1 %v4490_v13, %s6227_s19  ;;  %v4705_v29 = vrot.slane %v4703_v5, 5  ;;  %v4681_v61 = vshll.u32 %v4608_v8, 16  ;;  %v4832_v45 = vshrl.u32 %v4767_v20, 16  ;;  %v4688_v63 = vrot.slane %v4686_v49, 4  ;;  %v5993_v8 = vld [vmem:[%s9638_s5 + $0x8] sm:$0xff]  }
 0x4f7   : > { %v4691_v41 = vrot.slane %v4689_v36, 5  ;;  %v4835_v50 = vshll.u32 %v4767_v20, 16  ;;  %v4518_v52 = vsel %vm6371_vm3, %v4513_v3, %v4517_v57  ;;  %v4679_v16 = vrot.slane %v4678_v31, 4  ;;  %v4772_v38 = vld [vmem:[#allocation2 + $0x114] sm:$0x1]  ;;  %v9229_v31 = vpop.permute.xlu0 %4571 }
 0x4f8   : > { %4575 = vrot.lane.b32.xlu0 %v4555_v11, %s6228_s20  ;;  %v4706_v43 = vor.u32 %v4705_v29, %v4702_v24  ;;  %v4714_v51 = vshrl.u32 %v4613_v47, 16  ;;  %v4834_v42 = vrot.slane %v4832_v45, 4  ;;  %v4717_v2 = vshll.u32 %v4613_v47, 16  ;;  %v5995_v45 = vld [vmem:[%s9638_s5] sm:$0xff]  }
 0x4f9   : > { %v4837_v37 = vrot.slane %v4835_v50, 5  ;;  %v4683_v62 = vrot.slane %v4681_v61, 5  ;;  %v4709_v33 = vshll.u32 %v4612_v30, 16  ;;  %v4695_v23 = vshll.u32 %v4610_v48, 16  ;;  %v4770_v61 = vld [vmem:[#allocation2 + $0x10c] sm:$0x1]  ;;  %v9236_v48 = vpop.permute.xlu1 %4209 }
 0x4fa   : > { %4533 = vrot.lane.b32.xlu1 %v4518_v52, %s6227_s19  ;;  %v4860_v28 = vshrl.u32 %v4771_v25, 16  ;;  %v4692_v34 = vor.u32 %v4691_v41, %v4688_v63  ;;  %v4716_v4 = vrot.slane %v4714_v51, 4  ;;  %v4719_v40 = vrot.slane %v4717_v2, 5 }
 0x4fb   : > { %v4863_v58 = vshll.u32 %v4771_v25, 16  ;;  %v4684_v53 = vsel %vm6371_vm3, %v4679_v16, %v4683_v62  ;;  %v4707_v12 = vrot.slane %v4706_v43, 4  ;;  %v4838_v19 = vor.u32 %v4837_v37, %v4834_v42  ;;  %v9245_v42 = vpop.permute.xlu0 %4207 }
 0x4fc   : > { %4579 = vrot.lane.b32.xlu0 %v4557_v22, %s6228_s20  ;;  %v4862_v7 = vrot.slane %v4860_v28, 4  ;;  %v4846_v10 = vshrl.u32 %v4769_v55, 16  ;;  %v4711_v9 = vrot.slane %v4709_v33, 5  ;;  %v4849_v27 = vshll.u32 %v4769_v55, 16  ;;  %v4774_v22 = vld [vmem:[#allocation2 + $0x11c] sm:$0x1] }
 0x4fd   : > { %v4865_v44 = vrot.slane %v4863_v58, 5  ;;  %v4693_v21 = vrot.slane %v4692_v34, 4  ;;  %v4697_v56 = vrot.slane %v4695_v23, 5  ;;  %v4841_v32 = vshll.u32 %v4768_v6, 16  ;;  %v9252_v23 = vpop.permute.xlu1 %4213 }
 0x4fe   : > { %4577 = vrot.lane.b32.xlu1 %v4556_v17, %s6228_s20  ;;  %v4720_v26 = vor.u32 %v4719_v40, %v4716_v4  ;;  %v4848_v24 = vrot.slane %v4846_v10, 4  ;;  %v4851_v5 = vrot.slane %v4849_v27, 5  ;;  %v4874_v49 = vshrl.u32 %v4773_v14, 16 }
 0x4ff   : > { %v4877_v20 = vshll.u32 %v4773_v14, 16  ;;  %v4712_v13 = vsel %vm6371_vm3, %v4707_v12, %v4711_v9  ;;  %v4839_v11 = vrot.slane %v4838_v19, 4  ;;  %v4866_v3 = vor.u32 %v4865_v44, %v4862_v7  ;;  %v9258_v40 = vpop.permute.xlu0 %4211 }
 0x500   : > { %4735 = vrot.lane.b32.xlu0 %v4684_v53, %s6229_s21  ;;  %v4987_v36 = vsel %vm2335_vm4, %v9143_v39, 0  ;;  %v4723_v30 = vshll.u32 %v4614_v15, 16  ;;  %v4698_v29 = vsel %vm6371_vm3, %v4693_v21, %v4697_v56  ;;  %v4843_v47 = vrot.slane %v4841_v32, 5 }
 0x501   : > { %5932 = vmatpush3.bf16.msra.mxu1 %v4987_v36  ;;  %v4869_v57 = vshll.u32 %v4772_v38, 16  ;;  %v4721_v63 = vrot.slane %v4720_v26, 4  ;;  %v4852_v41 = vor.u32 %v4851_v5, %v4848_v24  ;;  %v4876_v39 = vrot.slane %v4874_v49, 4  ;;  %v3994_v17 = vpop.permute.xlu1 %3993 }
 0x502   : > { %4581 = vrot.lane.b32.xlu1 %v4558_v35, %s6228_s20  ;;  %5933 = vmatprep.subr.bf16.mxu1 %v5993_v8  ;;  %v4879_v50 = vrot.slane %v4877_v20, 5  ;;  %v4844_v25 = vsel %vm6371_vm3, %v4839_v11, %v4843_v47  ;;  %v4867_v52 = vrot.slane %v4866_v3, 4  ;;  %v4725_v16 = vrot.slane %v4723_v30, 5  ;;  %4016 = vst.msk [vmem:[#allocation4 + $0x4] sm:$0xf] %vm578_vm5, %v3994_v17 }
 0x503   : > { %v4855_v43 = vshll.u32 %v4770_v61, 16  ;;  %v4871_v51 = vrot.slane %v4869_v57, 5  ;;  %v4853_v2 = vrot.slane %v4852_v41, 4  ;;  %v4883_v55 = vshll.u32 %v4774_v22, 16 }
 0x504   : > { %4739 = vrot.lane.b32.xlu0 %v4712_v13, %s6229_s21  ;;  %v4726_v37 = vsel %vm6371_vm3, %v4721_v63, %v4725_v16  ;;  %v4880_v62 = vor.u32 %v4879_v50, %v4876_v39  ;;  %vm5289_vm0 = vcmask 1046528  }
 0x505   : > { %5934 = vmatpush3.bf16.msra.mxu1 %v5993_v8  ;;  %v4872_v33 = vsel %vm6371_vm3, %v4867_v52, %v4871_v51  ;;  %v4857_v28 = vrot.slane %v4855_v43, 5  ;;  %v4885_v58 = vrot.slane %v4883_v55, 5 }
 0x506   : > { %4737 = vrot.lane.b32.xlu1 %v4698_v29, %s6229_s21  ;;  %5935 = vmatprep.subr.bf16.mxu1 %v5995_v45  ;;  %v4881_v4 = vrot.slane %v4880_v62, 4  ;;  %v9953_v62 = vld [vmem:[#allocation9_spill] sm:$0xff] }
 0x507   : > { %v4858_v34 = vsel %vm6371_vm3, %v4853_v2, %v4857_v28 }
 0x508   : > { %4895 = vrot.lane.b32.xlu0 %v4844_v25, %s6230_s22  ;;  %v4886_v53 = vsel %vm6371_vm3, %v4881_v4, %v4885_v58  ;;  %v9954_v58 = vld [vmem:[#allocation17_spill] sm:$0xff]  ;;  %vm5554_vm3 = vcmask 519168  }
 0x509   : > { %5936 = vmatpush3.bf16.msra.mxu1 %v5995_v45  ;;  %v5249_v17 = vunpack.c.l.bf16 %v9954_v58 }
 0x50a   : > { %4741 = vrot.lane.b32.xlu1 %v4726_v37, %s6229_s21 }
 0x50b   : > { %v3996_v12 = vpop.permute.xlu0 %3995 }
 0x50c   : > { %4899 = vrot.lane.b32.xlu0 %v4872_v33, %s6230_s22  ;;  %4017 = vst.msk [vmem:[#allocation4 + $0x8] sm:$0xf] %vm578_vm5, %v3996_v12  ;;  %v5257_v33 = vunpack.c.l.bf16 %v9953_v62  ;;  %v9401_v62 = vld [vmem:[%s6296_s14 + $0xb4] sm:$0x1] }
 0x50e   : > { %4897 = vrot.lane.b32.xlu1 %v4858_v34, %s6230_s22  ;;  %v5290_v55 = vrot.slane %v5257_v33, 1  ;;  %v6198_v34 = vld [vmem:[%s6296_s14 + $0xc] sm:$0x1]  ;;  %v5266_v33 = vunpack.c.l.bf16 %v9401_v62 }
 0x50f   : > { %v5339_v4 = vunpack.c.l.bf16 %v6198_v34 }
 0x512   : > { %4901 = vrot.lane.b32.xlu1 %v4886_v53, %s6230_s22  ;;  %v9955_v53 = vld [vmem:[#allocation10_spill] sm:$0xff] }
 0x513   : > { %v5338_v12 = vunpack.c.l.bf16 %v9955_v53 }
 0x51e   : > { %v3998_v6 = vpop.permute.xlu1 %3997 }
 0x51f   : > { %4018 = vst.msk [vmem:[#allocation4 + $0xc] sm:$0xf] %vm578_vm5, %v3998_v6 }
 0x521   : > { %v4156_v19 = vpop.permute.xlu0 %4155 }
 0x522   : > { %4177 = vst.msk [vmem:[#allocation4 + $0x8] sm:$0xf] %vm726_vm6, %v4156_v19  ;;  %v4154_v7 = vpop.permute.xlu1 %4153  ;;  %v9956_v19 = vld [vmem:[#allocation7_spill] sm:$0xff] }
 0x523   : > { %4225 = vst.msk [vmem:[#allocation4 + $0x8] sm:$0xf] %vm767_vm7, %v9206_v60 }
 0x524   : > { %4176 = vst.msk [vmem:[#allocation4 + $0x4] sm:$0xf] %vm726_vm6, %v4154_v7  ;;  %v5330_v7 = vunpack.c.l.bf16 %v9956_v19 }
 0x525   : > { %4224 = vst.msk [vmem:[#allocation4 + $0x4] sm:$0xf] %vm767_vm7, %v9190_v0  ;;  %v4360_v54 = vpop.permute.xlu0 %4359 }
 0x526   : > { %4383 = vst.msk [vmem:[#allocation4] sm:$0xf] %vm808_vm8, %v4360_v54  ;;  %v5371_v54 = vrot.slane %v5339_v4, 1 }
 0x527   : > { %v4158_v44 = vpop.permute.xlu1 %4157 }
 0x528   : > { %4178 = vst.msk [vmem:[#allocation4 + $0xc] sm:$0xf] %vm726_vm6, %v4158_v44  ;;  %v5370_v44 = vrot.slane %v5338_v12, 1 }
 0x529   : > { %4226 = vst.msk [vmem:[#allocation4 + $0xc] sm:$0xf] %vm767_vm7, %v9200_v1 }
 0x52a   : > { %v4364_v10 = vpop.permute.xlu0 %4363 }
 0x52b   : > { %4385 = vst.msk [vmem:[#allocation4 + $0x8] sm:$0xf] %vm808_vm8, %v4364_v10  ;;  %v4362_v14 = vpop.permute.xlu1 %4361 }
 0x52c   : > { %4384 = vst.msk [vmem:[#allocation4 + $0x4] sm:$0xf] %vm808_vm8, %v4362_v14  ;;  %v5372_v14 = vsel %vm5289_vm0, %v5370_v44, %v5371_v54  ;;  %v9418_v54 = vld [vmem:[%s6296_s14 + $0xc4] sm:$0x1] }
 0x52d   : > { %v5270_v44 = vunpack.c.l.bf16 %v9418_v54 }
 0x52e   : > { %v4520_v60 = vpop.permute.xlu0 %4519 }
 0x52f   : > { %4543 = vst.msk [vmem:[#allocation4] sm:$0xf] %vm953_vm9, %v4520_v60  ;;  %v4366_v35 = vpop.permute.xlu1 %4365  ;;  %v5402_v60 = vmax.f32 %v5330_v7, %v5372_v14  ;;  %v9958_v14 = vld [vmem:[#allocation16_spill] sm:$0xff] }
 0x530   : > { %4591 = vst.msk [vmem:[#allocation4] sm:$0xf] %vm994_vm10, %v9215_v46 }
 0x531   : > { %4386 = vst.msk [vmem:[#allocation4 + $0xc] sm:$0xf] %vm808_vm8, %v4366_v35 }
 0x532   : > { %v4524_v0 = vpop.permute.xlu0 %4523 }
 0x533   : > { %4545 = vst.msk [vmem:[#allocation4 + $0x8] sm:$0xf] %vm953_vm9, %v4524_v0  ;;  %v4522_v9 = vpop.permute.xlu1 %4521 }
 0x534   : > { %4593 = vst.msk [vmem:[#allocation4 + $0x8] sm:$0xf] %vm994_vm10, %v9229_v31 }
 0x535   : > { %4544 = vst.msk [vmem:[#allocation4 + $0x4] sm:$0xf] %vm953_vm9, %v4522_v9 }
 0x536   : > { %4592 = vst.msk [vmem:[#allocation4 + $0x4] sm:$0xf] %vm994_vm10, %v9209_v59  ;;  %v4728_v1 = vpop.permute.xlu0 %4727 }
 0x537   : > { %4751 = vst.msk [vmem:[#allocation4] sm:$0xf] %vm1028_vm11, %v4728_v1  ;;  %v4526_v27 = vpop.permute.xlu1 %4525 }
 0x538   : > { %4546 = vst.msk [vmem:[#allocation4 + $0xc] sm:$0xf] %vm953_vm9, %v4526_v27 }
 0x539   : > { %4594 = vst.msk [vmem:[#allocation4 + $0xc] sm:$0xf] %vm994_vm10, %v9220_v18 }
 0x53a   : > { %v4732_v46 = vpop.permute.xlu0 %4731 }
 0x53b   : > { %4753 = vst.msk [vmem:[#allocation4 + $0x8] sm:$0xf] %vm1028_vm11, %v4732_v46  ;;  %v4730_v21 = vpop.permute.xlu1 %4729 }
 0x53c   : > { %4752 = vst.msk [vmem:[#allocation4 + $0x4] sm:$0xf] %vm1028_vm11, %v4730_v21 }
 0x53e   : > { %v4888_v56 = vpop.permute.xlu0 %4887 }
 0x53f   : > { %4911 = vst.msk [vmem:[#allocation4] sm:$0xf] %vm1075_vm12, %v4888_v56 }
 0x540   : > { %v4734_v32 = vpop.permute.xlu1 %4733 }
 0x541   : > { %4754 = vst.msk [vmem:[#allocation4 + $0xc] sm:$0xf] %vm1028_vm11, %v4734_v32  ;;  %v5804_v32 = vld [vmem:[%s9639_s6] ss:$0 sm:$0xff] }
 0x542   : > { %v4000_v59 = vpop.permute.xlu0 %3999 }
 0x543   : > { %4019 = vst.msk [vmem:[#allocation4 + $0x10] sm:$0xf] %vm578_vm5, %v4000_v59 }
 0x544   : > { %v4890_v15 = vpop.permute.xlu1 %4889 }
 0x545   : > { %4912 = vst.msk [vmem:[#allocation4 + $0x4] sm:$0xf] %vm1075_vm12, %v4890_v15 }
 0x547   : > { %v4892_v26 = vpop.permute.xlu0 %4891 }
 0x548   : > { %4913 = vst.msk [vmem:[#allocation4 + $0x8] sm:$0xf] %vm1075_vm12, %v4892_v26 }
 0x549   : > { %v4002_v18 = vpop.permute.xlu1 %4001 }
 0x54a   : > { %4020 = vst.msk [vmem:[#allocation4 + $0x14] sm:$0xf] %vm578_vm5, %v4002_v18 }
 0x54b   : > { %v4004_v8 = vpop.permute.xlu0 %4003 }
 0x54c   : > { %4021 = vst.msk [vmem:[#allocation4 + $0x18] sm:$0xf] %vm578_vm5, %v4004_v8  ;;  %v5994_v24 = vld [vmem:[#allocation4] sm:$0xff]  }
 0x54d   : > { %v4894_v38 = vpop.permute.xlu1 %4893  ;;  %5937 = vmatprep.mubr.msk.bf16.mxu1 %vm2286_vm13, %v5994_v24 }
 0x54e   : > { %4914 = vst.msk [vmem:[#allocation4 + $0xc] sm:$0xf] %vm1075_vm12, %v4894_v38 }
 0x550   : > { %v4160_v5 = vpop.permute.xlu0 %4159 }
 0x551   : > { %4179 = vst.msk [vmem:[#allocation4 + $0x10] sm:$0xf] %vm726_vm6, %v4160_v5 }
 0x552   : > { %4227 = vst.msk [vmem:[#allocation4 + $0x10] sm:$0xf] %vm767_vm7, %v9245_v42  ;;  %v4006_v49 = vpop.permute.xlu1 %4005 }
 0x553   : > { %4022 = vst.msk [vmem:[#allocation4 + $0x1c] sm:$0xf] %vm578_vm5, %v4006_v49 }
 0x554   : > { %v4164_v20 = vpop.permute.xlu0 %4163 }
 0x555   : > { %4181 = vst.msk [vmem:[#allocation4 + $0x18] sm:$0xf] %vm726_vm6, %v4164_v20  ;;  %v5996_v13 = vld [vmem:[#allocation4 + $0x8] sm:$0xff]  }
 0x556   : > { %4229 = vst.msk [vmem:[#allocation4 + $0x18] sm:$0xf] %vm767_vm7, %v9258_v40  ;;  %v4162_v11 = vpop.permute.xlu1 %4161  ;;  %5938 = vmatmul.mubr.msk.bf16.vlgmr.msra.gmra.mxu1 %vm2286_vm13, %v5996_v13  ;;  %v9364_v13 = vld [vmem:[%s6296_s14 + $0x1c] sm:$0x1] }
 0x557   : > { %4180 = vst.msk [vmem:[#allocation4 + $0x14] sm:$0xf] %vm726_vm6, %v4162_v11  ;;  %v5343_v11 = vunpack.c.l.bf16 %v9364_v13 }
 0x558   : > { %4228 = vst.msk [vmem:[#allocation4 + $0x14] sm:$0xf] %vm767_vm7, %v9236_v48 }
 0x559   : > { %v4368_v3 = vpop.permute.xlu0 %4367 }
 0x55a   : > { %4387 = vst.msk [vmem:[#allocation4 + $0x10] sm:$0xf] %vm808_vm8, %v4368_v3  ;;  %v6200_v3 = vld [vmem:[%s6296_s14 + $0x14] sm:$0x1] }
 0x55b   : > { %v4166_v31 = vpop.permute.xlu1 %4165 }
 0x55c   : > { %4182 = vst.msk [vmem:[#allocation4 + $0x1c] sm:$0xf] %vm726_vm6, %v4166_v31  ;;  %v5341_v31 = vunpack.c.l.bf16 %v6200_v3 }
 0x55d   : > { %4230 = vst.msk [vmem:[#allocation4 + $0x1c] sm:$0xf] %vm767_vm7, %v9252_v23  ;;  %v4372_v36 = vpop.permute.xlu0 %4371  ;;  %v6197_v23 = vld [vmem:[%s6296_s14 + $0x94] sm:$0x1] }
 0x55e   : > { %4389 = vst.msk [vmem:[#allocation4 + $0x18] sm:$0xf] %vm808_vm8, %v4372_v36  ;;  %v5258_v28 = vunpack.c.l.bf16 %v6197_v23  ;;  %v9405_v23 = vld [vmem:[%s6296_s14 + $0xcc] sm:$0x1] }
 0x55f   : > { %v4370_v30 = vpop.permute.xlu1 %4369 }
 0x560   : > { %4388 = vst.msk [vmem:[#allocation4 + $0x14] sm:$0xf] %vm808_vm8, %v4370_v30  ;;  %v5291_v40 = vrot.slane %v5258_v28, 1  ;;  %v5272_v28 = vunpack.c.l.bf16 %v9405_v23 }
 0x562   : > { %v4528_v29 = vpop.permute.xlu0 %4527  ;;  %v5292_v6 = vsel %vm5289_vm0, %v5290_v55, %v5291_v40 }
 0x563   : > { %4547 = vst.msk [vmem:[#allocation4 + $0x10] sm:$0xf] %vm953_vm9, %v4528_v29  ;;  %v5322_v10 = vmax.f32 %v5249_v17, %v5292_v6  ;;  %v6201_v29 = vld [vmem:[%s6296_s14 + $0x9c] sm:$0x1] }
 0x564   : > { %v4374_v47 = vpop.permute.xlu1 %4373  ;;  %v9957_v6 = vld [vmem:[#allocation8_spill] sm:$0xff] }
 0x565   : > { %4390 = vst.msk [vmem:[#allocation4 + $0x1c] sm:$0xf] %vm808_vm8, %v4374_v47  ;;  %v9347_v35 = vmax.f32 %v5322_v10, %v5402_v60  ;;  %v5260_v47 = vunpack.c.l.bf16 %v6201_v29  ;;  %v5259_v19 = vunpack.c.l.bf16 %v9957_v6  ;;  %v5250_v60 = vunpack.c.l.bf16 %v9958_v14  ;;  %v9964_v6 = vld [vmem:[#allocation11_spill] sm:$0xff] }
 0x566   : > { %v4532_v57 = vpop.permute.xlu0 %4531 }
 0x567   : > { %4549 = vst.msk [vmem:[#allocation4 + $0x18] sm:$0xf] %vm953_vm9, %v4532_v57  ;;  %v5418_v0 = vmin.f32 %v9347_v35, 20.0  ;;  %v9374_v57 = vld [vmem:[%s6296_s14 + $0xac] sm:$0x1]  ;;  %v5294_v7 = vrot.slane %v5260_v47, 1 }
 0x568   : > { %v4530_v61 = vpop.permute.xlu1 %4529  ;;  %v9961_v47 = vld [vmem:[#allocation15_spill] sm:$0xff] }
 0x569   : > { %4548 = vst.msk [vmem:[#allocation4 + $0x14] sm:$0xf] %vm953_vm9, %v4530_v61  ;;  %v5426_v9 = vmul.f32 1.442695, %v5418_v0  ;;  %v5264_v61 = vunpack.c.l.bf16 %v9374_v57  ;;  %v9959_v0 = vld [vmem:[#allocation12_spill] sm:$0xff] }
 0x56a   : > { %v4576_v48 = vpop.permute.xlu0 %4575 }
 0x56b   : > { %4595 = vst.msk [vmem:[#allocation4 + $0x10] sm:$0xf] %vm994_vm10, %v4576_v48  ;;  %6129 = vpow2.f32 %v5426_v9  ;;  %v6203_v48 = vld [vmem:[%s6296_s14 + $0xa4] sm:$0x1]  ;;  %v5340_v9 = vunpack.c.l.bf16 %v9959_v0  ;;  %v9965_v0 = vld [vmem:[#allocation18_spill] sm:$0xff] }
 0x56c   : > { %v4534_v45 = vpop.permute.xlu1 %4533 }
 0x56d   : > { %4550 = vst.msk [vmem:[#allocation4 + $0x1c] sm:$0xf] %vm953_vm9, %v4534_v45  ;;  %v5262_v45 = vunpack.c.l.bf16 %v6203_v48  ;;  %v5261_v48 = vunpack.c.l.bf16 %v9961_v47 }
 0x56e   : > { %v4580_v63 = vpop.permute.xlu0 %4579 }
 0x56f   : > { %4597 = vst.msk [vmem:[#allocation4 + $0x18] sm:$0xf] %vm994_vm10, %v4580_v63 }
 0x570   : > { %v4578_v41 = vpop.permute.xlu1 %4577 }
 0x571   : > { %4596 = vst.msk [vmem:[#allocation4 + $0x14] sm:$0xf] %vm994_vm10, %v4578_v41 }
 0x572   : > { %v4736_v39 = vpop.permute.xlu0 %4735 }
 0x573   : > { %4755 = vst.msk [vmem:[#allocation4 + $0x10] sm:$0xf] %vm1028_vm11, %v4736_v39  ;;  %v9379_v39 = vld [vmem:[%s6296_s14 + $0x24] sm:$0x1] }
 0x574   : > { %v4582_v50 = vpop.permute.xlu1 %4581 }
 0x575   : > { %4598 = vst.msk [vmem:[#allocation4 + $0x1c] sm:$0xf] %vm994_vm10, %v4582_v50  ;;  %v5345_v50 = vunpack.c.l.bf16 %v9379_v39  ;;  %v5303_v39 = vrot.slane %v5266_v33, 1 }
 0x576   : > { %v4740_v25 = vpop.permute.xlu0 %4739 }
 0x577   : > { %4757 = vst.msk [vmem:[#allocation4 + $0x18] sm:$0xf] %vm1028_vm11, %v4740_v25  ;;  %v9383_v25 = vld [vmem:[%s6296_s14 + $0x2c] sm:$0x1]  ;;  %v5380_v57 = vrot.slane %v5345_v50, 1 }
 0x578   : > { %v4738_v52 = vpop.permute.xlu1 %4737  ;;  %v6130_v56 = vpop.eup %6129 }
 0x579   : > { %4756 = vst.msk [vmem:[#allocation4 + $0x14] sm:$0xf] %vm1028_vm11, %v4738_v52  ;;  %v5442_v59 = vadd.f32 1.0, %v6130_v56  ;;  %v5347_v52 = vunpack.c.l.bf16 %v9383_v25  ;;  %v5374_v56 = vrot.slane %v5341_v31, 1 }
 0x57a   : > { %v4896_v16 = vpop.permute.xlu0 %4895 }
 0x57b   : > { %4915 = vst.msk [vmem:[#allocation4 + $0x10] sm:$0xf] %vm1075_vm12, %v4896_v16  ;;  %v5450_v26 = vmul.f32 %v5442_v59, %v5442_v59  ;;  %v9387_v16 = vld [vmem:[%s6296_s14 + $0x3c] sm:$0x1] }
 0x57c   : > { %v4742_v43 = vpop.permute.xlu1 %4741 }
 0x57d   : > { %4758 = vst.msk [vmem:[#allocation4 + $0x1c] sm:$0xf] %vm1028_vm11, %v4742_v43  ;;  %v5458_v8 = vadd.f32 1.0, %v5450_v26  ;;  %v5351_v43 = vunpack.c.l.bf16 %v9387_v16  ;;  %v5825_v58 = vadd.f32 -1.0, %v5450_v26 }
 0x57e   : > { %v4900_v51 = vpop.permute.xlu0 %4899 }
 0x57f   : > { %4917 = vst.msk [vmem:[#allocation4 + $0x18] sm:$0xf] %vm1075_vm12, %v4900_v51  ;;  %6131 = vrcp.f32 %v5458_v8 }
 0x580   : > { %v4898_v22 = vpop.permute.xlu1 %4897 }
 0x581   : > { %4916 = vst.msk [vmem:[#allocation4 + $0x14] sm:$0xf] %vm1075_vm12, %v4898_v22  ;;  %v9393_v22 = vld [vmem:[%s6296_s14 + $0x34] sm:$0x1] }
 0x584   : > { %v4902_v42 = vpop.permute.xlu1 %4901 }
 0x585   : > { %4918 = vst.msk [vmem:[#allocation4 + $0x1c] sm:$0xf] %vm1075_vm12, %v4902_v42  ;;  %v5349_v42 = vunpack.c.l.bf16 %v9393_v22 }
 0x588   : > { %v5997_v37 = vld [vmem:[#allocation4 + $0x10] sm:$0xff]  }
 0x589   : > { %5941 = vmatprep.mubr.msk.bf16.mxu1 %vm2286_vm13, %v5997_v37  ;;  %v9397_v37 = vld [vmem:[%s6296_s14 + $0xbc] sm:$0x1] }
 0x58c   : > { %v5998_v2 = vld [vmem:[#allocation4 + $0x18] sm:$0xff]   ;;  %v6132_v59 = vpop.eup %6131 }
 0x58d   : > { %5942 = vmatmul.mubr.msk.bf16.gmra.mxu1 %vm2286_vm13, %v5998_v2  ;;  %v5268_v2 = vunpack.c.l.bf16 %v9397_v37  ;;  %v5474_v3 = vmul.f32 %v6132_v59, %v5458_v8  ;;  %v5377_v8 = vrot.slane %v5343_v11, 1  ;;  %v5386_v37 = vrot.slane %v5349_v42, 1 }
 0x616   : > { %v5939_v1 = vpop.f32.mrf.mxu1 }
 0x617   : > { %v9359_v24 = vadd.f32 %v5939_v1, %v5804_v32 }
 0x618   : > { %v5023_v27 = vpop.f32.mrf.mxu1 }
 0x619   : > { %v9355_v18 = vadd.f32 %v5804_v32, %v5023_v27  ;;  %v5057_v36 = vsel %vm2500_vm2, %v9359_v24, 0.0  ;;  %v5293_v27 = vrot.slane %v5259_v19, 1  ;;  %v5342_v19 = vunpack.c.l.bf16 %v9964_v6 }
 0x61a   : > { %v5940_v46 = vpop.f32.mrf.mxu1 }
 0x61b   : > { %v5054_v5 = vsel %vm2500_vm2, %v9355_v18, 0.0  ;;  %v9370_v30 = vadd.f32 %v5940_v46, %v5804_v32  ;;  %v9960_v46 = vld [vmem:[#allocation5_spill] sm:$0xff] }
 0x61c   : > { %v5026_v21 = vpop.f32.mrf.mxu1 }
 0x61d   : > { %v9353_v15 = vadd.f32 %v5804_v32, %v5026_v21  ;;  %v5059_v34 = vsel %vm2500_vm2, %v9370_v30, 0.0  ;;  %v5331_v21 = vunpack.c.l.bf16 %v9960_v46 }
 0x61f   : > { %v5055_v38 = vsel %vm2500_vm2, %v9353_v15, 0.0 }
 0x620   : > { %v5056_v49 = vadd.f32 %v5055_v38, %v5054_v5  ;;  %v5506_v5 = vmul.f32 %v5825_v58, %v9347_v35  ;;  %v5296_v35 = vrot.slane %v5261_v48, 1  ;;  %v9963_v58 = vld [vmem:[#allocation6_spill] sm:$0xff] }
 0x622   : > { %v5058_v63 = vadd.f32 %v5057_v36, %v5056_v49  ;;  %v5295_v36 = vsel %vm5289_vm0, %v5293_v27, %v5294_v7  ;;  %v9966_v27 = vld [vmem:[#allocation13_spill] sm:$0xff] }
 0x623   : > { %v5323_v29 = vmax.f32 %v5250_v60, %v5295_v36  ;;  %v5263_v46 = vunpack.c.l.bf16 %v9966_v27  ;;  %v9973_v27 = vld [vmem:[#allocation28_spill] sm:$0xff] }
 0x624   : > { %v5060_v17 = vadd.f32 %v5059_v34, %v5058_v63  ;;  %v5297_v63 = vrot.slane %v5262_v45, 1 }
 0x626   : > { %v5298_v45 = vsel %vm5289_vm0, %v5296_v35, %v5297_v63  ;;  %v9969_v63 = vld [vmem:[#allocation29_spill] sm:$0xff] }
 0x64d   : > { %v5943_v20 = vpop.f32.mrf.mxu1 }
 0x64e   : > { %v9410_v4 = vadd.f32 %v5943_v20, %v5804_v32 }
 0x64f   : > { %v5039_v41 = vpop.f32.mrf.mxu1 }
 0x650   : > { %v9390_v51 = vadd.f32 %v5804_v32, %v5039_v41  ;;  %v5065_v26 = vsel %vm2500_vm2, %v9410_v4, 0.0 }
 0x651   : > { %v5944_v55 = vpop.f32.mrf.mxu1 }
 0x652   : > { %v5061_v40 = vsel %vm2500_vm2, %v9390_v51, 0.0  ;;  %v9414_v53 = vadd.f32 %v5944_v55, %v5804_v32  ;;  %v5482_v55 = vsub.f32 2.0, %v5474_v3 }
 0x653   : > { %v5042_v12 = vpop.f32.mrf.mxu1  ;;  %v5062_v1 = vadd.f32 %v5061_v40, %v5060_v17  ;;  %v9962_v40 = vld [vmem:[#allocation19_spill] sm:$0xff] }
 0x654   : > { %v9421_v10 = vadd.f32 %v5804_v32, %v5042_v12  ;;  %v5373_v32 = vrot.slane %v5340_v9, 1  ;;  %v5067_v49 = vsel %vm2500_vm2, %v9414_v53, 0.0  ;;  %v5251_v17 = vunpack.c.l.bf16 %v9962_v40 }
 0x655   : > { %v5332_v12 = vunpack.c.l.bf16 %v9963_v58  ;;  %v5490_v14 = vmul.f32 %v6132_v59, %v5482_v55  ;;  %v5252_v9 = vunpack.c.l.bf16 %v9965_v0 }
 0x656   : > { %v5063_v38 = vsel %vm2500_vm2, %v9421_v10, 0.0  ;;  %v5375_v31 = vsel %vm5289_vm0, %v5373_v32, %v5374_v56  ;;  %v5324_v11 = vmax.f32 %v5251_v17, %v5298_v45  ;;  %v9967_v32 = vld [vmem:[#allocation21_spill] sm:$0xff]  ;;  %v9972_v45 = vld [vmem:[#allocation22_spill] sm:$0xff] }
 0x657   : > { %v5064_v20 = vadd.f32 %v5063_v38, %v5062_v1  ;;  %v5403_v34 = vmax.f32 %v5331_v21, %v5375_v31  ;;  %v5376_v1 = vrot.slane %v5342_v19, 1  ;;  %v5300_v21 = vrot.slane %v5264_v61, 1  ;;  %v6212_v61 = vld [vmem:[%s6296_s14 + $0x40] sm:$0xf]  ;;  %v6213_v17 = vld [vmem:[%s6296_s14 + $0x44] sm:$0x1] }
 0x658   : > { %v5299_v38 = vrot.slane %v5263_v46, 1  ;;  %v5353_v35 = vunpack.c.l.bf16 %v6213_v17  ;;  %v5267_v46 = vunpack.c.l.bf16 %v9973_v27 }
 0x659   : > { %v5066_v41 = vadd.f32 %v5065_v26, %v5064_v20  ;;  %v9441_v60 = vmax.f32 %v5323_v29, %v5403_v34  ;;  %v5514_v26 = vmul.f32 %v5506_v5, %v5490_v14  ;;  %v5378_v59 = vsel %vm5289_vm0, %v5376_v1, %v5377_v8  ;;  %v9968_v20 = vld [vmem:[#allocation20_spill] sm:$0xff]  ;;  %v9970_v8 = vld [vmem:[#allocation25_spill] sm:$0xff] }
 0x65a   : > { %v5344_v3 = vunpack.c.l.bf16 %v9968_v20  ;;  %v5404_v31 = vmax.f32 %v5332_v12, %v5378_v59  ;;  %v5352_v5 = vunpack.c.l.bf16 %v6212_v61  ;;  %v5301_v47 = vsel %vm5289_vm0, %v5299_v38, %v5300_v21  ;;  %v9971_v14 = vld [vmem:[#allocation33_spill] sm:$0xff]  ;;  %v9976_v61 = vld [vmem:[#allocation27_spill] sm:$0xff] }
 0x65b   : > { %v5068_v7 = vadd.f32 %v5067_v49, %v5066_v41  ;;  %v5419_v13 = vmin.f32 %v9441_v60, 20.0  ;;  %v5333_v49 = vunpack.c.l.bf16 %v9967_v32  ;;  %5556 = vxpose.xlu1.b32.start [1/8] (short) (narrow) %v5514_v26, 8  ;;  %v5265_v41 = vunpack.c.l.bf16 %v9969_v63  ;;  %v9977_v63 = vld [vmem:[#allocation35_spill] sm:$0xff] }
 0x65c   : > { %v5379_v48 = vrot.slane %v5344_v3, 1  ;;  %v9457_v34 = vmax.f32 %v5324_v11, %v5404_v31  ;;  %v5325_v40 = vmax.f32 %v5252_v9, %v5301_v47  ;;  %v5253_v0 = vunpack.c.l.bf16 %v9971_v14  ;;  %v9975_v31 = vld [vmem:[#allocation24_spill] sm:$0xff] }
 0x65d   : > { %v5069_v56 = vrot.slane %v5068_v7, 4  ;;  %v5428_v29 = vmul.f32 1.442695, %v5419_v13  ;;  %v5302_v12 = vrot.slane %v5265_v41, 1  ;;  %v5334_v1 = vunpack.c.l.bf16 %v9972_v45  ;;  %v9974_v13 = vld [vmem:[#allocation32_spill] sm:$0xff] }
 0x65e   : > { %v5381_v58 = vsel %vm5289_vm0, %v5379_v48, %v5380_v57  ;;  %v5420_v6 = vmin.f32 %v9457_v34, 20.0  ;;  %v5383_v9 = vrot.slane %v5347_v52, 1  ;;  %v5254_v11 = vunpack.c.l.bf16 %v9974_v13 }
 0x65f   : > { %v5070_v36 = vadd.f32 %v5069_v56, %v5068_v7  ;;  %6133 = vpow2.f32 %v5428_v29  ;;  %v5405_v19 = vmax.f32 %v5333_v49, %v5381_v58  ;;  %v5346_v7 = vunpack.c.l.bf16 %v9970_v8 }
 0x660   : > { %v5430_v56 = vmul.f32 1.442695, %v5420_v6  ;;  %v5304_v62 = vsel %vm5289_vm0, %v5302_v12, %v5303_v39  ;;  %v5305_v59 = vrot.slane %v5267_v46, 1  ;;  %v5306_v38 = vrot.slane %v5268_v2, 1  ;;  %v9978_v39 = vld [vmem:[#allocation31_spill] sm:$0xff] }
 0x661   : > { %v5071_v55 = vrot.slane %v5070_v36, 2  ;;  %v9470_v26 = vmax.f32 %v5325_v40, %v5405_v19  ;;  %v5382_v33 = vrot.slane %v5346_v7, 1  ;;  %v9476_v32 = vrot.slane %v5352_v5, 1 }
 0x662   : > { %6135 = vpow2.f32 %v5430_v56  ;;  %v9479_v52 = vrot.slane %v5353_v35, 1  ;;  %v5326_v20 = vmax.f32 %v5253_v0, %v5304_v62  ;;  %v5335_v57 = vunpack.c.l.bf16 %v9975_v31  ;;  %v9980_v62 = vld [vmem:[#allocation26_spill] sm:$0xff] }
 0x663   : > { %v5072_v50 = vadd.f32 %v5071_v55, %v5070_v36  ;;  %v5421_v25 = vmin.f32 %v9470_v26, 20.0  ;;  %v5384_v3 = vsel %vm5289_vm0, %v5382_v33, %v5383_v9  ;;  %v5307_v36 = vsel %vm5289_vm0, %v5305_v59, %v5306_v38 }
 0x664   : > { %v5348_v47 = vunpack.c.l.bf16 %v9976_v61  ;;  %v5406_v5 = vmax.f32 %v5334_v1, %v5384_v3  ;;  %v5327_v48 = vmax.f32 %v5254_v11, %v5307_v36  ;;  %v5255_v41 = vunpack.c.l.bf16 %v9977_v63 }
 0x665   : > { %v5073_v21 = vrot.slane %v5072_v50, 1  ;;  %v5432_v2 = vmul.f32 1.442695, %v5421_v25  ;;  %v5350_v33 = vunpack.c.l.bf16 %v9980_v62  ;;  %v5389_v38 = vrot.slane %v5351_v43, 1 }
 0x666   : > { %v5385_v12 = vrot.slane %v5348_v47, 1  ;;  %v9536_v27 = vmax.f32 %v5326_v20, %v5406_v5 }
 0x667   : > { %v5074_v49 = vadd.f32 %v5073_v21, %v5072_v50  ;;  %v9979_v50 = vld [vmem:[#allocation23_spill] sm:$0xff]  ;;  %6137 = vpow2.f32 %v5432_v2  ;;  %v5388_v36 = vrot.slane %v5350_v33, 1 }
 0x668   : > { %v5336_v6 = vunpack.c.l.bf16 %v9979_v50  ;;  %v5387_v21 = vsel %vm5289_vm0, %v5385_v12, %v5386_v37  ;;  %v5422_v11 = vmin.f32 %v9536_v27, 20.0 }
 0x669   : > { %v5075_v29 = vmul.f32 0.015625, %v5074_v49  ;;  %v5407_v59 = vmax.f32 %v5335_v57, %v5387_v21  ;;  %v5390_v57 = vsel %vm5289_vm0, %v5388_v36, %v5389_v38 }
 0x66a   : > { %v5434_v47 = vmul.f32 1.442695, %v5422_v11  ;;  %v5408_v63 = vmax.f32 %v5336_v6, %v5390_v57 }
 0x66b   : > { %v9489_v55 = vsub.f32 %v9355_v18, %v5075_v29  ;;  %v9492_v40 = vsub.f32 %v9353_v15, %v5075_v29  ;;  %v9495_v17 = vsub.f32 %v9359_v24, %v5075_v29  ;;  %v9498_v35 = vsub.f32 %v9370_v30, %v5075_v29 }
 0x66c   : > { %v9501_v22 = vsub.f32 %v9390_v51, %v5075_v29  ;;  %v9504_v42 = vsub.f32 %v9421_v10, %v5075_v29  ;;  %v9507_v58 = vsub.f32 %v9410_v4, %v5075_v29  ;;  %v9510_v18 = vsub.f32 %v9414_v53, %v5075_v29  ;;  %v6134_v10 = vpop.eup %6133 }
 0x66d   : > { %v5084_v15 = vmul.f32 %v9489_v55, %v9489_v55  ;;  %v5085_v24 = vmul.f32 %v9492_v40, %v9492_v40  ;;  %v5086_v30 = vmul.f32 %v9495_v17, %v9495_v17  ;;  %v5087_v51 = vmul.f32 %v9498_v35, %v9498_v35 }
 0x66e   : > { %v5269_v4 = vunpack.c.l.bf16 %v9978_v39  ;;  %v5309_v53 = vrot.slane %v5270_v44, 1  ;;  %v5088_v19 = vmul.f32 %v9501_v22, %v9501_v22  ;;  %v5089_v8 = vmul.f32 %v9504_v42, %v9504_v42 }
 0x66f   : > { %v5092_v7 = vsel %vm2500_vm2, %v5084_v15, 0.0  ;;  %v5093_v14 = vsel %vm2500_vm2, %v5085_v24, 0.0  ;;  %v5090_v0 = vmul.f32 %v9507_v58, %v9507_v58  ;;  %v5091_v45 = vmul.f32 %v9510_v18, %v9510_v18  ;;  %v6136_v49 = vpop.eup %6135 }
 0x670   : > { %v5094_v54 = vadd.f32 %v5093_v14, %v5092_v7  ;;  %v5095_v44 = vsel %vm2500_vm2, %v5086_v30, 0.0  ;;  %v5097_v1 = vsel %vm2500_vm2, %v5087_v51, 0.0  ;;  %v5443_v9 = vadd.f32 1.0, %v6134_v10  ;;  %v9981_v30 = vld [vmem:[#allocation30_spill] sm:$0xff] }
 0x671   : > { %v5308_v56 = vrot.slane %v5269_v4, 1  ;;  %v5099_v3 = vsel %vm2500_vm2, %v5088_v19, 0.0  ;;  %v5101_v29 = vsel %vm2500_vm2, %v5089_v8, 0.0  ;;  %v5444_v61 = vadd.f32 1.0, %v6136_v49  ;;  %v6214_v19 = vld [vmem:[%s6296_s14 + $0x88] sm:$0xf] }
 0x672   : > { %v5096_v46 = vadd.f32 %v5095_v44, %v5094_v54  ;;  %v5451_v13 = vmul.f32 %v5443_v9, %v5443_v9  ;;  %v9546_v2 = vmax.f32 %v5327_v48, %v5407_v59  ;;  %v5103_v16 = vsel %vm2500_vm2, %v5090_v0, 0.0  ;;  %v9982_v48 = vld [vmem:[#allocation34_spill] sm:$0xff] }
 0x673   : > { %v5310_v20 = vsel %vm5289_vm0, %v5308_v56, %v5309_v53  ;;  %v5452_v43 = vmul.f32 %v5444_v61, %v5444_v61  ;;  %v5271_v51 = vunpack.c.l.bf16 %v9981_v30  ;;  %v5256_v39 = vunpack.c.l.bf16 %v9982_v48 }
 0x674   : > { %v5098_v25 = vadd.f32 %v5097_v1, %v5096_v46  ;;  %v5459_v31 = vadd.f32 1.0, %v5451_v13  ;;  %v5328_v5 = vmax.f32 %v5255_v41, %v5310_v20  ;;  %v5423_v24 = vmin.f32 %v9546_v2, 20.0  ;;  %v6138_v1 = vpop.eup %6137 }
 0x675   : > { %v5460_v10 = vadd.f32 1.0, %v5452_v43  ;;  %v5312_v41 = vrot.slane %v5272_v28, 1  ;;  %v5311_v50 = vrot.slane %v5271_v51, 1  ;;  %v5337_v8 = vunpack.c.l.bf16 %v6214_v19 }
 0x676   : > { %v5100_v37 = vadd.f32 %v5099_v3, %v5098_v25  ;;  %6139 = vrcp.f32 %v5459_v31  ;;  %v9552_v12 = vmax.f32 %v5328_v5, %v5408_v63  ;;  %v5436_v53 = vmul.f32 1.442695, %v5423_v24 }
 0x677   : > { %6141 = vpow2.f32 %v5434_v47  ;;  %v5105_v6 = vsel %vm2500_vm2, %v5091_v45, 0.0  ;;  %v5393_v14 = vsel %vm5289_vm0, %v9476_v32, %v9479_v52  ;;  %v5313_v54 = vsel %vm5289_vm0, %v5311_v50, %v5312_v41 }
 0x678   : > { %v5102_v15 = vadd.f32 %v5101_v29, %v5100_v37  ;;  %6143 = vrcp.f32 %v5460_v10  ;;  %v5424_v7 = vmin.f32 %v9552_v12, 20.0  ;;  %v5409_v23 = vmax.f32 %v5337_v8, %v5393_v14 }
 0x679   : > { %6145 = vpow2.f32 %v5436_v53  ;;  %v5329_v44 = vmax.f32 %v5256_v39, %v5313_v54  ;;  %v5445_v46 = vadd.f32 1.0, %v6138_v1  ;;  %v5826_v11 = vadd.f32 -1.0, %v5451_v13  ;;  %v5116_v1 = vld [vmem:[%s9640_s7] sm:$0x1] }
 0x67a   : > { %v5104_v4 = vadd.f32 %v5103_v16, %v5102_v15  ;;  %v5438_v28 = vmul.f32 1.442695, %v5424_v7  ;;  %v5827_v61 = vadd.f32 -1.0, %v5452_v43 }
 0x67b   : > { %v9564_v21 = vmax.f32 %v5329_v44, %v5409_v23  ;;  %v5453_v56 = vmul.f32 %v5445_v46, %v5445_v46  ;;  %v5507_v29 = vmul.f32 %v5826_v11, %v9441_v60 }
 0x67c   : > { %v5106_v0 = vadd.f32 %v5105_v6, %v5104_v4  ;;  %6147 = vpow2.f32 %v5438_v28 }
 0x67d   : > { %v5425_v62 = vmin.f32 %v9564_v21, 20.0  ;;  %v5461_v32 = vadd.f32 1.0, %v5453_v56 }
 0x67e   : > { %v5107_v9 = vrot.slane %v5106_v0, 4 }
 0x67f   : > { %v5440_v52 = vmul.f32 1.442695, %v5425_v62  ;;  %6149 = vrcp.f32 %v5461_v32 }
 0x680   : > { %v5108_v45 = vadd.f32 %v5107_v9, %v5106_v0 }
 0x681   : > { %6151 = vpow2.f32 %v5440_v52 }
 0x682   : > { %v5109_v33 = vrot.slane %v5108_v45, 2 }
 0x683   : > { %v6140_v59 = vpop.eup %6139 }
 0x684   : > { %v5110_v38 = vadd.f32 %v5109_v33, %v5108_v45  ;;  %v6142_v49 = vpop.eup %6141  ;;  %v5475_v25 = vmul.f32 %v6140_v59, %v5459_v31  ;;  %v5508_v31 = vmul.f32 %v5827_v61, %v9457_v34 }
 0x685   : > { %v5446_v20 = vadd.f32 1.0, %v6142_v49  ;;  %v6144_v47 = vpop.eup %6143 }
 0x686   : > { %v5111_v3 = vrot.slane %v5110_v38, 1  ;;  %v5483_v36 = vsub.f32 2.0, %v5475_v25  ;;  %v6146_v57 = vpop.eup %6145  ;;  %v5476_v13 = vmul.f32 %v6144_v47, %v5460_v10  ;;  %v5828_v10 = vadd.f32 -1.0, %v5453_v56 }
 0x687   : > { %v5454_v5 = vmul.f32 %v5446_v20, %v5446_v20  ;;  %v5447_v24 = vadd.f32 1.0, %v6146_v57  ;;  %v5816_v20 = vld [vmem:[%s9641_s8] ss:$0 sm:$0xff] }
 0x688   : > { %v5112_v37 = vadd.f32 %v5111_v3, %v5110_v38  ;;  %v5491_v16 = vmul.f32 %v6140_v59, %v5483_v36  ;;  %v5484_v51 = vsub.f32 2.0, %v5476_v13  ;;  %v5509_v0 = vmul.f32 %v5828_v10, %v9470_v26  ;;  %v9983_v59 = vld [vmem:[#allocation39_spill] sm:$0xff] }
 0x689   : > { %v5462_v15 = vadd.f32 1.0, %v5454_v5  ;;  %v6148_v48 = vpop.eup %6147  ;;  %v5455_v41 = vmul.f32 %v5447_v24, %v5447_v24  ;;  %v5829_v46 = vadd.f32 -1.0, %v5454_v5  ;;  %v9984_v38 = vsub.s32 0, %v9983_v59 }
 0x68a   : > { %v5113_v63 = vmul.f32 0.015625, %v5112_v37  ;;  %v5515_v30 = vmul.f32 %v5507_v29, %v5491_v16  ;;  %v5492_v60 = vmul.f32 %v6144_v47, %v5484_v51  ;;  %v5448_v43 = vadd.f32 1.0, %v6148_v48 }
 0x68b   : > { %6153 = vrcp.f32 %v5462_v15  ;;  %v5463_v4 = vadd.f32 1.0, %v5455_v41  ;;  %v5830_v62 = vadd.f32 -1.0, %v5455_v41  ;;  %v5510_v26 = vmul.f32 %v5829_v46, %v9536_v27 }
 0x68c   : > { %v5114_v39 = vadd.f32 1e-05, %v5113_v63  ;;  %5557 = vxpose.xlu1.b32.cont [2/8] (short) (narrow) %v5515_v30, 8  ;;  %v5516_v53 = vmul.f32 %v5508_v31, %v5492_v60  ;;  %v5456_v50 = vmul.f32 %v5448_v43, %v5448_v43  ;;  %v6150_v8 = vpop.eup %6149 }
 0x68d   : > { %v5477_v7 = vmul.f32 %v6150_v8, %v5461_v32  ;;  %v5511_v36 = vmul.f32 %v5830_v62, %v9546_v2 }
 0x68e   : > { %6155 = vrsqrt.f32 %v5114_v39  ;;  %v5464_v19 = vadd.f32 1.0, %v5456_v50  ;;  %v6152_v6 = vpop.eup %6151  ;;  %v5831_v33 = vadd.f32 -1.0, %v5456_v50 }
 0x68f   : > { %6157 = vrcp.f32 %v5463_v4  ;;  %v5449_v34 = vadd.f32 1.0, %v6152_v6  ;;  %v5485_v14 = vsub.f32 2.0, %v5477_v7 }
 0x690   : > { %5558 = vxpose.xlu1.b32.cont [3/8] (short) (narrow) %v5516_v53, 8  ;;  %6159 = vrcp.f32 %v5464_v19  ;;  %v5512_v29 = vmul.f32 %v5831_v33, %v9552_v12 }
 0x691   : > { %v5457_v54 = vmul.f32 %v5449_v34, %v5449_v34  ;;  %v5493_v23 = vmul.f32 %v6150_v8, %v5485_v14 }
 0x693   : > { %v5465_v28 = vadd.f32 1.0, %v5457_v54  ;;  %v5517_v9 = vmul.f32 %v5509_v0, %v5493_v23  ;;  %v5832_v61 = vadd.f32 -1.0, %v5457_v54 }
 0x695   : > { %6161 = vrcp.f32 %v5465_v28  ;;  %5559 = vxpose.xlu1.b32.cont [4/8] (short) (narrow) %v5517_v9, 8  ;;  %v5513_v23 = vmul.f32 %v5832_v61, %v9564_v21 }
 0x698   : > { %v6154_v44 = vpop.eup %6153 }
 0x699   : > { %v5478_v45 = vmul.f32 %v6154_v44, %v5462_v15 }
 0x69b   : > { %v6156_v56 = vpop.eup %6155  ;;  %v5486_v32 = vsub.f32 2.0, %v5478_v45 }
 0x69c   : > { %v5117_v11 = vmul.f32 %v6156_v56, %v5116_v1  ;;  %v6158_v52 = vpop.eup %6157 }
 0x69d   : > { %v5494_v25 = vmul.f32 %v6154_v44, %v5486_v32  ;;  %v5479_v3 = vmul.f32 %v6158_v52, %v5463_v4  ;;  %v6160_v47 = vpop.eup %6159 }
 0x69e   : > { %v5121_v49 = vrot.slane %v5117_v11, %v9984_v38 }
 0x69f   : > { %v5518_v13 = vmul.f32 %v5510_v26, %v5494_v25  ;;  %v5487_v15 = vsub.f32 2.0, %v5479_v3 }
 0x6a0   : > { %v5127_v37 = vmul.f32 %v5121_v49, %v9504_v42  ;;  %v5122_v5 = vmul.f32 %v5121_v49, %v9489_v55  ;;  %v5123_v27 = vmul.f32 %v5121_v49, %v9492_v40  ;;  %v5124_v57 = vmul.f32 %v5121_v49, %v9495_v17 }
 0x6a1   : > { %v5125_v16 = vmul.f32 %v5121_v49, %v9498_v35  ;;  %v5126_v63 = vmul.f32 %v5121_v49, %v9501_v22  ;;  %5560 = vxpose.xlu1.b32.cont [5/8] (short) (narrow) %v5518_v13, 8  ;;  %v5495_v40 = vmul.f32 %v6158_v52, %v5487_v15  ;;  %v5480_v17 = vmul.f32 %v6160_v47, %v5464_v19 }
 0x6a2   : > { %v9587_v24 = vadd.f32 %v5816_v20, %v5127_v37  ;;  %v9589_v2 = vadd.f32 %v5816_v20, %v5122_v5  ;;  %v9591_v12 = vadd.f32 %v5816_v20, %v5123_v27  ;;  %v9593_v30 = vadd.f32 %v5816_v20, %v5124_v57  ;;  %v6162_v10 = vpop.eup %6161 }
 0x6a3   : > { %v9595_v42 = vadd.f32 %v5816_v20, %v5125_v16  ;;  %v9597_v55 = vadd.f32 %v5816_v20, %v5126_v63  ;;  %v5519_v41 = vmul.f32 %v5511_v36, %v5495_v40  ;;  %v5488_v60 = vsub.f32 2.0, %v5480_v17 }
 0x6a4   : > { %v5150_v35 = vmin.f32 %v9587_v24, 20.0  ;;  %v5145_v22 = vmin.f32 %v9589_v2, 20.0  ;;  %v5146_v51 = vmin.f32 %v9591_v12, 20.0  ;;  %v5147_v31 = vmin.f32 %v9593_v30, 20.0 }
 0x6a5   : > { %v5148_v48 = vmin.f32 %v9595_v42, 20.0  ;;  %v5149_v39 = vmin.f32 %v9597_v55, 20.0  ;;  %v5128_v50 = vmul.f32 %v5121_v49, %v9507_v58  ;;  %v5496_v6 = vmul.f32 %v6160_v47, %v5488_v60  ;;  %5561 = vxpose.xlu1.b32.cont [6/8] (short) (narrow) %v5519_v41, 8 }
 0x6a6   : > { %v5163_v43 = vmul.f32 1.442695, %v5150_v35  ;;  %v5153_v4 = vmul.f32 1.442695, %v5145_v22  ;;  %v5155_v53 = vmul.f32 1.442695, %v5146_v51  ;;  %v5481_v34 = vmul.f32 %v6162_v10, %v5465_v28 }
 0x6a7   : > { %v5157_v19 = vmul.f32 1.442695, %v5147_v31  ;;  %v5159_v8 = vmul.f32 1.442695, %v5148_v48  ;;  %v9606_v7 = vadd.f32 %v5816_v20, %v5128_v50  ;;  %v5129_v14 = vmul.f32 %v5121_v49, %v9510_v18 }
 0x6a8   : > { %6163 = vpow2.f32 %v5163_v43  ;;  %v5161_v0 = vmul.f32 1.442695, %v5149_v39  ;;  %v5520_v54 = vmul.f32 %v5512_v29, %v5496_v6  ;;  %v5489_v58 = vsub.f32 2.0, %v5481_v34 }
 0x6a9   : > { %6165 = vpow2.f32 %v5153_v4  ;;  %v5151_v44 = vmin.f32 %v9606_v7, 20.0  ;;  %v9611_v1 = vadd.f32 %v5816_v20, %v5129_v14 }
 0x6aa   : > { %6167 = vpow2.f32 %v5155_v53  ;;  %5562 = vxpose.xlu1.b32.cont [7/8] (short) (narrow) %v5520_v54, 8  ;;  %v5497_v9 = vmul.f32 %v6162_v10, %v5489_v58 }
 0x6ab   : > { %6169 = vpow2.f32 %v5157_v19  ;;  %v5152_v46 = vmin.f32 %v9611_v1, 20.0  ;;  %v5165_v28 = vmul.f32 1.442695, %v5151_v44 }
 0x6ac   : > { %6171 = vpow2.f32 %v5159_v8  ;;  %v5521_v18 = vmul.f32 %v5513_v23, %v5497_v9 }
 0x6ad   : > { %6173 = vpow2.f32 %v5161_v0  ;;  %v5167_v45 = vmul.f32 1.442695, %v5152_v46 }
 0x6ae   : > { %5563 = vxpose.xlu1.b32.end [8/8] (short) (narrow) %v5521_v18, 8  ;;  %6175 = vpow2.f32 %v5165_v28 }
 0x6af   : > { %6177 = vpow2.f32 %v5167_v45 }
 0x6b5   : > { %v6164_v21 = vpop.eup %6163 }
 0x6b6   : > { %v6166_v56 = vpop.eup %6165  ;;  %v5174_v37 = vadd.f32 1.0, %v6164_v21 }
 0x6b7   : > { %v6168_v62 = vpop.eup %6167  ;;  %v5169_v33 = vadd.f32 1.0, %v6166_v56 }
 0x6b8   : > { %v6170_v11 = vpop.eup %6169  ;;  %v5170_v32 = vadd.f32 1.0, %v6168_v62  ;;  %v5182_v63 = vmul.f32 %v5174_v37, %v5174_v37 }
 0x6b9   : > { %v6172_v52 = vpop.eup %6171  ;;  %v5177_v26 = vmul.f32 %v5169_v33, %v5169_v33  ;;  %v5171_v59 = vadd.f32 1.0, %v6170_v11 }
 0x6ba   : > { %v6174_v38 = vpop.eup %6173  ;;  %v5178_v49 = vmul.f32 %v5170_v32, %v5170_v32  ;;  %v5172_v25 = vadd.f32 1.0, %v6172_v52  ;;  %v5190_v17 = vadd.f32 1.0, %v5182_v63 }
 0x6bb   : > { %v5185_v3 = vadd.f32 1.0, %v5177_v26  ;;  %v5179_v20 = vmul.f32 %v5171_v59, %v5171_v59  ;;  %v5173_v36 = vadd.f32 1.0, %v6174_v38  ;;  %v6176_v5 = vpop.eup %6175  ;;  %v5817_v41 = vadd.f32 -1.0, %v5177_v26 }
 0x6bc   : > { %v5186_v29 = vadd.f32 1.0, %v5178_v49  ;;  %v5180_v61 = vmul.f32 %v5172_v25, %v5172_v25  ;;  %v6178_v16 = vpop.eup %6177  ;;  %v5175_v15 = vadd.f32 1.0, %v6176_v5  ;;  %v5818_v34 = vadd.f32 -1.0, %v5178_v49 }
 0x6bd   : > { %6179 = vrcp.f32 %v5185_v3  ;;  %v5187_v47 = vadd.f32 1.0, %v5179_v20  ;;  %v5181_v57 = vmul.f32 %v5173_v36, %v5173_v36  ;;  %v5176_v40 = vadd.f32 1.0, %v6178_v16 }
 0x6be   : > { %6181 = vrcp.f32 %v5186_v29  ;;  %v5188_v27 = vadd.f32 1.0, %v5180_v61  ;;  %v5183_v35 = vmul.f32 %v5175_v15, %v5175_v15  ;;  %v5233_v6 = vmul.f32 %v5817_v41, %v9589_v2 }
 0x6bf   : > { %6183 = vrcp.f32 %v5187_v47  ;;  %v5189_v13 = vadd.f32 1.0, %v5181_v57  ;;  %v9614_v22 = vmul.f32 %v5176_v40, %v5176_v40  ;;  %v5234_v58 = vmul.f32 %v5818_v34, %v9591_v12 }
 0x6c0   : > { %6185 = vrcp.f32 %v5188_v27  ;;  %v5191_v51 = vadd.f32 1.0, %v5183_v35  ;;  %v5819_v9 = vadd.f32 -1.0, %v5179_v20  ;;  %v5820_v2 = vadd.f32 -1.0, %v5180_v61 }
 0x6c1   : > { %6187 = vrcp.f32 %v5189_v13  ;;  %v5192_v4 = vadd.f32 1.0, %v9614_v22  ;;  %v5821_v59 = vadd.f32 -1.0, %v5181_v57  ;;  %v5822_v36 = vadd.f32 -1.0, %v5182_v63 }
 0x6c2   : > { %6189 = vrcp.f32 %v5190_v17  ;;  %v5235_v56 = vmul.f32 %v5819_v9, %v9593_v30  ;;  %v5236_v26 = vmul.f32 %v5820_v2, %v9595_v42  ;;  %v5823_v5 = vadd.f32 -1.0, %v5183_v35 }
 0x6c3   : > { %6191 = vrcp.f32 %v5191_v51  ;;  %v5237_v20 = vmul.f32 %v5821_v59, %v9597_v55  ;;  %v5238_v37 = vmul.f32 %v5822_v36, %v9587_v24 }
 0x6c4   : > { %6193 = vrcp.f32 %v5192_v4  ;;  %v5239_v16 = vmul.f32 %v5823_v5, %v9606_v7 }
 0x6ca   : > { %v6180_v31 = vpop.eup %6179 }
 0x6cb   : > { %v6182_v48 = vpop.eup %6181  ;;  %v5201_v39 = vmul.f32 %v6180_v31, %v5185_v3 }
 0x6cc   : > { %v6184_v60 = vpop.eup %6183  ;;  %v5202_v43 = vmul.f32 %v6182_v48, %v5186_v29 }
 0x6cd   : > { %v5209_v53 = vsub.f32 2.0, %v5201_v39  ;;  %v5203_v50 = vmul.f32 %v6184_v60, %v5187_v47  ;;  %v6186_v10 = vpop.eup %6185 }
 0x6ce   : > { %v5210_v19 = vsub.f32 2.0, %v5202_v43  ;;  %v5204_v23 = vmul.f32 %v6186_v10, %v5188_v27  ;;  %v6188_v44 = vpop.eup %6187 }
 0x6cf   : > { %v5217_v8 = vmul.f32 %v6180_v31, %v5209_v53  ;;  %v5211_v54 = vsub.f32 2.0, %v5203_v50  ;;  %v5205_v45 = vmul.f32 %v6188_v44, %v5189_v13  ;;  %v6190_v21 = vpop.eup %6189  ;;  %v5824_v13 = vadd.f32 -1.0, %v9614_v22 }
 0x6d0   : > { %v5218_v0 = vmul.f32 %v6182_v48, %v5210_v19  ;;  %v5212_v18 = vsub.f32 2.0, %v5204_v23  ;;  %v5206_v32 = vmul.f32 %v6190_v21, %v5190_v17  ;;  %v6192_v52 = vpop.eup %6191 }
 0x6d1   : > { %v5241_v14 = vmul.f32 %v5233_v6, %v5217_v8  ;;  %v5219_v28 = vmul.f32 %v6184_v60, %v5211_v54  ;;  %v5213_v11 = vsub.f32 2.0, %v5205_v45  ;;  %v6194_v12 = vpop.eup %6193  ;;  %v5207_v3 = vmul.f32 %v6192_v52, %v5191_v51 }
 0x6d2   : > { %v5242_v46 = vmul.f32 %v5234_v58, %v5218_v0  ;;  %v5220_v33 = vmul.f32 %v6186_v10, %v5212_v18  ;;  %v5214_v25 = vsub.f32 2.0, %v5206_v32  ;;  %v5208_v47 = vmul.f32 %v6194_v12, %v5192_v4 }
 0x6d3   : > { %5522 = vxpose.xlu0.b32.start [1/8] (short) (narrow) %v5241_v14, 8  ;;  %v5243_v62 = vmul.f32 %v5235_v56, %v5219_v28  ;;  %v5221_v49 = vmul.f32 %v6188_v44, %v5213_v11  ;;  %v5215_v61 = vsub.f32 2.0, %v5207_v3  ;;  %v5240_v63 = vmul.f32 %v5824_v13, %v9611_v1 }
 0x6d4   : > { %v5244_v38 = vmul.f32 %v5236_v26, %v5220_v33  ;;  %v5222_v29 = vmul.f32 %v6190_v21, %v5214_v25  ;;  %v5216_v57 = vsub.f32 2.0, %v5208_v47 }
 0x6d5   : > { %v5245_v30 = vmul.f32 %v5237_v20, %v5221_v49  ;;  %v5223_v27 = vmul.f32 %v6192_v52, %v5215_v61 }
 0x6d6   : > { %v5246_v42 = vmul.f32 %v5238_v37, %v5222_v29  ;;  %v5224_v55 = vmul.f32 %v6194_v12, %v5216_v57 }
 0x6d7   : > { %5523 = vxpose.xlu0.b32.cont [2/8] (short) (narrow) %v5242_v46, 8  ;;  %v5247_v15 = vmul.f32 %v5239_v16, %v5223_v27 }
 0x6d8   : > { %v5248_v40 = vmul.f32 %v5240_v63, %v5224_v55 }
 0x6db   : > { %5524 = vxpose.xlu0.b32.cont [3/8] (short) (narrow) %v5243_v62, 8 }
 0x6df   : > { %5525 = vxpose.xlu0.b32.cont [4/8] (short) (narrow) %v5244_v38, 8 }
 0x6e3   : > { %5526 = vxpose.xlu0.b32.cont [5/8] (short) (narrow) %v5245_v30, 8 }
 0x6e7   : > { %5527 = vxpose.xlu0.b32.cont [6/8] (short) (narrow) %v5246_v42, 8 }
 0x6eb   : > { %5528 = vxpose.xlu0.b32.cont [7/8] (short) (narrow) %v5247_v15, 8 }
 0x6ef   : > { %5529 = vxpose.xlu0.b32.end [8/8] (short) (narrow) %v5248_v40, 8 }
 0x70e   : > { %v5572_v24 = vpop.trf.xlu1 }
 0x70f   : > { %5588 = vst.msk [vmem:[%s330_s12 + $0x4] sm:$0xf] %vm5554_vm3, %v5572_v24 }
 0x74f   : > { %v5538_v17 = vpop.trf.xlu0 }
 0x750   : > { %5555 = vst.msk [vmem:[%s330_s12] sm:$0xf] %vm5554_vm3, %v5538_v17 }
 0x751 PF: > { %s19_s30 = sadd.s32 1, %s6221_s30  }
 0x752   : > { %p16_p4 = scmp.ge.s32.totalorder %s19_s30, 4  }
 0x754   :  { %18 = sbr.rel (!%p16_p4) target bundleno = 1 (0x1), region = 99 }

</bundles_post_ra>
